<compile_context>
chip_gen: v7x
topology: tpu7x:2x2x1
jax: 0.10.0
libtpu: 0.0.40
codegen_flags: <defaults>
</compile_context>

<pallas_src>
import functools

import jax
import jax.numpy as jnp
import numpy as np
from jax.experimental import pallas as pl
from jax.experimental.pallas import tpu as pltpu


# ----------------------------- Pallas kernel ------------------------------- #

def _window_attention_kernel(x_ref, wqkv_ref, pos_ref, wproj_ref, bproj_ref,
                             o_ref, *, num_heads):
    """One grid step = Bt windows.

    x_ref:     (Bt, N, C)  bf16 input tokens
    wqkv_ref:  (C, 3C)     bf16 fused qkv weights, columns ordered (3, H, D);
                           q columns are pre-scaled by head_dim**-0.5
    pos_ref:   (H, N, N)   bf16 relative position bias (per head)
    wproj_ref: (C, C)      bf16 output-projection weights
    bproj_ref: (1, C)      f32 output-projection bias
    o_ref:     (Bt, N, C)  output tokens
    """
    bt, n, c = x_ref.shape
    d = c // num_heads
    xf = x_ref[...].reshape(bt * n, c)                          # (Bt*N, C) bf16

    # Single lane-dense QKV projection: one (Bt*N, C) @ (C, 3C) MXU pass group
    # instead of 3*H 32-lane-wide dots.
    qkv = jnp.dot(xf, wqkv_ref[...], preferred_element_type=jnp.float32)
    qkv = qkv.reshape(bt, n, 3 * c).astype(jnp.bfloat16)        # (Bt, N, 3C)

    # Per-head attention; the 32-lane slices of the fused activation are cheap
    # and hide under the MXU.
    # TODO(synk): for >= 8 heads switch to lax.fori_loop + a VMEM ov scratch to
    # bound per-head live ranges (toy config uses 4 heads).
    ov_parts = []
    for h in range(num_heads):
        qh = qkv[:, :, h * d:(h + 1) * d]                       # (Bt, N, D)
        kh = qkv[:, :, c + h * d:c + (h + 1) * d]
        vh = qkv[:, :, 2 * c + h * d:2 * c + (h + 1) * d]

        # scale already folded into the q weights; no explicit k transpose
        logits = jnp.einsum("bnd,bmd->bnm", qh, kh,
                            preferred_element_type=jnp.float32)  # (Bt, N, N)
        logits = logits + pos_ref[h].astype(jnp.float32)[None]

        # numerically-stable softmax in f32; reciprocal on the EUP slot
        logits = logits - jnp.max(logits, axis=-1, keepdims=True)
        p = jnp.exp(logits)
        p = p * pl.reciprocal(jnp.sum(p, axis=-1, keepdims=True), approx=True)

        ov_parts.append(
            jnp.einsum("bnm,bmd->bnd", p.astype(jnp.bfloat16), vh,
                       preferred_element_type=jnp.float32).astype(jnp.bfloat16))

    # Head merge = lane packing; single K=C output-projection matmul.
    ov = jnp.concatenate(ov_parts, axis=-1).reshape(bt * n, c)   # (Bt*N, C) bf16
    out = jnp.dot(ov, wproj_ref[...], preferred_element_type=jnp.float32)
    out = out + bproj_ref[...]                                   # (1, C) bcast
    # attn_drop / proj_drop are identity at p=0.0 (eval semantics)
    o_ref[...] = out.reshape(bt, n, c).astype(o_ref.dtype)


# ------------------------ position bias (JAX glue) -------------------------- #

def compute_pos_bias(params, num_heads, resolution, seq_len):
    """PosEmbMLPSwinv2D bias table -> (H, seq_len, seq_len), ct_correct=False."""
    W = resolution

    # relative_coords_table, normalized & log-scaled (pretrained_window_size > 0)
    rel = jnp.arange(-(W - 1), W, dtype=jnp.float32)
    gh, gw = jnp.meshgrid(rel, rel, indexing="ij")
    table = jnp.stack([gh, gw], axis=-1)                   # (2W-1, 2W-1, 2)
    table = table / float(W - 1)
    table = table * 8.0
    table = jnp.sign(table) * jnp.log2(jnp.abs(table) + 1.0) / np.log2(8.0)

    # cpb_mlp: Linear(2,512)+ReLU+Linear(512,H, no bias)
    flat = table.reshape(-1, 2)
    h1 = jnp.maximum(flat @ params["cpb_w1"].T + params["cpb_b1"], 0.0)
    bias_table = h1 @ params["cpb_w2"].T                   # ((2W-1)^2, H)

    # relative_position_index
    c = jnp.arange(W)
    mh, mw = jnp.meshgrid(c, c, indexing="ij")
    coords = jnp.stack([mh, mw]).reshape(2, -1)            # (2, W*W)
    relc = coords[:, :, None] - coords[:, None, :]         # (2, W^2, W^2)
    relc = relc.transpose(1, 2, 0)
    relc = relc.at[:, :, 0].add(W - 1)
    relc = relc.at[:, :, 1].add(W - 1)
    relc = relc.at[:, :, 0].multiply(2 * W - 1)
    idx = relc.sum(-1)                                     # (W^2, W^2)

    bias = bias_table[idx.reshape(-1)].reshape(W * W, W * W, num_heads)
    bias = bias.transpose(2, 0, 1)                         # (H, W^2, W^2)
    bias = 16.0 * jax.nn.sigmoid(bias)

    n_global = seq_len - W * W
    if n_global > 0:
        # zero-pad top/left (ct_correct=False path)
        # TODO(synk): ct_correct=True global-token bias remap not implemented
        # (the module under test uses the default ct_correct=False).
        bias = jnp.pad(bias, ((0, 0), (n_global, 0), (n_global, 0)))
    return bias


# ------------------------------- wrapper ------------------------------------ #

def _pick_block_b(B, N, *, target_rows=256, max_rows=1024, min_grid=8):
    """Largest divisor Bt of B with Bt*N <= max_rows, such that either
    Bt*N <= target_rows (still filling the MXU) or the grid keeps >= min_grid
    steps (pipelining / dual-TC balance on v7x)."""
    best = 1
    for d in range(1, B + 1):
        if B % d:
            continue
        if d * N > max_rows:
            break
        if d * N <= target_rows or (B // d) >= min_grid:
            best = d
    return best


def window_attention(x, params, *, num_heads, resolution, out_dtype=None):
    B, N, C = x.shape
    head_dim = C // num_heads
    scale = head_dim ** -0.5
    out_dtype = x.dtype if out_dtype is None else out_dtype

    # x-independent bias precompute (tiny); bf16 halves resident VMEM/DMA.
    pos = compute_pos_bias(params, num_heads, resolution, N).astype(jnp.bfloat16)

    # Fused qkv weights; fold the q scale into the q columns (free wrapper-side
    # transform, removes a (Bt, N, N) f32 multiply per head in the kernel).
    w_qkv = params["w_qkv"].at[:, :C].multiply(scale).astype(jnp.bfloat16)  # (C, 3C)
    w_proj = params["w_proj"].astype(jnp.bfloat16)                          # (C, C)
    b_proj = params["b_proj"].astype(jnp.float32)                           # (1, C)

    x_bf = x.astype(jnp.bfloat16)                                           # bf16 MXU path

    # Generation-aware block size / VMEM budget (v7x: 64 MiB, v5e/v6e: 128 MiB).
    try:
        info = pltpu.get_tpu_info()
        vmem_cap = int(getattr(info, "vmem_capacity_bytes", 64 << 20))
    except Exception:
        vmem_cap = 64 << 20
    max_rows = 1024 if vmem_cap <= (64 << 20) else 2048
    bt = _pick_block_b(B, N, target_rows=256, max_rows=max_rows, min_grid=8)
    vmem_limit = int(min(64 << 20, max(32 << 20, vmem_cap // 2)))

    kernel = functools.partial(_window_attention_kernel, num_heads=num_heads)

    return pl.pallas_call(
        kernel,
        out_shape=jax.ShapeDtypeStruct((B, N, C), out_dtype),
        grid_spec=pltpu.PrefetchScalarGridSpec(
            num_scalar_prefetch=0,
            grid=(B // bt,),
            in_specs=[
                pl.BlockSpec((bt, N, C), lambda b: (b, 0, 0)),            # x
                pl.BlockSpec((C, 3 * C), lambda b: (0, 0)),               # w_qkv
                pl.BlockSpec((num_heads, N, N), lambda b: (0, 0, 0)),     # pos
                pl.BlockSpec((C, C), lambda b: (0, 0)),                   # w_proj
                pl.BlockSpec((1, C), lambda b: (0, 0)),                   # b_proj
            ],
            out_specs=pl.BlockSpec((bt, N, C), lambda b: (b, 0, 0)),
        ),
        compiler_params=pltpu.CompilerParams(
            dimension_semantics=("parallel",),
            vmem_limit_bytes=vmem_limit),
    )(x_bf, w_qkv, pos, w_proj, b_proj)


# ----------------------- pure-JAX reference (check) ------------------------- #

def reference(x, params, *, num_heads, resolution):
    """Matches the kernel's bf16 operand quantization; math in f32."""
    B, N, C = x.shape
    head_dim = C // num_heads
    scale = head_dim ** -0.5
    xb = x.astype(jnp.bfloat16).astype(jnp.float32)
    w_qkv = params["w_qkv"].at[:, :C].multiply(scale)         # scale folded
    w_qkv = w_qkv.astype(jnp.bfloat16).astype(jnp.float32)
    w_proj = params["w_proj"].astype(jnp.bfloat16).astype(jnp.float32)
    pos = compute_pos_bias(params, num_heads, resolution, N)
    pos = pos.astype(jnp.bfloat16).astype(jnp.float32)

    qkv = xb @ w_qkv                                                 # (B, N, 3C)
    qkv = qkv.reshape(B, N, 3, num_heads, head_dim).transpose(2, 0, 3, 1, 4)
    q, k, v = qkv[0], qkv[1], qkv[2]                                 # (B, H, N, D)
    attn = jnp.einsum("bhnd,bhmd->bhnm", q, k)                       # scale folded
    attn = attn + pos[None]
    attn = jax.nn.softmax(attn, axis=-1)
    out = jnp.einsum("bhnm,bhmd->bhnd", attn, v)
    out = out.transpose(0, 2, 1, 3).reshape(B, N, C)
    return out @ w_proj + params["b_proj"]


# --------------------------------- main -------------------------------------- #

def make_params(key, dim, num_heads):
    ks = jax.random.split(key, 6)
    scale = 0.02
    return {
        # Linear weights stored pre-transposed: y = x @ W
        "w_qkv": (jax.random.normal(ks[0], (dim, 3 * dim), jnp.float32) * scale),
        "w_proj": (jax.random.normal(ks[1], (dim, dim), jnp.float32) * scale),
        "b_proj": (jax.random.normal(ks[2], (1, dim), jnp.float32) * scale),
        # cpb_mlp params in PyTorch (out, in) convention
        "cpb_w1": (jax.random.normal(ks[3], (512, 2), jnp.float32) * scale),
        "cpb_b1": (jax.random.normal(ks[4], (512,), jnp.float32) * scale),
        "cpb_w2": (jax.random.normal(ks[5], (num_heads, 512), jnp.float32) * scale),
    }


if __name__ == "__main__":
    B = 32                             # windows -> bt=4 (256 MXU rows), grid of 8
    dim = 128                          # lane-dense channel count
    num_heads = 4                      # head_dim = 32
    resolution = 8
    N = resolution * resolution        # 64 tokens per window (no global tokens)

    key = jax.random.PRNGKey(0)
    kx, kp = jax.random.split(key)
    x = jax.random.normal(kx, (B, N, dim), jnp.float32)
    params = make_params(kp, dim, num_heads)

    out = window_attention(x, params, num_heads=num_heads, resolution=resolution,
                           out_dtype=jnp.bfloat16)
    out = jax.block_until_ready(out)

    ref = reference(x, params, num_heads=num_heads, resolution=resolution)
    np.testing.assert_allclose(np.asarray(out.astype(jnp.float32)),
                               np.asarray(ref), rtol=2e-2, atol=2e-3)

    print("KERNEL_OK")
</pallas_src>

<mosaic_0001>
module attributes {stable_mosaic.version = 11 : i64} {
  func.func @_window_attention_kernel(%arg0: i32, %arg1: memref<4x64x128xbf16, #tpu.memory_space<vmem>>, %arg2: memref<128x384xbf16, #tpu.memory_space<vmem>>, %arg3: memref<4x64x64xbf16, #tpu.memory_space<vmem>>, %arg4: memref<128x128xbf16, #tpu.memory_space<vmem>>, %arg5: memref<1x128xf32, #tpu.memory_space<vmem>>, %arg6: memref<4x64x128xbf16, #tpu.memory_space<vmem>>) attributes {dimension_semantics = [#tpu.dimension_semantics<parallel>], iteration_bounds = array<i64: 8>, scalar_prefetch = 0 : i64, scratch_operands = 0 : i64, tpu.core_type = #tpu.core_type<tc>, window_params = [{transform_indices = @transform_0, window_bounds = array<i64: 4, 64, 128>}, {pipeline_mode = #tpu.pipeline_mode<synchronous>, transform_indices = @transform_1, window_bounds = array<i64: 128, 384>}, {pipeline_mode = #tpu.pipeline_mode<synchronous>, transform_indices = @transform_2, window_bounds = array<i64: 4, 64, 64>}, {pipeline_mode = #tpu.pipeline_mode<synchronous>, transform_indices = @transform_3, window_bounds = array<i64: 128, 128>}, {pipeline_mode = #tpu.pipeline_mode<synchronous>, transform_indices = @transform_4, window_bounds = array<i64: 1, 128>}, {transform_indices = @transform_5, window_bounds = array<i64: 4, 64, 128>}]} {
    %c0 = arith.constant 0 : index
    %c0_0 = arith.constant 0 : index
    %c0_1 = arith.constant 0 : index
    %0 = vector.load %arg1[%c0, %c0_0, %c0_1] : memref<4x64x128xbf16, #tpu.memory_space<vmem>>, vector<4x64x128xbf16>
    %1 = vector.shape_cast %0 : vector<4x64x128xbf16> to vector<256x128xbf16>
    %c0_2 = arith.constant 0 : index
    %c0_3 = arith.constant 0 : index
    %2 = vector.load %arg2[%c0_2, %c0_3] : memref<128x384xbf16, #tpu.memory_space<vmem>>, vector<128x384xbf16>
    %cst = arith.constant dense<0.000000e+00> : vector<256x384xf32>
    %3 = tpu.matmul %1, %2, %cst {dimension_numbers = #tpu.dot_dimension_numbers<[1], [0], [0], [1], [0, 0, 1, 1], [], []>} : vector<256x128xbf16>, vector<128x384xbf16>, vector<256x384xf32> -> vector<256x384xf32>
    %4 = vector.shape_cast %3 : vector<256x384xf32> to vector<4x64x384xf32>
    %5 = arith.truncf %4 : vector<4x64x384xf32> to vector<4x64x384xbf16>
    %6 = vector.extract_strided_slice %5 {offsets = [0, 0, 0], sizes = [4, 64, 32], strides = [1, 1, 1]} : vector<4x64x384xbf16> to vector<4x64x32xbf16>
    %7 = vector.extract_strided_slice %5 {offsets = [0, 0, 128], sizes = [4, 64, 32], strides = [1, 1, 1]} : vector<4x64x384xbf16> to vector<4x64x32xbf16>
    %8 = vector.extract_strided_slice %5 {offsets = [0, 0, 256], sizes = [4, 64, 32], strides = [1, 1, 1]} : vector<4x64x384xbf16> to vector<4x64x32xbf16>
    "tpu.trace_start"() <{level = 10 : i32, message = "bnd,bmd->bnm"}> : () -> ()
    %cst_4 = arith.constant dense<0.000000e+00> : vector<4x64x64xf32>
    %9 = tpu.matmul %6, %7, %cst_4 {dimension_numbers = #tpu.dot_dimension_numbers<[2], [2], [1], [1], [0, 0, 0, 1, 1, 1], [0], [0]>} : vector<4x64x32xbf16>, vector<4x64x32xbf16>, vector<4x64x64xf32> -> vector<4x64x64xf32>
    "tpu.trace_stop"() : () -> ()
    %c0_5 = arith.constant 0 : index
    %c0_6 = arith.constant 0 : index
    %c0_7 = arith.constant 0 : index
    %10 = vector.load %arg3[%c0_5, %c0_6, %c0_7] : memref<4x64x64xbf16, #tpu.memory_space<vmem>>, vector<1x64x64xbf16>
    %11 = vector.shape_cast %10 : vector<1x64x64xbf16> to vector<64x64xbf16>
    %12 = arith.extf %11 : vector<64x64xbf16> to vector<64x64xf32>
    %13 = vector.shape_cast %12 : vector<64x64xf32> to vector<1x64x64xf32>
    %14 = vector.broadcast %13 : vector<1x64x64xf32> to vector<4x64x64xf32>
    %15 = arith.addf %9, %14 : vector<4x64x64xf32>
    %cst_8 = arith.constant dense<0xFF800000> : vector<4x64xf32>
    %16 = vector.multi_reduction <maximumf>, %15, %cst_8 [2] : vector<4x64x64xf32> to vector<4x64xf32>
    %17 = vector.shape_cast %16 : vector<4x64xf32> to vector<4x64x1xf32>
    %18 = vector.broadcast %17 : vector<4x64x1xf32> to vector<4x64x64xf32>
    %19 = arith.subf %15, %18 : vector<4x64x64xf32>
    %20 = math.exp %19 : vector<4x64x64xf32>
    %cst_9 = arith.constant dense<0.000000e+00> : vector<4x64xf32>
    %21 = vector.multi_reduction <add>, %20, %cst_9 [2] : vector<4x64x64xf32> to vector<4x64xf32>
    %22 = vector.shape_cast %21 : vector<4x64xf32> to vector<4x64x1xf32>
    %23 = tpu.reciprocal %22 {approx = true} : vector<4x64x1xf32> -> vector<4x64x1xf32>
    %24 = vector.broadcast %23 : vector<4x64x1xf32> to vector<4x64x64xf32>
    %25 = arith.mulf %20, %24 : vector<4x64x64xf32>
    %26 = arith.truncf %25 : vector<4x64x64xf32> to vector<4x64x64xbf16>
    "tpu.trace_start"() <{level = 10 : i32, message = "bnm,bmd->bnd"}> : () -> ()
    %cst_10 = arith.constant dense<0.000000e+00> : vector<4x64x32xf32>
    %27 = tpu.matmul %26, %8, %cst_10 {dimension_numbers = #tpu.dot_dimension_numbers<[2], [1], [1], [2], [0, 0, 0, 1, 1, 2], [0], [0]>} : vector<4x64x64xbf16>, vector<4x64x32xbf16>, vector<4x64x32xf32> -> vector<4x64x32xf32>
    "tpu.trace_stop"() : () -> ()
    %28 = arith.truncf %27 : vector<4x64x32xf32> to vector<4x64x32xbf16>
    %29 = vector.extract_strided_slice %5 {offsets = [0, 0, 32], sizes = [4, 64, 32], strides = [1, 1, 1]} : vector<4x64x384xbf16> to vector<4x64x32xbf16>
    %30 = vector.extract_strided_slice %5 {offsets = [0, 0, 160], sizes = [4, 64, 32], strides = [1, 1, 1]} : vector<4x64x384xbf16> to vector<4x64x32xbf16>
    %31 = vector.extract_strided_slice %5 {offsets = [0, 0, 288], sizes = [4, 64, 32], strides = [1, 1, 1]} : vector<4x64x384xbf16> to vector<4x64x32xbf16>
    "tpu.trace_start"() <{level = 10 : i32, message = "bnd,bmd->bnm"}> : () -> ()
    %cst_11 = arith.constant dense<0.000000e+00> : vector<4x64x64xf32>
    %32 = tpu.matmul %29, %30, %cst_11 {dimension_numbers = #tpu.dot_dimension_numbers<[2], [2], [1], [1], [0, 0, 0, 1, 1, 1], [0], [0]>} : vector<4x64x32xbf16>, vector<4x64x32xbf16>, vector<4x64x64xf32> -> vector<4x64x64xf32>
    "tpu.trace_stop"() : () -> ()
    %c1 = arith.constant 1 : index
    %c0_12 = arith.constant 0 : index
    %c0_13 = arith.constant 0 : index
    %33 = vector.load %arg3[%c1, %c0_12, %c0_13] : memref<4x64x64xbf16, #tpu.memory_space<vmem>>, vector<1x64x64xbf16>
    %34 = vector.shape_cast %33 : vector<1x64x64xbf16> to vector<64x64xbf16>
    %35 = arith.extf %34 : vector<64x64xbf16> to vector<64x64xf32>
    %36 = vector.shape_cast %35 : vector<64x64xf32> to vector<1x64x64xf32>
    %37 = vector.broadcast %36 : vector<1x64x64xf32> to vector<4x64x64xf32>
    %38 = arith.addf %32, %37 : vector<4x64x64xf32>
    %cst_14 = arith.constant dense<0xFF800000> : vector<4x64xf32>
    %39 = vector.multi_reduction <maximumf>, %38, %cst_14 [2] : vector<4x64x64xf32> to vector<4x64xf32>
    %40 = vector.shape_cast %39 : vector<4x64xf32> to vector<4x64x1xf32>
    %41 = vector.broadcast %40 : vector<4x64x1xf32> to vector<4x64x64xf32>
    %42 = arith.subf %38, %41 : vector<4x64x64xf32>
    %43 = math.exp %42 : vector<4x64x64xf32>
    %cst_15 = arith.constant dense<0.000000e+00> : vector<4x64xf32>
    %44 = vector.multi_reduction <add>, %43, %cst_15 [2] : vector<4x64x64xf32> to vector<4x64xf32>
    %45 = vector.shape_cast %44 : vector<4x64xf32> to vector<4x64x1xf32>
    %46 = tpu.reciprocal %45 {approx = true} : vector<4x64x1xf32> -> vector<4x64x1xf32>
    %47 = vector.broadcast %46 : vector<4x64x1xf32> to vector<4x64x64xf32>
    %48 = arith.mulf %43, %47 : vector<4x64x64xf32>
    %49 = arith.truncf %48 : vector<4x64x64xf32> to vector<4x64x64xbf16>
    "tpu.trace_start"() <{level = 10 : i32, message = "bnm,bmd->bnd"}> : () -> ()
    %cst_16 = arith.constant dense<0.000000e+00> : vector<4x64x32xf32>
    %50 = tpu.matmul %49, %31, %cst_16 {dimension_numbers = #tpu.dot_dimension_numbers<[2], [1], [1], [2], [0, 0, 0, 1, 1, 2], [0], [0]>} : vector<4x64x64xbf16>, vector<4x64x32xbf16>, vector<4x64x32xf32> -> vector<4x64x32xf32>
    "tpu.trace_stop"() : () -> ()
    %51 = arith.truncf %50 : vector<4x64x32xf32> to vector<4x64x32xbf16>
    %52 = vector.extract_strided_slice %5 {offsets = [0, 0, 64], sizes = [4, 64, 32], strides = [1, 1, 1]} : vector<4x64x384xbf16> to vector<4x64x32xbf16>
    %53 = vector.extract_strided_slice %5 {offsets = [0, 0, 192], sizes = [4, 64, 32], strides = [1, 1, 1]} : vector<4x64x384xbf16> to vector<4x64x32xbf16>
    %54 = vector.extract_strided_slice %5 {offsets = [0, 0, 320], sizes = [4, 64, 32], strides = [1, 1, 1]} : vector<4x64x384xbf16> to vector<4x64x32xbf16>
    "tpu.trace_start"() <{level = 10 : i32, message = "bnd,bmd->bnm"}> : () -> ()
    %cst_17 = arith.constant dense<0.000000e+00> : vector<4x64x64xf32>
    %55 = tpu.matmul %52, %53, %cst_17 {dimension_numbers = #tpu.dot_dimension_numbers<[2], [2], [1], [1], [0, 0, 0, 1, 1, 1], [0], [0]>} : vector<4x64x32xbf16>, vector<4x64x32xbf16>, vector<4x64x64xf32> -> vector<4x64x64xf32>
    "tpu.trace_stop"() : () -> ()
    %c2 = arith.constant 2 : index
    %c0_18 = arith.constant 0 : index
    %c0_19 = arith.constant 0 : index
    %56 = vector.load %arg3[%c2, %c0_18, %c0_19] : memref<4x64x64xbf16, #tpu.memory_space<vmem>>, vector<1x64x64xbf16>
    %57 = vector.shape_cast %56 : vector<1x64x64xbf16> to vector<64x64xbf16>
    %58 = arith.extf %57 : vector<64x64xbf16> to vector<64x64xf32>
    %59 = vector.shape_cast %58 : vector<64x64xf32> to vector<1x64x64xf32>
    %60 = vector.broadcast %59 : vector<1x64x64xf32> to vector<4x64x64xf32>
    %61 = arith.addf %55, %60 : vector<4x64x64xf32>
    %cst_20 = arith.constant dense<0xFF800000> : vector<4x64xf32>
    %62 = vector.multi_reduction <maximumf>, %61, %cst_20 [2] : vector<4x64x64xf32> to vector<4x64xf32>
    %63 = vector.shape_cast %62 : vector<4x64xf32> to vector<4x64x1xf32>
    %64 = vector.broadcast %63 : vector<4x64x1xf32> to vector<4x64x64xf32>
    %65 = arith.subf %61, %64 : vector<4x64x64xf32>
    %66 = math.exp %65 : vector<4x64x64xf32>
    %cst_21 = arith.constant dense<0.000000e+00> : vector<4x64xf32>
    %67 = vector.multi_reduction <add>, %66, %cst_21 [2] : vector<4x64x64xf32> to vector<4x64xf32>
    %68 = vector.shape_cast %67 : vector<4x64xf32> to vector<4x64x1xf32>
    %69 = tpu.reciprocal %68 {approx = true} : vector<4x64x1xf32> -> vector<4x64x1xf32>
    %70 = vector.broadcast %69 : vector<4x64x1xf32> to vector<4x64x64xf32>
    %71 = arith.mulf %66, %70 : vector<4x64x64xf32>
    %72 = arith.truncf %71 : vector<4x64x64xf32> to vector<4x64x64xbf16>
    "tpu.trace_start"() <{level = 10 : i32, message = "bnm,bmd->bnd"}> : () -> ()
    %cst_22 = arith.constant dense<0.000000e+00> : vector<4x64x32xf32>
    %73 = tpu.matmul %72, %54, %cst_22 {dimension_numbers = #tpu.dot_dimension_numbers<[2], [1], [1], [2], [0, 0, 0, 1, 1, 2], [0], [0]>} : vector<4x64x64xbf16>, vector<4x64x32xbf16>, vector<4x64x32xf32> -> vector<4x64x32xf32>
    "tpu.trace_stop"() : () -> ()
    %74 = arith.truncf %73 : vector<4x64x32xf32> to vector<4x64x32xbf16>
    %75 = vector.extract_strided_slice %5 {offsets = [0, 0, 96], sizes = [4, 64, 32], strides = [1, 1, 1]} : vector<4x64x384xbf16> to vector<4x64x32xbf16>
    %76 = vector.extract_strided_slice %5 {offsets = [0, 0, 224], sizes = [4, 64, 32], strides = [1, 1, 1]} : vector<4x64x384xbf16> to vector<4x64x32xbf16>
    %77 = vector.extract_strided_slice %5 {offsets = [0, 0, 352], sizes = [4, 64, 32], strides = [1, 1, 1]} : vector<4x64x384xbf16> to vector<4x64x32xbf16>
    "tpu.trace_start"() <{level = 10 : i32, message = "bnd,bmd->bnm"}> : () -> ()
    %cst_23 = arith.constant dense<0.000000e+00> : vector<4x64x64xf32>
    %78 = tpu.matmul %75, %76, %cst_23 {dimension_numbers = #tpu.dot_dimension_numbers<[2], [2], [1], [1], [0, 0, 0, 1, 1, 1], [0], [0]>} : vector<4x64x32xbf16>, vector<4x64x32xbf16>, vector<4x64x64xf32> -> vector<4x64x64xf32>
    "tpu.trace_stop"() : () -> ()
    %c3 = arith.constant 3 : index
    %c0_24 = arith.constant 0 : index
    %c0_25 = arith.constant 0 : index
    %79 = vector.load %arg3[%c3, %c0_24, %c0_25] : memref<4x64x64xbf16, #tpu.memory_space<vmem>>, vector<1x64x64xbf16>
    %80 = vector.shape_cast %79 : vector<1x64x64xbf16> to vector<64x64xbf16>
    %81 = arith.extf %80 : vector<64x64xbf16> to vector<64x64xf32>
    %82 = vector.shape_cast %81 : vector<64x64xf32> to vector<1x64x64xf32>
    %83 = vector.broadcast %82 : vector<1x64x64xf32> to vector<4x64x64xf32>
    %84 = arith.addf %78, %83 : vector<4x64x64xf32>
    %cst_26 = arith.constant dense<0xFF800000> : vector<4x64xf32>
    %85 = vector.multi_reduction <maximumf>, %84, %cst_26 [2] : vector<4x64x64xf32> to vector<4x64xf32>
    %86 = vector.shape_cast %85 : vector<4x64xf32> to vector<4x64x1xf32>
    %87 = vector.broadcast %86 : vector<4x64x1xf32> to vector<4x64x64xf32>
    %88 = arith.subf %84, %87 : vector<4x64x64xf32>
    %89 = math.exp %88 : vector<4x64x64xf32>
    %cst_27 = arith.constant dense<0.000000e+00> : vector<4x64xf32>
    %90 = vector.multi_reduction <add>, %89, %cst_27 [2] : vector<4x64x64xf32> to vector<4x64xf32>
    %91 = vector.shape_cast %90 : vector<4x64xf32> to vector<4x64x1xf32>
    %92 = tpu.reciprocal %91 {approx = true} : vector<4x64x1xf32> -> vector<4x64x1xf32>
    %93 = vector.broadcast %92 : vector<4x64x1xf32> to vector<4x64x64xf32>
    %94 = arith.mulf %89, %93 : vector<4x64x64xf32>
    %95 = arith.truncf %94 : vector<4x64x64xf32> to vector<4x64x64xbf16>
    "tpu.trace_start"() <{level = 10 : i32, message = "bnm,bmd->bnd"}> : () -> ()
    %cst_28 = arith.constant dense<0.000000e+00> : vector<4x64x32xf32>
    %96 = tpu.matmul %95, %77, %cst_28 {dimension_numbers = #tpu.dot_dimension_numbers<[2], [1], [1], [2], [0, 0, 0, 1, 1, 2], [0], [0]>} : vector<4x64x64xbf16>, vector<4x64x32xbf16>, vector<4x64x32xf32> -> vector<4x64x32xf32>
    "tpu.trace_stop"() : () -> ()
    %97 = arith.truncf %96 : vector<4x64x32xf32> to vector<4x64x32xbf16>
    %98 = tpu.concatenate %28, %51, %74, %97 in 2 : vector<4x64x32xbf16>, vector<4x64x32xbf16>, vector<4x64x32xbf16>, vector<4x64x32xbf16> -> vector<4x64x128xbf16>
    %99 = vector.shape_cast %98 : vector<4x64x128xbf16> to vector<256x128xbf16>
    %c0_29 = arith.constant 0 : index
    %c0_30 = arith.constant 0 : index
    %100 = vector.load %arg4[%c0_29, %c0_30] : memref<128x128xbf16, #tpu.memory_space<vmem>>, vector<128x128xbf16>
    %cst_31 = arith.constant dense<0.000000e+00> : vector<256x128xf32>
    %101 = tpu.matmul %99, %100, %cst_31 {dimension_numbers = #tpu.dot_dimension_numbers<[1], [0], [0], [1], [0, 0, 1, 1], [], []>} : vector<256x128xbf16>, vector<128x128xbf16>, vector<256x128xf32> -> vector<256x128xf32>
    %c0_32 = arith.constant 0 : index
    %c0_33 = arith.constant 0 : index
    %102 = vector.load %arg5[%c0_32, %c0_33] : memref<1x128xf32, #tpu.memory_space<vmem>>, vector<1x128xf32>
    %103 = vector.broadcast %102 : vector<1x128xf32> to vector<256x128xf32>
    %104 = arith.addf %101, %103 : vector<256x128xf32>
    %105 = vector.shape_cast %104 : vector<256x128xf32> to vector<4x64x128xf32>
    %106 = arith.truncf %105 : vector<4x64x128xf32> to vector<4x64x128xbf16>
    %c0_34 = arith.constant 0 : index
    %c0_35 = arith.constant 0 : index
    %c0_36 = arith.constant 0 : index
    %107 = vector.load %arg6[%c0_34, %c0_35, %c0_36] : memref<4x64x128xbf16, #tpu.memory_space<vmem>>, vector<4x64x128xbf16>
    tpu.vector_store %arg6[%c0_34, %c0_35, %c0_36], %106 {strides = array<i32>} : memref<4x64x128xbf16, #tpu.memory_space<vmem>>, vector<4x64x128xbf16>,
    return
  }
  func.func @transform_0(%arg0: i32) -> (i32, i32, i32) {
    %c0_i32 = arith.constant 0 : i32
    %c0_i32_0 = arith.constant 0 : i32
    %c0_i32_1 = arith.constant 0 : i32
    return %arg0, %c0_i32, %c0_i32_0 : i32, i32, i32
  }
  func.func @transform_1(%arg0: i32) -> (i32, i32) {
    %c0_i32 = arith.constant 0 : i32
    %c0_i32_0 = arith.constant 0 : i32
    %c0_i32_1 = arith.constant 0 : i32
    return %c0_i32, %c0_i32_0 : i32, i32
  }
  func.func @transform_2(%arg0: i32) -> (i32, i32, i32) {
    %c0_i32 = arith.constant 0 : i32
    %c0_i32_0 = arith.constant 0 : i32
    %c0_i32_1 = arith.constant 0 : i32
    %c0_i32_2 = arith.constant 0 : i32
    return %c0_i32, %c0_i32_0, %c0_i32_1 : i32, i32, i32
  }
  func.func @transform_3(%arg0: i32) -> (i32, i32) {
    %c0_i32 = arith.constant 0 : i32
    %c0_i32_0 = arith.constant 0 : i32
    %c0_i32_1 = arith.constant 0 : i32
    return %c0_i32, %c0_i32_0 : i32, i32
  }
  func.func @transform_4(%arg0: i32) -> (i32, i32) {
    %c0_i32 = arith.constant 0 : i32
    %c0_i32_0 = arith.constant 0 : i32
    %c0_i32_1 = arith.constant 0 : i32
    return %c0_i32, %c0_i32_0 : i32, i32
  }
  func.func @transform_5(%arg0: i32) -> (i32, i32, i32) {
    %c0_i32 = arith.constant 0 : i32
    %c0_i32_0 = arith.constant 0 : i32
    %c0_i32_1 = arith.constant 0 : i32
    return %arg0, %c0_i32, %c0_i32_0 : i32, i32, i32
  }
}

</mosaic_0001>

<bundles_post_ra>
// kernel: tpu_custom_call.1
= control target key start
LH: loop header
LB: loop body
LE: loop exit
PB: predicated region body
PF: predicated region fallthrough
CT: control target
= control target key end

     0   :  { %10 = vsyncpa [#allocation3], 0  ;;  %s12039_s0 = inlined_call_operand.hbm [shape: bf16[32,64,128], index: 0, kind: input, shape index: {}]   ;;  %s12040_s1 = inlined_call_operand.hbm [shape: bf16[128,384], index: 1, kind: input, shape index: {}]   ;;  %s12041_s2 = inlined_call_operand.hbm [shape: bf16[4,64,64], index: 2, kind: input, shape index: {}]   ;;  %s12042_s3 = inlined_call_operand.hbm [shape: bf16[128,128], index: 3, kind: input, shape index: {}]   ;;  %s12043_s4 = inlined_call_operand.vmem [shape: f32[1,128], index: 4, kind: input, shape index: {}]   ;;  %s12044_s5 = inlined_call_operand.hbm [shape: bf16[32,64,128], index: 5, kind: output, shape index: {}]  }
   0x1   :  { %12 = vsyncpa [#allocation3 + $0x1], 0 }
   0x2   :  { %13 = vsyncpa [#allocation6], 0 }
   0x3   :  { %14 = vsyncpa [#allocation9], 0 }
   0x4   :  { %15 = vsyncpa [#allocation4], 0 }
   0x5   :  { %17 = vsyncpa [#allocation4 + $0x1], 0  ;;  %s8726_s18 = smov 0   ;;  %s8728_s19 = smov 0  }
   0x6   :  { %s8730_s20 = smov 0   ;;  %s8732_s21 = smov 0  }
   0x7 LB: > { %s8747_s22 = sadd.s32 4294967295, %s8680_s21   ;;  %s6408_s23 = sadd.s32 4294967294, %s8680_s21   ;;  %s8680_s21 = sphi %s8732_s21, %s12665_s21   ;;  %s8676_s20 = sphi %s8730_s20, %s12664_s20   ;;  %s8672_s19 = sphi %s8728_s19, %s12663_s19   ;;  %s8668_s18 = sphi %s8726_s18, %s12662_s18  }
   0x8   : > { %p43_p0 = scmp.ne.s32.totalorder %s8672_s19, %s8668_s18  ;;  %p12045_p1 = scmp.eq.s32.totalorder %s8747_s22, 0 }
   0x9   : > { %p157_p3 = scmp.eq.s32.totalorder %s6408_s23, 7  ;;  %p6409_p5 = scmp.ge.s32.totalorder %s8680_s21, 1 }
   0xa   : > { %p8756_p4 = por %p12045_p1, %p43_p0  ;;  %p164_p7 = scmp.lt.s32.totalorder %s8680_s21, 9 }
   0xb   : > { %p8761_p6 = por %p157_p3, %p43_p0  ;;  %s8682_s27 = smov [#allocation5]  }
   0xc   : > { %s12255_s24 = scalar_select %p8756_p4, 1, 0 }
   0xd   : > { %s12256_s25 = scalar_select %p8761_p6, 1, 0 }
   0xe   : > { %p8766_p8 = pnand %p6409_p5, %p164_p7  ;;  %s176_s28 = sshll.u32 %s8682_s27, 4  ;;  %s177_s28 = int_to_ptr.vmem [resolvable:$true] %s176_s28 }
   0xf   : > { %s8683_s30 = smov [#allocation7]   ;;  %s8492_s9 = scalar_lea.hbm %s12040_s1, 3072 }
  0x10   : > { %s12257_s26 = scalar_select %p8766_p8, 1, 0 }
  0x11   : > { %p7854_p9 = pneg %p8766_p8  ;;  %s189_s6 = sshll.u32 %s8683_s30, 4  ;;  %s8778_s6 = int_to_ptr.vmem [resolvable:$true] %s189_s6 }
  0x12   : > { %p8493_p11 = scmp.ne.s32.totalorder %s12040_s1, %s8492_s9  ;;  %p8499_p3 = scmp.lt.u32.totalorder %s8492_s9, %s12040_s1 }
  0x13   : > { %p8774_p10 = pnand %p7854_p9, %p12045_p1 }
  0x15   : > { %p8788_p12 = pneg %p8774_p10 }
  0x17   : > { %p8495_p13 = pnand %p8788_p12, %p8493_p11 }
  0x19   : > { %p8496_p0 = pneg %p8495_p13 }
  0x1b   : > { %p8501_p5 = pnand %p8499_p3, %p8496_p0 }
  0x1d   : > { %8504 = shalt.err (!%p8501_p5)
}
  0x1e   : > { %s8505_s15 = scalar_lea.vmem %s177_s28, 3072  ;;  %p8513_p2 = scmp.lt.s32.totalorder %s177_s28, %s177_s28 }
  0x1f   : > { %p8506_p7 = scmp.ne.s32.totalorder %s177_s28, %s8505_s15  ;;  %p8514_p6 = scmp.lt.s32.totalorder %s8505_s15, %s8505_s15 }
  0x21   : > { %p8508_p9 = pnand %p8506_p7, %p8788_p12  ;;  %p8515_p4 = por %p8514_p6, %p8513_p2 }
  0x23   : > { %p8509_p1 = pneg %p8508_p9 }
  0x25   : > { %p8516_p8 = pnand %p8515_p4, %p8509_p1 }
  0x27   : > { %8519 = shalt.err (!%p8516_p8)
}
  0x28   : > { %s8684_s16 = smov 192   ;;  %s8685_s17 = smov 12  }
  0x29   : > { %7857 = dma.hbm_to_vmem [thread:$0]  (!%p8774_p10), %s12040_s1, 3072, %s177_s28, [#allocation6], %s8684_s16, %s8684_s16, %s8685_s17  }
  0x2a   : > { %s8520_s8 = scalar_lea.hbm %s12041_s2, 2048 }
  0x2b   : > { %p8521_p11 = scmp.ne.s32.totalorder %s12041_s2, %s8520_s8  ;;  %p8527_p4 = scmp.lt.u32.totalorder %s8520_s8, %s12041_s2 }
  0x2d   : > { %p8523_p1 = pnand %p8521_p11, %p8788_p12 }
  0x2f   : > { %p8524_p2 = pneg %p8523_p1 }
  0x31   : > { %p8529_p6 = pnand %p8527_p4, %p8524_p2 }
  0x33   : > { %8532 = shalt.err (!%p8529_p6)
}
  0x34   : > { %s8533_s28 = scalar_lea.vmem %s8778_s6, 2048  ;;  %p8541_p3 = scmp.lt.s32.totalorder %s8778_s6, %s8778_s6 }
  0x35   : > { %p8534_p8 = scmp.ne.s32.totalorder %s8778_s6, %s8533_s28  ;;  %p8542_p5 = scmp.lt.s32.totalorder %s8533_s28, %s8533_s28 }
  0x37   : > { %p8536_p13 = pnand %p8534_p8, %p8788_p12  ;;  %p8543_p7 = por %p8542_p5, %p8541_p3 }
  0x39   : > { %p8537_p0 = pneg %p8536_p13 }
  0x3b   : > { %p8544_p9 = pnand %p8543_p7, %p8537_p0 }
  0x3d   : > { %8547 = shalt.err (!%p8544_p9)
}
  0x3e   : > { %s8686_s14 = smov 64   ;;  %s8687_s15 = smov 4  }
  0x3f   : > { %7860 = dma.hbm_to_vmem [thread:$0]  (!%p8774_p10), %s12041_s2, 2048, %s8778_s6, [#allocation6], %s8686_s14, %s8686_s14, %s8687_s15  }
  0x40   : > { %s8688_s23 = smov [#allocation8]   ;;  %s8831_s30 = sadd.s32 1, %s8680_s21  }
  0x41   : > { %s202_s27 = sshll.u32 %s8688_s23, 4  ;;  %s8548_s9 = scalar_lea.hbm %s12042_s3, 1024  ;;  %s203_s27 = int_to_ptr.vmem [resolvable:$true] %s202_s27 }
  0x42   : > { %p8549_p11 = scmp.ne.s32.totalorder %s12042_s3, %s8548_s9  ;;  %p8555_p4 = scmp.lt.u32.totalorder %s8548_s9, %s12042_s3 }
  0x44   : > { %p8551_p1 = pnand %p8549_p11, %p8788_p12 }
  0x46   : > { %p8552_p2 = pneg %p8551_p1 }
  0x48   : > { %p8557_p6 = pnand %p8555_p4, %p8552_p2 }
  0x4a   : > { %8560 = shalt.err (!%p8557_p6)
}
  0x4b   : > { %s8561_s6 = scalar_lea.vmem %s203_s27, 1024  ;;  %p8569_p3 = scmp.lt.s32.totalorder %s203_s27, %s203_s27 }
  0x4c   : > { %p8562_p8 = scmp.ne.s32.totalorder %s203_s27, %s8561_s6  ;;  %p8570_p5 = scmp.lt.s32.totalorder %s8561_s6, %s8561_s6 }
  0x4e   : > { %p8564_p13 = pnand %p8562_p8, %p8788_p12  ;;  %p8571_p7 = por %p8570_p5, %p8569_p3 }
  0x50   : > { %p8565_p0 = pneg %p8564_p13 }
  0x52   : > { %p8572_p9 = pnand %p8571_p7, %p8565_p0 }
  0x54   : > { %8575 = shalt.err (!%p8572_p9)
}
  0x55   : > { %7863 = dma.hbm_to_vmem [thread:$0]  (!%p8774_p10), %s12042_s3, 1024, %s203_s27, [#allocation9], %s8686_s14, %s8686_s14, %s8687_s15  }
  0x56   : > { %s27_s12 = ssub.s32 %s8680_s21, %s8831_s30  ;;  %s30_s29 = sadd.s32 1, %s8676_s20 }
  0x57   : > { %p28_p12 = scmp.eq.s32.totalorder %s27_s12, 0  ;;  %p37_p11 = scmp.ne.s32.totalorder %s8676_s20, %s8672_s19 }
  0x58   : > { %p38_p1 = scmp.eq.s32.totalorder %s8680_s21, 0  ;;  %p7875_p2 = scmp.lt.s32.totalorder %s8680_s21, 8 }
  0x59   : > { %s8862_s23 = scalar_select %p28_p12, %s8676_s20, %s30_s29  }
  0x5a   : > { %p39_p4 = por %p38_p1, %p37_p11  ;;  %p12260_p6 = scmp.eq.s32.totalorder %s8747_s22, 7 }
  0x5b   : > { %s219_s8 = sand.u32 1, %s8676_s20   ;;  %s6640_s9 = sshll.u32 %s8680_s21, 11 }
  0x5c   : > { %p8866_p8 = por %p12260_p6, %p37_p11  ;;  %s6414_s10 = sshll.u32 %s219_s8, 7 }
  0x5d   : > { %s8875_s27 = scalar_lea.hbm %s12039_s0, %s6640_s9  ;;  %s223_s28 = scalar_lea.vmem [#allocation2], %s6414_s10 }
  0x5e   : > { %s231_s6 = sshll.u32 %s223_s28, 4  ;;  %p8877_p10 = pnand %p7875_p2, %p39_p4  ;;  %s8881_s6 = int_to_ptr.vmem [resolvable:$true] %s231_s6 }
  0x5f   : > { %s8883_s17 = scalar_lea.sflag [#allocation3], %s219_s8  ;;  %s8576_s12 = scalar_lea.hbm %s8875_s27, 2048 }
  0x60   : > { %p8577_p13 = scmp.ne.s32.totalorder %s8875_s27, %s8576_s12  ;;  %p8578_p0 = pneg %p8877_p10 }
  0x61   : > { %s8581_s10 = scalar_lea.hbm %s12039_s0, 16384  ;;  %p8582_p7 = scmp.lt.u32.totalorder %s8875_s27, %s12039_s0 }
  0x62   : > { %p8579_p3 = pnand %p8578_p0, %p8577_p13  ;;  %p8583_p9 = scmp.lt.u32.totalorder %s8581_s10, %s8576_s12 }
  0x63   : > { %p8585_p11 = scmp.lt.u32.totalorder %s8576_s12, %s8875_s27 }
  0x64   : > { %p8580_p5 = pneg %p8579_p3  ;;  %p8584_p12 = por %p8583_p9, %p8582_p7 }
  0x66   : > { %p8586_p1 = por %p8585_p11, %p8584_p12 }
  0x68   : > { %p8587_p2 = pnand %p8586_p1, %p8580_p5 }
  0x6a   : > { %8590 = shalt.err (!%p8587_p2)
}
  0x6b   : > { %s8591_s8 = scalar_lea.vmem %s8881_s6, 2048  ;;  %s8689_s28 = smov [#allocation2]  }
  0x6c   : > { %p8592_p4 = scmp.ne.s32.totalorder %s8881_s6, %s8591_s8  ;;  %s8596_s29 = sshll.u32 %s8689_s28, 4  ;;  %s8597_s29 = int_to_ptr.vmem [resolvable:$false] %s8596_s29 }
  0x6d   : > { %s8598_s9 = scalar_lea.vmem %s8597_s29, 4096  ;;  %p8599_p3 = scmp.lt.s32.totalorder %s8881_s6, %s8597_s29 }
  0x6e   : > { %p8594_p6 = pnand %p8592_p4, %p8578_p0  ;;  %p8600_p7 = scmp.lt.s32.totalorder %s8598_s9, %s8591_s8 }
  0x70   : > { %p8595_p13 = pneg %p8594_p6  ;;  %p8601_p9 = por %p8600_p7, %p8599_p3 }
  0x72   : > { %p8602_p12 = pnand %p8601_p9, %p8595_p13 }
  0x74   : > { %8605 = shalt.err (!%p8602_p12)
}
  0x75   : > { %7867 = dma.hbm_to_vmem [thread:$0]  (!%p8877_p10), %s8875_s27, 2048, %s8881_s6, %s8883_s17, %s8686_s14, %s8686_s14, %s8687_s15  }
  0x76   : > { %p12263_p0 = scmp.ne.s32.totalorder %s12257_s26, 0 }
  0x78   : > { %243 = sbr.rel (%p12263_p0) target bundleno = 3709 (0xe7d), region = 40 }
  0x7f   : > { %s8917_s12 = sand.u32 1, %s8672_s19   ;;  %p12264_p5 = scmp.ne.s32.totalorder %s12255_s24, 0 }
  0x80   : > { %s6419_s10 = sshll.u32 %s8917_s12, 7  ;;  %s246_s11 = scalar_lea.sflag [#allocation3], %s8917_s12 }
  0x81   : > { %s8923_s16 = scalar_lea.vmem [#allocation2], %s6419_s10 }
  0x82   : > { %8651 = dma.done.wait (%p12264_p5), %s246_s11, 2048  }
  0x83   : > { %8653 = vsyncadd (%p12264_p5), %s246_s11, 4294965248  ;;  %p12265_p10 = scmp.eq.s32.totalorder %s8747_s22, 0 }
  0x85   : > { %8655 = dma.done.wait (%p12265_p10), [#allocation6], 5120   ;;  %p12266_p11 = pmov %p12265_p10 }
  0x86   : > { %p12267_p1 = pmov %p12265_p10 }
  0x87   : > { %8657 = vsyncadd (%p12266_p11), [#allocation6], 4294962176 }
  0x88   : > { %8659 = dma.done.wait (%p12267_p1), [#allocation9], 1024   ;;  %p12268_p2 = pmov %p12267_p1 }
  0x89   : > { %v8690_v0 = vmov 0   ;;  %v7924_v1 = vld [vmem:[#allocation5 + $0x4] ss:$12 sps:$4 sm:$0xff]   ;;  %v7926_v2 = vld [vmem:[#allocation5] ss:$12 sps:$4 sm:$0xff]   ;;  %v8941_v19 = vld [vmem:[%s8923_s16 + $0x58] sm:$0xff]  }
  0x8a   : > { %8661 = vsyncadd (%p12268_p2), [#allocation9], 4294966272  ;;  %611 = vmatprep.mubr.bf16.mxu0 %v8690_v0  ;;  %721 = vmatprep.mubr.bf16.mxu1 %v8690_v0  ;;  %v7927_v3 = vld [vmem:[#allocation5 + $0x1c] ss:$12 sps:$4 sm:$0xff]   ;;  %v7929_v4 = vld [vmem:[#allocation5 + $0x18] ss:$12 sps:$4 sm:$0xff]  }
  0x8b   : > { %579 = vmatprep.subr.bf16.mxu0 %v7924_v1  ;;  %7758 = vmatprep.subr.bf16.mxu1 %v7924_v1  ;;  %v7930_v5 = vld [vmem:[#allocation5 + $0x34] ss:$12 sps:$4 sm:$0xff]   ;;  %v7932_v6 = vld [vmem:[#allocation5 + $0x30] ss:$12 sps:$4 sm:$0xff]   ;;  %v7933_v7 = vld [vmem:[#allocation5 + $0x4c] ss:$12 sps:$4 sm:$0xff]  }
  0x8c   : > { %580 = vmatpush1.bf16.msra.mxu0 %v7926_v2  ;;  %7766 = vmatpush1.bf16.msra.mxu1 %v7926_v2  ;;  %v7935_v8 = vld [vmem:[#allocation5 + $0x48] ss:$12 sps:$4 sm:$0xff]   ;;  %v7936_v9 = vld [vmem:[#allocation5 + $0x64] ss:$12 sps:$4 sm:$0xff]   ;;  %v7938_v10 = vld [vmem:[#allocation5 + $0x60] ss:$12 sps:$4 sm:$0xff]  }
  0x8d   : > { %581 = vmatprep.subr.bf16.mxu0 %v7927_v3  ;;  %7759 = vmatprep.subr.bf16.mxu1 %v7927_v3  ;;  %v7939_v11 = vld [vmem:[#allocation5 + $0x7c] ss:$12 sps:$4 sm:$0xff]   ;;  %v7941_v12 = vld [vmem:[#allocation5 + $0x78] ss:$12 sps:$4 sm:$0xff]   ;;  %v7942_v13 = vld [vmem:[#allocation5 + $0x94] ss:$12 sps:$4 sm:$0xff]  }
  0x8e   : > { %v7944_v14 = vld [vmem:[#allocation5 + $0x90] ss:$12 sps:$4 sm:$0xff]   ;;  %v7945_v15 = vld [vmem:[#allocation5 + $0xac] ss:$12 sps:$4 sm:$0xff]   ;;  %v7947_v16 = vld [vmem:[#allocation5 + $0xa8] ss:$12 sps:$4 sm:$0xff]  }
  0x8f   : > { %v7964_v17 = vld [vmem:[#allocation5 + $0x8] ss:$12 sps:$4 sm:$0xff]   ;;  %v7948_v18 = vld [vmem:[%s8923_s16] sm:$0xff]   ;;  %v7967_v24 = vld [vmem:[#allocation5 + $0x50] ss:$12 sps:$4 sm:$0xff]   ;;  %vm997_vm0 = vcmask 261120  }
  0x90   : > { %582 = vmatpush1.bf16.msra.mxu0 %v7929_v4  ;;  %7767 = vmatpush1.bf16.msra.mxu1 %v7929_v4  ;;  %v7965_v20 = vld [vmem:[#allocation5 + $0x20] ss:$12 sps:$4 sm:$0xff]   ;;  %v7966_v21 = vld [vmem:[#allocation5 + $0x38] ss:$12 sps:$4 sm:$0xff]   ;;  %v7968_v25 = vld [vmem:[#allocation5 + $0x68] ss:$12 sps:$4 sm:$0xff]  }
  0x91   : > { %583 = vmatprep.subr.bf16.mxu0 %v7930_v5  ;;  %7760 = vmatprep.subr.bf16.mxu1 %v7930_v5  ;;  %v7949_v22 = vld [vmem:[%s8923_s16 + $0x8] sm:$0xff]   ;;  %v8948_v23 = vld [vmem:[%s8923_s16 + $0x60] sm:$0xff]   ;;  %v7950_v26 = vld [vmem:[%s8923_s16 + $0x10] sm:$0xff]   ;;  %s8691_s24 = smov 96   ;;  %vm1354_vm1 = vcmask 523264   ;;  %s8692_s26 = smov 64  }
  0x92   : > { %v7960_v27 = vld [vmem:[%s8923_s16 + $0x68] sm:$0xff]   ;;  %v7970_v29 = vld [vmem:[#allocation5 + $0x98] ss:$12 sps:$4 sm:$0xff]   ;;  %v7962_v31 = vld [vmem:[%s8923_s16 + $0x70] sm:$0xff]   ;;  %s8693_s14 = smov 32   ;;  %vm5850_vm2 = vcmask 785408  }
  0x93   : > { %v7969_v28 = vld [vmem:[#allocation5 + $0x80] ss:$12 sps:$4 sm:$0xff]   ;;  %v7951_v30 = vld [vmem:[%s8923_s16 + $0x18] sm:$0xff]   ;;  %v7954_v36 = vld [vmem:[%s8923_s16 + $0x30] sm:$0xff]   ;;  %s11941_s6 = scalar_lea.vmem [#allocation10], %s6419_s10  ;;  %s6674_s17 = sshll.u32 %s8747_s22, 11 }
  0x94   : > { %584 = vmatpush1.bf16.msra.mxu0 %v7932_v6  ;;  %7768 = vmatpush1.bf16.msra.mxu1 %v7932_v6  ;;  %v7971_v32 = vld [vmem:[#allocation5 + $0xb0] ss:$12 sps:$4 sm:$0xff]   ;;  %v7952_v33 = vld [vmem:[%s8923_s16 + $0x20] sm:$0xff]   ;;  %v7953_v35 = vld [vmem:[%s8923_s16 + $0x28] sm:$0xff]   ;;  %s6306_s13 = sshll.u32 %s11941_s6, 4  ;;  %s11990_s29 = scalar_lea.hbm %s12044_s5, %s6674_s17  ;;  %s11992_s13 = int_to_ptr.vmem [resolvable:$true] %s6306_s13 }
  0x95   : > { %585 = vmatprep.subr.bf16.mxu0 %v7933_v7  ;;  %7761 = vmatprep.subr.bf16.mxu1 %v7933_v7  ;;  %v7963_v34 = vld [vmem:[%s8923_s16 + $0x78] sm:$0xff]   ;;  %v7957_v38 = vld [vmem:[%s8923_s16 + $0x40] sm:$0xff]   ;;  %v7959_v39 = vld [vmem:[%s8923_s16 + $0x48] sm:$0xff]   ;;  %s6292_s22 = scalar_lea.sflag [#allocation4], %s8917_s12  ;;  %s8606_s9 = scalar_lea.vmem %s11992_s13, 2048 }
  0x96   : > { %v7955_v37 = vld [vmem:[%s8923_s16 + $0x38] sm:$0xff]   ;;  %v7961_v40 = vld [vmem:[%s8923_s16 + $0x50] sm:$0xff]   ;;  %p8607_p4 = scmp.ne.s32.totalorder %s11992_s13, %s8606_s9  ;;  %s8694_s10 = smov [#allocation10]  }
  0x97   : > { %s8610_s11 = sshll.u32 %s8694_s10, 4  ;;  %s8611_s11 = int_to_ptr.vmem [resolvable:$false] %s8610_s11 }
  0x98   : > { %586 = vmatpush1.bf16.msra.mxu0 %v7935_v8  ;;  %7769 = vmatpush1.bf16.msra.mxu1 %v7935_v8  ;;  %p8608_p6 = pnand %p8607_p4, %p8866_p8  ;;  %s8612_s16 = scalar_lea.vmem %s8611_s11, 4096 }
  0x99   : > { %587 = vmatprep.subr.bf16.mxu0 %v7936_v9  ;;  %7762 = vmatprep.subr.bf16.mxu1 %v7936_v9  ;;  %p8613_p3 = scmp.lt.s32.totalorder %s11992_s13, %s8611_s11  ;;  %p8614_p7 = scmp.lt.s32.totalorder %s8612_s16, %s8606_s9 }
  0x9a   : > { %p8609_p13 = pneg %p8608_p6 }
  0x9b   : > { %p8615_p9 = por %p8614_p7, %p8613_p3 }
  0x9c   : > { %588 = vmatpush1.bf16.msra.mxu0 %v7938_v10  ;;  %7770 = vmatpush1.bf16.msra.mxu1 %v7938_v10 }
  0x9d   : > { %589 = vmatprep.subr.bf16.mxu0 %v7939_v11  ;;  %7763 = vmatprep.subr.bf16.mxu1 %v7939_v11  ;;  %p8616_p12 = pnand %p8615_p9, %p8609_p13 }
  0xa0   : > { %590 = vmatpush1.bf16.msra.mxu0 %v7941_v12  ;;  %7771 = vmatpush1.bf16.msra.mxu1 %v7941_v12 }
  0xa1   : > { %591 = vmatprep.subr.bf16.mxu0 %v7942_v13  ;;  %7764 = vmatprep.subr.bf16.mxu1 %v7942_v13 }
  0xa4   : > { %592 = vmatpush1.bf16.msra.mxu0 %v7944_v14  ;;  %7772 = vmatpush1.bf16.msra.mxu1 %v7944_v14 }
  0xa5   : > { %593 = vmatprep.subr.bf16.mxu0 %v7945_v15  ;;  %7765 = vmatprep.subr.bf16.mxu1 %v7945_v15 }
  0xa8   : > { %594 = vmatpush1.bf16.msra.mxu0 %v7947_v16  ;;  %7773 = vmatpush1.bf16.msra.mxu1 %v7947_v16 }
  0xa9   : > { %7150 = vmatprep.subr.bf16.mxu1 %v7964_v17 }
  0xab   : > { %612 = vmatmul.mubr.bf16.vlgmr.msra.gmra.mrb[0].mxu0 %v7948_v18  ;;  %722 = vmatmul.mubr.bf16.vlgmr.msra.gmra.mrb[0].mxu1 %v8941_v19 }
  0xac   : > { %621 = vmatprep.mubr.bf16.mxu0 %v8690_v0  ;;  %731 = vmatprep.mubr.bf16.mxu1 %v8690_v0 }
  0xad   : > { %7151 = vmatpush3.bf16.msra.mxu1 %v7964_v17 }
  0xae   : > { %7152 = vmatprep.subr.bf16.mxu1 %v7965_v20 }
  0xb1   : > { %7153 = vmatpush3.bf16.msra.mxu1 %v7965_v20 }
  0xb2   : > { %7154 = vmatprep.subr.bf16.mxu1 %v7966_v21 }
  0xb3   : > { %622 = vmatmul.mubr.bf16.gmra.mrb[4].mxu0 %v7949_v22  ;;  %732 = vmatmul.mubr.bf16.gmra.mrb[4].mxu1 %v8948_v23 }
  0xb4   : > { %631 = vmatprep.mubr.bf16.mxu0 %v8690_v0  ;;  %741 = vmatprep.mubr.bf16.mxu1 %v8690_v0 }
  0xb5   : > { %7155 = vmatpush3.bf16.msra.mxu1 %v7966_v21 }
  0xb6   : > { %7156 = vmatprep.subr.bf16.mxu1 %v7967_v24 }
  0xb9   : > { %7157 = vmatpush3.bf16.msra.mxu1 %v7967_v24 }
  0xba   : > { %7158 = vmatprep.subr.bf16.mxu1 %v7968_v25 }
  0xbb   : > { %632 = vmatmul.mubr.bf16.gmra.mrb[8].mxu0 %v7950_v26  ;;  %742 = vmatmul.mubr.bf16.gmra.mrb[8].mxu1 %v7960_v27 }
  0xbc   : > { %641 = vmatprep.mubr.bf16.mxu0 %v8690_v0  ;;  %751 = vmatprep.mubr.bf16.mxu1 %v8690_v0 }
  0xbd   : > { %7159 = vmatpush3.bf16.msra.mxu1 %v7968_v25 }
  0xbe   : > { %7160 = vmatprep.subr.bf16.mxu1 %v7969_v28 }
  0xc1   : > { %7161 = vmatpush3.bf16.msra.mxu1 %v7969_v28 }
  0xc2   : > { %7162 = vmatprep.subr.bf16.mxu1 %v7970_v29 }
  0xc3   : > { %642 = vmatmul.mubr.bf16.gmra.mrb[12].mxu0 %v7951_v30  ;;  %752 = vmatmul.mubr.bf16.gmra.mrb[12].mxu1 %v7962_v31 }
  0xc4   : > { %651 = vmatprep.mubr.bf16.mxu0 %v8690_v0  ;;  %761 = vmatprep.mubr.bf16.mxu1 %v8690_v0 }
  0xc5   : > { %7163 = vmatpush3.bf16.msra.mxu1 %v7970_v29 }
  0xc6   : > { %7164 = vmatprep.subr.bf16.mxu1 %v7971_v32 }
  0xc9   : > { %7165 = vmatpush3.bf16.msra.mxu1 %v7971_v32 }
  0xcb   : > { %652 = vmatmul.mubr.bf16.gmra.mrb[16].mxu0 %v7952_v33  ;;  %762 = vmatmul.mubr.bf16.gmra.mrb[16].mxu1 %v7963_v34 }
  0xcc   : > { %661 = vmatprep.mubr.bf16.mxu0 %v8690_v0  ;;  %7166 = vmatprep.mubr.bf16.mxu1 %v7948_v18 }
  0xd3   : > { %662 = vmatmul.mubr.bf16.gmra.mrb[20].mxu0 %v7953_v35  ;;  %7167 = vmatmul.mubr.bf16.vlgmr.msra.gmra.mrb[20].mxu1 %v7949_v22 }
  0xd4   : > { %671 = vmatprep.mubr.bf16.mxu0 %v8690_v0  ;;  %7170 = vmatprep.mubr.bf16.mxu1 %v7950_v26 }
  0xdb   : > { %672 = vmatmul.mubr.bf16.gmra.mrb[24].mxu0 %v7954_v36  ;;  %7171 = vmatmul.mubr.bf16.gmra.mrb[24].mxu1 %v7951_v30 }
  0xdc   : > { %681 = vmatprep.mubr.bf16.mxu0 %v8690_v0  ;;  %7174 = vmatprep.mubr.bf16.mxu1 %v7952_v33 }
  0xe3   : > { %682 = vmatmul.mubr.bf16.gmra.mrb[28].mxu0 %v7955_v37  ;;  %7175 = vmatmul.mubr.bf16.gmra.mrb[28].mxu1 %v7953_v35 }
  0xe4   : > { %691 = vmatprep.mubr.bf16.mxu0 %v8690_v0  ;;  %7178 = vmatprep.mubr.bf16.mxu1 %v7954_v36 }
  0xeb   : > { %692 = vmatmul.mubr.bf16.gmra.mrb[32].mxu0 %v7957_v38  ;;  %7179 = vmatmul.mubr.bf16.gmra.mrb[32].mxu1 %v7955_v37 }
  0xec   : > { %701 = vmatprep.mubr.bf16.mxu0 %v8690_v0  ;;  %7182 = vmatprep.mubr.bf16.mxu1 %v7957_v38 }
  0xf3   : > { %702 = vmatmul.mubr.bf16.gmra.mrb[36].mxu0 %v7959_v39  ;;  %7183 = vmatmul.mubr.bf16.gmra.mrb[36].mxu1 %v7959_v39 }
  0xf4   : > { %711 = vmatprep.mubr.bf16.mxu0 %v8690_v0  ;;  %7186 = vmatprep.mubr.bf16.mxu1 %v7961_v40 }
  0xfb   : > { %712 = vmatmul.mubr.bf16.gmra.mrb[40].mxu0 %v7961_v40  ;;  %7187 = vmatmul.mubr.bf16.gmra.mrb[40].mxu1 %v8941_v19 }
  0xfc   : > { %7190 = vmatprep.mubr.bf16.mxu1 %v8948_v23 }
 0x103   : > { %7191 = vmatmul.mubr.bf16.gmra.mrb[44].mxu1 %v7960_v27 }
 0x104   : > { %7194 = vmatprep.mubr.bf16.mxu1 %v7962_v31 }
 0x10b   : > { %7195 = vmatmul.mubr.bf16.gmra.mrb[48].mxu1 %v7963_v34 }
 0x17e   : > { %v613_v41 = vpop.f32.mrb[0].mxu0  ;;  %v723_v42 = vpop.f32.mrb[0].mxu1 }
 0x17f   : > { %v615_v43 = vpop.f32.mrb[1].mxu0  ;;  %v725_v44 = vpop.f32.mrb[1].mxu1 }
 0x180   : > { %v617_v45 = vpop.f32.mrb[2].mxu0  ;;  %v727_v46 = vpop.f32.mrb[2].mxu1 }
 0x181   : > { %v8977_v47 = vpack.c.bf16 %v617_v45, %v613_v41  ;;  %v619_v48 = vpop.f32.mrb[3].mxu0  ;;  %v8979_v49 = vpack.c.bf16 %v727_v46, %v723_v42  ;;  %v729_v50 = vpop.f32.mrb[3].mxu1 }
 0x182   : > { %v8981_v51 = vpack.c.bf16 %v619_v48, %v615_v43  ;;  %v8983_v52 = vpack.c.bf16 %v729_v50, %v725_v44 }
 0x183   : > { %12269 = vst [vmem:[#allocation15_spill] sm:$0xff] %v8977_v47  ;;  %12270 = vst [vmem:[#allocation16_spill] sm:$0xff] %v8979_v49  ;;  %7206 = vmatprep.mubr.msk.bf16.mxu1 %vm997_vm0, %v8977_v47 }
 0x184   : > { %12271 = vst [vmem:[#allocation17_spill] sm:$0xff] %v8981_v51  ;;  %12272 = vst [vmem:[#allocation18_spill] sm:$0xff] %v8983_v52  ;;  %2080 = vrot.lane.b32.xlu0 %v8981_v51, %s8691_s24  ;;  %7774 = vmatprep.subr.msk.bf16.mxu1 %vm997_vm0, %v8981_v51  ;;  %v1011_v53 = vsel %vm997_vm0, %v8981_v51, 0 }
 0x185   : > { %7199 = vmatpush3.bf16.xpose.msra.mxu1 %v1011_v53 }
 0x186   : > { %v623_v54 = vpop.f32.mrb[4].mxu0  ;;  %v733_v55 = vpop.f32.mrb[4].mxu1 }
 0x187   : > { %v625_v56 = vpop.f32.mrb[5].mxu0  ;;  %v735_v57 = vpop.f32.mrb[5].mxu1 }
 0x188   : > { %v627_v58 = vpop.f32.mrb[6].mxu0  ;;  %v737_v59 = vpop.f32.mrb[6].mxu1 }
 0x189   : > { %v8993_v60 = vpack.c.bf16 %v627_v58, %v623_v54  ;;  %v629_v61 = vpop.f32.mrb[7].mxu0  ;;  %v8995_v62 = vpack.c.bf16 %v737_v59, %v733_v55  ;;  %v739_v63 = vpop.f32.mrb[7].mxu1 }
 0x18a   : > { %v8997_v0 = vpack.c.bf16 %v629_v61, %v625_v56  ;;  %v8999_v1 = vpack.c.bf16 %v739_v63, %v735_v57 }
 0x18b   : > { %12273 = vst [vmem:[#allocation19_spill] sm:$0xff] %v8995_v62 }
 0x18c   : > { %12274 = vst [vmem:[#allocation20_spill] sm:$0xff] %v8997_v0  ;;  %12275 = vst [vmem:[#allocation21_spill] sm:$0xff] %v8999_v1  ;;  %2082 = vrot.lane.b32.xlu1 %v8997_v0, %s8691_s24  ;;  %7775 = vmatprep.subr.msk.bf16.mxu1 %vm997_vm0, %v8997_v0  ;;  %v1014_v2 = vsel %vm997_vm0, %v8997_v0, 0 }
 0x18d   : > { %7201 = vmatpush3.bf16.xpose.msra.mxu1 %v1014_v2 }
 0x18e   : > { %v633_v3 = vpop.f32.mrb[8].mxu0  ;;  %v743_v4 = vpop.f32.mrb[8].mxu1 }
 0x18f   : > { %v635_v5 = vpop.f32.mrb[9].mxu0  ;;  %v745_v6 = vpop.f32.mrb[9].mxu1 }
 0x190   : > { %v637_v7 = vpop.f32.mrb[10].mxu0  ;;  %v747_v8 = vpop.f32.mrb[10].mxu1 }
 0x191   : > { %v9007_v9 = vpack.c.bf16 %v637_v7, %v633_v3  ;;  %v639_v10 = vpop.f32.mrb[11].mxu0  ;;  %v9009_v11 = vpack.c.bf16 %v747_v8, %v743_v4  ;;  %v749_v12 = vpop.f32.mrb[11].mxu1 }
 0x192   : > { %v9011_v13 = vpack.c.bf16 %v639_v10, %v635_v5  ;;  %v9013_v14 = vpack.c.bf16 %v749_v12, %v745_v6 }
 0x193   : > { %12276 = vst [vmem:[#allocation22_spill] sm:$0xff] %v9007_v9  ;;  %12277 = vst [vmem:[#allocation23_spill] sm:$0xff] %v9009_v11 }
 0x194   : > { %12278 = vst [vmem:[#allocation24_spill] sm:$0xff] %v9011_v13  ;;  %12279 = vst [vmem:[#allocation25_spill] sm:$0xff] %v9013_v14  ;;  %2084 = vrot.lane.b32.xlu0 %v9011_v13, %s8691_s24  ;;  %7776 = vmatprep.subr.msk.bf16.mxu1 %vm997_vm0, %v9011_v13  ;;  %v1017_v15 = vsel %vm997_vm0, %v9011_v13, 0 }
 0x195   : > { %7203 = vmatpush3.bf16.xpose.msra.mxu1 %v1017_v15 }
 0x196   : > { %v643_v16 = vpop.f32.mrb[12].mxu0  ;;  %v753_v17 = vpop.f32.mrb[12].mxu1 }
 0x197   : > { %v645_v18 = vpop.f32.mrb[13].mxu0  ;;  %v755_v19 = vpop.f32.mrb[13].mxu1 }
 0x198   : > { %v647_v20 = vpop.f32.mrb[14].mxu0  ;;  %v757_v21 = vpop.f32.mrb[14].mxu1 }
 0x199   : > { %v9021_v22 = vpack.c.bf16 %v647_v20, %v643_v16  ;;  %v649_v23 = vpop.f32.mrb[15].mxu0  ;;  %v9023_v24 = vpack.c.bf16 %v757_v21, %v753_v17  ;;  %v759_v25 = vpop.f32.mrb[15].mxu1 }
 0x19a   : > { %v9025_v26 = vpack.c.bf16 %v649_v23, %v645_v18  ;;  %v9027_v27 = vpack.c.bf16 %v759_v25, %v755_v19 }
 0x19b   : > { %12280 = vst [vmem:[#allocation26_spill] sm:$0xff] %v9021_v22  ;;  %12281 = vst [vmem:[#allocation27_spill] sm:$0xff] %v9023_v24 }
 0x19c   : > { %12282 = vst [vmem:[#allocation28_spill] sm:$0xff] %v9025_v26  ;;  %12283 = vst [vmem:[#allocation29_spill] sm:$0xff] %v9027_v27  ;;  %2086 = vrot.lane.b32.xlu1 %v9025_v26, %s8691_s24  ;;  %7777 = vmatprep.subr.msk.bf16.mxu1 %vm997_vm0, %v9025_v26  ;;  %v1020_v28 = vsel %vm997_vm0, %v9025_v26, 0 }
 0x19d   : > { %7205 = vmatpush3.bf16.xpose.msra.mxu1 %v1020_v28 }
 0x19e   : > { %v653_v29 = vpop.f32.mrb[16].mxu0  ;;  %v763_v30 = vpop.f32.mrb[16].mxu1 }
 0x19f   : > { %v655_v31 = vpop.f32.mrb[17].mxu0  ;;  %v765_v32 = vpop.f32.mrb[17].mxu1 }
 0x1a0   : > { %v657_v33 = vpop.f32.mrb[18].mxu0  ;;  %v767_v34 = vpop.f32.mrb[18].mxu1 }
 0x1a1   : > { %v9035_v35 = vpack.c.bf16 %v657_v33, %v653_v29  ;;  %v659_v36 = vpop.f32.mrb[19].mxu0  ;;  %v9037_v37 = vpack.c.bf16 %v767_v34, %v763_v30  ;;  %v769_v38 = vpop.f32.mrb[19].mxu1 }
 0x1a2   : > { %v9039_v39 = vpack.c.bf16 %v659_v36, %v655_v31  ;;  %v9041_v40 = vpack.c.bf16 %v769_v38, %v765_v32 }
 0x1a3   : > { %12284 = vst [vmem:[#allocation30_spill] sm:$0xff] %v9035_v35  ;;  %12285 = vst [vmem:[#allocation31_spill] sm:$0xff] %v9037_v37 }
 0x1a4   : > { %12286 = vst [vmem:[#allocation32_spill] sm:$0xff] %v9039_v39  ;;  %12287 = vst [vmem:[#allocation33_spill] sm:$0xff] %v9041_v40  ;;  %7207 = vmatmul.mubr.msk.bf16.vlgmr.msra.gmra.mrb[52].mxu1 %vm997_vm0, %v8993_v60  ;;  %2193 = vrot.lane.b32.xlu1 %v9039_v39, %s8691_s24  ;;  %v1100_v41 = vsel %vm997_vm0, %v9039_v39, 0 }
 0x1a5   : > { %7778 = vmatprep.subr.msk.bf16.mxu1 %vm997_vm0, %v9039_v39  ;;  %7210 = vmatprep.mubr.msk.bf16.mxu1 %vm997_vm0, %v9007_v9 }
 0x1a6   : > { %7215 = vmatpush3.bf16.xpose.msra.mxu1 %v1100_v41  ;;  %v663_v42 = vpop.f32.mrb[20].mxu0  ;;  %v7168_v43 = vpop.f32.mrb[20].mxu1 }
 0x1a7   : > { %v665_v44 = vpop.f32.mrb[21].mxu0  ;;  %v806_v45 = vpop.f32.mrb[21].mxu1 }
 0x1a8   : > { %v667_v46 = vpop.f32.mrb[22].mxu0  ;;  %v7169_v48 = vpop.f32.mrb[22].mxu1 }
 0x1a9   : > { %v9053_v50 = vpack.c.bf16 %v667_v46, %v663_v42  ;;  %v669_v53 = vpop.f32.mrb[23].mxu0  ;;  %v9055_v54 = vpack.c.bf16 %v7169_v48, %v7168_v43  ;;  %v809_v55 = vpop.f32.mrb[23].mxu1 }
 0x1aa   : > { %v9057_v56 = vpack.c.bf16 %v669_v53, %v665_v44  ;;  %v9059_v57 = vpack.c.bf16 %v809_v55, %v806_v45  ;;  %v1278_v55 = vsel %vm997_vm0, %v8999_v1, 0 }
 0x1ab   : > { %12288 = vst [vmem:[#allocation34_spill] sm:$0xff] %v9053_v50  ;;  %12289 = vst [vmem:[#allocation35_spill] sm:$0xff] %v9055_v54 }
 0x1ac   : > { %12290 = vst [vmem:[#allocation36_spill] sm:$0xff] %v9057_v56  ;;  %12291 = vst [vmem:[#allocation37_spill] sm:$0xff] %v9059_v57  ;;  %7211 = vmatmul.mubr.msk.bf16.gmra.mrb[56].mxu1 %vm997_vm0, %v9021_v22  ;;  %7779 = vmatprep.subr.msk.bf16.mxu1 %vm997_vm0, %v9057_v56  ;;  %v1103_v58 = vsel %vm997_vm0, %v9057_v56, 0 }
 0x1ad   : > { %7222 = vmatprep.mubr.msk.bf16.mxu1 %vm997_vm0, %v9035_v35 }
 0x1ae   : > { %7217 = vmatpush3.bf16.xpose.msra.mxu1 %v1103_v58  ;;  %v673_v59 = vpop.f32.mrb[24].mxu0  ;;  %v7172_v61 = vpop.f32.mrb[24].mxu1 }
 0x1af   : > { %v675_v63 = vpop.f32.mrb[25].mxu0  ;;  %v822_v2 = vpop.f32.mrb[25].mxu1 }
 0x1b0   : > { %v677_v3 = vpop.f32.mrb[26].mxu0  ;;  %v7173_v4 = vpop.f32.mrb[26].mxu1 }
 0x1b1   : > { %v9069_v5 = vpack.c.bf16 %v677_v3, %v673_v59  ;;  %v679_v6 = vpop.f32.mrb[27].mxu0  ;;  %v9071_v7 = vpack.c.bf16 %v7173_v4, %v7172_v61  ;;  %v825_v8 = vpop.f32.mrb[27].mxu1 }
 0x1b2   : > { %v9073_v10 = vpack.c.bf16 %v679_v6, %v675_v63  ;;  %v9075_v12 = vpack.c.bf16 %v825_v8, %v822_v2 }
 0x1b3   : > { %12292 = vst [vmem:[#allocation38_spill] sm:$0xff] %v9069_v5  ;;  %12293 = vst [vmem:[#allocation39_spill] sm:$0xff] %v9071_v7 }
 0x1b4   : > { %12294 = vst [vmem:[#allocation40_spill] sm:$0xff] %v9075_v12  ;;  %7780 = vmatprep.subr.msk.bf16.mxu1 %vm997_vm0, %v9073_v10  ;;  %v1106_v15 = vsel %vm997_vm0, %v9073_v10, 0 }
 0x1b6   : > { %7219 = vmatpush3.bf16.xpose.msra.mxu1 %v1106_v15  ;;  %v683_v16 = vpop.f32.mrb[28].mxu0  ;;  %v7176_v17 = vpop.f32.mrb[28].mxu1 }
 0x1b7   : > { %v685_v18 = vpop.f32.mrb[29].mxu0  ;;  %v838_v19 = vpop.f32.mrb[29].mxu1 }
 0x1b8   : > { %v687_v20 = vpop.f32.mrb[30].mxu0  ;;  %v7177_v21 = vpop.f32.mrb[30].mxu1 }
 0x1b9   : > { %v9081_v23 = vpack.c.bf16 %v687_v20, %v683_v16  ;;  %v689_v25 = vpop.f32.mrb[31].mxu0  ;;  %v9083_v28 = vpack.c.bf16 %v7177_v21, %v7176_v17  ;;  %v841_v29 = vpop.f32.mrb[31].mxu1 }
 0x1ba   : > { %v9085_v30 = vpack.c.bf16 %v689_v25, %v685_v18  ;;  %v9087_v31 = vpack.c.bf16 %v841_v29, %v838_v19  ;;  %v1281_v19 = vsel %vm997_vm0, %v9013_v14, 0 }
 0x1bb   : > { %12295 = vst [vmem:[#allocation41_spill] sm:$0xff] %v9081_v23  ;;  %12296 = vst [vmem:[#allocation42_spill] sm:$0xff] %v9083_v28 }
 0x1bc   : > { %12297 = vst [vmem:[#allocation43_spill] sm:$0xff] %v9085_v30  ;;  %12298 = vst [vmem:[#allocation44_spill] sm:$0xff] %v9087_v31  ;;  %7781 = vmatprep.subr.msk.bf16.mxu1 %vm997_vm0, %v9085_v30  ;;  %v1109_v32 = vsel %vm997_vm0, %v9085_v30, 0 }
 0x1be   : > { %7221 = vmatpush3.bf16.xpose.msra.mxu1 %v1109_v32  ;;  %v693_v33 = vpop.f32.mrb[32].mxu0  ;;  %v7180_v34 = vpop.f32.mrb[32].mxu1 }
 0x1bf   : > { %v695_v36 = vpop.f32.mrb[33].mxu0  ;;  %7786 = vmatprep.subr.msk.bf16.mxu1 %vm997_vm0, %v8999_v1  ;;  %v854_v38 = vpop.f32.mrb[33].mxu1 }
 0x1c0   : > { %v697_v41 = vpop.f32.mrb[34].mxu0  ;;  %v7181_v42 = vpop.f32.mrb[34].mxu1 }
 0x1c1   : > { %v9095_v43 = vpack.c.bf16 %v697_v41, %v693_v33  ;;  %v699_v44 = vpop.f32.mrb[35].mxu0  ;;  %v9097_v45 = vpack.c.bf16 %v7181_v42, %v7180_v34  ;;  %v857_v46 = vpop.f32.mrb[35].mxu1 }
 0x1c2   : > { %v9099_v48 = vpack.c.bf16 %v699_v44, %v695_v36  ;;  %v9101_v53 = vpack.c.bf16 %v857_v46, %v854_v38 }
 0x1c3   : > { %12299 = vst [vmem:[#allocation45_spill] sm:$0xff] %v9095_v43  ;;  %12300 = vst [vmem:[#allocation46_spill] sm:$0xff] %v9097_v45  ;;  %7238 = vmatprep.mubr.msk.bf16.mxu0 %vm997_vm0, %v9095_v43 }
 0x1c4   : > { %12301 = vst [vmem:[#allocation47_spill] sm:$0xff] %v9101_v53  ;;  %7782 = vmatprep.subr.msk.bf16.mxu0 %vm997_vm0, %v9099_v48  ;;  %v1189_v58 = vsel %vm997_vm0, %v9099_v48, 0 }
 0x1c5   : > { %7223 = vmatmul.mubr.msk.bf16.vlgmr.msra.gmra.mrb[60].mxu1 %vm997_vm0, %v9053_v50  ;;  %7231 = vmatpush3.bf16.xpose.msra.mxu0 %v1189_v58 }
 0x1c6   : > { %7226 = vmatprep.mubr.msk.bf16.mxu1 %vm997_vm0, %v9069_v5  ;;  %v703_v59 = vpop.f32.mrb[36].mxu0  ;;  %7247 = vmatpush3.bf16.xpose.msra.mxu1 %v1278_v55  ;;  %v7184_v61 = vpop.f32.mrb[36].mxu1  ;;  %v1284_v55 = vsel %vm997_vm0, %v9027_v27, 0 }
 0x1c7   : > { %v705_v63 = vpop.f32.mrb[37].mxu0  ;;  %7787 = vmatprep.subr.msk.bf16.mxu1 %vm997_vm0, %v9013_v14  ;;  %v870_v2 = vpop.f32.mrb[37].mxu1 }
 0x1c8   : > { %v707_v3 = vpop.f32.mrb[38].mxu0  ;;  %v7185_v4 = vpop.f32.mrb[38].mxu1 }
 0x1c9   : > { %v9117_v6 = vpack.c.bf16 %v707_v3, %v703_v59  ;;  %v709_v8 = vpop.f32.mrb[39].mxu0  ;;  %v9119_v15 = vpack.c.bf16 %v7185_v4, %v7184_v61  ;;  %v873_v16 = vpop.f32.mrb[39].mxu1 }
 0x1ca   : > { %v9121_v17 = vpack.c.bf16 %v709_v8, %v705_v63  ;;  %v9123_v18 = vpack.c.bf16 %v873_v16, %v870_v2  ;;  %v1287_v8 = vsel %vm997_vm0, %v9041_v40, 0  ;;  %v1198_v16 = vsel %vm997_vm0, %v8983_v52, 0 }
 0x1cb   : > { %12302 = vst [vmem:[#allocation48_spill] sm:$0xff] %v9117_v6  ;;  %12303 = vst [vmem:[#allocation49_spill] sm:$0xff] %v9119_v15 }
 0x1cc   : > { %12304 = vst [vmem:[#allocation50_spill] sm:$0xff] %v9123_v18  ;;  %7783 = vmatprep.subr.msk.bf16.mxu0 %vm997_vm0, %v9121_v17  ;;  %v1192_v20 = vsel %vm997_vm0, %v9121_v17, 0 }
 0x1cd   : > { %7227 = vmatmul.mubr.msk.bf16.gmra.mrb[64].mxu1 %vm997_vm0, %v9081_v23  ;;  %7233 = vmatpush3.bf16.xpose.msra.mxu0 %v1192_v20 }
 0x1ce   : > { %v713_v21 = vpop.f32.mrb[40].mxu0  ;;  %7249 = vmatpush3.bf16.xpose.msra.mxu1 %v1281_v19  ;;  %7254 = vmatprep.mubr.msk.bf16.mxu1 %vm997_vm0, %v8995_v62  ;;  %v7188_v25 = vpop.f32.mrb[40].mxu1 }
 0x1cf   : > { %v715_v29 = vpop.f32.mrb[41].mxu0  ;;  %7788 = vmatprep.subr.msk.bf16.mxu1 %vm997_vm0, %v9027_v27  ;;  %v886_v32 = vpop.f32.mrb[41].mxu1 }
 0x1d0   : > { %v717_v33 = vpop.f32.mrb[42].mxu0  ;;  %v7189_v34 = vpop.f32.mrb[42].mxu1 }
 0x1d1   : > { %v9137_v36 = vpack.c.bf16 %v717_v33, %v713_v21  ;;  %v719_v38 = vpop.f32.mrb[43].mxu0  ;;  %v9139_v41 = vpack.c.bf16 %v7189_v34, %v7188_v25  ;;  %v889_v42 = vpop.f32.mrb[43].mxu1  ;;  %v6819_v33 = vld [vmem:[#allocation7 + $0x8] sm:$0xff]   ;;  %v6676_v34 = vld [vmem:[#allocation7] sm:$0xff]  }
 0x1d2   : > { %v9141_v44 = vpack.c.bf16 %v719_v38, %v715_v29  ;;  %v9143_v46 = vpack.c.bf16 %v889_v42, %v886_v32  ;;  %v9197_v38 = vunpack.c.l.bf16 %v6819_v33  ;;  %v9199_v42 = vunpack.c.l.bf16 %v6676_v34 }
 0x1d3   : > { %12305 = vst [vmem:[#allocation51_spill] sm:$0xff] %v9137_v36  ;;  %12306 = vst [vmem:[#allocation52_spill] sm:$0xff] %v9139_v41 }
 0x1d4   : > { %12307 = vst [vmem:[#allocation53_spill] sm:$0xff] %v9141_v44  ;;  %12308 = vst [vmem:[#allocation54_spill] sm:$0xff] %v9143_v46  ;;  %7784 = vmatprep.subr.msk.bf16.mxu0 %vm997_vm0, %v9141_v44  ;;  %v1195_v58 = vsel %vm997_vm0, %v9141_v44, 0 }
 0x1d5   : > { %7235 = vmatpush3.bf16.xpose.msra.mxu0 %v1195_v58 }
 0x1d6   : > { %7251 = vmatpush3.bf16.xpose.msra.mxu1 %v1284_v55  ;;  %7785 = vmatprep.subr.msk.bf16.mxu0 %vm997_vm0, %v8983_v52  ;;  %v7192_v59 = vpop.f32.mrb[44].mxu1  ;;  %v9201_v55 = vunpack.c.h.bf16 %v6819_v33 }
 0x1d7   : > { %7789 = vmatprep.subr.msk.bf16.mxu1 %vm997_vm0, %v9041_v40  ;;  %v902_v61 = vpop.f32.mrb[45].mxu1 }
 0x1d8   : > { %v7193_v63 = vpop.f32.mrb[46].mxu1 }
 0x1d9   : > { %v9155_v2 = vpack.c.bf16 %v7193_v63, %v7192_v59  ;;  %v905_v3 = vpop.f32.mrb[47].mxu1  ;;  %v9203_v59 = vunpack.c.h.bf16 %v6676_v34 }
 0x1da   : > { %v9157_v4 = vpack.c.bf16 %v905_v3, %v902_v61 }
 0x1db   : > { %12309 = vst [vmem:[#allocation55_spill] sm:$0xff] %v9155_v2 }
 0x1dc   : > { %12310 = vst [vmem:[#allocation56_spill] sm:$0xff] %v9157_v4 }
 0x1dd   : > { %7237 = vmatpush3.bf16.xpose.msra.mxu0 %v1198_v16  ;;  %v6821_v16 = vld [vmem:[#allocation7 + $0x18] sm:$0xff]  }
 0x1de   : > { %7253 = vmatpush3.bf16.xpose.msra.mxu1 %v1287_v8  ;;  %v7196_v19 = vpop.f32.mrb[48].mxu1  ;;  %7262 = vmatprep.subr.bf16.mxu0 %v9059_v57  ;;  %v9221_v34 = vunpack.c.l.bf16 %v6821_v16 }
 0x1df   : > { %v918_v20 = vpop.f32.mrb[49].mxu1  ;;  %7278 = vmatprep.subr.bf16.mxu1 %v9087_v31 }
 0x1e0   : > { %v7197_v21 = vpop.f32.mrb[50].mxu1 }
 0x1e1   : > { %v9165_v25 = vpack.c.bf16 %v7197_v21, %v7196_v19  ;;  %v921_v29 = vpop.f32.mrb[51].mxu1 }
 0x1e2   : > { %v9167_v32 = vpack.c.bf16 %v921_v29, %v918_v20 }
 0x1e3   : > { %12311 = vst [vmem:[#allocation57_spill] sm:$0xff] %v9165_v25 }
 0x1e4   : > { %12312 = vst [vmem:[#allocation58_spill] sm:$0xff] %v9167_v32  ;;  %7239 = vmatmul.mubr.msk.bf16.vlgmr.msra.gmra.mrb[44].mxu0 %vm997_vm0, %v9117_v6 }
 0x1e5   : > { %7255 = vmatmul.mubr.msk.bf16.vlgmr.msra.gmra.mrb[68].mxu1 %vm997_vm0, %v9009_v11  ;;  %7242 = vmatprep.mubr.msk.bf16.mxu0 %vm997_vm0, %v9137_v36 }
 0x1e6   : > { %7258 = vmatprep.mubr.msk.bf16.mxu1 %vm997_vm0, %v9023_v24  ;;  %7263 = vmatpush3.bf16.msra.mxu0 %v9059_v57 }
 0x1e7   : > { %7264 = vmatprep.subr.bf16.mxu0 %v9055_v54  ;;  %7279 = vmatpush3.bf16.msra.mxu1 %v9087_v31 }
 0x1e8   : > { %7280 = vmatprep.subr.bf16.mxu1 %v9083_v28 }
 0x1ea   : > { %7265 = vmatpush3.bf16.msra.mxu0 %v9055_v54 }
 0x1eb   : > { %7266 = vmatprep.subr.bf16.mxu0 %v9075_v12  ;;  %7281 = vmatpush3.bf16.msra.mxu1 %v9083_v28 }
 0x1ec   : > { %7243 = vmatmul.mubr.msk.bf16.gmra.mrb[48].mxu0 %vm997_vm0, %v8979_v49  ;;  %7282 = vmatprep.subr.bf16.mxu1 %v9101_v53 }
 0x1ed   : > { %7259 = vmatmul.mubr.msk.bf16.gmra.mrb[72].mxu1 %vm997_vm0, %v9037_v37 }
 0x1ee   : > { %7267 = vmatpush3.bf16.msra.mxu0 %v9075_v12 }
 0x1ef   : > { %7268 = vmatprep.subr.bf16.mxu0 %v9071_v7  ;;  %7283 = vmatpush3.bf16.msra.mxu1 %v9101_v53 }
 0x1f0   : > { %7284 = vmatprep.subr.bf16.mxu1 %v9097_v45 }
 0x1f2   : > { %7269 = vmatpush3.bf16.msra.mxu0 %v9071_v7 }
 0x1f3   : > { %7285 = vmatpush3.bf16.msra.mxu1 %v9097_v45  ;;  %7294 = vmatprep.subr.bf16.mxu0 %v9123_v18 }
 0x1f4   : > { %7310 = vmatprep.subr.bf16.mxu1 %v9157_v4 }
 0x277   : > { %v7208_v58 = vpop.f32.mrb[52].mxu1 }
 0x278   : > { %v9206_v61 = vadd.f32 %v7208_v58, %v9197_v38  ;;  %v1056_v63 = vpop.f32.mrb[53].mxu1  ;;  %v6820_v58 = vld [vmem:[#allocation7 + $0x10] sm:$0xff]  }
 0x279   : > { %v9209_v3 = vadd.f32 %v9199_v42, %v1056_v63  ;;  %v7209_v8 = vpop.f32.mrb[54].mxu1  ;;  %v9227_v26 = vunpack.c.l.bf16 %v6820_v58 }
 0x27a   : > { %v9212_v19 = vadd.f32 %v7209_v8, %v9201_v55  ;;  %v1059_v20 = vpop.f32.mrb[55].mxu1  ;;  %v1361_v21 = vsel %vm1354_vm1, %v9206_v61, -inf  ;;  %v9225_v8 = vunpack.c.h.bf16 %v6821_v16 }
 0x27b   : > { %v9217_v29 = vadd.f32 %v9203_v59, %v1059_v20  ;;  %1362 = vmax.xlane.f32.xlu1 %v1361_v21  ;;  %v1355_v33 = vsel %vm1354_vm1, %v9209_v3, -inf }
 0x27c   : > { %1356 = vmax.xlane.f32.xlu0 %v1355_v33  ;;  %v1364_v63 = vsel %vm1354_vm1, %v9212_v19, -inf  ;;  %v9234_v33 = vunpack.c.h.bf16 %v6820_v58 }
 0x27d   : > { %v1358_v20 = vsel %vm1354_vm1, %v9217_v29, -inf }
 0x27f   : > { %v7212_v13 = vpop.f32.mrb[56].mxu1  ;;  %1365 = vmax.xlane.f32.xlu1 %v1364_v63 }
 0x280   : > { %v9232_v21 = vadd.f32 %v7212_v13, %v9221_v34  ;;  %v1072_v39 = vpop.f32.mrb[57].mxu1  ;;  %1359 = vmax.xlane.f32.xlu0 %v1358_v20 }
 0x281   : > { %v7213_v0 = vpop.f32.mrb[58].mxu1  ;;  %v9242_v28 = vadd.f32 %v9227_v26, %v1072_v39 }
 0x282   : > { %v9237_v45 = vadd.f32 %v7213_v0, %v9225_v8  ;;  %v1075_v16 = vpop.f32.mrb[59].mxu1  ;;  %v1373_v63 = vsel %vm1354_vm1, %v9232_v21, -inf }
 0x283   : > { %v9245_v7 = vadd.f32 %v9234_v33, %v1075_v16  ;;  %v1367_v58 = vsel %vm1354_vm1, %v9242_v28, -inf }
 0x284   : > { %1374 = vmax.xlane.f32.xlu0 %v1373_v63  ;;  %v1376_v13 = vsel %vm1354_vm1, %v9237_v45, -inf }
 0x285   : > { %1377 = vmax.xlane.f32.xlu1 %v1376_v13  ;;  %v1370_v0 = vsel %vm1354_vm1, %v9245_v7, -inf }
 0x288   : > { %1368 = vmax.xlane.f32.xlu0 %v1367_v58 }
 0x289   : > { %1371 = vmax.xlane.f32.xlu1 %v1370_v0 }
 0x298   : > { %v7224_v20 = vpop.f32.mrb[60].mxu1 }
 0x299   : > { %v9254_v39 = vadd.f32 %v7224_v20, %v9197_v38  ;;  %v1145_v54 = vpop.f32.mrb[61].mxu1 }
 0x29a   : > { %v7225_v16 = vpop.f32.mrb[62].mxu1  ;;  %v9257_v63 = vadd.f32 %v9199_v42, %v1145_v54 }
 0x29b   : > { %v9260_v57 = vadd.f32 %v7225_v16, %v9201_v55  ;;  %v1148_v13 = vpop.f32.mrb[63].mxu1  ;;  %v1385_v58 = vsel %vm1354_vm1, %v9254_v39, -inf }
 0x29c   : > { %1386 = vmax.xlane.f32.xlu0 %v1385_v58  ;;  %v9265_v24 = vadd.f32 %v9203_v59, %v1148_v13  ;;  %v1379_v20 = vsel %vm1354_vm1, %v9257_v63, -inf }
 0x29d   : > { %v1388_v0 = vsel %vm1354_vm1, %v9260_v57, -inf }
 0x29e   : > { %1389 = vmax.xlane.f32.xlu1 %v1388_v0  ;;  %v1382_v62 = vsel %vm1354_vm1, %v9265_v24, -inf }
 0x2a0   : > { %v7228_v54 = vpop.f32.mrb[64].mxu1  ;;  %1380 = vmax.xlane.f32.xlu0 %v1379_v20 }
 0x2a1   : > { %v9272_v16 = vadd.f32 %v7228_v54, %v9221_v34  ;;  %v1161_v36 = vpop.f32.mrb[65].mxu1 }
 0x2a2   : > { %v7229_v58 = vpop.f32.mrb[66].mxu1  ;;  %1383 = vmax.xlane.f32.xlu1 %v1382_v62  ;;  %v9277_v13 = vadd.f32 %v9227_v26, %v1161_v36 }
 0x2a3   : > { %v9280_v23 = vadd.f32 %v7229_v58, %v9225_v8  ;;  %v1164_v0 = vpop.f32.mrb[67].mxu1  ;;  %v1397_v51 = vsel %vm1354_vm1, %v9272_v16, -inf }
 0x2a4   : > { %1398 = vmax.xlane.f32.xlu0 %v1397_v51  ;;  %v9285_v20 = vadd.f32 %v9234_v33, %v1164_v0  ;;  %v1391_v62 = vsel %vm1354_vm1, %v9277_v13, -inf }
 0x2a5   : > { %v1400_v54 = vsel %vm1354_vm1, %v9280_v23, -inf }
 0x2a6   : > { %1401 = vmax.xlane.f32.xlu1 %v1400_v54  ;;  %v1394_v36 = vsel %vm1354_vm1, %v9285_v20, -inf }
 0x2a8   : > { %1392 = vmax.xlane.f32.xlu0 %v1391_v62 }
 0x2aa   : > { %1395 = vmax.xlane.f32.xlu1 %v1394_v36 }
 0x2b7   : > { %v7240_v58 = vpop.f32.mrb[44].mxu0 }
 0x2b8   : > { %v9294_v27 = vadd.f32 %v7240_v58, %v9197_v38  ;;  %v1234_v51 = vpop.f32.mrb[45].mxu0  ;;  %v7256_v43 = vpop.f32.mrb[68].mxu1 }
 0x2b9   : > { %v7241_v0 = vpop.f32.mrb[46].mxu0  ;;  %v1323_v52 = vpop.f32.mrb[69].mxu1  ;;  %v9300_v9 = vadd.f32 %v7256_v43, %v9197_v38 }
 0x2ba   : > { %v9297_v53 = vadd.f32 %v7241_v0, %v9201_v55  ;;  %v1237_v54 = vpop.f32.mrb[47].mxu0  ;;  %v1409_v62 = vsel %vm1354_vm1, %v9294_v27, -inf  ;;  %v7257_v1 = vpop.f32.mrb[70].mxu1  ;;  %v9310_v0 = vadd.f32 %v9199_v42, %v1234_v51 }
 0x2bb   : > { %1410 = vmax.xlane.f32.xlu0 %v1409_v62  ;;  %v1326_v36 = vpop.f32.mrb[71].mxu1  ;;  %v9305_v58 = vadd.f32 %v7257_v1, %v9201_v55  ;;  %v1433_v43 = vsel %vm1354_vm1, %v9300_v9, -inf  ;;  %v9315_v35 = vadd.f32 %v9203_v59, %v1237_v54 }
 0x2bc   : > { %v1412_v31 = vsel %vm1354_vm1, %v9297_v53, -inf  ;;  %v1403_v51 = vsel %vm1354_vm1, %v9310_v0, -inf  ;;  %v9325_v54 = vadd.f32 %v9203_v59, %v1326_v36 }
 0x2bd   : > { %1413 = vmax.xlane.f32.xlu1 %v1412_v31  ;;  %v1436_v62 = vsel %vm1354_vm1, %v9305_v58, -inf  ;;  %v9320_v31 = vadd.f32 %v9199_v42, %v1323_v52  ;;  %v1406_v49 = vsel %vm1354_vm1, %v9315_v35, -inf }
 0x2bf   : > { %1434 = vmax.xlane.f32.xlu0 %v1433_v43  ;;  %v7244_v38 = vpop.f32.mrb[48].mxu0  ;;  %v1427_v52 = vsel %vm1354_vm1, %v9320_v31, -inf }
 0x2c0   : > { %v1250_v1 = vpop.f32.mrb[49].mxu0  ;;  %v7260_v55 = vpop.f32.mrb[72].mxu1 }
 0x2c1   : > { %1437 = vmax.xlane.f32.xlu1 %v1436_v62  ;;  %v7245_v12 = vpop.f32.mrb[50].mxu0  ;;  %v1339_v30 = vpop.f32.mrb[73].mxu1  ;;  %v9330_v62 = vadd.f32 %v7244_v38, %v9221_v34  ;;  %v9340_v59 = vadd.f32 %v7260_v55, %v9221_v34 }
 0x2c2   : > { %v1253_v37 = vpop.f32.mrb[51].mxu0  ;;  %v7261_v43 = vpop.f32.mrb[74].mxu1  ;;  %v9335_v42 = vadd.f32 %v7245_v12, %v9225_v8  ;;  %v9350_v12 = vadd.f32 %v9227_v26, %v1250_v1 }
 0x2c3   : > { %1404 = vmax.xlane.f32.xlu0 %v1403_v51  ;;  %v1342_v25 = vpop.f32.mrb[75].mxu1  ;;  %v1430_v51 = vsel %vm1354_vm1, %v9325_v54, -inf  ;;  %v9345_v36 = vadd.f32 %v7261_v43, %v9225_v8  ;;  %v9355_v34 = vadd.f32 %v9234_v33, %v1253_v37  ;;  %v9360_v8 = vadd.f32 %v9227_v26, %v1339_v30  ;;  %v9373_v26 = vpop.permute.xlu1 %2082 }
 0x2c4   : > { %v1424_v38 = vsel %vm1354_vm1, %v9335_v42, -inf  ;;  %v1415_v43 = vsel %vm1354_vm1, %v9350_v12, -inf  ;;  %v9365_v1 = vadd.f32 %v9234_v33, %v1342_v25  ;;  %12313 = vst [vmem:[#allocation59_spill] sm:$0xff] %v9373_v26 }
 0x2c5   : > { %1407 = vmax.xlane.f32.xlu1 %v1406_v49  ;;  %v1421_v49 = vsel %vm1354_vm1, %v9330_v62, -inf  ;;  %v1448_v55 = vsel %vm1354_vm1, %v9345_v36, -inf  ;;  %v1439_v37 = vsel %vm1354_vm1, %v9360_v8, -inf }
 0x2c7   : > { %1428 = vmax.xlane.f32.xlu0 %v1427_v52  ;;  %v1445_v52 = vsel %vm1354_vm1, %v9340_v59, -inf  ;;  %v9375_v30 = vpop.permute.xlu1 %2086 }
 0x2c8   : > { %12314 = vst [vmem:[#allocation60_spill] sm:$0xff] %v9375_v30 }
 0x2c9   : > { %1431 = vmax.xlane.f32.xlu1 %v1430_v51  ;;  %v1418_v51 = vsel %vm1354_vm1, %v9355_v34, -inf }
 0x2cb   : > { %1422 = vmax.xlane.f32.xlu0 %v1421_v49  ;;  %v1442_v49 = vsel %vm1354_vm1, %v9365_v1, -inf  ;;  %v9379_v25 = vpop.permute.xlu1 %2193 }
 0x2cc   : > { %12315 = vst [vmem:[#allocation61_spill] sm:$0xff] %v9379_v25 }
 0x2cd   : > { %1425 = vmax.xlane.f32.xlu1 %v1424_v38  ;;  %v9377_v38 = vpop.permute.xlu0 %2080 }
 0x2cf   : > { %1446 = vmax.xlane.f32.xlu0 %v1445_v52 }
 0x2d1   : > { %1449 = vmax.xlane.f32.xlu1 %v1448_v55  ;;  %v9381_v33 = vpop.permute.xlu0 %2084 }
 0x2d2   : > { %12316 = vst [vmem:[#allocation62_spill] sm:$0xff] %v9381_v33 }
 0x2d3   : > { %1416 = vmax.xlane.f32.xlu0 %v1415_v43 }
 0x2d5   : > { %1419 = vmax.xlane.f32.xlu1 %v1418_v51 }
 0x2d7   : > { %1440 = vmax.xlane.f32.xlu0 %v1439_v37 }
 0x2d9   : > { %1443 = vmax.xlane.f32.xlu1 %v1442_v49 }
 0x308   : > { %v1363_v52 = vpop.xlane.xlu1 %1362 }
 0x309   : > { %v1453_v55 = vsub.f32 %v9206_v61, %v1363_v52  ;;  %v1357_v43 = vpop.xlane.xlu0 %1356 }
 0x30a   : > { %v1451_v51 = vsub.f32 %v9209_v3, %v1357_v43 }
 0x30b   : > { %v1487_v37 = vmul.f32 1.442695, %v1453_v55 }
 0x30c   : > { %v1483_v32 = vmul.f32 1.442695, %v1451_v51  ;;  %v1366_v11 = vpop.xlane.xlu1 %1365 }
 0x30d   : > { %7980 = vpow2.f32 %v1487_v37  ;;  %v1454_v49 = vsub.f32 %v9212_v19, %v1366_v11  ;;  %v1360_v26 = vpop.xlane.xlu0 %1359 }
 0x30e   : > { %v1452_v30 = vsub.f32 %v9217_v29, %v1360_v26  ;;  %7982 = vpow2.f32 %v1483_v32 }
 0x30f   : > { %v1489_v2 = vmul.f32 1.442695, %v1454_v49 }
 0x310   : > { %v1485_v25 = vmul.f32 1.442695, %v1452_v30 }
 0x311   : > { %7984 = vpow2.f32 %v1489_v2  ;;  %v1375_v33 = vpop.xlane.xlu0 %1374 }
 0x312   : > { %v1457_v4 = vsub.f32 %v9232_v21, %v1375_v33  ;;  %v1378_v61 = vpop.xlane.xlu1 %1377  ;;  %7986 = vpow2.f32 %v1485_v25 }
 0x313   : > { %v1458_v3 = vsub.f32 %v9237_v45, %v1378_v61 }
 0x314   : > { %v1495_v52 = vmul.f32 1.442695, %v1457_v4 }
 0x315   : > { %v1497_v55 = vmul.f32 1.442695, %v1458_v3  ;;  %v1369_v43 = vpop.xlane.xlu0 %1368 }
 0x316   : > { %7988 = vpow2.f32 %v1495_v52  ;;  %v1455_v11 = vsub.f32 %v9242_v28, %v1369_v43  ;;  %v1372_v19 = vpop.xlane.xlu1 %1371 }
 0x317   : > { %v9390_v51 = vpop.eup %7980  ;;  %7990 = vpow2.f32 %v1497_v55  ;;  %v1456_v32 = vsub.f32 %v9245_v7, %v1372_v19 }
 0x318   : > { %v1491_v2 = vmul.f32 1.442695, %v1455_v11  ;;  %v1553_v29 = vsel %vm1354_vm1, %v9390_v51, 0.0  ;;  %v9395_v21 = vpop.eup %7982 }
 0x319   : > { %v1493_v26 = vmul.f32 1.442695, %v1456_v32  ;;  %1554 = vadd.xlane.f32.xlu0 %v1553_v29  ;;  %v1547_v4 = vsel %vm1354_vm1, %v9395_v21, 0.0 }
 0x31a   : > { %7992 = vpow2.f32 %v1491_v2 }
 0x31b   : > { %v9397_v45 = vpop.eup %7984  ;;  %7994 = vpow2.f32 %v1493_v26 }
 0x31c   : > { %v1556_v28 = vsel %vm1354_vm1, %v9397_v45, 0.0  ;;  %v9403_v30 = vpop.eup %7986 }
 0x31d   : > { %1557 = vadd.xlane.f32.xlu1 %v1556_v28  ;;  %1548 = vadd.xlane.f32.xlu0 %v1547_v4  ;;  %v1550_v25 = vsel %vm1354_vm1, %v9403_v30, 0.0 }
 0x320   : > { %v9405_v7 = vpop.eup %7988 }
 0x321   : > { %v9409_v33 = vpop.eup %7990  ;;  %1551 = vadd.xlane.f32.xlu1 %v1550_v25  ;;  %v1565_v37 = vsel %vm1354_vm1, %v9405_v7, 0.0 }
 0x322   : > { %1566 = vadd.xlane.f32.xlu0 %v1565_v37  ;;  %v1568_v61 = vsel %vm1354_vm1, %v9409_v33, 0.0 }
 0x324   : > { %v9413_v49 = vpop.eup %7992 }
 0x325   : > { %v9417_v3 = vpop.eup %7994  ;;  %1569 = vadd.xlane.f32.xlu1 %v1568_v61  ;;  %v1559_v52 = vsel %vm1354_vm1, %v9413_v49, 0.0 }
 0x326   : > { %1560 = vadd.xlane.f32.xlu0 %v1559_v52  ;;  %v1562_v55 = vsel %vm1354_vm1, %v9417_v3, 0.0 }
 0x329   : > { %v1387_v43 = vpop.xlane.xlu0 %1386  ;;  %1563 = vadd.xlane.f32.xlu1 %v1562_v55 }
 0x32a   : > { %v1461_v11 = vsub.f32 %v9254_v39, %v1387_v43 }
 0x32b   : > { %v1390_v19 = vpop.xlane.xlu1 %1389 }
 0x32c   : > { %v1503_v32 = vmul.f32 1.442695, %v1461_v11  ;;  %v1462_v2 = vsub.f32 %v9260_v57, %v1390_v19 }
 0x32d   : > { %v1381_v29 = vpop.xlane.xlu0 %1380 }
 0x32e   : > { %7996 = vpow2.f32 %v1503_v32  ;;  %v1505_v26 = vmul.f32 1.442695, %v1462_v2  ;;  %v1459_v28 = vsub.f32 %v9257_v63, %v1381_v29 }
 0x32f   : > { %v1384_v4 = vpop.xlane.xlu1 %1383 }
 0x330   : > { %7998 = vpow2.f32 %v1505_v26  ;;  %v1499_v25 = vmul.f32 1.442695, %v1459_v28  ;;  %v1460_v37 = vsub.f32 %v9265_v24, %v1384_v4 }
 0x331   : > { %v1399_v61 = vpop.xlane.xlu0 %1398 }
 0x332   : > { %8000 = vpow2.f32 %v1499_v25  ;;  %v1501_v52 = vmul.f32 1.442695, %v1460_v37  ;;  %v1465_v55 = vsub.f32 %v9272_v16, %v1399_v61 }
 0x333   : > { %v1402_v39 = vpop.xlane.xlu1 %1401 }
 0x334   : > { %8002 = vpow2.f32 %v1501_v52  ;;  %v1511_v43 = vmul.f32 1.442695, %v1465_v55  ;;  %v1466_v57 = vsub.f32 %v9280_v23, %v1402_v39 }
 0x335   : > { %v1393_v11 = vpop.xlane.xlu0 %1392 }
 0x336   : > { %8004 = vpow2.f32 %v1511_v43  ;;  %v1513_v19 = vmul.f32 1.442695, %v1466_v57  ;;  %v1463_v63 = vsub.f32 %v9277_v13, %v1393_v11 }
 0x337   : > { %v1396_v32 = vpop.xlane.xlu1 %1395 }
 0x338   : > { %v9430_v2 = vpop.eup %7996  ;;  %8006 = vpow2.f32 %v1513_v19  ;;  %v1507_v24 = vmul.f32 1.442695, %v1463_v63  ;;  %v1464_v29 = vsub.f32 %v9285_v20, %v1396_v32 }
 0x339   : > { %v1577_v16 = vsel %vm1354_vm1, %v9430_v2, 0.0 }
 0x33a   : > { %v9435_v26 = vpop.eup %7998  ;;  %8008 = vpow2.f32 %v1507_v24  ;;  %v1509_v28 = vmul.f32 1.442695, %v1464_v29  ;;  %1578 = vadd.xlane.f32.xlu0 %v1577_v16 }
 0x33b   : > { %v1580_v23 = vsel %vm1354_vm1, %v9435_v26, 0.0 }
 0x33c   : > { %v9439_v4 = vpop.eup %8000  ;;  %8010 = vpow2.f32 %v1509_v28  ;;  %1581 = vadd.xlane.f32.xlu1 %v1580_v23 }
 0x33d   : > { %v1571_v13 = vsel %vm1354_vm1, %v9439_v4, 0.0 }
 0x33e   : > { %v9443_v25 = vpop.eup %8002  ;;  %1572 = vadd.xlane.f32.xlu0 %v1571_v13 }
 0x33f   : > { %v1574_v20 = vsel %vm1354_vm1, %v9443_v25, 0.0 }
 0x340   : > { %v9447_v37 = vpop.eup %8004  ;;  %1575 = vadd.xlane.f32.xlu1 %v1574_v20 }
 0x341   : > { %v1589_v61 = vsel %vm1354_vm1, %v9447_v37, 0.0 }
 0x342   : > { %v9451_v52 = vpop.eup %8006  ;;  %1590 = vadd.xlane.f32.xlu0 %v1589_v61 }
 0x343   : > { %v1592_v55 = vsel %vm1354_vm1, %v9451_v52, 0.0 }
 0x344   : > { %v9455_v39 = vpop.eup %8008  ;;  %1593 = vadd.xlane.f32.xlu1 %v1592_v55 }
 0x345   : > { %v1583_v43 = vsel %vm1354_vm1, %v9455_v39, 0.0 }
 0x346   : > { %v9459_v57 = vpop.eup %8010  ;;  %1584 = vadd.xlane.f32.xlu0 %v1583_v43 }
 0x347   : > { %v1586_v11 = vsel %vm1354_vm1, %v9459_v57, 0.0 }
 0x348   : > { %1587 = vadd.xlane.f32.xlu1 %v1586_v11  ;;  %v1411_v19 = vpop.xlane.xlu0 %1410 }
 0x349   : > { %v1469_v63 = vsub.f32 %v9294_v27, %v1411_v19 }
 0x34a   : > { %v1414_v32 = vpop.xlane.xlu1 %1413 }
 0x34b   : > { %v1519_v24 = vmul.f32 1.442695, %v1469_v63  ;;  %v1470_v29 = vsub.f32 %v9297_v53, %v1414_v32 }
 0x34c   : > { %v1435_v16 = vpop.xlane.xlu0 %1434 }
 0x34d   : > { %8012 = vpow2.f32 %v1519_v24  ;;  %v1521_v28 = vmul.f32 1.442695, %v1470_v29  ;;  %v1477_v23 = vsub.f32 %v9300_v9, %v1435_v16 }
 0x34e   : > { %v1438_v13 = vpop.xlane.xlu1 %1437 }
 0x34f   : > { %8014 = vpow2.f32 %v1521_v28  ;;  %v1535_v20 = vmul.f32 1.442695, %v1477_v23  ;;  %v1478_v61 = vsub.f32 %v9305_v58, %v1438_v13 }
 0x350   : > { %v1405_v55 = vpop.xlane.xlu0 %1404 }
 0x351   : > { %8016 = vpow2.f32 %v1535_v20  ;;  %v1537_v43 = vmul.f32 1.442695, %v1478_v61  ;;  %v1467_v11 = vsub.f32 %v9310_v0, %v1405_v55 }
 0x352   : > { %v1408_v27 = vpop.xlane.xlu1 %1407 }
 0x353   : > { %8018 = vpow2.f32 %v1537_v43  ;;  %v1515_v19 = vmul.f32 1.442695, %v1467_v11  ;;  %v1468_v53 = vsub.f32 %v9315_v35, %v1408_v27 }
 0x354   : > { %v1429_v63 = vpop.xlane.xlu0 %1428 }
 0x355   : > { %8020 = vpow2.f32 %v1515_v19  ;;  %v1517_v32 = vmul.f32 1.442695, %v1468_v53  ;;  %v1475_v9 = vsub.f32 %v9320_v31, %v1429_v63 }
 0x356   : > { %v1432_v53 = vpop.xlane.xlu1 %1431 }
 0x357   : > { %v9470_v24 = vpop.eup %8012  ;;  %8022 = vpow2.f32 %v1517_v32  ;;  %v1531_v29 = vmul.f32 1.442695, %v1475_v9  ;;  %v1476_v32 = vsub.f32 %v9325_v54, %v1432_v53 }
 0x358   : > { %v1601_v58 = vsel %vm1354_vm1, %v9470_v24, 0.0  ;;  %v1423_v27 = vpop.xlane.xlu0 %1422 }
 0x359   : > { %v9474_v16 = vpop.eup %8014  ;;  %8024 = vpow2.f32 %v1531_v29  ;;  %1602 = vadd.xlane.f32.xlu0 %v1601_v58  ;;  %v1473_v58 = vsub.f32 %v9330_v62, %v1423_v27 }
 0x35a   : > { %v1604_v0 = vsel %vm1354_vm1, %v9474_v16, 0.0  ;;  %v1426_v9 = vpop.xlane.xlu1 %1425 }
 0x35b   : > { %v9478_v35 = vpop.eup %8016  ;;  %1605 = vadd.xlane.f32.xlu1 %v1604_v0  ;;  %v1533_v0 = vmul.f32 1.442695, %v1476_v32 }
 0x35c   : > { %12317 = vst [vmem:[#allocation63_spill] sm:$0xff] %v9478_v35  ;;  %v1625_v31 = vsel %vm1354_vm1, %v9478_v35, 0.0  ;;  %v1447_v19 = vpop.xlane.xlu0 %1446 }
 0x35d   : > { %v9482_v28 = vpop.eup %8018  ;;  %1626 = vadd.xlane.f32.xlu0 %v1625_v31  ;;  %8026 = vpow2.f32 %v1533_v0 }
 0x35e   : > { %v1628_v23 = vsel %vm1354_vm1, %v9482_v28, 0.0 }
 0x35f   : > { %v9486_v13 = vpop.eup %8020  ;;  %1629 = vadd.xlane.f32.xlu1 %v1628_v23  ;;  %v1527_v23 = vmul.f32 1.442695, %v1473_v58 }
 0x360   : > { %v1595_v20 = vsel %vm1354_vm1, %v9486_v13, 0.0  ;;  %v1417_v63 = vpop.xlane.xlu0 %1416 }
 0x361   : > { %v9490_v61 = vpop.eup %8022  ;;  %1596 = vadd.xlane.f32.xlu0 %v1595_v20  ;;  %v1481_v20 = vsub.f32 %v9340_v59, %v1447_v19  ;;  %8028 = vpow2.f32 %v1527_v23  ;;  %v1471_v35 = vsub.f32 %v9350_v12, %v1417_v63 }
 0x362   : > { %v1598_v55 = vsel %vm1354_vm1, %v9490_v61, 0.0 }
 0x363   : > { %v9494_v43 = vpop.eup %8024  ;;  %1599 = vadd.xlane.f32.xlu1 %v1598_v55  ;;  %v1450_v55 = vpop.xlane.xlu1 %1449  ;;  %v1523_v27 = vmul.f32 1.442695, %v1471_v35 }
 0x364   : > { %v1619_v11 = vsel %vm1354_vm1, %v9494_v43, 0.0  ;;  %v1441_v29 = vpop.xlane.xlu0 %1440  ;;  %v1482_v53 = vsub.f32 %v9345_v36, %v1450_v55 }
 0x365   : > { %1620 = vadd.xlane.f32.xlu0 %v1619_v11  ;;  %v1479_v31 = vsub.f32 %v9360_v8, %v1441_v29  ;;  %v1474_v11 = vsub.f32 %v9335_v42, %v1426_v9 }
 0x366   : > { %v1545_v8 = vmul.f32 1.442695, %v1482_v53 }
 0x367   : > { %v1529_v54 = vmul.f32 1.442695, %v1474_v11  ;;  %v1420_v62 = vpop.xlane.xlu1 %1419  ;;  %v9510_v19 = vpop.eup %8026 }
 0x368   : > { %v1472_v59 = vsub.f32 %v9355_v34, %v1420_v62  ;;  %v1622_v12 = vsel %vm1354_vm1, %v9510_v19, 0.0 }
 0x36a   : > { %v1525_v32 = vmul.f32 1.442695, %v1472_v59 }
 0x36b   : > { %v9512_v42 = vpop.eup %8028 }
 0x374   : > { %2195 = vrot.lane.b32.xlu1 %v9057_v56, %s8691_s24  ;;  %v1539_v56 = vmul.f32 1.442695, %v1479_v31 }
 0x376   : > { %8030 = vpow2.f32 %v1539_v56 }
 0x37b   : > { %2068 = vrot.lane.b32.xlu0 %v8977_v47, %s8691_s24  ;;  %v1543_v47 = vmul.f32 1.442695, %v1481_v20  ;;  %v1444_v20 = vpop.xlane.xlu1 %1443 }
 0x37d   : > { %8032 = vpow2.f32 %v1543_v47  ;;  %v1613_v47 = vsel %vm1354_vm1, %v9512_v42, 0.0 }
 0x37e   : > { %8034 = vpow2.f32 %v1529_v54 }
 0x37f   : > { %8036 = vpow2.f32 %v1523_v27 }
 0x380   : > { %8038 = vpow2.f32 %v1545_v8  ;;  %v9516_v63 = vpop.eup %8030 }
 0x381   : > { %8040 = vpow2.f32 %v1525_v32  ;;  %v1631_v36 = vsel %vm1354_vm1, %v9516_v63, 0.0 }
 0x387   : > { %v9520_v56 = vpop.eup %8032 }
 0x388   : > { %v9524_v34 = vpop.eup %8034  ;;  %v1637_v35 = vsel %vm1354_vm1, %v9520_v56, 0.0 }
 0x389   : > { %v9528_v9 = vpop.eup %8036  ;;  %v1616_v29 = vsel %vm1354_vm1, %v9524_v34, 0.0 }
 0x38a   : > { %v9532_v58 = vpop.eup %8038  ;;  %v1607_v0 = vsel %vm1354_vm1, %v9528_v9, 0.0 }
 0x38b   : > { %v1640_v31 = vsel %vm1354_vm1, %v9532_v58, 0.0  ;;  %v9538_v23 = vpop.eup %8040 }
 0x38c   : > { %v1610_v11 = vsel %vm1354_vm1, %v9538_v23, 0.0 }
 0x398   : > { %1623 = vadd.xlane.f32.xlu1 %v1622_v12 }
 0x39a   : > { %1614 = vadd.xlane.f32.xlu0 %v1613_v47 }
 0x39c   : > { %1632 = vadd.xlane.f32.xlu1 %v1631_v36 }
 0x39e   : > { %1638 = vadd.xlane.f32.xlu0 %v1637_v35 }
 0x3a0   : > { %1617 = vadd.xlane.f32.xlu1 %v1616_v29 }
 0x3a2   : > { %1608 = vadd.xlane.f32.xlu0 %v1607_v0 }
 0x3a4   : > { %1641 = vadd.xlane.f32.xlu1 %v1640_v31 }
 0x3a6   : > { %v1555_v55 = vpop.xlane.xlu0 %1554 }
 0x3a8   : > { %1611 = vadd.xlane.f32.xlu1 %v1610_v11 }
 0x3aa   : > { %v1558_v54 = vpop.xlane.xlu1 %1557  ;;  %v1549_v53 = vpop.xlane.xlu0 %1548 }
 0x3ab   : > { %8042 = vrcp.f32 %v1558_v54 }
 0x3ac   : > { %8044 = vrcp.f32 %v1549_v53 }
 0x3ad   : > { %8046 = vrcp.f32 %v1555_v55 }
 0x3ae   : > { %v1552_v62 = vpop.xlane.xlu1 %1551 }
 0x3af   : > { %8048 = vrcp.f32 %v1552_v62  ;;  %v1567_v27 = vpop.xlane.xlu0 %1566 }
 0x3b2   : > { %v1570_v8 = vpop.xlane.xlu1 %1569 }
 0x3b3   : > { %v1561_v59 = vpop.xlane.xlu0 %1560  ;;  %8050 = vrcp.f32 %v1570_v8 }
 0x3b4   : > { %8052 = vrcp.f32 %v1561_v59 }
 0x3b5   : > { %v8043_v32 = vpop.eup %8042  ;;  %8054 = vrcp.f32 %v1567_v27 }
 0x3b6   : > { %v1564_v12 = vpop.xlane.xlu1 %1563  ;;  %v8045_v47 = vpop.eup %8044  ;;  %v1678_v29 = vmul.f32 %v8043_v32, %v9397_v45 }
 0x3b7   : > { %8056 = vrcp.f32 %v1564_v12  ;;  %v8047_v36 = vpop.eup %8046  ;;  %v1675_v0 = vmul.f32 %v8045_v47, %v9395_v21  ;;  %v1480_v21 = vsub.f32 %v9365_v1, %v1444_v20 }
 0x3b8   : > { %2306 = vrot.lane.b32.xlu0 %v9099_v48, %s8691_s24  ;;  %v1677_v55 = vmul.f32 %v8047_v36, %v9390_v51 }
 0x3b9   : > { %v8049_v35 = vpop.eup %8048  ;;  %2197 = vrot.lane.b32.xlu1 %v9073_v10, %s8691_s24  ;;  %v1541_v12 = vmul.f32 1.442695, %v1480_v21 }
 0x3ba   : > { %v1676_v31 = vmul.f32 %v8049_v35, %v9403_v30  ;;  %v1708_v54 = vpack.c.bf16 %v1678_v29, %v1677_v55 }
 0x3bb   : > { %8058 = vpow2.f32 %v1541_v12 }
 0x3bc   : > { %v1707_v11 = vpack.c.bf16 %v1676_v31, %v1675_v0 }
 0x3bd   : > { %2070 = vrot.lane.b32.xlu1 %v8993_v60, %s8691_s24  ;;  %v8051_v53 = vpop.eup %8050 }
 0x3be   : > { %7270 = vmatprep.mubr.msk.bf16.mxu0 %vm1354_vm1, %v1707_v11  ;;  %v8053_v62 = vpop.eup %8052  ;;  %v1682_v51 = vmul.f32 %v8051_v53, %v9409_v33 }
 0x3bf   : > { %7271 = vmatmul.mubr.msk.bf16.vlgmr.msra.gmra.mrb[52].mxu0 %vm1354_vm1, %v1708_v54  ;;  %v8055_v45 = vpop.eup %8054  ;;  %v1679_v30 = vmul.f32 %v8053_v62, %v9413_v49 }
 0x3c0   : > { %7295 = vmatpush3.bf16.msra.mxu0 %v9123_v18  ;;  %v1681_v59 = vmul.f32 %v8055_v45, %v9405_v7 }
 0x3c1   : > { %v8057_v27 = vpop.eup %8056  ;;  %7296 = vmatprep.subr.bf16.mxu0 %v9119_v15  ;;  %2308 = vrot.lane.b32.xlu1 %v9121_v17, %s8691_s24 }
 0x3c2   : > { %v1680_v8 = vmul.f32 %v8057_v27, %v9417_v3  ;;  %v1710_v1 = vpack.c.bf16 %v1682_v51, %v1681_v59  ;;  %v12318_v59 = vld [vmem:[#allocation56_spill] sm:$0xff] }
 0x3c4   : > { %7297 = vmatpush3.bf16.msra.mxu0 %v9119_v15  ;;  %v1709_v32 = vpack.c.bf16 %v1680_v8, %v1679_v30 }
 0x3c5   : > { %7298 = vmatprep.subr.bf16.mxu0 %v9143_v46  ;;  %2310 = vrot.lane.b32.xlu1 %v9141_v44, %s8691_s24  ;;  %v9580_v36 = vpop.eup %8058 }
 0x3c6   : > { %7274 = vmatprep.mubr.msk.bf16.mxu0 %vm1354_vm1, %v1709_v32  ;;  %v1634_v55 = vsel %vm1354_vm1, %v9580_v36, 0.0 }
 0x3c7   : > { %v1579_v20 = vpop.xlane.xlu0 %1578  ;;  %7275 = vmatmul.mubr.msk.bf16.gmra.mrb[56].mxu0 %vm1354_vm1, %v1710_v1 }
 0x3c8   : > { %7299 = vmatpush3.bf16.msra.mxu0 %v9143_v46 }
 0x3c9   : > { %v1582_v33 = vpop.xlane.xlu1 %1581  ;;  %7300 = vmatprep.subr.bf16.mxu0 %v9139_v41  ;;  %2183 = vrot.lane.b32.xlu1 %v9053_v50, %s8691_s24 }
 0x3ca   : > { %8060 = vrcp.f32 %v1582_v33 }
 0x3cb   : > { %v1573_v7 = vpop.xlane.xlu0 %1572 }
 0x3cc   : > { %8062 = vrcp.f32 %v1573_v7  ;;  %7301 = vmatpush3.bf16.msra.mxu0 %v9139_v41  ;;  %v12321_v7 = vld [vmem:[#allocation58_spill] sm:$0xff] }
 0x3cd   : > { %8064 = vrcp.f32 %v1579_v20  ;;  %v1576_v49 = vpop.xlane.xlu1 %1575  ;;  %7790 = vmatprep.subr.msk.bf16.mxu0 %vm997_vm0, %v9377_v38  ;;  %2074 = vrot.lane.b32.xlu1 %v9021_v22, %s8691_s24 }
 0x3ce   : > { %8066 = vrcp.f32 %v1576_v49 }
 0x3cf   : > { %v1591_v3 = vpop.xlane.xlu0 %1590 }
 0x3d1   : > { %v1594_v47 = vpop.xlane.xlu1 %1593  ;;  %2421 = vrot.lane.b32.xlu1 %v9013_v14, %s8691_s24 }
 0x3d2   : > { %8068 = vrcp.f32 %v1594_v47 }
 0x3d3   : > { %v1585_v35 = vpop.xlane.xlu0 %1584 }
 0x3d4   : > { %8070 = vrcp.f32 %v1585_v35  ;;  %v8061_v29 = vpop.eup %8060  ;;  %v12325_v35 = vld [vmem:[#allocation61_spill] sm:$0xff] }
 0x3d5   : > { %8072 = vrcp.f32 %v1591_v3  ;;  %v1588_v0 = vpop.xlane.xlu1 %1587  ;;  %2296 = vrot.lane.b32.xlu1 %v9117_v6, %s8691_s24  ;;  %v1686_v53 = vmul.f32 %v8061_v29, %v9435_v26  ;;  %v12322_v3 = vld [vmem:[#allocation16_spill] sm:$0xff] }
 0x3d6   : > { %v8063_v31 = vpop.eup %8062  ;;  %8074 = vrcp.f32 %v1588_v0  ;;  %v12326_v0 = vld [vmem:[#allocation43_spill] sm:$0xff] }
 0x3d7   : > { %v8065_v11 = vpop.eup %8064  ;;  %1635 = vadd.xlane.f32.xlu0 %v1634_v55  ;;  %v1683_v62 = vmul.f32 %v8063_v31, %v9439_v4  ;;  %v12319_v4 = vld [vmem:[#allocation55_spill] sm:$0xff]  ;;  %v12327_v31 = vld [vmem:[#allocation40_spill] sm:$0xff] }
 0x3d8   : > { %v8067_v54 = vpop.eup %8066  ;;  %v1685_v27 = vmul.f32 %v8065_v11, %v9430_v2  ;;  %v12320_v2 = vld [vmem:[#allocation23_spill] sm:$0xff] }
 0x3d9   : > { %2185 = vrot.lane.b32.xlu1 %v9069_v5, %s8691_s24  ;;  %v1684_v45 = vmul.f32 %v8067_v54, %v9443_v25  ;;  %v12328_v54 = vld [vmem:[#allocation30_spill] sm:$0xff] }
 0x3da   : > { %v1712_v51 = vpack.c.bf16 %v1686_v53, %v1685_v27  ;;  %v12329_v53 = vld [vmem:[#allocation44_spill] sm:$0xff] }
 0x3db   : > { %v1711_v21 = vpack.c.bf16 %v1684_v45, %v1683_v62  ;;  %v12330_v62 = vld [vmem:[#allocation21_spill] sm:$0xff] }
 0x3dc   : > { %v8069_v30 = vpop.eup %8068 }
 0x3dd   : > { %7286 = vmatprep.mubr.msk.bf16.mxu1 %vm1354_vm1, %v1711_v21  ;;  %2425 = vrot.lane.b32.xlu1 %v9041_v40, %s8691_s24  ;;  %v1690_v25 = vmul.f32 %v8069_v30, %v9451_v52  ;;  %v12331_v21 = vld [vmem:[#allocation22_spill] sm:$0xff] }
 0x3de   : > { %v8071_v8 = vpop.eup %8070  ;;  %7287 = vmatmul.mubr.msk.bf16.vlgmr.msra.gmra.mrb[76].mxu1 %vm1354_vm1, %v1712_v51  ;;  %v12332_v51 = vld [vmem:[#allocation47_spill] sm:$0xff] }
 0x3df   : > { %v8073_v26 = vpop.eup %8072  ;;  %7311 = vmatpush3.bf16.msra.mxu1 %v12318_v59  ;;  %v1687_v12 = vmul.f32 %v8071_v8, %v9455_v39  ;;  %v12323_v39 = vld [vmem:[#allocation57_spill] sm:$0xff] }
 0x3e0   : > { %v8075_v32 = vpop.eup %8074  ;;  %7312 = vmatprep.subr.bf16.mxu1 %v12319_v4  ;;  %v1689_v20 = vmul.f32 %v8073_v26, %v9447_v37  ;;  %v12324_v37 = vld [vmem:[#allocation31_spill] sm:$0xff] }
 0x3e1   : > { %2409 = vrot.lane.b32.xlu1 %v12320_v2, %s8691_s24  ;;  %v1688_v1 = vmul.f32 %v8075_v32, %v9459_v57 }
 0x3e2   : > { %v1714_v49 = vpack.c.bf16 %v1690_v25, %v1689_v20 }
 0x3e3   : > { %7313 = vmatpush3.bf16.msra.mxu1 %v12319_v4  ;;  %v1713_v33 = vpack.c.bf16 %v1688_v1, %v1687_v12  ;;  %v12333_v12 = vld [vmem:[#allocation18_spill] sm:$0xff] }
 0x3e4   : > { %7314 = vmatprep.subr.bf16.mxu1 %v12321_v7 }
 0x3e5   : > { %7290 = vmatprep.mubr.msk.bf16.mxu1 %vm1354_vm1, %v1713_v33  ;;  %2300 = vrot.lane.b32.xlu1 %v12322_v3, %s8691_s24 }
 0x3e6   : > { %7291 = vmatmul.mubr.msk.bf16.gmra.mrb[80].mxu1 %vm1354_vm1, %v1714_v49  ;;  %v1603_v52 = vpop.xlane.xlu0 %1602  ;;  %v12334_v49 = vld [vmem:[#allocation45_spill] sm:$0xff] }
 0x3e7   : > { %7315 = vmatpush3.bf16.msra.mxu1 %v12321_v7 }
 0x3e8   : > { %7316 = vmatprep.subr.bf16.mxu1 %v12323_v39  ;;  %v1606_v57 = vpop.xlane.xlu1 %1605 }
 0x3e9   : > { %2413 = vrot.lane.b32.xlu1 %v12324_v37, %s8691_s24  ;;  %8076 = vrcp.f32 %v1606_v57 }
 0x3ea   : > { %v1627_v47 = vpop.xlane.xlu0 %1626 }
 0x3eb   : > { %7317 = vmatpush3.bf16.msra.mxu1 %v12323_v39 }
 0x3ec   : > { %7794 = vmatprep.subr.msk.bf16.mxu1 %vm997_vm0, %v12325_v35  ;;  %v1630_v29 = vpop.xlane.xlu1 %1629 }
 0x3ed   : > { %2199 = vrot.lane.b32.xlu0 %v12326_v0, %s8691_s24  ;;  %2892 = vrot.lane.b32.xlu1 %v12327_v31, %s8691_s24  ;;  %v12349_v31 = vld [vmem:[#allocation63_spill] sm:$0xff] }
 0x3ee   : > { %v1597_v55 = vpop.xlane.xlu0 %1596 }
 0x3ef   : > { %8078 = vrcp.f32 %v1597_v55  ;;  %v12339_v55 = vld [vmem:[#allocation62_spill] sm:$0xff] }
 0x3f0   : > { %8080 = vrcp.f32 %v1603_v52  ;;  %v1600_v11 = vpop.xlane.xlu1 %1599  ;;  %v12338_v52 = vld [vmem:[#allocation41_spill] sm:$0xff] }
 0x3f1   : > { %8082 = vrcp.f32 %v1600_v11  ;;  %2181 = vrot.lane.b32.xlu0 %v12328_v54, %s8691_s24  ;;  %2981 = vrot.lane.b32.xlu1 %v12329_v53, %s8691_s24  ;;  %v12341_v11 = vld [vmem:[#allocation51_spill] sm:$0xff] }
 0x3f2   : > { %8084 = vrcp.f32 %v1630_v29 }
 0x3f3   : > { %v8077_v45 = vpop.eup %8076 }
 0x3f4   : > { %v1694_v26 = vmul.f32 %v8077_v45, %v9474_v16  ;;  %v2101_v16 = vsel %vm997_vm0, %v9377_v38, 0  ;;  %v12340_v38 = vld [vmem:[#allocation19_spill] sm:$0xff]  ;;  %v2107_v45 = vsel %vm997_vm0, %v12339_v55, 0 }
 0x3f5   : > { %2419 = vrot.lane.b32.xlu0 %v12330_v62, %s8691_s24  ;;  %3074 = vrot.lane.b32.xlu1 %v9123_v18, %s8691_s24 }
 0x3f9   : > { %v8079_v27 = vpop.eup %8078  ;;  %2072 = vrot.lane.b32.xlu0 %v12331_v21, %s8691_s24  ;;  %2985 = vrot.lane.b32.xlu1 %v12332_v51, %s8691_s24 }
 0x3fa   : > { %v8081_v30 = vpop.eup %8080  ;;  %v1691_v32 = vmul.f32 %v8079_v27, %v9486_v13  ;;  %v12335_v13 = vld [vmem:[#allocation59_spill] sm:$0xff]  ;;  %v12342_v27 = vld [vmem:[#allocation60_spill] sm:$0xff] }
 0x3fb   : > { %v8083_v8 = vpop.eup %8082  ;;  %v1693_v1 = vmul.f32 %v8081_v30, %v9470_v24  ;;  %v12336_v24 = vld [vmem:[#allocation29_spill] sm:$0xff]  ;;  %v2104_v57 = vsel %vm997_vm0, %v12335_v13, 0  ;;  %v12343_v30 = vld [vmem:[#allocation27_spill] sm:$0xff] }
 0x3fc   : > { %v1692_v25 = vmul.f32 %v8083_v8, %v9490_v61  ;;  %v12337_v61 = vld [vmem:[#allocation17_spill] sm:$0xff] }
 0x3fd   : > { %2312 = vrot.lane.b32.xlu0 %v12333_v12, %s8691_s24  ;;  %3078 = vrot.lane.b32.xlu1 %v9143_v46, %s8691_s24  ;;  %v1716_v33 = vpack.c.bf16 %v1694_v26, %v1693_v1  ;;  %v12344_v8 = vld [vmem:[#allocation37_spill] sm:$0xff]  ;;  %v2110_v26 = vsel %vm997_vm0, %v12342_v27, 0  ;;  %v2196_v1 = vpop.permute.xlu1 %2195 }
 0x3fe   : > { %v1715_v20 = vpack.c.bf16 %v1692_v25, %v1691_v32  ;;  %v1621_v32 = vpop.xlane.xlu0 %1620  ;;  %v12345_v25 = vld [vmem:[#allocation35_spill] sm:$0xff] }
 0x3ff   : > { %8086 = vrcp.f32 %v1621_v32 }
 0x400   : > { %7302 = vmatprep.mubr.msk.bf16.mxu0 %vm1354_vm1, %v1715_v20  ;;  %v12346_v20 = vld [vmem:[#allocation39_spill] sm:$0xff]  ;;  %8088 = vrcp.f32 %v1627_v47 }
 0x401   : > { %2294 = vrot.lane.b32.xlu0 %v12334_v49, %s8691_s24  ;;  %3167 = vrot.lane.b32.xlu1 %v12318_v59, %s8691_s24 }
 0x402   : > { %7303 = vmatmul.mubr.msk.bf16.vlgmr.msra.gmra.mrb[60].mxu0 %vm1354_vm1, %v1716_v33  ;;  %v2069_v33 = vpop.permute.xlu0 %2068 }
 0x403   : > { %7327 = vmatpush3.bf16.xpose.msra.mxu0 %v2101_v16 }
 0x404   : > { %7791 = vmatprep.subr.msk.bf16.mxu0 %vm997_vm0, %v12335_v13  ;;  %v12347_v13 = vld [vmem:[#allocation42_spill] sm:$0xff] }
 0x405   : > { %2423 = vrot.lane.b32.xlu0 %v12336_v24, %s8691_s24  ;;  %3297 = vrot.lane.b32.xlu1 %v12337_v61, %s8692_s26 }
 0x409   : > { %2187 = vrot.lane.b32.xlu0 %v12338_v52, %s8691_s24 }
 0x40b   : > { %7329 = vmatpush3.bf16.xpose.msra.mxu0 %v2104_v57 }
 0x40c   : > { %7792 = vmatprep.subr.msk.bf16.mxu0 %vm997_vm0, %v12339_v55 }
 0x40d   : > { %2407 = vrot.lane.b32.xlu0 %v12340_v38, %s8691_s24 }
 0x411   : > { %2298 = vrot.lane.b32.xlu0 %v12341_v11, %s8691_s24 }
 0x413   : > { %7331 = vmatpush3.bf16.xpose.msra.mxu0 %v2107_v45 }
 0x414   : > { %7793 = vmatprep.subr.msk.bf16.mxu0 %vm997_vm0, %v12342_v27  ;;  %v8085_v27 = vpop.eup %8084 }
 0x415   : > { %2411 = vrot.lane.b32.xlu0 %v12343_v30, %s8691_s24  ;;  %v8087_v32 = vpop.eup %8086  ;;  %v1702_v51 = vmul.f32 %v8085_v27, %v9482_v28 }
 0x416   : > { %v8089_v47 = vpop.eup %8088  ;;  %v1699_v18 = vmul.f32 %v8087_v32, %v9494_v43 }
 0x417   : > { %v1701_v37 = vmul.f32 %v8089_v47, %v12349_v31 }
 0x419   : > { %2888 = vrot.lane.b32.xlu0 %v12344_v8, %s8691_s24  ;;  %v1720_v40 = vpack.c.bf16 %v1702_v51, %v1701_v37 }
 0x41b   : > { %7333 = vmatpush3.bf16.xpose.msra.mxu0 %v2110_v26  ;;  %v12348_v26 = vld [vmem:[#allocation46_spill] sm:$0xff] }
 0x41d   : > { %2890 = vrot.lane.b32.xlu0 %v12345_v25, %s8691_s24 }
 0x421   : > { %2894 = vrot.lane.b32.xlu0 %v12346_v20, %s8691_s24 }
 0x425   : > { %v1624_v16 = vpop.xlane.xlu1 %1623  ;;  %2983 = vrot.lane.b32.xlu0 %v12347_v13, %s8691_s24 }
 0x426   : > { %8090 = vrcp.f32 %v1624_v16 }
 0x427   : > { %v1615_v57 = vpop.xlane.xlu0 %1614 }
 0x429   : > { %3076 = vrot.lane.b32.xlu0 %v9119_v15, %s8691_s24  ;;  %v9683_v55 = vpop.xlane.xlu1 %1632 }
 0x42b   : > { %v9685_v45 = vpop.xlane.xlu0 %1638 }
 0x42d   : > { %2987 = vrot.lane.b32.xlu0 %v12348_v26, %s8691_s24  ;;  %v1618_v29 = vpop.xlane.xlu1 %1617 }
 0x42e   : > { %8092 = vrcp.f32 %v1618_v29 }
 0x42f   : > { %v1609_v59 = vpop.xlane.xlu0 %1608 }
 0x430   : > { %v8091_v46 = vpop.eup %8090  ;;  %8094 = vrcp.f32 %v1609_v59  ;;  %v2217_v59 = vsel %vm997_vm0, %v2196_v1, 0 }
 0x431   : > { %3080 = vrot.lane.b32.xlu0 %v9139_v41, %s8691_s24  ;;  %v1642_v16 = vpop.xlane.xlu1 %1641  ;;  %v1700_v53 = vmul.f32 %v8091_v46, %v9510_v19  ;;  %8096 = vrcp.f32 %v1615_v57  ;;  %v2214_v46 = vsel %vm997_vm0, %v12325_v35, 0 }
 0x433   : > { %v2307_v3 = vpop.permute.xlu0 %2306  ;;  %v1719_v2 = vpack.c.bf16 %v1700_v53, %v1699_v18 }
 0x434   : > { %7798 = vmatprep.subr.msk.bf16.mxu0 %vm997_vm0, %v2307_v3 }
 0x435   : > { %3169 = vrot.lane.b32.xlu0 %v12319_v4, %s8691_s24  ;;  %v1612_v28 = vpop.xlane.xlu1 %1611  ;;  %7318 = vmatprep.mubr.msk.bf16.mxu1 %vm1354_vm1, %v1719_v2 }
 0x436   : > { %8098 = vrcp.f32 %v1612_v28  ;;  %7319 = vmatmul.mubr.msk.bf16.vlgmr.msra.gmra.mrb[84].mxu1 %vm1354_vm1, %v1720_v40 }
 0x437   : > { %7343 = vmatpush3.bf16.xpose.msra.mxu1 %v2214_v46  ;;  %8100 = vrcp.f32 %v1642_v16 }
 0x438   : > { %7795 = vmatprep.subr.msk.bf16.mxu1 %vm997_vm0, %v2196_v1  ;;  %v8093_v18 = vpop.eup %8092  ;;  %8102 = vrcp.f32 %v9683_v55 }
 0x439   : > { %3171 = vrot.lane.b32.xlu0 %v12321_v7, %s8691_s24  ;;  %v2198_v19 = vpop.permute.xlu1 %2197  ;;  %v1698_v37 = vmul.f32 %v8093_v18, %v9524_v34  ;;  %v2327_v34 = vsel %vm997_vm0, %v2307_v3, 0  ;;  %8104 = vrcp.f32 %v9685_v45 }
 0x43a   : > { %v8095_v43 = vpop.eup %8094  ;;  %v2220_v1 = vsel %vm997_vm0, %v2198_v19, 0 }
 0x43b   : > { %v8097_v2 = vpop.eup %8096  ;;  %v1695_v35 = vmul.f32 %v8095_v43, %v9528_v9 }
 0x43c   : > { %v1697_v53 = vmul.f32 %v8097_v2, %v9512_v42 }
 0x43d   : > { %3173 = vrot.lane.b32.xlu0 %v12323_v39, %s8691_s24  ;;  %v2071_v57 = vpop.permute.xlu1 %2070 }
 0x43e   : > { %v1718_v27 = vpack.c.bf16 %v1698_v37, %v1697_v53 }
 0x43f   : > { %7345 = vmatpush3.bf16.xpose.msra.mxu1 %v2217_v59 }
 0x440   : > { %v8099_v40 = vpop.eup %8098  ;;  %7796 = vmatprep.subr.msk.bf16.mxu1 %vm997_vm0, %v2198_v19 }
 0x441   : > { %v1696_v31 = vmul.f32 %v8099_v40, %v9538_v23  ;;  %v2309_v29 = vpop.permute.xlu1 %2308  ;;  %v8101_v43 = vpop.eup %8100 }
 0x442   : > { %v2330_v23 = vsel %vm997_vm0, %v2309_v29, 0  ;;  %v8103_v59 = vpop.eup %8102  ;;  %v1706_v37 = vmul.f32 %v8101_v43, %v9532_v58 }
 0x443   : > { %v1717_v51 = vpack.c.bf16 %v1696_v31, %v1695_v35  ;;  %v8105_v2 = vpop.eup %8104  ;;  %v1703_v45 = vmul.f32 %v8103_v59, %v9516_v63 }
 0x444   : > { %v1705_v31 = vmul.f32 %v8105_v2, %v9520_v56 }
 0x445   : > { %7306 = vmatprep.mubr.msk.bf16.mxu0 %vm1354_vm1, %v1717_v51  ;;  %v2311_v9 = vpop.permute.xlu1 %2310 }
 0x446   : > { %7307 = vmatmul.mubr.msk.bf16.gmra.mrb[64].mxu0 %vm1354_vm1, %v1718_v27  ;;  %v2333_v47 = vsel %vm997_vm0, %v2311_v9, 0  ;;  %v1722_v51 = vpack.c.bf16 %v1706_v37, %v1705_v31 }
 0x447   : > { %7347 = vmatpush3.bf16.xpose.msra.mxu1 %v2220_v1  ;;  %7334 = vmatprep.mubr.msk.bf16.mxu0 %vm997_vm0, %v2069_v33 }
 0x449   : > { %v2184_v42 = vpop.permute.xlu1 %2183 }
 0x44d   : > { %v2075_v32 = vpop.permute.xlu1 %2074 }
 0x44e   : > { %7335 = vmatmul.mubr.msk.bf16.vlgmr.msra.gmra.mrb[68].mxu0 %vm997_vm0, %v2071_v57 }
 0x44f   : > { %7359 = vmatpush3.bf16.xpose.msra.mxu0 %v2327_v34 }
 0x450   : > { %7799 = vmatprep.subr.msk.bf16.mxu0 %vm997_vm0, %v2309_v29 }
 0x451   : > { %v2422_v33 = vpop.permute.xlu1 %2421 }
 0x455   : > { %v2297_v28 = vpop.permute.xlu1 %2296 }
 0x457   : > { %7361 = vmatpush3.bf16.xpose.msra.mxu0 %v2330_v23  ;;  %v2443_v23 = vsel %vm997_vm0, %v2422_v33, 0 }
 0x458   : > { %7800 = vmatprep.subr.msk.bf16.mxu0 %vm997_vm0, %v2311_v9 }
 0x459   : > { %v2186_v40 = vpop.permute.xlu1 %2185 }
 0x45d   : > { %v2426_v57 = vpop.permute.xlu1 %2425 }
 0x45f   : > { %7363 = vmatpush3.bf16.xpose.msra.mxu0 %v2333_v47 }
 0x461   : > { %v2410_v56 = vpop.permute.xlu1 %2409 }
 0x464   : > { %v1636_v3 = vpop.xlane.xlu0 %1635 }
 0x465   : > { %8106 = vrcp.f32 %v1636_v3  ;;  %v2301_v29 = vpop.permute.xlu1 %2300 }
 0x468   : > { %v2200_v46 = vpop.permute.xlu0 %2199 }
 0x469   : > { %7797 = vmatprep.subr.msk.bf16.mxu1 %vm997_vm0, %v2200_v46  ;;  %v2223_v18 = vsel %vm997_vm0, %v2200_v46, 0 }
 0x46a   : > { %7349 = vmatpush3.bf16.xpose.msra.mxu1 %v2223_v18 }
 0x46c   : > { %v2182_v19 = vpop.permute.xlu0 %2181 }
 0x46f   : > { %v8107_v16 = vpop.eup %8106 }
 0x470   : > { %v2420_v55 = vpop.permute.xlu0 %2419  ;;  %v1704_v35 = vmul.f32 %v8107_v16, %v9580_v36  ;;  %v2449_v16 = vsel %vm997_vm0, %v2426_v57, 0 }
 0x471   : > { %7802 = vmatprep.subr.msk.bf16.mxu1 %vm997_vm0, %v2420_v55  ;;  %v2440_v1 = vsel %vm997_vm0, %v2420_v55, 0 }
 0x472   : > { %v1721_v53 = vpack.c.bf16 %v1704_v35, %v1703_v45 }
 0x474   : > { %7322 = vmatprep.mubr.msk.bf16.mxu1 %vm1354_vm1, %v1721_v53  ;;  %v2073_v27 = vpop.permute.xlu0 %2072 }
 0x475   : > { %7323 = vmatmul.mubr.msk.bf16.gmra.mrb[88].mxu1 %vm1354_vm1, %v1722_v51  ;;  %7338 = vmatprep.mubr.msk.bf16.mxu0 %vm997_vm0, %v2073_v27 }
 0x476   : > { %7339 = vmatmul.mubr.msk.bf16.gmra.mrb[72].mxu0 %vm997_vm0, %v2075_v32  ;;  %7350 = vmatprep.mubr.msk.bf16.mxu1 %vm997_vm0, %v2182_v19  ;;  %v2414_v32 = vpop.permute.xlu1 %2413 }
 0x478   : > { %v2313_v63 = vpop.permute.xlu0 %2312 }
 0x479   : > { %7801 = vmatprep.subr.msk.bf16.mxu0 %vm997_vm0, %v2313_v63  ;;  %v2336_v58 = vsel %vm997_vm0, %v2313_v63, 0 }
 0x47a   : > { %7365 = vmatpush3.bf16.xpose.msra.mxu0 %v2336_v58  ;;  %v2893_v47 = vpop.permute.xlu1 %2892 }
 0x47c   : > { %v2295_v36 = vpop.permute.xlu0 %2294 }
 0x47d   : > { %7351 = vmatmul.mubr.msk.bf16.vlgmr.msra.gmra.mrb[92].mxu1 %vm997_vm0, %v2184_v42  ;;  %7366 = vmatprep.mubr.msk.bf16.mxu0 %vm997_vm0, %v2295_v36 }
 0x47e   : > { %7375 = vmatpush3.bf16.xpose.msra.mxu1 %v2440_v1  ;;  %7354 = vmatprep.mubr.msk.bf16.mxu1 %vm997_vm0, %v2186_v40 }
 0x47f   : > { %7803 = vmatprep.subr.msk.bf16.mxu1 %vm997_vm0, %v2422_v33  ;;  %v2982_v33 = vpop.permute.xlu1 %2981 }
 0x480   : > { %v2424_v34 = vpop.permute.xlu0 %2423 }
 0x481   : > { %7367 = vmatmul.mubr.msk.bf16.vlgmr.msra.gmra.mrb[76].mxu0 %vm997_vm0, %v2297_v28  ;;  %v2446_v46 = vsel %vm997_vm0, %v2424_v34, 0 }
 0x483   : > { %v9766_v55 = vpop.permute.xlu1 %3074 }
 0x484   : > { %v2188_v9 = vpop.permute.xlu0 %2187  ;;  %12354 = vst [vmem:[#allocation60_spill] sm:$0xff] %v9766_v55 }
 0x485   : > { %7355 = vmatmul.mubr.msk.bf16.gmra.mrb[96].mxu1 %vm997_vm0, %v2188_v9 }
 0x486   : > { %7377 = vmatpush3.bf16.xpose.msra.mxu1 %v2443_v23 }
 0x487   : > { %7804 = vmatprep.subr.msk.bf16.mxu1 %vm997_vm0, %v2424_v34  ;;  %v2986_v63 = vpop.permute.xlu1 %2985 }
 0x488   : > { %v2408_v42 = vpop.permute.xlu0 %2407 }
 0x489   : > { %7382 = vmatprep.mubr.msk.bf16.mxu1 %vm997_vm0, %v2408_v42 }
 0x48b   : > { %v9782_v1 = vpop.permute.xlu1 %3078 }
 0x48c   : > { %v2299_v3 = vpop.permute.xlu0 %2298  ;;  %12359 = vst [vmem:[#allocation67_spill] sm:$0xff] %v9782_v1 }
 0x48d   : > { %7370 = vmatprep.mubr.msk.bf16.mxu0 %vm997_vm0, %v2299_v3 }
 0x48e   : > { %7379 = vmatpush3.bf16.xpose.msra.mxu1 %v2446_v46  ;;  %7371 = vmatmul.mubr.msk.bf16.gmra.mrb[80].mxu0 %vm997_vm0, %v2301_v29 }
 0x48f   : > { %7805 = vmatprep.subr.msk.bf16.mxu1 %vm997_vm0, %v2426_v57  ;;  %v9788_v34 = vpop.permute.xlu1 %3167 }
 0x490   : > { %v2412_v28 = vpop.permute.xlu0 %2411  ;;  %12361 = vst [vmem:[#allocation69_spill] sm:$0xff] %v9788_v34 }
 0x492   : > { %v9753_v18 = vpop.f32.mrb[52].mxu0 }
 0x493   : > { %12350 = vst [vmem:[#allocation61_spill] sm:$0xff] %v9753_v18  ;;  %v9755_v43 = vpop.f32.mrb[53].mxu0 }
 0x494   : > { %12351 = vst [vmem:[#allocation22_spill] sm:$0xff] %v9755_v43  ;;  %v9757_v19 = vpop.f32.mrb[54].mxu0  ;;  %v2889_v59 = vpop.permute.xlu0 %2888 }
 0x495   : > { %12352 = vst [vmem:[#allocation59_spill] sm:$0xff] %v9757_v19  ;;  %v9761_v40 = vpop.f32.mrb[55].mxu0  ;;  %7390 = vmatprep.subr.bf16.mxu0 %v2889_v59 }
 0x496   : > { %12353 = vst [vmem:[#allocation62_spill] sm:$0xff] %v9761_v40  ;;  %7381 = vmatpush3.bf16.xpose.msra.mxu1 %v2449_v16  ;;  %7391 = vmatpush3.bf16.msra.mxu0 %v2889_v59 }
 0x497   : > { %7406 = vmatprep.subr.bf16.mxu1 %v2982_v33 }
 0x498   : > { %v2891_v45 = vpop.permute.xlu0 %2890 }
 0x499   : > { %7392 = vmatprep.subr.bf16.mxu0 %v2891_v45 }
 0x49a   : > { %v9768_v35 = vpop.f32.mrb[56].mxu0  ;;  %7393 = vmatpush3.bf16.msra.mxu0 %v2891_v45 }
 0x49b   : > { %12355 = vst [vmem:[#allocation63_spill] sm:$0xff] %v9768_v35  ;;  %v9770_v31 = vpop.f32.mrb[57].mxu0  ;;  %7394 = vmatprep.subr.bf16.mxu0 %v2893_v47 }
 0x49c   : > { %12356 = vst [vmem:[#allocation64_spill] sm:$0xff] %v9770_v31  ;;  %v9772_v53 = vpop.f32.mrb[58].mxu0  ;;  %v2895_v51 = vpop.permute.xlu0 %2894 }
 0x49d   : > { %12357 = vst [vmem:[#allocation65_spill] sm:$0xff] %v9772_v53  ;;  %7383 = vmatmul.mubr.msk.bf16.vlgmr.msra.gmra.mrb[100].mxu1 %vm997_vm0, %v2410_v56  ;;  %v9777_v27 = vpop.f32.mrb[59].mxu0 }
 0x49e   : > { %12358 = vst [vmem:[#allocation66_spill] sm:$0xff] %v9777_v27  ;;  %7386 = vmatprep.mubr.msk.bf16.mxu1 %vm997_vm0, %v2412_v28  ;;  %7407 = vmatpush3.bf16.msra.mxu1 %v2982_v33 }
 0x49f   : > { %7395 = vmatpush3.bf16.msra.mxu0 %v2893_v47 }
 0x4a0   : > { %7396 = vmatprep.subr.bf16.mxu0 %v2895_v51  ;;  %v2984_v36 = vpop.permute.xlu0 %2983 }
 0x4a1   : > { %7408 = vmatprep.subr.bf16.mxu1 %v2984_v36 }
 0x4a2   : > { %7409 = vmatpush3.bf16.msra.mxu1 %v2984_v36 }
 0x4a3   : > { %7397 = vmatpush3.bf16.msra.mxu0 %v2895_v51  ;;  %7410 = vmatprep.subr.bf16.mxu1 %v2986_v63 }
 0x4a4   : > { %7422 = vmatprep.subr.bf16.mxu0 %v9766_v55  ;;  %v9785_v56 = vpop.permute.xlu0 %3076 }
 0x4a5   : > { %12360 = vst [vmem:[#allocation68_spill] sm:$0xff] %v9785_v56  ;;  %7387 = vmatmul.mubr.msk.bf16.gmra.mrb[104].mxu1 %vm997_vm0, %v2414_v32  ;;  %v6822_v32 = vld [vmem:[#allocation7 + $0x28] sm:$0xff]  }
 0x4a6   : > { %7411 = vmatpush3.bf16.msra.mxu1 %v2986_v63 }
 0x4a8   : > { %v2988_v29 = vpop.permute.xlu0 %2987 }
 0x4a9   : > { %7412 = vmatprep.subr.bf16.mxu1 %v2988_v29 }
 0x4aa   : > { %7413 = vmatpush3.bf16.msra.mxu1 %v2988_v29 }
 0x4ab   : > { %7438 = vmatprep.subr.bf16.mxu1 %v9788_v34 }
 0x4b1   : > { %v9791_v9 = vpop.f32.mrb[76].mxu1 }
 0x4b2   : > { %12362 = vst [vmem:[#allocation70_spill] sm:$0xff] %v9791_v9  ;;  %v9793_v23 = vpop.f32.mrb[77].mxu1 }
 0x4b3   : > { %12363 = vst [vmem:[#allocation71_spill] sm:$0xff] %v9793_v23  ;;  %v9795_v42 = vpop.f32.mrb[78].mxu1 }
 0x4b4   : > { %12364 = vst [vmem:[#allocation72_spill] sm:$0xff] %v9795_v42  ;;  %v9799_v3 = vpop.f32.mrb[79].mxu1 }
 0x4b5   : > { %12365 = vst [vmem:[#allocation73_spill] sm:$0xff] %v9799_v3  ;;  %v9874_v3 = vunpack.c.h.bf16 %v6822_v32 }
 0x4b9   : > { %v9803_v46 = vpop.f32.mrb[80].mxu1 }
 0x4ba   : > { %12366 = vst [vmem:[#allocation74_spill] sm:$0xff] %v9803_v46  ;;  %v9805_v28 = vpop.f32.mrb[81].mxu1 }
 0x4bb   : > { %12367 = vst [vmem:[#allocation75_spill] sm:$0xff] %v9805_v28  ;;  %v9807_v33 = vpop.f32.mrb[82].mxu1 }
 0x4bc   : > { %12368 = vst [vmem:[#allocation76_spill] sm:$0xff] %v9807_v33  ;;  %v9811_v16 = vpop.f32.mrb[83].mxu1 }
 0x4bd   : > { %12369 = vst [vmem:[#allocation77_spill] sm:$0xff] %v9811_v16  ;;  %v6692_v16 = vld [vmem:[#allocation7 + $0x20] sm:$0xff]  }
 0x4be   : > { %v9872_v42 = vunpack.c.l.bf16 %v6692_v16  ;;  %v9876_v35 = vunpack.c.h.bf16 %v6692_v16 }
 0x4d5   : > { %v9815_v51 = vpop.f32.mrb[60].mxu0 }
 0x4d6   : > { %12370 = vst [vmem:[#allocation78_spill] sm:$0xff] %v9815_v51  ;;  %v9817_v63 = vpop.f32.mrb[61].mxu0 }
 0x4d7   : > { %12371 = vst [vmem:[#allocation79_spill] sm:$0xff] %v9817_v63  ;;  %v9819_v36 = vpop.f32.mrb[62].mxu0 }
 0x4d8   : > { %12372 = vst [vmem:[#allocation80_spill] sm:$0xff] %v9819_v36  ;;  %v9823_v47 = vpop.f32.mrb[63].mxu0 }
 0x4d9   : > { %12373 = vst [vmem:[#allocation81_spill] sm:$0xff] %v9823_v47 }
 0x509   : > { %v9827_v59 = vpop.f32.mrb[84].mxu1 }
 0x50a   : > { %12374 = vst [vmem:[#allocation82_spill] sm:$0xff] %v9827_v59  ;;  %v9829_v57 = vpop.f32.mrb[85].mxu1  ;;  %v9851_v59 = vunpack.c.l.bf16 %v6822_v32 }
 0x50b   : > { %12375 = vst [vmem:[#allocation83_spill] sm:$0xff] %v9829_v57  ;;  %v9831_v58 = vpop.f32.mrb[86].mxu1 }
 0x50c   : > { %12376 = vst [vmem:[#allocation84_spill] sm:$0xff] %v9831_v58  ;;  %v9835_v2 = vpop.f32.mrb[87].mxu1 }
 0x50d   : > { %12377 = vst [vmem:[#allocation85_spill] sm:$0xff] %v9835_v2 }
 0x519   : > { %v9839_v29 = vpop.f32.mrb[64].mxu0 }
 0x51a   : > { %12378 = vst [vmem:[#allocation86_spill] sm:$0xff] %v9839_v29  ;;  %v9841_v51 = vpop.f32.mrb[65].mxu0 }
 0x51b   : > { %12379 = vst [vmem:[#allocation87_spill] sm:$0xff] %v9841_v51  ;;  %v9843_v36 = vpop.f32.mrb[66].mxu0 }
 0x51c   : > { %12380 = vst [vmem:[#allocation88_spill] sm:$0xff] %v9843_v36  ;;  %v9847_v47 = vpop.f32.mrb[67].mxu0 }
 0x51d   : > { %12381 = vst [vmem:[#allocation89_spill] sm:$0xff] %v9847_v47 }
 0x521   : > { %v7336_v58 = vpop.f32.mrb[68].mxu0 }
 0x522   : > { %v9854_v37 = vadd.f32 %v7336_v58, %v9851_v59  ;;  %v2146_v57 = vpop.f32.mrb[69].mxu0 }
 0x523   : > { %v7337_v2 = vpop.f32.mrb[70].mxu0 }
 0x524   : > { %v2149_v46 = vpop.f32.mrb[71].mxu0  ;;  %v2522_v33 = vsel %vm1354_vm1, %v9854_v37, -inf  ;;  %v9911_v39 = vadd.f32 %v7337_v2, %v9874_v3 }
 0x525   : > { %2523 = vmax.xlane.f32.xlu0 %v2522_v33  ;;  %v9890_v16 = vadd.f32 %v9876_v35, %v2149_v46 }
 0x526   : > { %v2525_v2 = vsel %vm1354_vm1, %v9911_v39, -inf }
 0x548   : > { %v9858_v28 = vpop.f32.mrb[88].mxu1 }
 0x549   : > { %12382 = vst [vmem:[#allocation90_spill] sm:$0xff] %v9858_v28  ;;  %v9860_v63 = vpop.f32.mrb[89].mxu1  ;;  %v7340_v29 = vpop.f32.mrb[72].mxu0  ;;  %v9882_v28 = vadd.f32 %v9872_v42, %v2146_v57 }
 0x54a   : > { %12383 = vst [vmem:[#allocation91_spill] sm:$0xff] %v9860_v63  ;;  %v9862_v36 = vpop.f32.mrb[90].mxu1  ;;  %v9864_v45 = vpop.f32.mrb[73].mxu0 }
 0x54b   : > { %12384 = vst [vmem:[#allocation92_spill] sm:$0xff] %v9862_v36  ;;  %v9868_v51 = vpop.f32.mrb[91].mxu1  ;;  %v7341_v47 = vpop.f32.mrb[74].mxu0  ;;  %v2516_v18 = vsel %vm1354_vm1, %v9882_v28, -inf }
 0x54c   : > { %12385 = vst [vmem:[#allocation93_spill] sm:$0xff] %v9868_v51  ;;  %v2165_v33 = vpop.f32.mrb[75].mxu0 }
 0x550   : > { %v7352_v23 = vpop.f32.mrb[92].mxu1 }
 0x551   : > { %v9879_v53 = vadd.f32 %v7352_v23, %v9851_v59  ;;  %v2259_v31 = vpop.f32.mrb[93].mxu1 }
 0x552   : > { %v7353_v58 = vpop.f32.mrb[94].mxu1  ;;  %v9897_v27 = vadd.f32 %v9872_v42, %v2259_v31 }
 0x553   : > { %v9885_v36 = vadd.f32 %v7353_v58, %v9874_v3  ;;  %v2262_v9 = vpop.f32.mrb[95].mxu1  ;;  %v2546_v63 = vsel %vm1354_vm1, %v9879_v53, -inf }
 0x554   : > { %2547 = vmax.xlane.f32.xlu0 %v2546_v63  ;;  %v7368_v32 = vpop.f32.mrb[76].mxu0  ;;  %v6824_v63 = vld [vmem:[#allocation7 + $0x38] sm:$0xff]   ;;  %v9906_v43 = vadd.f32 %v9876_v35, %v2262_v9 }
 0x555   : > { %v9892_v51 = vpop.f32.mrb[77].mxu0  ;;  %v2549_v23 = vsel %vm1354_vm1, %v9885_v36, -inf  ;;  %v9903_v46 = vunpack.c.h.bf16 %v6824_v63  ;;  %v9913_v7 = vunpack.c.l.bf16 %v6824_v63  ;;  %v6823_v63 = vld [vmem:[#allocation7 + $0x30] sm:$0xff]  }
 0x556   : > { %2550 = vmax.xlane.f32.xlu1 %v2549_v23  ;;  %v7369_v57 = vpop.f32.mrb[78].mxu0  ;;  %v2519_v23 = vsel %vm1354_vm1, %v9890_v16, -inf  ;;  %v2543_v9 = vsel %vm1354_vm1, %v9906_v43, -inf  ;;  %v9927_v34 = vunpack.c.h.bf16 %v6823_v63 }
 0x557   : > { %v9899_v58 = vpop.f32.mrb[79].mxu0  ;;  %v9918_v1 = vadd.f32 %v7341_v47, %v9903_v46 }
 0x558   : > { %2517 = vmax.xlane.f32.xlu0 %v2516_v18  ;;  %v7356_v19 = vpop.f32.mrb[96].mxu1  ;;  %v2540_v18 = vsel %vm1354_vm1, %v9897_v27, -inf }
 0x559   : > { %v2275_v40 = vpop.f32.mrb[97].mxu1  ;;  %v2537_v47 = vsel %vm1354_vm1, %v9918_v1, -inf }
 0x55a   : > { %2520 = vmax.xlane.f32.xlu1 %v2519_v23  ;;  %v7357_v31 = vpop.f32.mrb[98].mxu1  ;;  %v9923_v23 = vadd.f32 %v7340_v29, %v9913_v7  ;;  %v9939_v29 = vadd.f32 %v7356_v19, %v9913_v7 }
 0x55b   : > { %v2278_v4 = vpop.f32.mrb[99].mxu1  ;;  %v9930_v56 = vadd.f32 %v7357_v31, %v9903_v46  ;;  %v9944_v31 = vadd.f32 %v9927_v34, %v2165_v33 }
 0x55c   : > { %2541 = vmax.xlane.f32.xlu0 %v2540_v18  ;;  %v2558_v19 = vsel %vm1354_vm1, %v9939_v29, -inf }
 0x55d   : > { %v2561_v41 = vsel %vm1354_vm1, %v9930_v56, -inf }
 0x55e   : > { %2544 = vmax.xlane.f32.xlu1 %v2543_v9  ;;  %v9936_v9 = vunpack.c.l.bf16 %v6823_v63 }
 0x560   : > { %2526 = vmax.xlane.f32.xlu0 %v2525_v2  ;;  %v2534_v2 = vsel %vm1354_vm1, %v9923_v23, -inf  ;;  %v9950_v63 = vadd.f32 %v9936_v9, %v9864_v45  ;;  %v9960_v33 = vadd.f32 %v9936_v9, %v2275_v40  ;;  %v9965_v45 = vadd.f32 %v7369_v57, %v9874_v3 }
 0x561   : > { %v7372_v18 = vpop.f32.mrb[80].mxu0 }
 0x562   : > { %2538 = vmax.xlane.f32.xlu1 %v2537_v47  ;;  %v9934_v55 = vpop.f32.mrb[81].mxu0  ;;  %v9955_v47 = vadd.f32 %v9927_v34, %v2278_v4  ;;  %v9970_v4 = vadd.f32 %v7368_v32, %v9851_v59  ;;  %v2573_v26 = vsel %vm1354_vm1, %v9965_v45, -inf }
 0x563   : > { %v7373_v61 = vpop.f32.mrb[82].mxu0 }
 0x564   : > { %2535 = vmax.xlane.f32.xlu0 %v2534_v2  ;;  %v2391_v5 = vpop.f32.mrb[83].mxu0  ;;  %v2531_v2 = vsel %vm1354_vm1, %v9944_v31, -inf  ;;  %v2570_v32 = vsel %vm1354_vm1, %v9970_v4, -inf  ;;  %v10007_v13 = vadd.f32 %v7373_v61, %v9903_v46 }
 0x566   : > { %2562 = vmax.xlane.f32.xlu1 %v2561_v41  ;;  %v2528_v41 = vsel %vm1354_vm1, %v9950_v63, -inf }
 0x568   : > { %2559 = vmax.xlane.f32.xlu0 %v2558_v19  ;;  %v2555_v19 = vsel %vm1354_vm1, %v9955_v47, -inf }
 0x56a   : > { %2532 = vmax.xlane.f32.xlu1 %v2531_v2  ;;  %v2552_v2 = vsel %vm1354_vm1, %v9960_v33, -inf }
 0x56c   : > { %2529 = vmax.xlane.f32.xlu0 %v2528_v41 }
 0x56e   : > { %2556 = vmax.xlane.f32.xlu1 %v2555_v19 }
 0x570   : > { %v7384_v6 = vpop.f32.mrb[100].mxu1  ;;  %2553 = vmax.xlane.f32.xlu0 %v2552_v2  ;;  %v9986_v2 = vadd.f32 %v9876_v35, %v9899_v58 }
 0x571   : > { %v2485_v40 = vpop.f32.mrb[101].mxu1  ;;  %v9977_v57 = vadd.f32 %v7384_v6, %v9851_v59  ;;  %v9992_v6 = vadd.f32 %v9872_v42, %v9892_v51 }
 0x572   : > { %v7385_v41 = vpop.f32.mrb[102].mxu1  ;;  %2574 = vmax.xlane.f32.xlu1 %v2573_v26  ;;  %v2567_v58 = vsel %vm1354_vm1, %v9986_v2, -inf }
 0x573   : > { %v9980_v14 = vadd.f32 %v7385_v41, %v9874_v3  ;;  %v2488_v19 = vpop.f32.mrb[103].mxu1  ;;  %v2594_v26 = vsel %vm1354_vm1, %v9977_v57, -inf  ;;  %v2564_v51 = vsel %vm1354_vm1, %v9992_v6, -inf }
 0x574   : > { %2571 = vmax.xlane.f32.xlu0 %v2570_v32  ;;  %v9997_v59 = vadd.f32 %v9876_v35, %v2488_v19  ;;  %v10012_v19 = vadd.f32 %v7372_v18, %v9913_v7  ;;  %v10027_v18 = vadd.f32 %v9927_v34, %v2391_v5 }
 0x575   : > { %v2597_v15 = vsel %vm1354_vm1, %v9980_v14, -inf }
 0x576   : > { %2598 = vmax.xlane.f32.xlu1 %v2597_v15  ;;  %v10002_v15 = vadd.f32 %v9872_v42, %v2485_v40  ;;  %v2591_v35 = vsel %vm1354_vm1, %v9997_v59, -inf  ;;  %v2585_v40 = vsel %vm1354_vm1, %v10007_v13, -inf }
 0x578   : > { %v7388_v3 = vpop.f32.mrb[104].mxu1  ;;  %2595 = vmax.xlane.f32.xlu0 %v2594_v26  ;;  %v2588_v26 = vsel %vm1354_vm1, %v10002_v15, -inf }
 0x579   : > { %v2501_v41 = vpop.f32.mrb[105].mxu1  ;;  %v10022_v61 = vadd.f32 %v7388_v3, %v9913_v7  ;;  %v2579_v3 = vsel %vm1354_vm1, %v10027_v18, -inf }
 0x57a   : > { %v7389_v32 = vpop.f32.mrb[106].mxu1  ;;  %2568 = vmax.xlane.f32.xlu1 %v2567_v58  ;;  %v2582_v58 = vsel %vm1354_vm1, %v10012_v19, -inf  ;;  %v10043_v5 = vadd.f32 %v9936_v9, %v2501_v41 }
 0x57b   : > { %v2504_v22 = vpop.f32.mrb[107].mxu1  ;;  %v10017_v42 = vadd.f32 %v7389_v32, %v9903_v46  ;;  %v10033_v46 = vadd.f32 %v9936_v9, %v9934_v55  ;;  %v2606_v32 = vsel %vm1354_vm1, %v10022_v61, -inf }
 0x57c   : > { %2565 = vmax.xlane.f32.xlu0 %v2564_v51  ;;  %v10038_v7 = vadd.f32 %v9927_v34, %v2504_v22  ;;  %v10051_v22 = vpop.permute.xlu0 %3080 }
 0x57d   : > { %v2609_v51 = vsel %vm1354_vm1, %v10017_v42, -inf  ;;  %12386 = vst [vmem:[#allocation94_spill] sm:$0xff] %v10051_v22 }
 0x57e   : > { %2592 = vmax.xlane.f32.xlu1 %v2591_v35  ;;  %v2576_v35 = vsel %vm1354_vm1, %v10033_v46, -inf  ;;  %v2603_v55 = vsel %vm1354_vm1, %v10038_v7, -inf }
 0x580   : > { %2589 = vmax.xlane.f32.xlu0 %v2588_v26  ;;  %v2600_v26 = vsel %vm1354_vm1, %v10043_v5, -inf  ;;  %v10053_v34 = vpop.permute.xlu0 %3169 }
 0x581   : > { %12387 = vst [vmem:[#allocation95_spill] sm:$0xff] %v10053_v34 }
 0x582   : > { %2586 = vmax.xlane.f32.xlu1 %v2585_v40  ;;  %v12388_v40 = vld [vmem:[#allocation20_spill] sm:$0xff] }
 0x584   : > { %2583 = vmax.xlane.f32.xlu0 %v2582_v58  ;;  %v10057_v9 = vpop.permute.xlu0 %3171 }
 0x585   : > { %12389 = vst [vmem:[#allocation96_spill] sm:$0xff] %v10057_v9 }
 0x586   : > { %2610 = vmax.xlane.f32.xlu1 %v2609_v51 }
 0x588   : > { %2607 = vmax.xlane.f32.xlu0 %v2606_v32  ;;  %v10059_v41 = vpop.permute.xlu0 %3173 }
 0x589   : > { %12390 = vst [vmem:[#allocation97_spill] sm:$0xff] %v10059_v41 }
 0x58a   : > { %2580 = vmax.xlane.f32.xlu1 %v2579_v3 }
 0x58c   : > { %2577 = vmax.xlane.f32.xlu0 %v2576_v35 }
 0x58e   : > { %2604 = vmax.xlane.f32.xlu1 %v2603_v55  ;;  %v10066_v55 = vpop.permute.xlu1 %3297 }
 0x58f   : > { %12392 = vst [vmem:[#allocation99_spill] sm:$0xff] %v10066_v55 }
 0x590   : > { %2601 = vmax.xlane.f32.xlu0 %v2600_v26 }
 0x5a6   : > { %3299 = vrot.lane.b32.xlu0 %v12388_v40, %s8692_s26 }
 0x5b2   : > { %v2524_v58 = vpop.xlane.xlu0 %2523 }
 0x5b3   : > { %v2614_v51 = vsub.f32 %v9854_v37, %v2524_v58 }
 0x5b5   : > { %v2648_v32 = vmul.f32 1.442695, %v2614_v51 }
 0x5b7   : > { %8108 = vpow2.f32 %v2648_v32 }
 0x5c1   : > { %v10062_v3 = vpop.eup %8108 }
 0x5c2   : > { %12391 = vst [vmem:[#allocation98_spill] sm:$0xff] %v10062_v3  ;;  %v2714_v35 = vsel %vm1354_vm1, %v10062_v3, 0.0 }
 0x5c5   : > { %2715 = vadd.xlane.f32.xlu0 %v2714_v35 }
 0x5e1   : > { %v2548_v26 = vpop.xlane.xlu0 %2547 }
 0x5e2   : > { %v2622_v40 = vsub.f32 %v9879_v53, %v2548_v26 }
 0x5e3   : > { %v2551_v22 = vpop.xlane.xlu1 %2550 }
 0x5e4   : > { %v2664_v9 = vmul.f32 1.442695, %v2622_v40  ;;  %v2623_v35 = vsub.f32 %v9885_v36, %v2551_v22 }
 0x5e5   : > { %v2518_v34 = vpop.xlane.xlu0 %2517 }
 0x5e6   : > { %8110 = vpow2.f32 %v2664_v9  ;;  %v2612_v41 = vsub.f32 %v9882_v28, %v2518_v34  ;;  %v2666_v9 = vmul.f32 1.442695, %v2623_v35 }
 0x5e7   : > { %v2521_v37 = vpop.xlane.xlu1 %2520 }
 0x5e8   : > { %v2644_v58 = vmul.f32 1.442695, %v2612_v41  ;;  %v2613_v28 = vsub.f32 %v9890_v16, %v2521_v37 }
 0x5e9   : > { %v2542_v51 = vpop.xlane.xlu0 %2541 }
 0x5ea   : > { %8112 = vpow2.f32 %v2644_v58  ;;  %v2620_v32 = vsub.f32 %v9897_v27, %v2542_v51  ;;  %v2646_v22 = vmul.f32 1.442695, %v2613_v28 }
 0x5eb   : > { %v2545_v50 = vpop.xlane.xlu1 %2544 }
 0x5ec   : > { %v2660_v3 = vmul.f32 1.442695, %v2620_v32 }
 0x5ed   : > { %v2527_v55 = vpop.xlane.xlu0 %2526 }
 0x5ee   : > { %8114 = vpow2.f32 %v2660_v3  ;;  %v2615_v53 = vsub.f32 %v9911_v39, %v2527_v55  ;;  %v2621_v39 = vsub.f32 %v9906_v43, %v2545_v50 }
 0x5ef   : > { %v2539_v26 = vpop.xlane.xlu1 %2538 }
 0x5f0   : > { %v10073_v40 = vpop.eup %8110  ;;  %v2650_v34 = vmul.f32 1.442695, %v2615_v53  ;;  %v2662_v32 = vmul.f32 1.442695, %v2621_v39 }
 0x5f1   : > { %v2536_v41 = vpop.xlane.xlu0 %2535  ;;  %v2738_v58 = vsel %vm1354_vm1, %v10073_v40, 0.0 }
 0x5f2   : > { %8116 = vpow2.f32 %v2650_v34  ;;  %2739 = vadd.xlane.f32.xlu1 %v2738_v58  ;;  %v2618_v16 = vsub.f32 %v9923_v23, %v2536_v41 }
 0x5f3   : > { %v2563_v27 = vpop.xlane.xlu1 %2562  ;;  %8118 = vpow2.f32 %v2666_v9 }
 0x5f4   : > { %v10078_v36 = vpop.eup %8112  ;;  %8120 = vpow2.f32 %v2646_v22  ;;  %v2627_v35 = vsub.f32 %v9930_v56, %v2563_v27  ;;  %v2656_v43 = vmul.f32 1.442695, %v2618_v16 }
 0x5f5   : > { %v2560_v3 = vpop.xlane.xlu0 %2559  ;;  %v2708_v55 = vsel %vm1354_vm1, %v10078_v36, 0.0  ;;  %8122 = vpow2.f32 %v2662_v32 }
 0x5f6   : > { %2709 = vadd.xlane.f32.xlu0 %v2708_v55  ;;  %v2626_v28 = vsub.f32 %v9939_v29, %v2560_v3  ;;  %v2674_v23 = vmul.f32 1.442695, %v2627_v35 }
 0x5f7   : > { %v2533_v37 = vpop.xlane.xlu1 %2532 }
 0x5f8   : > { %v10084_v51 = vpop.eup %8114 }
 0x5f9   : > { %v2530_v53 = vpop.xlane.xlu0 %2529  ;;  %v2732_v9 = vsel %vm1354_vm1, %v10084_v51, 0.0 }
 0x5fa   : > { %v2616_v50 = vsub.f32 %v9950_v63, %v2530_v53  ;;  %2733 = vadd.xlane.f32.xlu1 %v2732_v9  ;;  %v2672_v63 = vmul.f32 1.442695, %v2626_v28  ;;  %v2619_v53 = vsub.f32 %v9918_v1, %v2539_v26 }
 0x5fb   : > { %v2557_v34 = vpop.xlane.xlu1 %2556 }
 0x5fc   : > { %v10091_v58 = vpop.eup %8116  ;;  %v2652_v41 = vmul.f32 1.442695, %v2616_v50  ;;  %v2625_v22 = vsub.f32 %v9955_v47, %v2557_v34 }
 0x5fd   : > { %v2554_v39 = vpop.xlane.xlu0 %2553  ;;  %v2717_v56 = vsel %vm1354_vm1, %v10091_v58, 0.0  ;;  %v10096_v27 = vpop.eup %8118 }
 0x5fe   : > { %8124 = vpow2.f32 %v2652_v41  ;;  %2718 = vadd.xlane.f32.xlu1 %v2717_v56  ;;  %v2624_v29 = vsub.f32 %v9960_v33, %v2554_v39  ;;  %v2670_v55 = vmul.f32 1.442695, %v2625_v22  ;;  %v2741_v47 = vsel %vm1354_vm1, %v10096_v27, 0.0  ;;  %v10102_v35 = vpop.eup %8120 }
 0x5ff   : > { %8126 = vpow2.f32 %v2656_v43  ;;  %v2575_v3 = vpop.xlane.xlu1 %2574  ;;  %v10108_v34 = vpop.eup %8122  ;;  %v2617_v41 = vsub.f32 %v9944_v31, %v2533_v37 }
 0x600   : > { %8128 = vpow2.f32 %v2674_v23  ;;  %v2631_v16 = vsub.f32 %v9965_v45, %v2575_v3  ;;  %v2668_v9 = vmul.f32 1.442695, %v2624_v29  ;;  %v2711_v45 = vsel %vm1354_vm1, %v10102_v35, 0.0 }
 0x601   : > { %v2572_v32 = vpop.xlane.xlu0 %2571  ;;  %8130 = vpow2.f32 %v2672_v63  ;;  %v2658_v23 = vmul.f32 1.442695, %v2619_v53  ;;  %v2735_v63 = vsel %vm1354_vm1, %v10108_v34, 0.0  ;;  %v2654_v31 = vmul.f32 1.442695, %v2617_v41 }
 0x602   : > { %2742 = vadd.xlane.f32.xlu1 %v2741_v47  ;;  %8132 = vpow2.f32 %v2670_v55  ;;  %v2682_v43 = vmul.f32 1.442695, %v2631_v16  ;;  %v2630_v37 = vsub.f32 %v9970_v4, %v2572_v32 }
 0x603   : > { %v2599_v50 = vpop.xlane.xlu1 %2598  ;;  %8134 = vpow2.f32 %v2668_v9 }
 0x604   : > { %v2639_v33 = vsub.f32 %v9980_v14, %v2599_v50  ;;  %8136 = vpow2.f32 %v2682_v43  ;;  %v2680_v4 = vmul.f32 1.442695, %v2630_v37 }
 0x605   : > { %v2596_v28 = vpop.xlane.xlu0 %2595  ;;  %8138 = vpow2.f32 %v2658_v23 }
 0x606   : > { %2712 = vadd.xlane.f32.xlu1 %v2711_v45  ;;  %v2698_v26 = vmul.f32 1.442695, %v2639_v33  ;;  %v2638_v32 = vsub.f32 %v9977_v57, %v2596_v28 }
 0x607   : > { %v2569_v22 = vpop.xlane.xlu1 %2568 }
 0x608   : > { %v10111_v1 = vpop.eup %8124  ;;  %v2629_v39 = vsub.f32 %v9986_v2, %v2569_v22  ;;  %8140 = vpow2.f32 %v2698_v26  ;;  %v2696_v26 = vmul.f32 1.442695, %v2638_v32 }
 0x609   : > { %v10114_v56 = vpop.eup %8126  ;;  %v2566_v14 = vpop.xlane.xlu0 %2565  ;;  %v2720_v29 = vsel %vm1354_vm1, %v10111_v1, 0.0  ;;  %8142 = vpow2.f32 %v2654_v31 }
 0x60a   : > { %v10120_v3 = vpop.eup %8128  ;;  %2736 = vadd.xlane.f32.xlu1 %v2735_v63  ;;  %2721 = vadd.xlane.f32.xlu0 %v2720_v29  ;;  %v2678_v2 = vmul.f32 1.442695, %v2629_v39  ;;  %v2726_v9 = vsel %vm1354_vm1, %v10114_v56, 0.0  ;;  %v2628_v39 = vsub.f32 %v9992_v6, %v2566_v14 }
 0x60b   : > { %v2593_v55 = vpop.xlane.xlu1 %2592  ;;  %v10124_v47 = vpop.eup %8130  ;;  %v2753_v50 = vsel %vm1354_vm1, %v10120_v3, 0.0 }
 0x60c   : > { %v2637_v16 = vsub.f32 %v9997_v59, %v2593_v55  ;;  %v10130_v43 = vpop.eup %8132  ;;  %8144 = vpow2.f32 %v2678_v2  ;;  %v2750_v23 = vsel %vm1354_vm1, %v10124_v47, 0.0  ;;  %v2676_v2 = vmul.f32 1.442695, %v2628_v39 }
 0x60d   : > { %v2590_v53 = vpop.xlane.xlu0 %2589  ;;  %v10133_v59 = vpop.eup %8134  ;;  %v2747_v41 = vsel %vm1354_vm1, %v10130_v43, 0.0  ;;  %8146 = vpow2.f32 %v2680_v4 }
 0x60e   : > { %2727 = vadd.xlane.f32.xlu1 %v2726_v9  ;;  %2754 = vadd.xlane.f32.xlu0 %v2753_v50  ;;  %v2694_v33 = vmul.f32 1.442695, %v2637_v16  ;;  %v10139_v22 = vpop.eup %8136  ;;  %v2744_v31 = vsel %vm1354_vm1, %v10133_v59, 0.0  ;;  %v2636_v6 = vsub.f32 %v10002_v15, %v2590_v53 }
 0x60f   : > { %v10142_v57 = vpop.eup %8138  ;;  %v2587_v28 = vpop.xlane.xlu1 %2586  ;;  %v2765_v29 = vsel %vm1354_vm1, %v10139_v22, 0.0 }
 0x610   : > { %8148 = vpow2.f32 %v2694_v33  ;;  %v2729_v4 = vsel %vm1354_vm1, %v10142_v57, 0.0  ;;  %v2692_v15 = vmul.f32 1.442695, %v2636_v6 }
 0x611   : > { %v2584_v45 = vpop.xlane.xlu0 %2583  ;;  %8150 = vpow2.f32 %v2696_v26 }
 0x612   : > { %2751 = vadd.xlane.f32.xlu1 %v2750_v23  ;;  %2748 = vadd.xlane.f32.xlu0 %v2747_v41  ;;  %v10148_v37 = vpop.eup %8140  ;;  %v2634_v53 = vsub.f32 %v10012_v19, %v2584_v45 }
 0x613   : > { %v10152_v16 = vpop.eup %8142  ;;  %v2789_v50 = vsel %vm1354_vm1, %v10148_v37, 0.0  ;;  %v2611_v33 = vpop.xlane.xlu1 %2610 }
 0x614   : > { %v2723_v39 = vsel %vm1354_vm1, %v10152_v16, 0.0  ;;  %v2688_v19 = vmul.f32 1.442695, %v2634_v53 }
 0x615   : > { %v2608_v63 = vpop.xlane.xlu0 %2607 }
 0x616   : > { %v2642_v55 = vsub.f32 %v10022_v61, %v2608_v63  ;;  %2766 = vadd.xlane.f32.xlu0 %v2765_v29  ;;  %2745 = vadd.xlane.f32.xlu1 %v2744_v31  ;;  %v10158_v32 = vpop.eup %8144  ;;  %v2635_v61 = vsub.f32 %v10007_v13, %v2587_v28  ;;  %v2643_v28 = vsub.f32 %v10017_v42, %v2611_v33 }
 0x617   : > { %v10162_v23 = vpop.eup %8146  ;;  %v2759_v26 = vsel %vm1354_vm1, %v10158_v32, 0.0 }
 0x618   : > { %v2704_v14 = vmul.f32 1.442695, %v2642_v55  ;;  %v2690_v13 = vmul.f32 1.442695, %v2635_v61  ;;  %v2581_v55 = vpop.xlane.xlu1 %2580  ;;  %v2762_v6 = vsel %vm1354_vm1, %v10162_v23, 0.0 }
 0x619   : > { %v2578_v9 = vpop.xlane.xlu0 %2577 }
 0x61a   : > { %8152 = vpow2.f32 %v2704_v14  ;;  %2790 = vadd.xlane.f32.xlu0 %v2789_v50  ;;  %2730 = vadd.xlane.f32.xlu1 %v2729_v4  ;;  %v10168_v63 = vpop.eup %8148  ;;  %v2632_v45 = vsub.f32 %v10033_v46, %v2578_v9  ;;  %v2633_v46 = vsub.f32 %v10027_v18, %v2581_v55 }
 0x61b   : > { %8154 = vpow2.f32 %v2676_v2  ;;  %v2783_v2 = vsel %vm1354_vm1, %v10168_v63, 0.0  ;;  %v10177_v14 = vpop.eup %8150 }
 0x61c   : > { %8156 = vpow2.f32 %v2692_v15  ;;  %v2684_v9 = vmul.f32 1.442695, %v2632_v45  ;;  %v2786_v50 = vsel %vm1354_vm1, %v10177_v14, 0.0  ;;  %v2686_v33 = vmul.f32 1.442695, %v2633_v46  ;;  %v12394_v46 = vld [vmem:[#allocation28_spill] sm:$0xff] }
 0x61d   : > { %v2602_v41 = vpop.xlane.xlu0 %2601 }
 0x61e   : > { %v2640_v29 = vsub.f32 %v10043_v5, %v2602_v41  ;;  %2760 = vadd.xlane.f32.xlu0 %v2759_v26  ;;  %2724 = vadd.xlane.f32.xlu1 %v2723_v39  ;;  %v2706_v5 = vmul.f32 1.442695, %v2643_v28 }
 0x620   : > { %v2700_v31 = vmul.f32 1.442695, %v2640_v29 }
 0x622   : > { %8158 = vpow2.f32 %v2700_v31  ;;  %2784 = vadd.xlane.f32.xlu0 %v2783_v2  ;;  %2763 = vadd.xlane.f32.xlu1 %v2762_v6 }
 0x623   : > { %8160 = vpow2.f32 %v2690_v13 }
 0x624   : > { %v10179_v42 = vpop.eup %8152  ;;  %8162 = vpow2.f32 %v2688_v19 }
 0x625   : > { %v2798_v4 = vsel %vm1354_vm1, %v10179_v42, 0.0  ;;  %v10186_v61 = vpop.eup %8154  ;;  %8164 = vpow2.f32 %v2706_v5  ;;  %v12393_v5 = vld [vmem:[#allocation32_spill] sm:$0xff] }
 0x626   : > { %2787 = vadd.xlane.f32.xlu1 %v2786_v50  ;;  %2799 = vadd.xlane.f32.xlu0 %v2798_v4  ;;  %8166 = vpow2.f32 %v2684_v9  ;;  %v2756_v15 = vsel %vm1354_vm1, %v10186_v61, 0.0  ;;  %v10190_v53 = vpop.eup %8156  ;;  %v12395_v9 = vld [vmem:[#allocation36_spill] sm:$0xff]  ;;  %v12397_v4 = vld [vmem:[#allocation15_spill] sm:$0xff] }
 0x627   : > { %8168 = vpow2.f32 %v2686_v33  ;;  %v2780_v26 = vsel %vm1354_vm1, %v10190_v53, 0.0  ;;  %v12396_v50 = vld [vmem:[#allocation24_spill] sm:$0xff]  ;;  %v2605_v33 = vpop.xlane.xlu1 %2604 }
 0x62a   : > { %2757 = vadd.xlane.f32.xlu1 %v2756_v15  ;;  %v2641_v15 = vsub.f32 %v10038_v7, %v2605_v33 }
 0x62c   : > { %v10192_v18 = vpop.eup %8158 }
 0x62d   : > { %v10194_v41 = vpop.eup %8160  ;;  %v2792_v39 = vsel %vm1354_vm1, %v10192_v18, 0.0 }
 0x62e   : > { %v10200_v29 = vpop.eup %8162  ;;  %2781 = vadd.xlane.f32.xlu1 %v2780_v26  ;;  %2793 = vadd.xlane.f32.xlu0 %v2792_v39  ;;  %v2777_v19 = vsel %vm1354_vm1, %v10194_v41, 0.0  ;;  %v2702_v26 = vmul.f32 1.442695, %v2641_v15 }
 0x62f   : > { %v10202_v13 = vpop.eup %8164  ;;  %v2774_v28 = vsel %vm1354_vm1, %v10200_v29, 0.0 }
 0x630   : > { %v10208_v45 = vpop.eup %8166  ;;  %v2801_v55 = vsel %vm1354_vm1, %v10202_v13, 0.0  ;;  %8170 = vpow2.f32 %v2702_v26 }
 0x631   : > { %v2768_v31 = vsel %vm1354_vm1, %v10208_v45, 0.0  ;;  %v10214_v2 = vpop.eup %8168 }
 0x632   : > { %2775 = vadd.xlane.f32.xlu1 %v2774_v28  ;;  %2778 = vadd.xlane.f32.xlu0 %v2777_v19  ;;  %v2771_v6 = vsel %vm1354_vm1, %v10214_v2, 0.0  ;;  %v10263_v19 = vpop.permute.xlu0 %3299 }
 0x636   : > { %2769 = vadd.xlane.f32.xlu1 %v2768_v31  ;;  %2802 = vadd.xlane.f32.xlu0 %v2801_v55 }
 0x63a   : > { %2772 = vadd.xlane.f32.xlu0 %v2771_v6  ;;  %v10253_v39 = vpop.eup %8170 }
 0x63b   : > { %v2795_v7 = vsel %vm1354_vm1, %v10253_v39, 0.0 }
 0x647   : > { %3402 = vrot.lane.b32.xlu1 %v12393_v5, %s8692_s26 }
 0x64b   : > { %3303 = vrot.lane.b32.xlu1 %v12394_v46, %s8692_s26 }
 0x64f   : > { %3404 = vrot.lane.b32.xlu1 %v12395_v9, %s8692_s26 }
 0x650   : > { %3301 = vrot.lane.b32.xlu0 %v12396_v50, %s8692_s26 }
 0x652   : > { %v2716_v55 = vpop.xlane.xlu0 %2715 }
 0x653   : > { %3406 = vrot.lane.b32.xlu1 %v9073_v10, %s8692_s26 }
 0x654   : > { %3289 = vrot.lane.b32.xlu0 %v12397_v4, %s8692_s26 }
 0x657   : > { %3291 = vrot.lane.b32.xlu1 %v8993_v60, %s8692_s26 }
 0x658   : > { %3507 = vrot.lane.b32.xlu0 %v9099_v48, %s8692_s26 }
 0x65b   : > { %3509 = vrot.lane.b32.xlu1 %v9121_v17, %s8692_s26 }
 0x65c   : > { %3408 = vrot.lane.b32.xlu0 %v12326_v0, %s8692_s26 }
 0x660   : > { %3394 = vrot.lane.b32.xlu0 %v12328_v54, %s8692_s26 }
 0x664   : > { %3612 = vrot.lane.b32.xlu0 %v12330_v62, %s8692_s26 }
 0x668   : > { %3293 = vrot.lane.b32.xlu0 %v12331_v21, %s8692_s26 }
 0x66c   : > { %3513 = vrot.lane.b32.xlu0 %v12333_v12, %s8692_s26  ;;  %v12402_v12 = vld [vmem:[#allocation25_spill] sm:$0xff] }
 0x670   : > { %3499 = vrot.lane.b32.xlu0 %v12334_v49, %s8692_s26 }
 0x674   : > { %3616 = vrot.lane.b32.xlu0 %v12336_v24, %s8692_s26  ;;  %v12400_v24 = vld [vmem:[#allocation26_spill] sm:$0xff] }
 0x678   : > { %3400 = vrot.lane.b32.xlu0 %v12338_v52, %s8692_s26 }
 0x67c   : > { %3604 = vrot.lane.b32.xlu0 %v12340_v38, %s8692_s26 }
 0x67f   : > { %2796 = vadd.xlane.f32.xlu1 %v2795_v7  ;;  %v2740_v28 = vpop.xlane.xlu1 %2739  ;;  %v12398_v7 = vld [vmem:[#allocation34_spill] sm:$0xff] }
 0x680   : > { %3503 = vrot.lane.b32.xlu0 %v12341_v11, %s8692_s26  ;;  %v12405_v11 = vld [vmem:[#allocation52_spill] sm:$0xff] }
 0x683   : > { %v2710_v33 = vpop.xlane.xlu0 %2709 }
 0x684   : > { %3608 = vrot.lane.b32.xlu0 %v12343_v30, %s8692_s26  ;;  %8172 = vrcp.f32 %v2710_v33  ;;  %v12399_v30 = vld [vmem:[#allocation42_spill] sm:$0xff] }
 0x687   : > { %v2734_v31 = vpop.xlane.xlu1 %2733 }
 0x688   : > { %4077 = vrot.lane.b32.xlu0 %v12344_v8, %s8692_s26  ;;  %v12404_v8 = vld [vmem:[#allocation48_spill] sm:$0xff] }
 0x68b   : > { %v2719_v6 = vpop.xlane.xlu1 %2718 }
 0x68c   : > { %4079 = vrot.lane.b32.xlu0 %v12345_v25, %s8692_s26  ;;  %8174 = vrcp.f32 %v2719_v6  ;;  %v12401_v6 = vld [vmem:[#allocation49_spill] sm:$0xff] }
 0x68d   : > { %8176 = vrcp.f32 %v2716_v55 }
 0x68e   : > { %v8173_v55 = vpop.eup %8172 }
 0x68f   : > { %v2743_v15 = vpop.xlane.xlu1 %2742  ;;  %v2836_v0 = vmul.f32 %v8173_v55, %v10078_v36 }
 0x690   : > { %3511 = vrot.lane.b32.xlu1 %v9141_v44, %s8692_s26  ;;  %4083 = vrot.lane.b32.xlu0 %v12346_v20, %s8692_s26 }
 0x693   : > { %v2713_v26 = vpop.xlane.xlu1 %2712 }
 0x694   : > { %8178 = vrcp.f32 %v2713_v26  ;;  %3396 = vrot.lane.b32.xlu1 %v12398_v7, %s8692_s26  ;;  %4168 = vrot.lane.b32.xlu0 %v12399_v30, %s8692_s26 }
 0x695   : > { %8180 = vrcp.f32 %v2743_v15  ;;  %v12403_v15 = vld [vmem:[#allocation46_spill] sm:$0xff] }
 0x696   : > { %8182 = vrcp.f32 %v2734_v31  ;;  %v8175_v49 = vpop.eup %8174 }
 0x697   : > { %8184 = vrcp.f32 %v2740_v28  ;;  %v2737_v25 = vpop.xlane.xlu1 %2736  ;;  %v2722_v38 = vpop.xlane.xlu0 %2721 }
 0x698   : > { %8186 = vrcp.f32 %v2737_v25  ;;  %3295 = vrot.lane.b32.xlu1 %v12400_v24, %s8692_s26  ;;  %4257 = vrot.lane.b32.xlu0 %v12401_v6, %s8692_s26  ;;  %v8177_v28 = vpop.eup %8176  ;;  %v2839_v25 = vmul.f32 %v8175_v49, %v10091_v58 }
 0x69b   : > { %v2728_v33 = vpop.xlane.xlu1 %2727  ;;  %v2755_v26 = vpop.xlane.xlu0 %2754 }
 0x69c   : > { %3614 = vrot.lane.b32.xlu1 %v12402_v12, %s8692_s26  ;;  %4172 = vrot.lane.b32.xlu0 %v12403_v15, %s8692_s26  ;;  %v12406_v15 = vld [vmem:[#allocation98_spill] sm:$0xff] }
 0x69d   : > { %v2838_v52 = vmul.f32 %v8177_v28, %v12406_v15  ;;  %v12415_v15 = vld [vmem:[#allocation23_spill] sm:$0xff] }
 0x69e   : > { %v8179_v31 = vpop.eup %8178 }
 0x69f   : > { %v8181_v30 = vpop.eup %8180  ;;  %v2752_v44 = vpop.xlane.xlu1 %2751  ;;  %v2837_v6 = vmul.f32 %v8179_v31, %v10102_v35  ;;  %v2869_v58 = vpack.c.bf16 %v2839_v25, %v2838_v52  ;;  %v12409_v52 = vld [vmem:[#allocation60_spill] sm:$0xff]  ;;  %v12417_v25 = vld [vmem:[#allocation94_spill] sm:$0xff] }
 0x6a0   : > { %v2749_v54 = vpop.xlane.xlu0 %2748  ;;  %v8183_v20 = vpop.eup %8182  ;;  %3501 = vrot.lane.b32.xlu1 %v12404_v8, %s8692_s26  ;;  %4261 = vrot.lane.b32.xlu0 %v12405_v11, %s8692_s26  ;;  %8188 = vrcp.f32 %v2752_v44  ;;  %v2847_v49 = vmul.f32 %v8181_v30, %v10096_v27  ;;  %v12407_v44 = vld [vmem:[#allocation38_spill] sm:$0xff]  ;;  %v12410_v30 = vld [vmem:[#allocation68_spill] sm:$0xff] }
 0x6a1   : > { %v8185_v12 = vpop.eup %8184  ;;  %v2868_v62 = vpack.c.bf16 %v2837_v6, %v2836_v0  ;;  %8190 = vrcp.f32 %v2749_v54  ;;  %v2844_v55 = vmul.f32 %v8183_v20, %v10084_v51  ;;  %v12408_v0 = vld [vmem:[#allocation17_spill] sm:$0xff] }
 0x6a2   : > { %v8187_v7 = vpop.eup %8186  ;;  %8192 = vrcp.f32 %v2755_v26  ;;  %v2846_v11 = vmul.f32 %v8185_v12, %v10073_v40  ;;  %v12411_v40 = vld [vmem:[#allocation33_spill] sm:$0xff] }
 0x6a3   : > { %v2746_v36 = vpop.xlane.xlu1 %2745  ;;  %7398 = vmatprep.mubr.msk.bf16.mxu0 %vm1354_vm1, %v2868_v62  ;;  %v2845_v31 = vmul.f32 %v8187_v7, %v10108_v34  ;;  %v12412_v51 = vld [vmem:[#allocation69_spill] sm:$0xff]  ;;  %v12414_v34 = vld [vmem:[#allocation67_spill] sm:$0xff] }
 0x6a4   : > { %v10295_v35 = vpop.xlane.xlu0 %2766  ;;  %8194 = vrcp.f32 %v2746_v36  ;;  %3398 = vrot.lane.b32.xlu1 %v12407_v44, %s8692_s26  ;;  %4474 = vrot.lane.b32.xlu0 %v12408_v0, %s8693_s14  ;;  %v2873_v62 = vpack.c.bf16 %v2847_v49, %v2846_v11  ;;  %v12413_v11 = vld [vmem:[#allocation95_spill] sm:$0xff] }
 0x6a5   : > { %7399 = vmatmul.mubr.msk.bf16.vlgmr.msra.gmra.mrb[84].mxu0 %vm1354_vm1, %v2869_v58  ;;  %v2872_v54 = vpack.c.bf16 %v2845_v31, %v2844_v55  ;;  %v12418_v55 = vld [vmem:[#allocation16_spill] sm:$0xff] }
 0x6a6   : > { %7423 = vmatpush3.bf16.msra.mxu0 %v12409_v52  ;;  %v12421_v52 = vld [vmem:[#allocation31_spill] sm:$0xff] }
 0x6a7   : > { %7424 = vmatprep.subr.bf16.mxu0 %v12410_v30  ;;  %7414 = vmatprep.mubr.msk.bf16.mxu1 %vm1354_vm1, %v2872_v54  ;;  %v2731_v20 = vpop.xlane.xlu1 %2730 }
 0x6a8   : > { %v2791_v12 = vpop.xlane.xlu0 %2790  ;;  %7415 = vmatmul.mubr.msk.bf16.vlgmr.msra.gmra.mrb[108].mxu1 %vm1354_vm1, %v2873_v62  ;;  %3618 = vrot.lane.b32.xlu1 %v12411_v40, %s8692_s26  ;;  %8196 = vrcp.f32 %v2731_v20  ;;  %v12420_v62 = vld [vmem:[#allocation99_spill] sm:$0xff] }
 0x6a9   : > { %7439 = vmatpush3.bf16.msra.mxu1 %v12412_v51  ;;  %4478 = vrot.lane.b32.xlu0 %v12396_v50, %s8693_s14  ;;  %8198 = vrcp.f32 %v2722_v38  ;;  %v12416_v50 = vld [vmem:[#allocation96_spill] sm:$0xff] }
 0x6aa   : > { %7425 = vmatpush3.bf16.msra.mxu0 %v12410_v30  ;;  %7440 = vmatprep.subr.bf16.mxu1 %v12413_v11  ;;  %v8189_v27 = vpop.eup %8188  ;;  %8200 = vrcp.f32 %v2728_v33 }
 0x6ab   : > { %7426 = vmatprep.subr.bf16.mxu0 %v12414_v34  ;;  %v2725_v7 = vpop.xlane.xlu1 %2724  ;;  %v8191_v26 = vpop.eup %8190  ;;  %v2850_v33 = vmul.f32 %v8189_v27, %v10124_v47  ;;  %v12419_v47 = vld [vmem:[#allocation97_spill] sm:$0xff] }
 0x6ac   : > { %v2761_v6 = vpop.xlane.xlu0 %2760  ;;  %8202 = vrcp.f32 %v2725_v7  ;;  %3606 = vrot.lane.b32.xlu1 %v12415_v15, %s8692_s26  ;;  %v8193_v28 = vpop.eup %8192  ;;  %v2849_v36 = vmul.f32 %v8191_v26, %v10130_v43  ;;  %v12422_v7 = vld [vmem:[#allocation40_spill] sm:$0xff] }
 0x6ad   : > { %7441 = vmatpush3.bf16.msra.mxu1 %v12413_v11  ;;  %4581 = vrot.lane.b32.xlu0 %v12395_v9, %s8693_s14  ;;  %v2851_v31 = vmul.f32 %v8193_v28, %v10120_v3 }
 0x6ae   : > { %v8195_v38 = vpop.eup %8194  ;;  %7427 = vmatpush3.bf16.msra.mxu0 %v12414_v34  ;;  %7442 = vmatprep.subr.bf16.mxu1 %v12416_v50 }
 0x6af   : > { %7428 = vmatprep.subr.bf16.mxu0 %v12417_v25  ;;  %v2764_v49 = vpop.xlane.xlu1 %2763  ;;  %v2848_v58 = vmul.f32 %v8195_v38, %v10133_v59  ;;  %v2875_v54 = vpack.c.bf16 %v2851_v31, %v2850_v33  ;;  %v12424_v33 = vld [vmem:[#allocation50_spill] sm:$0xff] }
 0x6b0   : > { %3505 = vrot.lane.b32.xlu1 %v12418_v55, %s8692_s26  ;;  %v2785_v9 = vpop.xlane.xlu0 %2784  ;;  %8204 = vrcp.f32 %v2764_v49 }
 0x6b1   : > { %7443 = vmatpush3.bf16.msra.mxu1 %v12416_v50  ;;  %4468 = vrot.lane.b32.xlu0 %v8993_v60, %s8693_s14  ;;  %v2874_v0 = vpack.c.bf16 %v2849_v36, %v2848_v58  ;;  %8206 = vrcp.f32 %v2761_v6 }
 0x6b2   : > { %7429 = vmatpush3.bf16.msra.mxu0 %v12417_v25  ;;  %7444 = vmatprep.subr.bf16.mxu1 %v12419_v47  ;;  %v8197_v59 = vpop.eup %8196  ;;  %8208 = vrcp.f32 %v10295_v35 }
 0x6b3   : > { %7806 = vmatprep.subr.msk.bf16.mxu0 %vm997_vm0, %v12420_v62  ;;  %v2788_v43 = vpop.xlane.xlu1 %2787  ;;  %7418 = vmatprep.mubr.msk.bf16.mxu1 %vm1354_vm1, %v2874_v0  ;;  %v8199_v3 = vpop.eup %8198  ;;  %v2843_v20 = vmul.f32 %v8197_v59, %v10142_v57  ;;  %v12425_v59 = vld [vmem:[#allocation47_spill] sm:$0xff] }
 0x6b4   : > { %3610 = vrot.lane.b32.xlu1 %v12421_v52, %s8692_s26  ;;  %7419 = vmatmul.mubr.msk.bf16.gmra.mrb[112].mxu1 %vm1354_vm1, %v2875_v54  ;;  %v8201_v60 = vpop.eup %8200  ;;  %v10345_v51 = vpop.xlane.xlu0 %2799  ;;  %v2840_v27 = vmul.f32 %v8199_v3, %v10111_v1  ;;  %v12423_v1 = vld [vmem:[#allocation44_spill] sm:$0xff] }
 0x6b5   : > { %7445 = vmatpush3.bf16.msra.mxu1 %v12419_v47  ;;  %v2842_v26 = vmul.f32 %v8201_v60, %v10114_v56 }
 0x6b6   : > { %v8203_v30 = vpop.eup %8202 }
 0x6b7   : > { %v2758_v11 = vpop.xlane.xlu1 %2757  ;;  %v2841_v34 = vmul.f32 %v8203_v30, %v10152_v16  ;;  %v2871_v6 = vpack.c.bf16 %v2843_v20, %v2842_v26 }
 0x6b8   : > { %8210 = vrcp.f32 %v2758_v11  ;;  %4081 = vrot.lane.b32.xlu1 %v12422_v7, %s8692_s26 }
 0x6b9   : > { %8212 = vrcp.f32 %v2788_v43  ;;  %v2870_v28 = vpack.c.bf16 %v2841_v34, %v2840_v27  ;;  %v12426_v27 = vld [vmem:[#allocation54_spill] sm:$0xff] }
 0x6ba   : > { %8214 = vrcp.f32 %v2785_v9  ;;  %v8205_v16 = vpop.eup %8204 }
 0x6bb   : > { %8216 = vrcp.f32 %v2791_v12  ;;  %v2782_v57 = vpop.xlane.xlu1 %2781  ;;  %7402 = vmatprep.mubr.msk.bf16.mxu0 %vm1354_vm1, %v2870_v28  ;;  %v10353_v35 = vpop.xlane.xlu0 %2793  ;;  %v2854_v49 = vmul.f32 %v8205_v16, %v10162_v23 }
 0x6bc   : > { %8218 = vrcp.f32 %v2782_v57  ;;  %4166 = vrot.lane.b32.xlu1 %v12423_v1, %s8692_s26  ;;  %7403 = vmatmul.mubr.msk.bf16.gmra.mrb[88].mxu0 %vm1354_vm1, %v2871_v6  ;;  %v8207_v56 = vpop.eup %8206 }
 0x6bd   : > { %v8209_v25 = vpop.eup %8208  ;;  %v2853_v0 = vmul.f32 %v8207_v56, %v10158_v32  ;;  %v3321_v56 = vsel %vm997_vm0, %v10263_v19, 0 }
 0x6be   : > { %v2855_v54 = vmul.f32 %v8209_v25, %v10139_v22 }
 0x6bf   : > { %v2776_v38 = vpop.xlane.xlu1 %2775  ;;  %v2779_v50 = vpop.xlane.xlu0 %2778 }
 0x6c0   : > { %4255 = vrot.lane.b32.xlu1 %v12424_v33, %s8692_s26  ;;  %8220 = vrcp.f32 %v2776_v38  ;;  %v2877_v23 = vpack.c.bf16 %v2855_v54, %v2854_v49 }
 0x6c1   : > { %8222 = vrcp.f32 %v2779_v50  ;;  %v12428_v50 = vld [vmem:[#allocation55_spill] sm:$0xff] }
 0x6c2   : > { %v8211_v12 = vpop.eup %8210 }
 0x6c3   : > { %v8213_v58 = vpop.eup %8212  ;;  %v2770_v36 = vpop.xlane.xlu1 %2769  ;;  %v2852_v9 = vmul.f32 %v8211_v12, %v10186_v61 }
 0x6c4   : > { %v10361_v31 = vpop.xlane.xlu0 %2802  ;;  %v8215_v47 = vpop.eup %8214  ;;  %4170 = vrot.lane.b32.xlu1 %v12425_v59, %s8692_s26  ;;  %v2862_v30 = vmul.f32 %v8213_v58, %v10177_v14  ;;  %8224 = vrcp.f32 %v2770_v36  ;;  %v3318_v14 = vsel %vm997_vm0, %v12420_v62, 0 }
 0x6c5   : > { %v8217_v43 = vpop.eup %8216  ;;  %v2876_v3 = vpack.c.bf16 %v2853_v0, %v2852_v9  ;;  %v2861_v22 = vmul.f32 %v8215_v47, %v10168_v63  ;;  %v12429_v47 = vld [vmem:[#allocation58_spill] sm:$0xff] }
 0x6c6   : > { %v8219_v60 = vpop.eup %8218  ;;  %v2863_v11 = vmul.f32 %v8217_v43, %v10148_v37 }
 0x6c7   : > { %v3403_v20 = vpop.permute.xlu1 %3402  ;;  %7430 = vmatprep.mubr.msk.bf16.mxu0 %vm1354_vm1, %v2876_v3  ;;  %v2860_v32 = vmul.f32 %v8219_v60, %v10190_v53  ;;  %v12427_v53 = vld [vmem:[#allocation56_spill] sm:$0xff] }
 0x6c8   : > { %v2773_v61 = vpop.xlane.xlu0 %2772  ;;  %4259 = vrot.lane.b32.xlu1 %v12426_v27, %s8692_s26  ;;  %7431 = vmatmul.mubr.msk.bf16.vlgmr.msra.gmra.mrb[92].mxu0 %vm1354_vm1, %v2877_v23  ;;  %v2881_v26 = vpack.c.bf16 %v2863_v11, %v2862_v30  ;;  %v3423_v28 = vsel %vm997_vm0, %v3403_v20, 0  ;;  %v12431_v3 = vld [vmem:[#allocation20_spill] sm:$0xff] }
 0x6c9   : > { %8226 = vrcp.f32 %v2773_v61  ;;  %7455 = vmatpush3.bf16.xpose.msra.mxu0 %v3318_v14  ;;  %7810 = vmatprep.subr.msk.bf16.mxu1 %vm997_vm0, %v3403_v20  ;;  %v2880_v34 = vpack.c.bf16 %v2861_v22, %v2860_v32 }
 0x6ca   : > { %7807 = vmatprep.subr.msk.bf16.mxu0 %vm997_vm0, %v10263_v19  ;;  %v8221_v62 = vpop.eup %8220  ;;  %8228 = vrcp.f32 %v10361_v31 }
 0x6cb   : > { %v3304_v63 = vpop.permute.xlu1 %3303  ;;  %7446 = vmatprep.mubr.msk.bf16.mxu1 %vm1354_vm1, %v2880_v34  ;;  %v8223_v6 = vpop.eup %8222  ;;  %v2858_v12 = vmul.f32 %v8221_v62, %v10200_v29  ;;  %8230 = vrcp.f32 %v10353_v35 }
 0x6cc   : > { %v3302_v37 = vpop.permute.xlu0 %3301  ;;  %4344 = vrot.lane.b32.xlu1 %v12427_v53, %s8692_s26  ;;  %7447 = vmatmul.mubr.msk.bf16.vlgmr.msra.gmra.mrb[116].mxu1 %vm1354_vm1, %v2881_v26  ;;  %v2859_v49 = vmul.f32 %v8223_v6, %v10194_v41  ;;  %v12430_v41 = vld [vmem:[#allocation57_spill] sm:$0xff]  ;;  %v3327_v23 = vsel %vm997_vm0, %v3304_v63, 0  ;;  %8232 = vrcp.f32 %v10345_v51 }
 0x6cd   : > { %7471 = vmatpush3.bf16.xpose.msra.mxu1 %v3423_v28 }
 0x6ce   : > { %v8225_v38 = vpop.eup %8224  ;;  %v2879_v43 = vpack.c.bf16 %v2859_v49, %v2858_v12 }
 0x6cf   : > { %v3405_v57 = vpop.permute.xlu1 %3404  ;;  %v2856_v9 = vmul.f32 %v8225_v38, %v10208_v45  ;;  %v3324_v45 = vsel %vm997_vm0, %v3302_v37, 0 }
 0x6d0   : > { %v3290_v16 = vpop.permute.xlu0 %3289  ;;  %4346 = vrot.lane.b32.xlu1 %v12428_v50, %s8692_s26  ;;  %7811 = vmatprep.subr.msk.bf16.mxu1 %vm997_vm0, %v3405_v57  ;;  %v3426_v19 = vsel %vm997_vm0, %v3405_v57, 0 }
 0x6d1   : > { %7457 = vmatpush3.bf16.xpose.msra.mxu0 %v3321_v56 }
 0x6d2   : > { %7808 = vmatprep.subr.msk.bf16.mxu0 %vm997_vm0, %v3302_v37 }
 0x6d3   : > { %v8227_v25 = vpop.eup %8226  ;;  %v3407_v58 = vpop.permute.xlu1 %3406 }
 0x6d4   : > { %v3508_v36 = vpop.permute.xlu0 %3507  ;;  %v2857_v0 = vmul.f32 %v8227_v25, %v10214_v2  ;;  %4348 = vrot.lane.b32.xlu1 %v12429_v47, %s8692_s26  ;;  %v3429_v60 = vsel %vm997_vm0, %v3407_v58, 0  ;;  %v8229_v62 = vpop.eup %8228 }
 0x6d5   : > { %7473 = vmatpush3.bf16.xpose.msra.mxu1 %v3426_v19  ;;  %v8231_v31 = vpop.eup %8230  ;;  %v2867_v51 = vmul.f32 %v8229_v62, %v10202_v13 }
 0x6d6   : > { %v2878_v54 = vpack.c.bf16 %v2857_v0, %v2856_v9  ;;  %7812 = vmatprep.subr.msk.bf16.mxu1 %vm997_vm0, %v3407_v58  ;;  %v2864_v56 = vmul.f32 %v8231_v31, %v10192_v18 }
 0x6d7   : > { %v3292_v20 = vpop.permute.xlu1 %3291 }
 0x6d8   : > { %7434 = vmatprep.mubr.msk.bf16.mxu0 %vm1354_vm1, %v2878_v54  ;;  %v3409_v29 = vpop.permute.xlu0 %3408  ;;  %4350 = vrot.lane.b32.xlu1 %v12430_v41, %s8692_s26 }
 0x6d9   : > { %7435 = vmatmul.mubr.msk.bf16.gmra.mrb[96].mxu0 %vm1354_vm1, %v2879_v43  ;;  %v3432_v61 = vsel %vm997_vm0, %v3409_v29, 0 }
 0x6da   : > { %7459 = vmatpush3.bf16.xpose.msra.mxu0 %v3324_v45  ;;  %7462 = vmatprep.mubr.msk.bf16.mxu0 %vm997_vm0, %v3290_v16  ;;  %v8233_v16 = vpop.eup %8232 }
 0x6db   : > { %7809 = vmatprep.subr.msk.bf16.mxu0 %vm997_vm0, %v3304_v63  ;;  %v3510_v22 = vpop.permute.xlu1 %3509  ;;  %v2866_v49 = vmul.f32 %v8233_v16, %v10179_v42 }
 0x6dc   : > { %v10407_v2 = vpop.permute.xlu0 %3394  ;;  %4476 = vrot.lane.b32.xlu1 %v12431_v3, %s8693_s14  ;;  %v3531_v11 = vsel %vm997_vm0, %v3510_v22, 0 }
 0x6dd   : > { %7475 = vmatpush3.bf16.xpose.msra.mxu1 %v3429_v60  ;;  %v2883_v9 = vpack.c.bf16 %v2867_v51, %v2866_v49 }
 0x6de   : > { %7813 = vmatprep.subr.msk.bf16.mxu1 %vm997_vm0, %v3409_v29 }
 0x6e0   : > { %4579 = vrot.lane.b32.xlu1 %v12393_v5, %s8693_s14  ;;  %v10416_v30 = vpop.permute.xlu0 %3612  ;;  %v3528_v5 = vsel %vm997_vm0, %v3508_v36, 0 }
 0x6e2   : > { %7461 = vmatpush3.bf16.xpose.msra.mxu0 %v3327_v23 }
 0x6e3   : > { %7814 = vmatprep.subr.msk.bf16.mxu0 %vm997_vm0, %v3508_v36 }
 0x6e4   : > { %4480 = vrot.lane.b32.xlu1 %v12394_v46, %s8693_s14  ;;  %v3294_v32 = vpop.permute.xlu0 %3293 }
 0x6e5   : > { %7477 = vmatpush3.bf16.xpose.msra.mxu1 %v3432_v61 }
 0x6e6   : > { %7818 = vmatprep.subr.msk.bf16.mxu1 %vm997_vm0, %v10416_v30 }
 0x6e8   : > { %4466 = vrot.lane.b32.xlu1 %v12397_v4, %s8693_s14  ;;  %v3514_v46 = vpop.permute.xlu0 %3513 }
 0x6e9   : > { %7463 = vmatmul.mubr.msk.bf16.vlgmr.msra.gmra.mrb[100].mxu0 %vm997_vm0, %v3292_v20  ;;  %v3537_v12 = vsel %vm997_vm0, %v3514_v46, 0 }
 0x6ea   : > { %7466 = vmatprep.mubr.msk.bf16.mxu0 %vm997_vm0, %v3294_v32  ;;  %7487 = vmatpush3.bf16.xpose.msra.mxu0 %v3528_v5 }
 0x6eb   : > { %7815 = vmatprep.subr.msk.bf16.mxu0 %vm997_vm0, %v3510_v22 }
 0x6ec   : > { %4583 = vrot.lane.b32.xlu1 %v9073_v10, %s8693_s14  ;;  %v3500_v14 = vpop.permute.xlu0 %3499 }
 0x6f0   : > { %v3617_v34 = vpop.permute.xlu0 %3616 }
 0x6f2   : > { %7489 = vmatpush3.bf16.xpose.msra.mxu0 %v3531_v11 }
 0x6f4   : > { %v3401_v26 = vpop.permute.xlu0 %3400 }
 0x6f8   : > { %v3605_v63 = vpop.permute.xlu0 %3604 }
 0x6fc   : > { %v3504_v37 = vpop.permute.xlu0 %3503 }
 0x700   : > { %v10439_v6 = vpop.permute.xlu0 %3608 }
 0x704   : > { %v4078_v58 = vpop.permute.xlu0 %4077 }
 0x708   : > { %v4080_v13 = vpop.permute.xlu0 %4079 }
 0x70c   : > { %v2797_v4 = vpop.xlane.xlu1 %2796  ;;  %v4084_v60 = vpop.permute.xlu0 %4083 }
 0x70d   : > { %8234 = vrcp.f32 %v2797_v4 }
 0x710   : > { %v3512_v28 = vpop.permute.xlu1 %3511  ;;  %v4169_v61 = vpop.permute.xlu0 %4168 }
 0x711   : > { %7816 = vmatprep.subr.msk.bf16.mxu0 %vm997_vm0, %v3512_v28  ;;  %v3534_v10 = vsel %vm997_vm0, %v3512_v28, 0 }
 0x712   : > { %7491 = vmatpush3.bf16.xpose.msra.mxu0 %v3534_v10 }
 0x713   : > { %7817 = vmatprep.subr.msk.bf16.mxu0 %vm997_vm0, %v3514_v46 }
 0x714   : > { %v3397_v57 = vpop.permute.xlu1 %3396  ;;  %v10473_v5 = vpop.permute.xlu0 %4257 }
 0x717   : > { %v8235_v35 = vpop.eup %8234 }
 0x718   : > { %v3296_v38 = vpop.permute.xlu1 %3295  ;;  %v2865_v25 = vmul.f32 %v8235_v35, %v10253_v39  ;;  %v3633_v39 = vsel %vm997_vm0, %v10416_v30, 0  ;;  %v4173_v46 = vpop.permute.xlu0 %4172 }
 0x719   : > { %7467 = vmatmul.mubr.msk.bf16.gmra.mrb[104].mxu0 %vm997_vm0, %v3296_v38 }
 0x71a   : > { %7493 = vmatpush3.bf16.xpose.msra.mxu0 %v3537_v12  ;;  %7494 = vmatprep.mubr.msk.bf16.mxu0 %vm997_vm0, %v3500_v14  ;;  %v2882_v36 = vpack.c.bf16 %v2865_v25, %v2864_v56 }
 0x71b   : > { %7518 = vmatprep.subr.bf16.mxu0 %v4078_v58 }
 0x71c   : > { %v3615_v0 = vpop.permute.xlu1 %3614  ;;  %7450 = vmatprep.mubr.msk.bf16.mxu1 %vm1354_vm1, %v2882_v36 }
 0x71d   : > { %7451 = vmatmul.mubr.msk.bf16.gmra.mrb[120].mxu1 %vm1354_vm1, %v2883_v9  ;;  %v3636_v43 = vsel %vm997_vm0, %v3615_v0, 0 }
 0x71e   : > { %7478 = vmatprep.mubr.msk.bf16.mxu1 %vm997_vm0, %v10407_v2  ;;  %v3639_v2 = vsel %vm997_vm0, %v3617_v34, 0 }
 0x720   : > { %v3502_v18 = vpop.permute.xlu1 %3501 }
 0x721   : > { %7495 = vmatmul.mubr.msk.bf16.vlgmr.msra.gmra.mrb[108].mxu0 %vm997_vm0, %v3502_v18 }
 0x722   : > { %7498 = vmatprep.mubr.msk.bf16.mxu0 %vm997_vm0, %v3504_v37  ;;  %7519 = vmatpush3.bf16.msra.mxu0 %v4078_v58 }
 0x723   : > { %7520 = vmatprep.subr.bf16.mxu0 %v4080_v13 }
 0x724   : > { %v3399_v42 = vpop.permute.xlu1 %3398 }
 0x725   : > { %7479 = vmatmul.mubr.msk.bf16.vlgmr.msra.gmra.mrb[124].mxu1 %vm997_vm0, %v3397_v57 }
 0x726   : > { %7503 = vmatpush3.bf16.xpose.msra.mxu1 %v3633_v39  ;;  %7482 = vmatprep.mubr.msk.bf16.mxu1 %vm997_vm0, %v3399_v42 }
 0x727   : > { %7819 = vmatprep.subr.msk.bf16.mxu1 %vm997_vm0, %v3615_v0  ;;  %7521 = vmatpush3.bf16.msra.mxu0 %v4080_v13 }
 0x728   : > { %v3619_v19 = vpop.permute.xlu1 %3618 }
 0x729   : > { %v3642_v30 = vsel %vm997_vm0, %v3619_v19, 0 }
 0x72c   : > { %v3607_v54 = vpop.permute.xlu1 %3606 }
 0x72d   : > { %7483 = vmatmul.mubr.msk.bf16.gmra.mrb[128].mxu1 %vm997_vm0, %v3401_v26 }
 0x72e   : > { %7505 = vmatpush3.bf16.xpose.msra.mxu1 %v3636_v43  ;;  %7510 = vmatprep.mubr.msk.bf16.mxu1 %vm997_vm0, %v3605_v63 }
 0x72f   : > { %7820 = vmatprep.subr.msk.bf16.mxu1 %vm997_vm0, %v3617_v34 }
 0x730   : > { %v3506_v29 = vpop.permute.xlu1 %3505 }
 0x731   : > { %7499 = vmatmul.mubr.msk.bf16.gmra.mrb[112].mxu0 %vm997_vm0, %v3506_v29 }
 0x734   : > { %v3611_v45 = vpop.permute.xlu1 %3610 }
 0x736   : > { %7507 = vmatpush3.bf16.xpose.msra.mxu1 %v3639_v2  ;;  %v6825_v2 = vld [vmem:[#allocation7 + $0x48] sm:$0xff]  }
 0x737   : > { %7821 = vmatprep.subr.msk.bf16.mxu1 %vm997_vm0, %v3619_v19  ;;  %v10565_v38 = vunpack.c.l.bf16 %v6825_v2 }
 0x738   : > { %v4082_v3 = vpop.permute.xlu1 %4081 }
 0x739   : > { %7522 = vmatprep.subr.bf16.mxu0 %v4082_v3 }
 0x73a   : > { %7523 = vmatpush3.bf16.msra.mxu0 %v4082_v3 }
 0x73b   : > { %7524 = vmatprep.subr.bf16.mxu0 %v4084_v60 }
 0x73c   : > { %v4167_v23 = vpop.permute.xlu1 %4166 }
 0x73e   : > { %7509 = vmatpush3.bf16.xpose.msra.mxu1 %v3642_v30  ;;  %7525 = vmatpush3.bf16.msra.mxu0 %v4084_v60 }
 0x73f   : > { %7534 = vmatprep.subr.bf16.mxu1 %v4167_v23 }
 0x740   : > { %v10467_v20 = vpop.permute.xlu1 %4255 }
 0x741   : > { %7550 = vmatprep.subr.bf16.mxu0 %v10467_v20 }
 0x744   : > { %v4171_v32 = vpop.permute.xlu1 %4170 }
 0x745   : > { %7511 = vmatmul.mubr.msk.bf16.vlgmr.msra.gmra.mrb[132].mxu1 %vm997_vm0, %v3607_v54 }
 0x746   : > { %7514 = vmatprep.mubr.msk.bf16.mxu1 %vm997_vm0, %v10439_v6  ;;  %7535 = vmatpush3.bf16.msra.mxu1 %v4167_v23 }
 0x747   : > { %7536 = vmatprep.subr.bf16.mxu1 %v4169_v61 }
 0x748   : > { %v10475_v22 = vpop.permute.xlu1 %4259 }
 0x74a   : > { %7537 = vmatpush3.bf16.msra.mxu1 %v4169_v61 }
 0x74b   : > { %7538 = vmatprep.subr.bf16.mxu1 %v4171_v32 }
 0x74c   : > { %v10478_v11 = vpop.permute.xlu1 %4344 }
 0x74d   : > { %7515 = vmatmul.mubr.msk.bf16.gmra.mrb[136].mxu1 %vm997_vm0, %v3611_v45 }
 0x74e   : > { %7539 = vmatpush3.bf16.msra.mxu1 %v4171_v32 }
 0x74f   : > { %7540 = vmatprep.subr.bf16.mxu1 %v4173_v46 }
 0x752   : > { %7541 = vmatpush3.bf16.msra.mxu1 %v4173_v46 }
 0x753   : > { %7566 = vmatprep.subr.bf16.mxu1 %v10478_v11 }
 0x778   : > { %v10481_v14 = vpop.f32.mrb[84].mxu0 }
 0x779   : > { %12432 = vst [vmem:[#allocation32_spill] sm:$0xff] %v10481_v14  ;;  %v10483_v34 = vpop.f32.mrb[85].mxu0 }
 0x77a   : > { %12433 = vst [vmem:[#allocation28_spill] sm:$0xff] %v10483_v34  ;;  %v10485_v26 = vpop.f32.mrb[86].mxu0 }
 0x77b   : > { %12434 = vst [vmem:[#allocation36_spill] sm:$0xff] %v10485_v26  ;;  %v10489_v4 = vpop.f32.mrb[87].mxu0  ;;  %v10491_v37 = vpop.f32.mrb[108].mxu1 }
 0x77c   : > { %12435 = vst [vmem:[#allocation24_spill] sm:$0xff] %v10489_v4  ;;  %12436 = vst [vmem:[#allocation15_spill] sm:$0xff] %v10491_v37  ;;  %v10495_v10 = vpop.f32.mrb[109].mxu1 }
 0x77d   : > { %12437 = vst [vmem:[#allocation26_spill] sm:$0xff] %v10495_v10  ;;  %v10497_v62 = vpop.f32.mrb[110].mxu1 }
 0x77e   : > { %12438 = vst [vmem:[#allocation48_spill] sm:$0xff] %v10497_v62  ;;  %v10501_v57 = vpop.f32.mrb[111].mxu1 }
 0x77f   : > { %12439 = vst [vmem:[#allocation98_spill] sm:$0xff] %v10501_v57  ;;  %v6826_v57 = vld [vmem:[#allocation7 + $0x50] sm:$0xff]  }
 0x780   : > { %v10651_v14 = vunpack.c.h.bf16 %v6826_v57 }
 0x787   : > { %v10505_v16 = vpop.f32.mrb[112].mxu1 }
 0x788   : > { %12440 = vst [vmem:[#allocation17_spill] sm:$0xff] %v10505_v16  ;;  %v10507_v35 = vpop.f32.mrb[113].mxu1  ;;  %v10596_v16 = vunpack.c.h.bf16 %v6825_v2 }
 0x789   : > { %12441 = vst [vmem:[#allocation60_spill] sm:$0xff] %v10507_v35  ;;  %v10509_v51 = vpop.f32.mrb[114].mxu1 }
 0x78a   : > { %12442 = vst [vmem:[#allocation68_spill] sm:$0xff] %v10509_v51  ;;  %v10513_v56 = vpop.f32.mrb[115].mxu1 }
 0x78b   : > { %12443 = vst [vmem:[#allocation33_spill] sm:$0xff] %v10513_v56 }
 0x78f   : > { %v10517_v12 = vpop.f32.mrb[88].mxu0 }
 0x790   : > { %12444 = vst [vmem:[#allocation69_spill] sm:$0xff] %v10517_v12  ;;  %v10519_v49 = vpop.f32.mrb[89].mxu0 }
 0x791   : > { %12445 = vst [vmem:[#allocation95_spill] sm:$0xff] %v10519_v49  ;;  %v10521_v58 = vpop.f32.mrb[90].mxu0 }
 0x792   : > { %12446 = vst [vmem:[#allocation67_spill] sm:$0xff] %v10521_v58  ;;  %v10525_v9 = vpop.f32.mrb[91].mxu0 }
 0x793   : > { %12447 = vst [vmem:[#allocation23_spill] sm:$0xff] %v10525_v9 }
 0x79b   : > { %v10529_v18 = vpop.f32.mrb[92].mxu0 }
 0x79c   : > { %12448 = vst [vmem:[#allocation96_spill] sm:$0xff] %v10529_v18  ;;  %v10531_v13 = vpop.f32.mrb[93].mxu0 }
 0x79d   : > { %12449 = vst [vmem:[#allocation94_spill] sm:$0xff] %v10531_v13  ;;  %v10533_v42 = vpop.f32.mrb[94].mxu0 }
 0x79e   : > { %12450 = vst [vmem:[#allocation97_spill] sm:$0xff] %v10533_v42  ;;  %v10537_v19 = vpop.f32.mrb[95].mxu0 }
 0x79f   : > { %12451 = vst [vmem:[#allocation99_spill] sm:$0xff] %v10537_v19  ;;  %v10541_v43 = vpop.f32.mrb[116].mxu1 }
 0x7a0   : > { %12452 = vst [vmem:[#allocation31_spill] sm:$0xff] %v10541_v43  ;;  %v10543_v29 = vpop.f32.mrb[117].mxu1 }
 0x7a1   : > { %12453 = vst [vmem:[#allocation40_spill] sm:$0xff] %v10543_v29  ;;  %v10545_v45 = vpop.f32.mrb[118].mxu1 }
 0x7a2   : > { %12454 = vst [vmem:[#allocation50_spill] sm:$0xff] %v10545_v45  ;;  %v10549_v3 = vpop.f32.mrb[119].mxu1  ;;  %v6708_v45 = vld [vmem:[#allocation7 + $0x40] sm:$0xff]  }
 0x7a3   : > { %12455 = vst [vmem:[#allocation47_spill] sm:$0xff] %v10549_v3 }
 0x7ac   : > { %v10553_v23 = vpop.f32.mrb[96].mxu0 }
 0x7ad   : > { %12456 = vst [vmem:[#allocation54_spill] sm:$0xff] %v10553_v23  ;;  %v10555_v30 = vpop.f32.mrb[97].mxu0 }
 0x7ae   : > { %12457 = vst [vmem:[#allocation20_spill] sm:$0xff] %v10555_v30  ;;  %v10557_v61 = vpop.f32.mrb[98].mxu0 }
 0x7af   : > { %12458 = vst [vmem:[#allocation100_spill] sm:$0xff] %v10557_v61  ;;  %v10561_v46 = vpop.f32.mrb[99].mxu0 }
 0x7b0   : > { %12459 = vst [vmem:[#allocation101_spill] sm:$0xff] %v10561_v46  ;;  %v10592_v46 = vunpack.c.l.bf16 %v6708_v45 }
 0x7bc   : > { %v7464_v54 = vpop.f32.mrb[100].mxu0 }
 0x7bd   : > { %v10568_v60 = vadd.f32 %v7464_v54, %v10565_v38  ;;  %v3363_v6 = vpop.f32.mrb[101].mxu0  ;;  %v10598_v54 = vunpack.c.h.bf16 %v6708_v45 }
 0x7be   : > { %v7465_v25 = vpop.f32.mrb[102].mxu0 }
 0x7bf   : > { %v3366_v36 = vpop.f32.mrb[103].mxu0  ;;  %v3715_v31 = vsel %vm1354_vm1, %v10568_v60, -inf }
 0x7c0   : > { %3716 = vmax.xlane.f32.xlu0 %v3715_v31  ;;  %v10612_v2 = vadd.f32 %v10598_v54, %v3366_v36 }
 0x7c2   : > { %v3712_v62 = vsel %vm1354_vm1, %v10612_v2, -inf }
 0x7ec   : > { %v7468_v32 = vpop.f32.mrb[104].mxu0 }
 0x7ed   : > { %v10572_v63 = vpop.f32.mrb[105].mxu0 }
 0x7ee   : > { %v7469_v0 = vpop.f32.mrb[106].mxu0 }
 0x7ef   : > { %v3382_v28 = vpop.f32.mrb[107].mxu0 }
 0x7f0   : > { %v10574_v39 = vpop.f32.mrb[120].mxu1 }
 0x7f1   : > { %12460 = vst [vmem:[#allocation102_spill] sm:$0xff] %v10574_v39  ;;  %v10576_v29 = vpop.f32.mrb[121].mxu1 }
 0x7f2   : > { %12461 = vst [vmem:[#allocation103_spill] sm:$0xff] %v10576_v29  ;;  %v10578_v3 = vpop.f32.mrb[122].mxu1  ;;  %v10604_v29 = vadd.f32 %v10592_v46, %v3363_v6 }
 0x7f3   : > { %12462 = vst [vmem:[#allocation104_spill] sm:$0xff] %v10578_v3  ;;  %v10582_v43 = vpop.f32.mrb[123].mxu1 }
 0x7f4   : > { %12463 = vst [vmem:[#allocation105_spill] sm:$0xff] %v10582_v43  ;;  %v10586_v23 = vpop.f32.mrb[108].mxu0  ;;  %v3709_v6 = vsel %vm1354_vm1, %v10604_v29, -inf }
 0x7f5   : > { %v10588_v61 = vpop.f32.mrb[109].mxu0 }
 0x7f6   : > { %v10590_v30 = vpop.f32.mrb[110].mxu0 }
 0x7f7   : > { %v10594_v18 = vpop.f32.mrb[111].mxu0 }
 0x7f8   : > { %v7480_v42 = vpop.f32.mrb[124].mxu1 }
 0x7f9   : > { %v10601_v39 = vadd.f32 %v7480_v42, %v10565_v38  ;;  %v3468_v3 = vpop.f32.mrb[125].mxu1 }
 0x7fa   : > { %v7481_v31 = vpop.f32.mrb[126].mxu1  ;;  %v10617_v45 = vadd.f32 %v10592_v46, %v3468_v3  ;;  %v10629_v3 = vadd.f32 %v7465_v25, %v10596_v16 }
 0x7fb   : > { %v10607_v43 = vadd.f32 %v7481_v31, %v10596_v16  ;;  %v3471_v51 = vpop.f32.mrb[127].mxu1  ;;  %v3739_v13 = vsel %vm1354_vm1, %v10601_v39, -inf  ;;  %v6827_v31 = vld [vmem:[#allocation7 + $0x58] sm:$0xff]  }
 0x7fc   : > { %3740 = vmax.xlane.f32.xlu0 %v3739_v13  ;;  %v10621_v37 = vunpack.c.h.bf16 %v6827_v31  ;;  %v10624_v13 = vadd.f32 %v10598_v54, %v3471_v51  ;;  %v10631_v35 = vunpack.c.l.bf16 %v6827_v31 }
 0x7fd   : > { %v3742_v42 = vsel %vm1354_vm1, %v10607_v43, -inf }
 0x7fe   : > { %3743 = vmax.xlane.f32.xlu1 %v3742_v42  ;;  %v10638_v51 = vadd.f32 %v7469_v0, %v10621_v37  ;;  %v10645_v31 = vadd.f32 %v7468_v32, %v10631_v35 }
 0x800   : > { %3710 = vmax.xlane.f32.xlu0 %v3709_v6  ;;  %v7484_v19 = vpop.f32.mrb[128].mxu1  ;;  %v3733_v6 = vsel %vm1354_vm1, %v10617_v45, -inf  ;;  %v3730_v26 = vsel %vm1354_vm1, %v10638_v51, -inf  ;;  %v3727_v49 = vsel %vm1354_vm1, %v10645_v31, -inf }
 0x801   : > { %v3484_v36 = vpop.f32.mrb[129].mxu1  ;;  %v10661_v32 = vadd.f32 %v7484_v19, %v10631_v35 }
 0x802   : > { %3713 = vmax.xlane.f32.xlu1 %v3712_v62  ;;  %v7485_v42 = vpop.f32.mrb[130].mxu1  ;;  %v3736_v62 = vsel %vm1354_vm1, %v10624_v13, -inf }
 0x803   : > { %v3487_v56 = vpop.f32.mrb[131].mxu1  ;;  %v10654_v0 = vadd.f32 %v7485_v42, %v10621_v37 }
 0x804   : > { %3734 = vmax.xlane.f32.xlu0 %v3733_v6  ;;  %v10635_v12 = vpop.f32.mrb[112].mxu0  ;;  %v3718_v6 = vsel %vm1354_vm1, %v10629_v3, -inf }
 0x805   : > { %v10640_v58 = vpop.f32.mrb[113].mxu0  ;;  %v3754_v42 = vsel %vm1354_vm1, %v10654_v0, -inf }
 0x806   : > { %3737 = vmax.xlane.f32.xlu1 %v3736_v62  ;;  %v7501_v25 = vpop.f32.mrb[114].mxu0  ;;  %v10658_v62 = vunpack.c.l.bf16 %v6826_v57  ;;  %v10677_v57 = vadd.f32 %v10651_v14, %v3487_v56  ;;  %v10694_v56 = vadd.f32 %v10586_v23, %v10565_v38 }
 0x807   : > { %v10647_v10 = vpop.f32.mrb[115].mxu0 }
 0x808   : > { %3719 = vmax.xlane.f32.xlu0 %v3718_v6  ;;  %v10666_v6 = vadd.f32 %v10651_v14, %v3382_v28  ;;  %v10672_v9 = vadd.f32 %v10658_v62, %v10572_v63  ;;  %v10682_v28 = vadd.f32 %v10658_v62, %v3484_v36  ;;  %v10688_v63 = vadd.f32 %v10590_v30, %v10596_v16 }
 0x809   : > { %v3763_v23 = vsel %vm1354_vm1, %v10694_v56, -inf }
 0x80a   : > { %3731 = vmax.xlane.f32.xlu1 %v3730_v26  ;;  %v3751_v26 = vsel %vm1354_vm1, %v10661_v32, -inf  ;;  %v3721_v19 = vsel %vm1354_vm1, %v10672_v9, -inf  ;;  %v3745_v36 = vsel %vm1354_vm1, %v10682_v28, -inf }
 0x80c   : > { %3728 = vmax.xlane.f32.xlu0 %v3727_v49  ;;  %v3724_v49 = vsel %vm1354_vm1, %v10666_v6, -inf }
 0x80e   : > { %3755 = vmax.xlane.f32.xlu1 %v3754_v42  ;;  %v3748_v42 = vsel %vm1354_vm1, %v10677_v57, -inf }
 0x810   : > { %3752 = vmax.xlane.f32.xlu0 %v3751_v26 }
 0x812   : > { %3725 = vmax.xlane.f32.xlu1 %v3724_v49 }
 0x814   : > { %3722 = vmax.xlane.f32.xlu0 %v3721_v19  ;;  %v3766_v19 = vsel %vm1354_vm1, %v10688_v63, -inf }
 0x816   : > { %3749 = vmax.xlane.f32.xlu1 %v3748_v42 }
 0x818   : > { %v7512_v26 = vpop.f32.mrb[132].mxu1  ;;  %3746 = vmax.xlane.f32.xlu0 %v3745_v36  ;;  %v10710_v36 = vadd.f32 %v10598_v54, %v10594_v18 }
 0x819   : > { %v3678_v49 = vpop.f32.mrb[133].mxu1  ;;  %v10701_v30 = vadd.f32 %v7512_v26, %v10565_v38  ;;  %v10716_v38 = vadd.f32 %v10592_v46, %v10588_v61 }
 0x81a   : > { %v7513_v41 = vpop.f32.mrb[134].mxu1  ;;  %3767 = vmax.xlane.f32.xlu1 %v3766_v19  ;;  %v3760_v18 = vsel %vm1354_vm1, %v10710_v36, -inf  ;;  %v10729_v61 = vadd.f32 %v10592_v46, %v3678_v49 }
 0x81b   : > { %v10704_v42 = vadd.f32 %v7513_v41, %v10596_v16  ;;  %v3681_v34 = vpop.f32.mrb[135].mxu1  ;;  %v3787_v41 = vsel %vm1354_vm1, %v10701_v30, -inf  ;;  %v3757_v53 = vsel %vm1354_vm1, %v10716_v38, -inf }
 0x81c   : > { %3764 = vmax.xlane.f32.xlu0 %v3763_v23  ;;  %v10721_v26 = vadd.f32 %v10598_v54, %v3681_v34  ;;  %v10734_v34 = vadd.f32 %v7501_v25, %v10621_v37  ;;  %v3781_v46 = vsel %vm1354_vm1, %v10729_v61, -inf }
 0x81d   : > { %v3790_v4 = vsel %vm1354_vm1, %v10704_v42, -inf }
 0x81e   : > { %3791 = vmax.xlane.f32.xlu1 %v3790_v4  ;;  %v3784_v54 = vsel %vm1354_vm1, %v10721_v26, -inf }
 0x820   : > { %v7516_v16 = vpop.f32.mrb[136].mxu1  ;;  %3788 = vmax.xlane.f32.xlu0 %v3787_v41  ;;  %v10740_v41 = vadd.f32 %v10635_v12, %v10631_v35  ;;  %v10756_v12 = vadd.f32 %v10651_v14, %v10647_v10 }
 0x821   : > { %v3694_v19 = vpop.f32.mrb[137].mxu1  ;;  %v10750_v25 = vadd.f32 %v7516_v16, %v10631_v35 }
 0x822   : > { %v10726_v23 = vadd.f32 %v10658_v62, %v3694_v19  ;;  %v7517_v4 = vpop.f32.mrb[138].mxu1  ;;  %3761 = vmax.xlane.f32.xlu1 %v3760_v18  ;;  %v3775_v19 = vsel %vm1354_vm1, %v10740_v41, -inf }
 0x823   : > { %v3697_v47 = vpop.f32.mrb[139].mxu1  ;;  %v10745_v49 = vadd.f32 %v7517_v4, %v10621_v37  ;;  %v10762_v37 = vadd.f32 %v10658_v62, %v10640_v58  ;;  %v3799_v35 = vsel %vm1354_vm1, %v10750_v25, -inf  ;;  %v3772_v4 = vsel %vm1354_vm1, %v10756_v12, -inf  ;;  %v10775_v58 = vpop.permute.xlu0 %4261 }
 0x824   : > { %3758 = vmax.xlane.f32.xlu0 %v3757_v53  ;;  %v3778_v53 = vsel %vm1354_vm1, %v10734_v34, -inf  ;;  %v10767_v16 = vadd.f32 %v10651_v14, %v3697_v47 }
 0x825   : > { %v3802_v18 = vsel %vm1354_vm1, %v10745_v49, -inf  ;;  %v3769_v10 = vsel %vm1354_vm1, %v10762_v37, -inf }
 0x826   : > { %3785 = vmax.xlane.f32.xlu1 %v3784_v54  ;;  %v3796_v54 = vsel %vm1354_vm1, %v10767_v16, -inf }
 0x827   : > { %v10777_v62 = vpop.permute.xlu0 %4474 }
 0x828   : > { %3782 = vmax.xlane.f32.xlu0 %v3781_v46  ;;  %12464 = vst [vmem:[#allocation106_spill] sm:$0xff] %v10777_v62 }
 0x82a   : > { %3779 = vmax.xlane.f32.xlu1 %v3778_v53 }
 0x82b   : > { %v10779_v46 = vpop.permute.xlu0 %4478 }
 0x82c   : > { %3776 = vmax.xlane.f32.xlu0 %v3775_v19  ;;  %12465 = vst [vmem:[#allocation107_spill] sm:$0xff] %v10779_v46 }
 0x82e   : > { %3803 = vmax.xlane.f32.xlu1 %v3802_v18 }
 0x82f   : > { %v10781_v47 = vpop.permute.xlu0 %4581 }
 0x830   : > { %3800 = vmax.xlane.f32.xlu0 %v3799_v35  ;;  %12466 = vst [vmem:[#allocation108_spill] sm:$0xff] %v10781_v47  ;;  %v10788_v35 = vpop.permute.xlu1 %4346 }
 0x832   : > { %3773 = vmax.xlane.f32.xlu1 %v3772_v4 }
 0x833   : > { %v10785_v14 = vpop.permute.xlu0 %4468 }
 0x834   : > { %3770 = vmax.xlane.f32.xlu0 %v3769_v10  ;;  %12467 = vst [vmem:[#allocation109_spill] sm:$0xff] %v10785_v14  ;;  %v10790_v4 = vpop.permute.xlu1 %4348  ;;  %v3793_v10 = vsel %vm1354_vm1, %v10726_v23, -inf }
 0x836   : > { %3797 = vmax.xlane.f32.xlu1 %v3796_v54 }
 0x838   : > { %v10796_v50 = vpop.permute.xlu1 %4350 }
 0x839   : > { %12468 = vst [vmem:[#allocation110_spill] sm:$0xff] %v10796_v50 }
 0x83c   : > { %v10800_v14 = vpop.permute.xlu1 %4476 }
 0x83d   : > { %12469 = vst [vmem:[#allocation111_spill] sm:$0xff] %v10800_v14 }
 0x84a   : > { %4684 = vrot.lane.b32.xlu0 %v9099_v48, %s8693_s14 }
 0x84d   : > { %v3717_v53 = vpop.xlane.xlu0 %3716 }
 0x84e   : > { %v3807_v19 = vsub.f32 %v10568_v60, %v3717_v53  ;;  %v10802_v60 = vpop.permute.xlu1 %4579 }
 0x84f   : > { %12470 = vst [vmem:[#allocation112_spill] sm:$0xff] %v10802_v60 }
 0x850   : > { %v3841_v18 = vmul.f32 1.442695, %v3807_v19 }
 0x852   : > { %8236 = vpow2.f32 %v3841_v18  ;;  %v10804_v53 = vpop.permute.xlu1 %4480 }
 0x853   : > { %12471 = vst [vmem:[#allocation113_spill] sm:$0xff] %v10804_v53 }
 0x856   : > { %v10806_v19 = vpop.permute.xlu1 %4466 }
 0x857   : > { %12472 = vst [vmem:[#allocation114_spill] sm:$0xff] %v10806_v19 }
 0x85a   : > { %v10808_v18 = vpop.permute.xlu1 %4583 }
 0x85b   : > { %12473 = vst [vmem:[#allocation115_spill] sm:$0xff] %v10808_v18 }
 0x85c   : > { %v10794_v54 = vpop.eup %8236 }
 0x85d   : > { %v3907_v48 = vsel %vm1354_vm1, %v10794_v54, 0.0 }
 0x869   : > { %3794 = vmax.xlane.f32.xlu0 %v3793_v10 }
 0x86d   : > { %3908 = vadd.xlane.f32.xlu0 %v3907_v48 }
 0x889   : > { %v3741_v1 = vpop.xlane.xlu0 %3740 }
 0x88a   : > { %v3815_v46 = vsub.f32 %v10601_v39, %v3741_v1 }
 0x88b   : > { %v3744_v47 = vpop.xlane.xlu1 %3743 }
 0x88c   : > { %v3857_v55 = vmul.f32 1.442695, %v3815_v46  ;;  %v3816_v19 = vsub.f32 %v10607_v43, %v3744_v47 }
 0x88d   : > { %v3711_v10 = vpop.xlane.xlu0 %3710 }
 0x88e   : > { %8238 = vpow2.f32 %v3857_v55  ;;  %v3805_v44 = vsub.f32 %v10604_v29, %v3711_v10  ;;  %v3859_v55 = vmul.f32 1.442695, %v3816_v19 }
 0x88f   : > { %v3714_v48 = vpop.xlane.xlu1 %3713 }
 0x890   : > { %v3837_v62 = vmul.f32 1.442695, %v3805_v44  ;;  %v3806_v29 = vsub.f32 %v10612_v2, %v3714_v48 }
 0x891   : > { %v3735_v14 = vpop.xlane.xlu0 %3734 }
 0x892   : > { %8240 = vpow2.f32 %v3837_v62  ;;  %v3813_v60 = vsub.f32 %v10617_v45, %v3735_v14 }
 0x893   : > { %v3738_v53 = vpop.xlane.xlu1 %3737 }
 0x894   : > { %v3853_v50 = vmul.f32 1.442695, %v3813_v60 }
 0x895   : > { %v3720_v18 = vpop.xlane.xlu0 %3719 }
 0x896   : > { %8242 = vpow2.f32 %v3853_v50  ;;  %v3808_v1 = vsub.f32 %v10629_v3, %v3720_v18  ;;  %v3839_v50 = vmul.f32 1.442695, %v3806_v29  ;;  %v3814_v3 = vsub.f32 %v10624_v13, %v3738_v53 }
 0x897   : > { %v3732_v39 = vpop.xlane.xlu1 %3731 }
 0x898   : > { %v10815_v46 = vpop.eup %8238  ;;  %v3843_v10 = vmul.f32 1.442695, %v3808_v1  ;;  %v3855_v18 = vmul.f32 1.442695, %v3814_v3 }
 0x899   : > { %v3729_v44 = vpop.xlane.xlu0 %3728  ;;  %v3931_v62 = vsel %vm1354_vm1, %v10815_v46, 0.0 }
 0x89a   : > { %8244 = vpow2.f32 %v3843_v10  ;;  %3932 = vadd.xlane.f32.xlu1 %v3931_v62  ;;  %v3811_v2 = vsub.f32 %v10645_v31, %v3729_v44 }
 0x89b   : > { %v3756_v45 = vpop.xlane.xlu1 %3755  ;;  %8246 = vpow2.f32 %v3859_v55 }
 0x89c   : > { %v10820_v43 = vpop.eup %8240  ;;  %8248 = vpow2.f32 %v3839_v50  ;;  %v3820_v48 = vsub.f32 %v10654_v0, %v3756_v45  ;;  %v3849_v53 = vmul.f32 1.442695, %v3811_v2 }
 0x89d   : > { %v3753_v47 = vpop.xlane.xlu0 %3752  ;;  %v3901_v14 = vsel %vm1354_vm1, %v10820_v43, 0.0  ;;  %8250 = vpow2.f32 %v3855_v18 }
 0x89e   : > { %3902 = vadd.xlane.f32.xlu0 %v3901_v14  ;;  %v3819_v29 = vsub.f32 %v10661_v32, %v3753_v47  ;;  %v3867_v31 = vmul.f32 1.442695, %v3820_v48 }
 0x89f   : > { %v3726_v60 = vpop.xlane.xlu1 %3725 }
 0x8a0   : > { %v10826_v19 = vpop.eup %8242 }
 0x8a1   : > { %v3723_v1 = vpop.xlane.xlu0 %3722  ;;  %v3925_v55 = vsel %vm1354_vm1, %v10826_v19, 0.0 }
 0x8a2   : > { %v3809_v13 = vsub.f32 %v10672_v9, %v3723_v1  ;;  %3926 = vadd.xlane.f32.xlu1 %v3925_v55  ;;  %v3865_v9 = vmul.f32 1.442695, %v3819_v29  ;;  %v3812_v1 = vsub.f32 %v10638_v51, %v3732_v39 }
 0x8a3   : > { %v3750_v10 = vpop.xlane.xlu1 %3749 }
 0x8a4   : > { %v10833_v62 = vpop.eup %8244  ;;  %v3845_v44 = vmul.f32 1.442695, %v3809_v13  ;;  %v3818_v50 = vsub.f32 %v10677_v57, %v3750_v10 }
 0x8a5   : > { %v3747_v3 = vpop.xlane.xlu0 %3746  ;;  %v3910_v0 = vsel %vm1354_vm1, %v10833_v62, 0.0  ;;  %v10838_v45 = vpop.eup %8246 }
 0x8a6   : > { %8252 = vpow2.f32 %v3845_v44  ;;  %3911 = vadd.xlane.f32.xlu1 %v3910_v0  ;;  %v3817_v32 = vsub.f32 %v10682_v28, %v3747_v3  ;;  %v3863_v14 = vmul.f32 1.442695, %v3818_v50  ;;  %v3934_v57 = vsel %vm1354_vm1, %v10838_v45, 0.0  ;;  %v10844_v48 = vpop.eup %8248 }
 0x8a7   : > { %8254 = vpow2.f32 %v3849_v53  ;;  %v3768_v47 = vpop.xlane.xlu1 %3767  ;;  %v10850_v10 = vpop.eup %8250  ;;  %v3810_v44 = vsub.f32 %v10666_v6, %v3726_v60 }
 0x8a8   : > { %8256 = vpow2.f32 %v3867_v31  ;;  %v3824_v2 = vsub.f32 %v10688_v63, %v3768_v47  ;;  %v3861_v55 = vmul.f32 1.442695, %v3817_v32  ;;  %v3904_v63 = vsel %vm1354_vm1, %v10844_v48, 0.0 }
 0x8a9   : > { %v3765_v18 = vpop.xlane.xlu0 %3764  ;;  %8258 = vpow2.f32 %v3865_v9  ;;  %v3851_v31 = vmul.f32 1.442695, %v3812_v1  ;;  %v3928_v9 = vsel %vm1354_vm1, %v10850_v10, 0.0  ;;  %v3847_v6 = vmul.f32 1.442695, %v3810_v44 }
 0x8aa   : > { %3935 = vadd.xlane.f32.xlu1 %v3934_v57  ;;  %8260 = vpow2.f32 %v3863_v14  ;;  %v3875_v53 = vmul.f32 1.442695, %v3824_v2  ;;  %v3823_v60 = vsub.f32 %v10694_v56, %v3765_v18 }
 0x8ab   : > { %v3792_v13 = vpop.xlane.xlu1 %3791  ;;  %8262 = vpow2.f32 %v3861_v55 }
 0x8ac   : > { %v3832_v28 = vsub.f32 %v10704_v42, %v3792_v13  ;;  %8264 = vpow2.f32 %v3875_v53  ;;  %v3873_v53 = vmul.f32 1.442695, %v3823_v60 }
 0x8ad   : > { %v3789_v29 = vpop.xlane.xlu0 %3788  ;;  %8266 = vpow2.f32 %v3851_v31 }
 0x8ae   : > { %3905 = vadd.xlane.f32.xlu1 %v3904_v63  ;;  %v3891_v39 = vmul.f32 1.442695, %v3832_v28  ;;  %v3831_v28 = vsub.f32 %v10701_v30, %v3789_v29 }
 0x8af   : > { %v3762_v50 = vpop.xlane.xlu1 %3761 }
 0x8b0   : > { %v10853_v51 = vpop.eup %8252  ;;  %v3822_v3 = vsub.f32 %v10710_v36, %v3762_v50  ;;  %8268 = vpow2.f32 %v3891_v39  ;;  %v3889_v30 = vmul.f32 1.442695, %v3831_v28 }
 0x8b1   : > { %v10856_v0 = vpop.eup %8254  ;;  %v3759_v42 = vpop.xlane.xlu0 %3758  ;;  %v3913_v32 = vsel %vm1354_vm1, %v10853_v51, 0.0  ;;  %8270 = vpow2.f32 %v3847_v6 }
 0x8b2   : > { %v10862_v47 = vpop.eup %8256  ;;  %3929 = vadd.xlane.f32.xlu1 %v3928_v9  ;;  %3914 = vadd.xlane.f32.xlu0 %v3913_v32  ;;  %v3871_v36 = vmul.f32 1.442695, %v3822_v3  ;;  %v3919_v1 = vsel %vm1354_vm1, %v10856_v0, 0.0  ;;  %v3821_v39 = vsub.f32 %v10716_v38, %v3759_v42 }
 0x8b3   : > { %v3786_v14 = vpop.xlane.xlu1 %3785  ;;  %v10866_v57 = vpop.eup %8258  ;;  %v3946_v55 = vsel %vm1354_vm1, %v10862_v47, 0.0 }
 0x8b4   : > { %v3830_v2 = vsub.f32 %v10721_v26, %v3786_v14  ;;  %v10872_v13 = vpop.eup %8260  ;;  %8272 = vpow2.f32 %v3871_v36  ;;  %v3943_v31 = vsel %vm1354_vm1, %v10866_v57, 0.0  ;;  %v3869_v14 = vmul.f32 1.442695, %v3821_v39 }
 0x8b5   : > { %v3783_v56 = vpop.xlane.xlu0 %3782  ;;  %v10877_v63 = vpop.eup %8262  ;;  %v3940_v44 = vsel %vm1354_vm1, %v10872_v13, 0.0  ;;  %8274 = vpow2.f32 %v3873_v53 }
 0x8b6   : > { %3920 = vadd.xlane.f32.xlu1 %v3919_v1  ;;  %3947 = vadd.xlane.f32.xlu0 %v3946_v55  ;;  %v3887_v26 = vmul.f32 1.442695, %v3830_v2  ;;  %v10883_v50 = vpop.eup %8264  ;;  %v3937_v6 = vsel %vm1354_vm1, %v10877_v63, 0.0  ;;  %v3829_v38 = vsub.f32 %v10729_v61, %v3783_v56 }
 0x8b7   : > { %v10874_v18 = vpop.xlane.xlu1 %3779  ;;  %v10888_v29 = vpop.eup %8266  ;;  %v3958_v32 = vsel %vm1354_vm1, %v10883_v50, 0.0 }
 0x8b8   : > { %8276 = vpow2.f32 %v3887_v26  ;;  %v3922_v55 = vsel %vm1354_vm1, %v10888_v29, 0.0 }
 0x8b9   : > { %v3777_v9 = vpop.xlane.xlu0 %3776  ;;  %8278 = vpow2.f32 %v3889_v30 }
 0x8ba   : > { %3944 = vadd.xlane.f32.xlu1 %v3943_v31  ;;  %3941 = vadd.xlane.f32.xlu0 %v3940_v44  ;;  %v10894_v60 = vpop.eup %8268  ;;  %8280 = vpow2.f32 %v3869_v14  ;;  %v3885_v31 = vmul.f32 1.442695, %v3829_v38  ;;  %v3827_v61 = vsub.f32 %v10740_v41, %v3777_v9 }
 0x8bb   : > { %v10886_v3 = vpop.xlane.xlu1 %3803  ;;  %v10898_v2 = vpop.eup %8270  ;;  %v3982_v1 = vsel %vm1354_vm1, %v10894_v60, 0.0 }
 0x8bc   : > { %v3916_v44 = vsel %vm1354_vm1, %v10898_v2, 0.0  ;;  %v3881_v30 = vmul.f32 1.442695, %v3827_v61 }
 0x8bd   : > { %v3801_v26 = vpop.xlane.xlu0 %3800 }
 0x8be   : > { %3959 = vadd.xlane.f32.xlu0 %v3958_v32  ;;  %3938 = vadd.xlane.f32.xlu1 %v3937_v6  ;;  %v10904_v53 = vpop.eup %8272  ;;  %v3835_v32 = vsub.f32 %v10750_v25, %v3801_v26 }
 0x8bf   : > { %v3774_v36 = vpop.xlane.xlu1 %3773  ;;  %v3952_v56 = vsel %vm1354_vm1, %v10904_v53, 0.0 }
 0x8c0   : > { %v3826_v42 = vsub.f32 %v10756_v12, %v3774_v36  ;;  %v10907_v12 = vpop.eup %8274  ;;  %v3897_v36 = vmul.f32 1.442695, %v3835_v32 }
 0x8c1   : > { %v3771_v6 = vpop.xlane.xlu0 %3770  ;;  %v3955_v9 = vsel %vm1354_vm1, %v10907_v12, 0.0 }
 0x8c2   : > { %v3879_v28 = vmul.f32 1.442695, %v3826_v42  ;;  %3983 = vadd.xlane.f32.xlu0 %v3982_v1  ;;  %3923 = vadd.xlane.f32.xlu1 %v3922_v55  ;;  %v10913_v39 = vpop.eup %8276  ;;  %v3825_v38 = vsub.f32 %v10762_v37, %v3771_v6 }
 0x8c3   : > { %v3976_v41 = vsel %vm1354_vm1, %v10913_v39, 0.0  ;;  %v10920_v14 = vpop.eup %8278 }
 0x8c4   : > { %8282 = vpow2.f32 %v3879_v28  ;;  %v10923_v42 = vpop.eup %8280  ;;  %v3979_v25 = vsel %vm1354_vm1, %v10920_v14, 0.0  ;;  %v3877_v28 = vmul.f32 1.442695, %v3825_v38 }
 0x8c5   : > { %8284 = vpow2.f32 %v3885_v31  ;;  %v3949_v26 = vsel %vm1354_vm1, %v10923_v42, 0.0 }
 0x8c6   : > { %3953 = vadd.xlane.f32.xlu0 %v3952_v56  ;;  %3917 = vadd.xlane.f32.xlu1 %v3916_v44  ;;  %8286 = vpow2.f32 %v3881_v30 }
 0x8c7   : > { %8288 = vpow2.f32 %v3897_v36  ;;  %v10952_v36 = vpop.permute.xlu0 %4684 }
 0x8c8   : > { %8290 = vpow2.f32 %v3877_v28 }
 0x8ca   : > { %3977 = vadd.xlane.f32.xlu0 %v3976_v41  ;;  %3956 = vadd.xlane.f32.xlu1 %v3955_v9  ;;  %v3798_v41 = vpop.xlane.xlu1 %3797 }
 0x8cb   : > { %v3834_v9 = vsub.f32 %v10767_v16, %v3798_v41  ;;  %v12476_v41 = vld [vmem:[#allocation41_spill] sm:$0xff] }
 0x8cd   : > { %v3895_v38 = vmul.f32 1.442695, %v3834_v9  ;;  %v3836_v9 = vsub.f32 %v10745_v49, %v10886_v3 }
 0x8ce   : > { %v10927_v1 = vpop.eup %8282  ;;  %3980 = vadd.xlane.f32.xlu1 %v3979_v25  ;;  %v3828_v25 = vsub.f32 %v10734_v34, %v10874_v18  ;;  %v12474_v18 = vld [vmem:[#allocation34_spill] sm:$0xff] }
 0x8cf   : > { %v3964_v55 = vsel %vm1354_vm1, %v10927_v1, 0.0  ;;  %v10933_v31 = vpop.eup %8284  ;;  %8292 = vpow2.f32 %v3895_v38 }
 0x8d0   : > { %3965 = vadd.xlane.f32.xlu0 %v3964_v55  ;;  %v3973_v37 = vsel %vm1354_vm1, %v10933_v31, 0.0  ;;  %v10937_v61 = vpop.eup %8286 }
 0x8d1   : > { %v3967_v56 = vsel %vm1354_vm1, %v10937_v61, 0.0  ;;  %v10941_v44 = vpop.eup %8288 }
 0x8d2   : > { %3950 = vadd.xlane.f32.xlu1 %v3949_v26  ;;  %v3991_v30 = vsel %vm1354_vm1, %v10941_v44, 0.0  ;;  %v10945_v32 = vpop.eup %8290  ;;  %v3883_v26 = vmul.f32 1.442695, %v3828_v25  ;;  %v12477_v25 = vld [vmem:[#allocation25_spill] sm:$0xff] }
 0x8d3   : > { %v3961_v6 = vsel %vm1354_vm1, %v10945_v32, 0.0 }
 0x8d6   : > { %3974 = vadd.xlane.f32.xlu1 %v3973_v37 }
 0x8da   : > { %3968 = vadd.xlane.f32.xlu1 %v3967_v56  ;;  %v10957_v56 = vpop.eup %8292 }
 0x8de   : > { %3992 = vadd.xlane.f32.xlu1 %v3991_v30 }
 0x8e2   : > { %3962 = vadd.xlane.f32.xlu1 %v3961_v6  ;;  %v12475_v6 = vld [vmem:[#allocation21_spill] sm:$0xff] }
 0x8e6   : > { %4472 = vrot.lane.b32.xlu0 %v12400_v24, %s8693_s14  ;;  %v3988_v24 = vsel %vm1354_vm1, %v10957_v56, 0.0 }
 0x8f6   : > { %v3795_v55 = vpop.xlane.xlu0 %3794 }
 0x8f7   : > { %v3833_v28 = vsub.f32 %v10726_v23, %v3795_v55 }
 0x8f9   : > { %v3893_v37 = vmul.f32 1.442695, %v3833_v28 }
 0x8fb   : > { %8294 = vpow2.f32 %v3893_v37 }
 0x8fc   : > { %8296 = vpow2.f32 %v3883_v26  ;;  %v12478_v26 = vld [vmem:[#allocation51_spill] sm:$0xff] }
 0x905   : > { %v10961_v16 = vpop.eup %8294  ;;  %3989 = vadd.xlane.f32.xlu0 %v3988_v24 }
 0x906   : > { %v3985_v30 = vsel %vm1354_vm1, %v10961_v16, 0.0  ;;  %v10965_v34 = vpop.eup %8296 }
 0x907   : > { %3986 = vadd.xlane.f32.xlu1 %v3985_v30  ;;  %v3970_v23 = vsel %vm1354_vm1, %v10965_v34, 0.0 }
 0x90b   : > { %3971 = vadd.xlane.f32.xlu1 %v3970_v23 }
 0x91b   : > { %4686 = vrot.lane.b32.xlu0 %v9121_v17, %s8693_s14  ;;  %v3899_v17 = vmul.f32 1.442695, %v3836_v9 }
 0x91c   : > { %4470 = vrot.lane.b32.xlu1 %v12331_v21, %s8693_s14  ;;  %v3909_v21 = vpop.xlane.xlu0 %3908 }
 0x91d   : > { %8298 = vpow2.f32 %v3899_v17 }
 0x91f   : > { %4573 = vrot.lane.b32.xlu0 %v12474_v18, %s8693_s14 }
 0x923   : > { %4789 = vrot.lane.b32.xlu0 %v12475_v6, %s8693_s14 }
 0x927   : > { %4577 = vrot.lane.b32.xlu0 %v12476_v41, %s8693_s14  ;;  %v3933_v38 = vpop.xlane.xlu1 %3932  ;;  %v10991_v3 = vpop.eup %8298 }
 0x92b   : > { %4791 = vrot.lane.b32.xlu0 %v12477_v25, %s8693_s14  ;;  %v3903_v37 = vpop.xlane.xlu0 %3902 }
 0x92f   : > { %v3927_v55 = vpop.xlane.xlu1 %3926  ;;  %4678 = vrot.lane.b32.xlu0 %v12404_v8, %s8693_s14 }
 0x933   : > { %v3912_v28 = vpop.xlane.xlu1 %3911  ;;  %4680 = vrot.lane.b32.xlu0 %v12478_v26, %s8693_s14 }
 0x934   : > { %8300 = vrcp.f32 %v3912_v28 }
 0x935   : > { %8302 = vrcp.f32 %v3903_v37 }
 0x936   : > { %8304 = vrcp.f32 %v3909_v21 }
 0x937   : > { %v3936_v24 = vpop.xlane.xlu1 %3935  ;;  %4795 = vrot.lane.b32.xlu0 %v12411_v40, %s8693_s14  ;;  %v3994_v40 = vsel %vm1354_vm1, %v10991_v3, 0.0 }
 0x93b   : > { %v3906_v49 = vpop.xlane.xlu1 %3905  ;;  %4783 = vrot.lane.b32.xlu0 %v12415_v15, %s8693_s14  ;;  %v12479_v15 = vld [vmem:[#allocation37_spill] sm:$0xff] }
 0x93c   : > { %8306 = vrcp.f32 %v3906_v49 }
 0x93d   : > { %8308 = vrcp.f32 %v3936_v24 }
 0x93e   : > { %8310 = vrcp.f32 %v3927_v55  ;;  %v8301_v23 = vpop.eup %8300 }
 0x93f   : > { %8312 = vrcp.f32 %v3933_v38  ;;  %v3930_v8 = vpop.xlane.xlu1 %3929  ;;  %4787 = vrot.lane.b32.xlu0 %v12421_v52, %s8693_s14  ;;  %v3915_v30 = vpop.xlane.xlu0 %3914  ;;  %v4032_v38 = vmul.f32 %v8301_v23, %v10833_v62  ;;  %v12480_v23 = vld [vmem:[#allocation39_spill] sm:$0xff] }
 0x940   : > { %8314 = vrcp.f32 %v3930_v8  ;;  %3995 = vadd.xlane.f32.xlu1 %v3994_v40  ;;  %v8303_v41 = vpop.eup %8302 }
 0x941   : > { %v8305_v9 = vpop.eup %8304  ;;  %v4029_v21 = vmul.f32 %v8303_v41, %v10820_v43 }
 0x942   : > { %v4031_v37 = vmul.f32 %v8305_v9, %v10794_v54 }
 0x943   : > { %v3921_v18 = vpop.xlane.xlu1 %3920  ;;  %5254 = vrot.lane.b32.xlu0 %v12479_v15, %s8693_s14  ;;  %v3948_v6 = vpop.xlane.xlu0 %3947 }
 0x944   : > { %v4062_v40 = vpack.c.bf16 %v4032_v38, %v4031_v37 }
 0x946   : > { %v8307_v25 = vpop.eup %8306 }
 0x947   : > { %v8309_v17 = vpop.eup %8308  ;;  %v3945_v55 = vpop.xlane.xlu1 %3944  ;;  %5258 = vrot.lane.b32.xlu0 %v12422_v7, %s8693_s14  ;;  %v4030_v28 = vmul.f32 %v8307_v25, %v10844_v48 }
 0x948   : > { %v3942_v52 = vpop.xlane.xlu0 %3941  ;;  %v8311_v26 = vpop.eup %8310  ;;  %8316 = vrcp.f32 %v3945_v55  ;;  %v4040_v62 = vmul.f32 %v8309_v17, %v10838_v45  ;;  %v12483_v17 = vld [vmem:[#allocation110_spill] sm:$0xff] }
 0x949   : > { %v8313_v24 = vpop.eup %8312  ;;  %v4061_v49 = vpack.c.bf16 %v4030_v28, %v4029_v21  ;;  %8318 = vrcp.f32 %v3942_v52  ;;  %v4037_v43 = vmul.f32 %v8311_v26, %v10826_v19  ;;  %v12485_v52 = vld [vmem:[#allocation106_spill] sm:$0xff] }
 0x94a   : > { %v8315_v8 = vpop.eup %8314  ;;  %8320 = vrcp.f32 %v3948_v6  ;;  %v4039_v54 = vmul.f32 %v8313_v24, %v10815_v46  ;;  %v12487_v21 = vld [vmem:[#allocation38_spill] sm:$0xff] }
 0x94b   : > { %5260 = vrot.lane.b32.xlu0 %v12480_v23, %s8693_s14  ;;  %v3939_v7 = vpop.xlane.xlu1 %3938  ;;  %7526 = vmatprep.mubr.msk.bf16.mxu0 %vm1354_vm1, %v4061_v49  ;;  %v4038_v48 = vmul.f32 %v8315_v8, %v10850_v10 }
 0x94c   : > { %8322 = vrcp.f32 %v3939_v7  ;;  %7527 = vmatmul.mubr.msk.bf16.vlgmr.msra.gmra.mrb[116].mxu0 %vm1354_vm1, %v4062_v40  ;;  %v3960_v15 = vpop.xlane.xlu0 %3959  ;;  %v4066_v6 = vpack.c.bf16 %v4040_v62, %v4039_v54  ;;  %v12488_v62 = vld [vmem:[#allocation18_spill] sm:$0xff] }
 0x94d   : > { %7551 = vmatpush3.bf16.msra.mxu0 %v10467_v20  ;;  %v4065_v45 = vpack.c.bf16 %v4038_v48, %v4037_v43  ;;  %v12481_v20 = vld [vmem:[#allocation43_spill] sm:$0xff] }
 0x94e   : > { %7552 = vmatprep.subr.bf16.mxu0 %v10473_v5 }
 0x94f   : > { %7542 = vmatprep.mubr.msk.bf16.mxu1 %vm1354_vm1, %v4065_v45  ;;  %5347 = vrot.lane.b32.xlu0 %v12425_v59, %s8693_s14  ;;  %v3924_v19 = vpop.xlane.xlu1 %3923 }
 0x950   : > { %7543 = vmatmul.mubr.msk.bf16.vlgmr.msra.gmra.mrb[140].mxu1 %vm1354_vm1, %v4066_v6  ;;  %8324 = vrcp.f32 %v3924_v19  ;;  %v3984_v10 = vpop.xlane.xlu0 %3983 }
 0x951   : > { %7553 = vmatpush3.bf16.msra.mxu0 %v10473_v5  ;;  %7567 = vmatpush3.bf16.msra.mxu1 %v10478_v11  ;;  %8326 = vrcp.f32 %v3915_v30  ;;  %v12482_v30 = vld [vmem:[#allocation30_spill] sm:$0xff] }
 0x952   : > { %7568 = vmatprep.subr.bf16.mxu1 %v10788_v35  ;;  %4585 = vrot.lane.b32.xlu1 %v12481_v20, %s8693_s14  ;;  %v8317_v46 = vpop.eup %8316  ;;  %8328 = vrcp.f32 %v3921_v18 }
 0x953   : > { %7554 = vmatprep.subr.bf16.mxu0 %v10475_v22  ;;  %5432 = vrot.lane.b32.xlu0 %v12424_v33, %s8693_s14  ;;  %v3918_v59 = vpop.xlane.xlu1 %3917  ;;  %v8319_v41 = vpop.eup %8318  ;;  %v4043_v18 = vmul.f32 %v8317_v46, %v10866_v57  ;;  %v12484_v57 = vld [vmem:[#allocation53_spill] sm:$0xff] }
 0x954   : > { %8330 = vrcp.f32 %v3918_v59  ;;  %v8321_v5 = vpop.eup %8320  ;;  %v3954_v25 = vpop.xlane.xlu0 %3953 }
 0x955   : > { %7555 = vmatpush3.bf16.msra.mxu0 %v10475_v22  ;;  %7569 = vmatpush3.bf16.msra.mxu1 %v10788_v35  ;;  %v4042_v22 = vmul.f32 %v8319_v41, %v10872_v13  ;;  %v4044_v35 = vmul.f32 %v8321_v5, %v10862_v47  ;;  %v12486_v13 = vld [vmem:[#allocation112_spill] sm:$0xff] }
 0x956   : > { %v8323_v11 = vpop.eup %8322  ;;  %7570 = vmatprep.subr.bf16.mxu1 %v10790_v4  ;;  %4571 = vrot.lane.b32.xlu1 %v12482_v30, %s8693_s14 }
 0x957   : > { %7556 = vmatprep.subr.bf16.mxu0 %v10775_v58  ;;  %5436 = vrot.lane.b32.xlu0 %v12426_v27, %s8693_s14  ;;  %v3957_v33 = vpop.xlane.xlu1 %3956  ;;  %v4041_v9 = vmul.f32 %v8323_v11, %v10877_v63  ;;  %v4068_v55 = vpack.c.bf16 %v4044_v35, %v4043_v18  ;;  %v12491_v18 = vld [vmem:[#allocation16_spill] sm:$0xff]  ;;  %v12492_v35 = vld [vmem:[#allocation19_spill] sm:$0xff] }
 0x958   : > { %8332 = vrcp.f32 %v3957_v33  ;;  %v3978_v26 = vpop.xlane.xlu0 %3977 }
 0x959   : > { %7557 = vmatpush3.bf16.msra.mxu0 %v10775_v58  ;;  %7571 = vmatpush3.bf16.msra.mxu1 %v10790_v4  ;;  %v4067_v38 = vpack.c.bf16 %v4042_v22, %v4041_v9  ;;  %8334 = vrcp.f32 %v3954_v25  ;;  %v12493_v25 = vld [vmem:[#allocation111_spill] sm:$0xff] }
 0x95a   : > { %7572 = vmatprep.subr.bf16.mxu1 %v12483_v17  ;;  %4688 = vrot.lane.b32.xlu1 %v12484_v57, %s8693_s14  ;;  %v8325_v27 = vpop.eup %8324  ;;  %8336 = vrcp.f32 %v3960_v15  ;;  %v12490_v15 = vld [vmem:[#allocation29_spill] sm:$0xff] }
 0x95b   : > { %7822 = vmatprep.subr.msk.bf16.mxu0 %vm997_vm0, %v12485_v52  ;;  %v3981_v63 = vpop.xlane.xlu1 %3980  ;;  %7546 = vmatprep.mubr.msk.bf16.mxu1 %vm1354_vm1, %v4067_v38  ;;  %v8327_v47 = vpop.eup %8326  ;;  %v4036_v28 = vmul.f32 %v8325_v27, %v10888_v29  ;;  %v12497_v27 = vld [vmem:[#allocation107_spill] sm:$0xff] }
 0x95c   : > { %7547 = vmatmul.mubr.msk.bf16.gmra.mrb[144].mxu1 %vm1354_vm1, %v4068_v55  ;;  %v8329_v58 = vpop.eup %8328  ;;  %v4033_v24 = vmul.f32 %v8327_v47, %v10853_v51  ;;  %v12489_v51 = vld [vmem:[#allocation45_spill] sm:$0xff]  ;;  %v12496_v55 = vld [vmem:[#allocation35_spill] sm:$0xff] }
 0x95d   : > { %7573 = vmatpush3.bf16.msra.mxu1 %v12483_v17  ;;  %v4035_v8 = vmul.f32 %v8329_v58, %v10856_v0  ;;  %v3966_v6 = vpop.xlane.xlu0 %3965  ;;  %v4498_v17 = vsel %vm997_vm0, %v12493_v25, 0 }
 0x95e   : > { %v8331_v4 = vpop.eup %8330  ;;  %7826 = vmatprep.subr.msk.bf16.mxu1 %vm997_vm0, %v12486_v13  ;;  %4575 = vrot.lane.b32.xlu1 %v12487_v21, %s8693_s14  ;;  %v4501_v21 = vsel %vm997_vm0, %v12497_v27, 0 }
 0x95f   : > { %v3951_v37 = vpop.xlane.xlu1 %3950  ;;  %v4034_v49 = vmul.f32 %v8331_v4, %v10898_v2  ;;  %v4064_v23 = vpack.c.bf16 %v4036_v28, %v4035_v8  ;;  %v12498_v4 = vld [vmem:[#allocation44_spill] sm:$0xff] }
 0x960   : > { %8338 = vrcp.f32 %v3951_v37  ;;  %v12504_v8 = vld [vmem:[#allocation52_spill] sm:$0xff] }
 0x961   : > { %8340 = vrcp.f32 %v3981_v63  ;;  %v4063_v40 = vpack.c.bf16 %v4034_v49, %v4033_v24  ;;  %v12503_v24 = vld [vmem:[#allocation49_spill] sm:$0xff]  ;;  %v4473_v49 = vpop.permute.xlu0 %4472 }
 0x962   : > { %8342 = vrcp.f32 %v3978_v26  ;;  %4690 = vrot.lane.b32.xlu1 %v12488_v62, %s8693_s14  ;;  %v8333_v29 = vpop.eup %8332  ;;  %v12502_v26 = vld [vmem:[#allocation46_spill] sm:$0xff] }
 0x963   : > { %8344 = vrcp.f32 %v3984_v10  ;;  %v3975_v7 = vpop.xlane.xlu1 %3974  ;;  %7530 = vmatprep.mubr.msk.bf16.mxu0 %vm1354_vm1, %v4063_v40  ;;  %v8335_v0 = vpop.eup %8334  ;;  %v4047_v54 = vmul.f32 %v8333_v29, %v10907_v12 }
 0x964   : > { %8346 = vrcp.f32 %v3975_v7  ;;  %7531 = vmatmul.mubr.msk.bf16.gmra.mrb[120].mxu0 %vm1354_vm1, %v4064_v23  ;;  %v8337_v43 = vpop.eup %8336  ;;  %v4046_v46 = vmul.f32 %v8335_v0, %v10904_v53 }
 0x965   : > { %v4048_v59 = vmul.f32 %v8337_v43, %v10883_v50  ;;  %8348 = vrcp.f32 %v3966_v6  ;;  %v4495_v50 = vsel %vm997_vm0, %v12485_v52, 0 }
 0x966   : > { %4676 = vrot.lane.b32.xlu1 %v12489_v51, %s8693_s14 }
 0x967   : > { %v11063_v2 = vpop.xlane.xlu1 %3968  ;;  %v4070_v30 = vpack.c.bf16 %v4048_v59, %v4047_v54 }
 0x96a   : > { %v8339_v48 = vpop.eup %8338  ;;  %4793 = vrot.lane.b32.xlu1 %v12490_v15, %s8693_s14 }
 0x96b   : > { %v8341_v45 = vpop.eup %8340  ;;  %v11068_v19 = vpop.xlane.xlu1 %3992  ;;  %v4045_v20 = vmul.f32 %v8339_v48, %v10923_v42 }
 0x96c   : > { %v8343_v10 = vpop.eup %8342  ;;  %v4055_v12 = vmul.f32 %v8341_v45, %v10920_v14 }
 0x96d   : > { %v8345_v41 = vpop.eup %8344  ;;  %v4069_v5 = vpack.c.bf16 %v4046_v46, %v4045_v20  ;;  %v4054_v53 = vmul.f32 %v8343_v10, %v10913_v39  ;;  %v12494_v39 = vld [vmem:[#allocation27_spill] sm:$0xff]  ;;  %v12506_v10 = vld [vmem:[#allocation109_spill] sm:$0xff] }
 0x96e   : > { %v8347_v11 = vpop.eup %8346  ;;  %4682 = vrot.lane.b32.xlu1 %v12491_v18, %s8693_s14  ;;  %v4056_v9 = vmul.f32 %v8345_v41, %v10894_v60  ;;  %v4600_v60 = vsel %vm997_vm0, %v12486_v13, 0  ;;  %v12499_v13 = vld [vmem:[#allocation115_spill] sm:$0xff] }
 0x96f   : > { %v3963_v33 = vpop.xlane.xlu1 %3962  ;;  %7558 = vmatprep.mubr.msk.bf16.mxu0 %vm1354_vm1, %v4069_v5  ;;  %v4053_v42 = vmul.f32 %v8347_v11, %v10933_v31  ;;  %v12495_v31 = vld [vmem:[#allocation108_spill] sm:$0xff]  ;;  %v8349_v38 = vpop.eup %8348  ;;  %v4606_v28 = vsel %vm997_vm0, %v12499_v13, 0 }
 0x970   : > { %8350 = vrcp.f32 %v3963_v33  ;;  %7559 = vmatmul.mubr.msk.bf16.vlgmr.msra.gmra.mrb[124].mxu0 %vm1354_vm1, %v4070_v30  ;;  %v4074_v22 = vpack.c.bf16 %v4056_v9, %v4055_v12  ;;  %v4050_v63 = vmul.f32 %v8349_v38, %v10927_v1  ;;  %v4603_v47 = vsel %vm997_vm0, %v12495_v31, 0  ;;  %v12501_v1 = vld [vmem:[#allocation113_spill] sm:$0xff] }
 0x971   : > { %7583 = vmatpush3.bf16.xpose.msra.mxu0 %v4495_v50  ;;  %v4073_v14 = vpack.c.bf16 %v4054_v53, %v4053_v42  ;;  %v4504_v37 = vsel %vm997_vm0, %v12501_v1, 0 }
 0x972   : > { %4781 = vrot.lane.b32.xlu1 %v12492_v35, %s8693_s14  ;;  %7823 = vmatprep.subr.msk.bf16.mxu0 %vm997_vm0, %v12493_v25 }
 0x973   : > { %7574 = vmatprep.mubr.msk.bf16.mxu1 %vm1354_vm1, %v4073_v14 }
 0x974   : > { %7575 = vmatmul.mubr.msk.bf16.vlgmr.msra.gmra.mrb[148].mxu1 %vm1354_vm1, %v4074_v22 }
 0x975   : > { %7599 = vmatpush3.bf16.xpose.msra.mxu1 %v4600_v60 }
 0x976   : > { %4785 = vrot.lane.b32.xlu1 %v12494_v39, %s8693_s14  ;;  %7827 = vmatprep.subr.msk.bf16.mxu1 %vm997_vm0, %v12495_v31 }
 0x979   : > { %7585 = vmatpush3.bf16.xpose.msra.mxu0 %v4498_v17 }
 0x97a   : > { %v8351_v57 = vpop.eup %8350  ;;  %5256 = vrot.lane.b32.xlu1 %v12496_v55, %s8693_s14  ;;  %7824 = vmatprep.subr.msk.bf16.mxu0 %vm997_vm0, %v12497_v27 }
 0x97b   : > { %v4049_v52 = vmul.f32 %v8351_v57, %v10945_v32  ;;  %v12500_v32 = vld [vmem:[#allocation42_spill] sm:$0xff] }
 0x97d   : > { %7601 = vmatpush3.bf16.xpose.msra.mxu1 %v4603_v47  ;;  %v4071_v58 = vpack.c.bf16 %v4050_v63, %v4049_v52 }
 0x97e   : > { %5343 = vrot.lane.b32.xlu1 %v12498_v4, %s8693_s14  ;;  %7828 = vmatprep.subr.msk.bf16.mxu1 %vm997_vm0, %v12499_v13 }
 0x97f   : > { %7562 = vmatprep.mubr.msk.bf16.mxu0 %vm1354_vm1, %v4071_v58 }
 0x981   : > { %7587 = vmatpush3.bf16.xpose.msra.mxu0 %v4501_v21 }
 0x982   : > { %5345 = vrot.lane.b32.xlu1 %v12500_v32, %s8693_s14  ;;  %7825 = vmatprep.subr.msk.bf16.mxu0 %vm997_vm0, %v12501_v1 }
 0x985   : > { %7603 = vmatpush3.bf16.xpose.msra.mxu1 %v4606_v28 }
 0x986   : > { %5349 = vrot.lane.b32.xlu1 %v12502_v26, %s8693_s14 }
 0x989   : > { %7589 = vmatpush3.bf16.xpose.msra.mxu0 %v4504_v37 }
 0x98a   : > { %5434 = vrot.lane.b32.xlu1 %v12503_v24, %s8693_s14  ;;  %7830 = vmatprep.subr.msk.bf16.mxu0 %vm997_vm0, %v10952_v36 }
 0x98e   : > { %5438 = vrot.lane.b32.xlu1 %v12504_v8, %s8693_s14 }
 0x992   : > { %v3990_v40 = vpop.xlane.xlu0 %3989 }
 0x993   : > { %8352 = vrcp.f32 %v3990_v40 }
 0x994   : > { %v3987_v62 = vpop.xlane.xlu1 %3986 }
 0x995   : > { %8354 = vrcp.f32 %v3987_v62 }
 0x996   : > { %8356 = vrcp.f32 %v11063_v2  ;;  %v4687_v20 = vpop.permute.xlu0 %4686  ;;  %v12505_v2 = vld [vmem:[#allocation114_spill] sm:$0xff] }
 0x998   : > { %v3972_v23 = vpop.xlane.xlu1 %3971 }
 0x999   : > { %8358 = vrcp.f32 %v3972_v23 }
 0x99a   : > { %v4574_v46 = vpop.permute.xlu0 %4573  ;;  %8360 = vrcp.f32 %v11068_v19 }
 0x99d   : > { %v8353_v7 = vpop.eup %8352 }
 0x99e   : > { %v4058_v0 = vmul.f32 %v8353_v7, %v10957_v56  ;;  %v4705_v56 = vsel %vm997_vm0, %v10952_v36, 0 }
 0x99f   : > { %v8355_v51 = vpop.eup %8354 }
 0x9a0   : > { %v4057_v29 = vmul.f32 %v8355_v51, %v10961_v16  ;;  %v8357_v43 = vpop.eup %8356  ;;  %v4471_v16 = vpop.permute.xlu1 %4470 }
 0x9a1   : > { %v4051_v15 = vmul.f32 %v8357_v43, %v10937_v61  ;;  %v4790_v61 = vpop.permute.xlu0 %4789 }
 0x9a2   : > { %v4075_v48 = vpack.c.bf16 %v4058_v0, %v4057_v29  ;;  %v4810_v38 = vsel %vm997_vm0, %v4790_v61, 0 }
 0x9a3   : > { %v8359_v54 = vpop.eup %8358 }
 0x9a4   : > { %7578 = vmatprep.mubr.msk.bf16.mxu1 %vm1354_vm1, %v4075_v48  ;;  %v4052_v45 = vmul.f32 %v8359_v54, %v10965_v34  ;;  %v4708_v34 = vsel %vm997_vm0, %v4687_v20, 0  ;;  %v8361_v42 = vpop.eup %8360 }
 0x9a5   : > { %v4578_v59 = vpop.permute.xlu0 %4577  ;;  %v4059_v14 = vmul.f32 %v8361_v42, %v10941_v44 }
 0x9a6   : > { %v4072_v6 = vpack.c.bf16 %v4052_v45, %v4051_v15 }
 0x9a8   : > { %7563 = vmatmul.mubr.msk.bf16.gmra.mrb[128].mxu0 %vm1354_vm1, %v4072_v6 }
 0x9a9   : > { %7590 = vmatprep.mubr.msk.bf16.mxu0 %vm997_vm0, %v12505_v2  ;;  %v4792_v41 = vpop.permute.xlu0 %4791 }
 0x9aa   : > { %v4813_v55 = vsel %vm997_vm0, %v4792_v41, 0 }
 0x9ad   : > { %v4679_v5 = vpop.permute.xlu0 %4678 }
 0x9b0   : > { %7591 = vmatmul.mubr.msk.bf16.vlgmr.msra.gmra.mrb[132].mxu0 %vm997_vm0, %v12506_v10 }
 0x9b1   : > { %7615 = vmatpush3.bf16.xpose.msra.mxu0 %v4705_v56  ;;  %7594 = vmatprep.mubr.msk.bf16.mxu0 %vm997_vm0, %v4471_v16  ;;  %v4681_v11 = vpop.permute.xlu0 %4680 }
 0x9b2   : > { %7831 = vmatprep.subr.msk.bf16.mxu0 %vm997_vm0, %v4687_v20 }
 0x9b5   : > { %v4796_v36 = vpop.permute.xlu0 %4795 }
 0x9b6   : > { %v4819_v32 = vsel %vm997_vm0, %v4796_v36, 0 }
 0x9b8   : > { %7595 = vmatmul.mubr.msk.bf16.gmra.mrb[136].mxu0 %vm997_vm0, %v4473_v49 }
 0x9b9   : > { %7617 = vmatpush3.bf16.xpose.msra.mxu0 %v4708_v34  ;;  %v4784_v53 = vpop.permute.xlu0 %4783 }
 0x9bd   : > { %v4788_v25 = vpop.permute.xlu0 %4787 }
 0x9c1   : > { %v5255_v44 = vpop.permute.xlu0 %5254 }
 0x9c5   : > { %v5259_v27 = vpop.permute.xlu0 %5258 }
 0x9c9   : > { %v5261_v58 = vpop.permute.xlu0 %5260 }
 0x9cd   : > { %v3996_v30 = vpop.xlane.xlu1 %3995  ;;  %v5348_v13 = vpop.permute.xlu0 %5347 }
 0x9ce   : > { %8362 = vrcp.f32 %v3996_v30  ;;  %v6830_v30 = vld [vmem:[#allocation7 + $0x78] sm:$0xff]  }
 0x9cf   : > { %v11318_v29 = vunpack.c.l.bf16 %v6830_v30 }
 0x9d1   : > { %v4586_v12 = vpop.permute.xlu1 %4585  ;;  %v11172_v1 = vpop.permute.xlu0 %5432 }
 0x9d2   : > { %7829 = vmatprep.subr.msk.bf16.mxu1 %vm997_vm0, %v4586_v12  ;;  %v4609_v18 = vsel %vm997_vm0, %v4586_v12, 0 }
 0x9d3   : > { %7605 = vmatpush3.bf16.xpose.msra.mxu1 %v4609_v18 }
 0x9d4   : > { %7834 = vmatprep.subr.msk.bf16.mxu1 %vm997_vm0, %v4790_v61 }
 0x9d5   : > { %v4572_v33 = vpop.permute.xlu1 %4571 }
 0x9d8   : > { %v8363_v9 = vpop.eup %8362 }
 0x9d9   : > { %v4689_v50 = vpop.permute.xlu1 %4688  ;;  %v4060_v19 = vmul.f32 %v8363_v9, %v10991_v3 }
 0x9da   : > { %7832 = vmatprep.subr.msk.bf16.mxu0 %vm997_vm0, %v4689_v50  ;;  %v4711_v22 = vsel %vm997_vm0, %v4689_v50, 0 }
 0x9db   : > { %7619 = vmatpush3.bf16.xpose.msra.mxu0 %v4711_v22  ;;  %v4076_v35 = vpack.c.bf16 %v4060_v19, %v4059_v14  ;;  %v6828_v19 = vld [vmem:[#allocation7 + $0x68] sm:$0xff]  }
 0x9dd   : > { %v4576_v60 = vpop.permute.xlu1 %4575  ;;  %7579 = vmatmul.mubr.msk.bf16.gmra.mrb[152].mxu1 %vm1354_vm1, %v4076_v35 }
 0x9de   : > { %7606 = vmatprep.mubr.msk.bf16.mxu1 %vm997_vm0, %v4572_v33 }
 0x9e1   : > { %v4691_v39 = vpop.permute.xlu1 %4690 }
 0x9e2   : > { %7833 = vmatprep.subr.msk.bf16.mxu0 %vm997_vm0, %v4691_v39  ;;  %v4714_v31 = vsel %vm997_vm0, %v4691_v39, 0  ;;  %v11262_v39 = vunpack.c.l.bf16 %v6828_v19 }
 0x9e3   : > { %7621 = vmatpush3.bf16.xpose.msra.mxu0 %v4714_v31 }
 0x9e4   : > { %7646 = vmatprep.subr.bf16.mxu0 %v5255_v44 }
 0x9e5   : > { %v4677_v3 = vpop.permute.xlu1 %4676  ;;  %7607 = vmatmul.mubr.msk.bf16.vlgmr.msra.gmra.mrb[156].mxu1 %vm997_vm0, %v4574_v46 }
 0x9e6   : > { %7631 = vmatpush3.bf16.xpose.msra.mxu1 %v4810_v38  ;;  %7610 = vmatprep.mubr.msk.bf16.mxu1 %vm997_vm0, %v4576_v60 }
 0x9e7   : > { %7622 = vmatprep.mubr.msk.bf16.mxu0 %vm997_vm0, %v4677_v3  ;;  %7835 = vmatprep.subr.msk.bf16.mxu1 %vm997_vm0, %v4792_v41  ;;  %v11266_v3 = vunpack.c.h.bf16 %v6828_v19 }
 0x9e9   : > { %v4794_v17 = vpop.permute.xlu1 %4793 }
 0x9ea   : > { %7623 = vmatmul.mubr.msk.bf16.vlgmr.msra.gmra.mrb[140].mxu0 %vm997_vm0, %v4679_v5  ;;  %v4816_v47 = vsel %vm997_vm0, %v4794_v17, 0 }
 0x9eb   : > { %7626 = vmatprep.mubr.msk.bf16.mxu0 %vm997_vm0, %v4681_v11  ;;  %7647 = vmatpush3.bf16.msra.mxu0 %v5255_v44 }
 0x9ed   : > { %v4683_v57 = vpop.permute.xlu1 %4682  ;;  %7611 = vmatmul.mubr.msk.bf16.gmra.mrb[160].mxu1 %vm997_vm0, %v4578_v59 }
 0x9ee   : > { %7633 = vmatpush3.bf16.xpose.msra.mxu1 %v4813_v55 }
 0x9ef   : > { %7836 = vmatprep.subr.msk.bf16.mxu1 %vm997_vm0, %v4794_v17 }
 0x9f1   : > { %v4782_v52 = vpop.permute.xlu1 %4781 }
 0x9f2   : > { %7627 = vmatmul.mubr.msk.bf16.gmra.mrb[144].mxu0 %vm997_vm0, %v4683_v57  ;;  %7638 = vmatprep.mubr.msk.bf16.mxu1 %vm997_vm0, %v4782_v52 }
 0x9f5   : > { %v4786_v63 = vpop.permute.xlu1 %4785 }
 0x9f6   : > { %7635 = vmatpush3.bf16.xpose.msra.mxu1 %v4816_v47 }
 0x9f7   : > { %7837 = vmatprep.subr.msk.bf16.mxu1 %vm997_vm0, %v4796_v36 }
 0x9f9   : > { %v5257_v4 = vpop.permute.xlu1 %5256 }
 0x9fa   : > { %7648 = vmatprep.subr.bf16.mxu0 %v5257_v4 }
 0x9fb   : > { %7649 = vmatpush3.bf16.msra.mxu0 %v5257_v4 }
 0x9fc   : > { %7650 = vmatprep.subr.bf16.mxu0 %v5259_v27 }
 0x9fd   : > { %v5344_v21 = vpop.permute.xlu1 %5343 }
 0x9fe   : > { %7637 = vmatpush3.bf16.xpose.msra.mxu1 %v4819_v32 }
 0x9ff   : > { %7662 = vmatprep.subr.bf16.mxu1 %v5344_v21  ;;  %7651 = vmatpush3.bf16.msra.mxu0 %v5259_v27 }
 0xa00   : > { %7652 = vmatprep.subr.bf16.mxu0 %v5261_v58 }
 0xa01   : > { %v5346_v28 = vpop.permute.xlu1 %5345 }
 0xa03   : > { %7653 = vmatpush3.bf16.msra.mxu0 %v5261_v58 }
 0xa04   : > { %7678 = vmatprep.subr.bf16.mxu0 %v11172_v1 }
 0xa05   : > { %7639 = vmatmul.mubr.msk.bf16.vlgmr.msra.gmra.mrb[164].mxu1 %vm997_vm0, %v4784_v53  ;;  %v5350_v26 = vpop.permute.xlu1 %5349 }
 0xa06   : > { %7642 = vmatprep.mubr.msk.bf16.mxu1 %vm997_vm0, %v4786_v63  ;;  %7663 = vmatpush3.bf16.msra.mxu1 %v5344_v21 }
 0xa07   : > { %7664 = vmatprep.subr.bf16.mxu1 %v5346_v28 }
 0xa0a   : > { %7665 = vmatpush3.bf16.msra.mxu1 %v5346_v28 }
 0xa0b   : > { %7666 = vmatprep.subr.bf16.mxu1 %v5348_v13 }
 0xa0d   : > { %7643 = vmatmul.mubr.msk.bf16.gmra.mrb[168].mxu1 %vm997_vm0, %v4788_v25  ;;  %v6724_v25 = vld [vmem:[#allocation7 + $0x60] sm:$0xff]  }
 0xa0e   : > { %7667 = vmatpush3.bf16.msra.mxu1 %v5348_v13  ;;  %v11264_v31 = vunpack.c.l.bf16 %v6724_v25  ;;  %v11298_v33 = vunpack.c.h.bf16 %v6724_v25 }
 0xa0f   : > { %7668 = vmatprep.subr.bf16.mxu1 %v5350_v26 }
 0xa12   : > { %7669 = vmatpush3.bf16.msra.mxu1 %v5350_v26 }
 0xa1f   : > { %v11178_v37 = vpop.f32.mrb[116].mxu0 }
 0xa20   : > { %v11180_v24 = vpop.f32.mrb[117].mxu0 }
 0xa21   : > { %v11182_v49 = vpop.f32.mrb[118].mxu0 }
 0xa22   : > { %v11186_v40 = vpop.f32.mrb[119].mxu0 }
 0xa23   : > { %v11190_v23 = vpop.f32.mrb[140].mxu1 }
 0xa24   : > { %v11192_v7 = vpop.f32.mrb[141].mxu1 }
 0xa25   : > { %v11194_v51 = vpop.f32.mrb[142].mxu1 }
 0xa26   : > { %v11198_v0 = vpop.f32.mrb[143].mxu1 }
 0xa2f   : > { %v11202_v48 = vpop.f32.mrb[144].mxu1 }
 0xa30   : > { %v11204_v54 = vpop.f32.mrb[145].mxu1 }
 0xa31   : > { %v11206_v15 = vpop.f32.mrb[146].mxu1 }
 0xa32   : > { %v11210_v6 = vpop.f32.mrb[147].mxu1 }
 0xa37   : > { %v11214_v2 = vpop.f32.mrb[120].mxu0 }
 0xa38   : > { %v11216_v46 = vpop.f32.mrb[121].mxu0 }
 0xa39   : > { %v11218_v16 = vpop.f32.mrb[122].mxu0 }
 0xa3a   : > { %v11222_v56 = vpop.f32.mrb[123].mxu0 }
 0xa43   : > { %v11226_v34 = vpop.f32.mrb[124].mxu0 }
 0xa44   : > { %12507 = vst [vmem:[#allocation34_spill] sm:$0xff] %v11226_v34  ;;  %v11228_v59 = vpop.f32.mrb[125].mxu0 }
 0xa45   : > { %12508 = vst [vmem:[#allocation21_spill] sm:$0xff] %v11228_v59  ;;  %v11230_v41 = vpop.f32.mrb[126].mxu0 }
 0xa46   : > { %12509 = vst [vmem:[#allocation41_spill] sm:$0xff] %v11230_v41  ;;  %v11234_v11 = vpop.f32.mrb[127].mxu0 }
 0xa47   : > { %12510 = vst [vmem:[#allocation25_spill] sm:$0xff] %v11234_v11  ;;  %v11238_v36 = vpop.f32.mrb[148].mxu1 }
 0xa48   : > { %12511 = vst [vmem:[#allocation51_spill] sm:$0xff] %v11238_v36  ;;  %v11240_v12 = vpop.f32.mrb[149].mxu1 }
 0xa49   : > { %12512 = vst [vmem:[#allocation37_spill] sm:$0xff] %v11240_v12  ;;  %v11242_v18 = vpop.f32.mrb[150].mxu1 }
 0xa4a   : > { %12513 = vst [vmem:[#allocation39_spill] sm:$0xff] %v11242_v18  ;;  %v11246_v42 = vpop.f32.mrb[151].mxu1 }
 0xa4b   : > { %12514 = vst [vmem:[#allocation43_spill] sm:$0xff] %v11246_v42 }
 0xa7b   : > { %v11250_v9 = vpop.f32.mrb[128].mxu0 }
 0xa7c   : > { %12515 = vst [vmem:[#allocation30_spill] sm:$0xff] %v11250_v9  ;;  %v11252_v50 = vpop.f32.mrb[129].mxu0 }
 0xa7d   : > { %12516 = vst [vmem:[#allocation110_spill] sm:$0xff] %v11252_v50  ;;  %v11254_v14 = vpop.f32.mrb[130].mxu0 }
 0xa7e   : > { %12517 = vst [vmem:[#allocation53_spill] sm:$0xff] %v11254_v14  ;;  %v11258_v35 = vpop.f32.mrb[131].mxu0 }
 0xa7f   : > { %12518 = vst [vmem:[#allocation106_spill] sm:$0xff] %v11258_v35 }
 0xa83   : > { %v7592_v44 = vpop.f32.mrb[132].mxu0 }
 0xa84   : > { %v11269_v38 = vadd.f32 %v7592_v44, %v11262_v39  ;;  %v4540_v17 = vpop.f32.mrb[133].mxu0 }
 0xa85   : > { %v11272_v57 = vadd.f32 %v11264_v31, %v4540_v17  ;;  %v7593_v55 = vpop.f32.mrb[134].mxu0 }
 0xa86   : > { %v4543_v27 = vpop.f32.mrb[135].mxu0  ;;  %v4892_v52 = vsel %vm1354_vm1, %v11269_v38, -inf  ;;  %v11277_v63 = vadd.f32 %v7593_v55, %v11266_v3  ;;  %v11308_v55 = vunpack.c.h.bf16 %v6830_v30 }
 0xa87   : > { %4893 = vmax.xlane.f32.xlu0 %v4892_v52  ;;  %v4886_v47 = vsel %vm1354_vm1, %v11272_v57, -inf }
 0xa88   : > { %4887 = vmax.xlane.f32.xlu1 %v4886_v47  ;;  %v4895_v4 = vsel %vm1354_vm1, %v11277_v63, -inf }
 0xa8b   : > { %v7596_v58 = vpop.f32.mrb[136].mxu0 }
 0xa8c   : > { %4896 = vmax.xlane.f32.xlu1 %v4895_v4  ;;  %v4556_v13 = vpop.f32.mrb[137].mxu0 }
 0xa8d   : > { %v7597_v21 = vpop.f32.mrb[138].mxu0 }
 0xa8e   : > { %v4559_v32 = vpop.f32.mrb[139].mxu0 }
 0xab0   : > { %v11283_v28 = vpop.f32.mrb[152].mxu1 }
 0xab1   : > { %12519 = vst [vmem:[#allocation112_spill] sm:$0xff] %v11283_v28  ;;  %v11285_v26 = vpop.f32.mrb[153].mxu1 }
 0xab2   : > { %12520 = vst [vmem:[#allocation38_spill] sm:$0xff] %v11285_v26  ;;  %v11287_v19 = vpop.f32.mrb[154].mxu1  ;;  %v6829_v26 = vld [vmem:[#allocation7 + $0x70] sm:$0xff]  }
 0xab3   : > { %12521 = vst [vmem:[#allocation18_spill] sm:$0xff] %v11287_v19  ;;  %v11291_v17 = vpop.f32.mrb[155].mxu1 }
 0xab4   : > { %12522 = vst [vmem:[#allocation45_spill] sm:$0xff] %v11291_v17 }
 0xab8   : > { %v7608_v52 = vpop.f32.mrb[156].mxu1 }
 0xab9   : > { %v11296_v47 = vadd.f32 %v7608_v52, %v11262_v39  ;;  %v4645_v4 = vpop.f32.mrb[157].mxu1 }
 0xaba   : > { %v7609_v53 = vpop.f32.mrb[158].mxu1  ;;  %v11301_v22 = vadd.f32 %v11264_v31, %v4645_v4 }
 0xabb   : > { %v11304_v60 = vadd.f32 %v7609_v53, %v11266_v3  ;;  %v4648_v44 = vpop.f32.mrb[159].mxu1  ;;  %v4916_v5 = vsel %vm1354_vm1, %v11296_v47, -inf  ;;  %v11316_v53 = vadd.f32 %v11298_v33, %v4543_v27  ;;  %v11328_v27 = vadd.f32 %v7596_v58, %v11318_v29 }
 0xabc   : > { %4917 = vmax.xlane.f32.xlu0 %v4916_v5  ;;  %v11311_v52 = vadd.f32 %v11298_v33, %v4648_v44  ;;  %v4910_v5 = vsel %vm1354_vm1, %v11301_v22, -inf  ;;  %v11323_v44 = vadd.f32 %v7597_v21, %v11308_v55  ;;  %v11341_v58 = vunpack.c.l.bf16 %v6829_v26 }
 0xabd   : > { %v7624_v45 = vpop.f32.mrb[140].mxu0  ;;  %v4919_v25 = vsel %vm1354_vm1, %v11304_v60, -inf  ;;  %v4889_v62 = vsel %vm1354_vm1, %v11316_v53, -inf }
 0xabe   : > { %4920 = vmax.xlane.f32.xlu1 %v4919_v25  ;;  %v4750_v4 = vpop.f32.mrb[141].mxu0  ;;  %v4913_v25 = vsel %vm1354_vm1, %v11311_v52, -inf  ;;  %v4907_v28 = vsel %vm1354_vm1, %v11323_v44, -inf }
 0xabf   : > { %v7625_v20 = vpop.f32.mrb[142].mxu0 }
 0xac0   : > { %4911 = vmax.xlane.f32.xlu0 %v4910_v5  ;;  %v7612_v10 = vpop.f32.mrb[160].mxu1  ;;  %v4753_v43 = vpop.f32.mrb[143].mxu0  ;;  %v11332_v5 = vunpack.c.h.bf16 %v6829_v26 }
 0xac1   : > { %v4661_v8 = vpop.f32.mrb[161].mxu1  ;;  %v11344_v19 = vadd.f32 %v7612_v10, %v11318_v29  ;;  %v11394_v50 = vadd.f32 %v11298_v33, %v4753_v43 }
 0xac2   : > { %4914 = vmax.xlane.f32.xlu1 %v4913_v25  ;;  %v7613_v61 = vpop.f32.mrb[162].mxu1 }
 0xac3   : > { %v4664_v30 = vpop.f32.mrb[163].mxu1  ;;  %v11335_v21 = vadd.f32 %v7613_v61, %v11308_v55  ;;  %v11349_v61 = vadd.f32 %v11332_v5, %v4559_v32  ;;  %v4928_v10 = vsel %vm1354_vm1, %v11344_v19, -inf  ;;  %v11364_v32 = vadd.f32 %v11341_v58, %v4661_v8 }
 0xac4   : > { %4890 = vmax.xlane.f32.xlu0 %v4889_v62  ;;  %v4904_v62 = vsel %vm1354_vm1, %v11328_v27, -inf  ;;  %v11359_v26 = vadd.f32 %v11332_v5, %v4664_v30  ;;  %v11374_v30 = vadd.f32 %v7624_v45, %v11262_v39  ;;  %v11386_v45 = vadd.f32 %v11264_v31, %v4750_v4 }
 0xac5   : > { %v7628_v17 = vpop.f32.mrb[144].mxu0  ;;  %v4931_v36 = vsel %vm1354_vm1, %v11335_v21, -inf  ;;  %v4937_v43 = vsel %vm1354_vm1, %v11394_v50, -inf }
 0xac6   : > { %4908 = vmax.xlane.f32.xlu1 %v4907_v28  ;;  %v11339_v25 = vpop.f32.mrb[145].mxu0  ;;  %v11354_v28 = vadd.f32 %v11341_v58, %v4556_v13  ;;  %v11369_v13 = vadd.f32 %v7625_v20, %v11266_v3  ;;  %v4934_v4 = vsel %vm1354_vm1, %v11386_v45, -inf  ;;  %v11409_v35 = vadd.f32 %v7628_v17, %v11318_v29 }
 0xac7   : > { %v7629_v12 = vpop.f32.mrb[146].mxu0 }
 0xac8   : > { %4905 = vmax.xlane.f32.xlu0 %v4904_v62  ;;  %v4769_v42 = vpop.f32.mrb[147].mxu0  ;;  %v4901_v62 = vsel %vm1354_vm1, %v11349_v61, -inf  ;;  %v4943_v8 = vsel %vm1354_vm1, %v11369_v13, -inf }
 0xaca   : > { %4932 = vmax.xlane.f32.xlu1 %v4931_v36  ;;  %v4898_v36 = vsel %vm1354_vm1, %v11354_v28, -inf }
 0xacc   : > { %4929 = vmax.xlane.f32.xlu0 %v4928_v10  ;;  %v4925_v10 = vsel %vm1354_vm1, %v11359_v26, -inf }
 0xace   : > { %4902 = vmax.xlane.f32.xlu1 %v4901_v62  ;;  %v4922_v62 = vsel %vm1354_vm1, %v11364_v32, -inf }
 0xad0   : > { %4899 = vmax.xlane.f32.xlu0 %v4898_v36  ;;  %v4940_v36 = vsel %vm1354_vm1, %v11374_v30, -inf }
 0xad2   : > { %4926 = vmax.xlane.f32.xlu1 %v4925_v10 }
 0xad4   : > { %4923 = vmax.xlane.f32.xlu0 %v4922_v62 }
 0xad6   : > { %4944 = vmax.xlane.f32.xlu1 %v4943_v8 }
 0xad8   : > { %v7640_v20 = vpop.f32.mrb[164].mxu1  ;;  %4941 = vmax.xlane.f32.xlu0 %v4940_v36 }
 0xad9   : > { %v11383_v18 = vadd.f32 %v7640_v20, %v11262_v39  ;;  %v4855_v10 = vpop.f32.mrb[165].mxu1 }
 0xada   : > { %v7641_v9 = vpop.f32.mrb[166].mxu1  ;;  %v11399_v36 = vadd.f32 %v11264_v31, %v4855_v10  ;;  %v11414_v10 = vadd.f32 %v7629_v12, %v11308_v55  ;;  %v11430_v12 = vadd.f32 %v11341_v58, %v11339_v25 }
 0xadb   : > { %v11389_v14 = vadd.f32 %v7641_v9, %v11266_v3  ;;  %v4858_v62 = vpop.f32.mrb[167].mxu1  ;;  %v4964_v8 = vsel %vm1354_vm1, %v11383_v18, -inf }
 0xadc   : > { %4965 = vmax.xlane.f32.xlu0 %v4964_v8  ;;  %v11404_v3 = vadd.f32 %v11298_v33, %v4858_v62  ;;  %v4958_v31 = vsel %vm1354_vm1, %v11399_v36, -inf }
 0xadd   : > { %v4967_v39 = vsel %vm1354_vm1, %v11389_v14, -inf }
 0xade   : > { %4968 = vmax.xlane.f32.xlu1 %v4967_v39  ;;  %v4961_v33 = vsel %vm1354_vm1, %v11404_v3, -inf }
 0xae0   : > { %v7644_v9 = vpop.f32.mrb[168].mxu1  ;;  %4935 = vmax.xlane.f32.xlu0 %v4934_v4  ;;  %v4952_v4 = vsel %vm1354_vm1, %v11409_v35, -inf }
 0xae1   : > { %v4871_v20 = vpop.f32.mrb[169].mxu1  ;;  %v11419_v62 = vadd.f32 %v7644_v9, %v11318_v29  ;;  %v11435_v29 = vadd.f32 %v11332_v5, %v4769_v42 }
 0xae2   : > { %4938 = vmax.xlane.f32.xlu1 %v4937_v43  ;;  %v7645_v8 = vpop.f32.mrb[170].mxu1  ;;  %v4955_v43 = vsel %vm1354_vm1, %v11414_v10, -inf }
 0xae3   : > { %v4874_v39 = vpop.f32.mrb[171].mxu1  ;;  %v11424_v17 = vadd.f32 %v7645_v8, %v11308_v55  ;;  %v11440_v55 = vadd.f32 %v11341_v58, %v4871_v20  ;;  %v4946_v8 = vsel %vm1354_vm1, %v11430_v12, -inf  ;;  %v12523_v58 = vld [vmem:[#allocation55_spill] sm:$0xff]  ;;  %v12524_v20 = vld [vmem:[#allocation56_spill] sm:$0xff] }
 0xae4   : > { %4959 = vmax.xlane.f32.xlu0 %v4958_v31  ;;  %v4976_v31 = vsel %vm1354_vm1, %v11419_v62, -inf  ;;  %v11445_v25 = vadd.f32 %v11332_v5, %v4874_v39  ;;  %v11457_v5 = vpop.permute.xlu1 %5434  ;;  %v11459_v39 = vpop.permute.xlu0 %5436 }
 0xae5   : > { %v4979_v9 = vsel %vm1354_vm1, %v11424_v17, -inf  ;;  %v4970_v42 = vsel %vm1354_vm1, %v11440_v55, -inf  ;;  %12525 = vst [vmem:[#allocation29_spill] sm:$0xff] %v11457_v5  ;;  %12526 = vst [vmem:[#allocation16_spill] sm:$0xff] %v11459_v39 }
 0xae6   : > { %4962 = vmax.xlane.f32.xlu1 %v4961_v33  ;;  %v4949_v33 = vsel %vm1354_vm1, %v11435_v29, -inf }
 0xae8   : > { %4953 = vmax.xlane.f32.xlu0 %v4952_v4  ;;  %v4973_v4 = vsel %vm1354_vm1, %v11445_v25, -inf }
 0xaea   : > { %4956 = vmax.xlane.f32.xlu1 %v4955_v43  ;;  %v11461_v43 = vpop.permute.xlu1 %5438 }
 0xaeb   : > { %12527 = vst [vmem:[#allocation19_spill] sm:$0xff] %v11461_v43 }
 0xaec   : > { %4977 = vmax.xlane.f32.xlu0 %v4976_v31 }
 0xaee   : > { %4980 = vmax.xlane.f32.xlu1 %v4979_v9 }
 0xaf0   : > { %4947 = vmax.xlane.f32.xlu0 %v4946_v8 }
 0xaf2   : > { %4950 = vmax.xlane.f32.xlu1 %v4949_v33 }
 0xaf4   : > { %4971 = vmax.xlane.f32.xlu0 %v4970_v42 }
 0xaf6   : > { %4974 = vmax.xlane.f32.xlu1 %v4973_v4 }
 0xb07   : > { %5523 = vrot.lane.b32.xlu1 %v12523_v58, %s8693_s14 }
 0xb0a   : > { %5521 = vrot.lane.b32.xlu0 %v12524_v20, %s8693_s14 }
 0xb14   : > { %v4894_v31 = vpop.xlane.xlu0 %4893 }
 0xb15   : > { %v4984_v9 = vsub.f32 %v11269_v38, %v4894_v31  ;;  %v4888_v8 = vpop.xlane.xlu1 %4887 }
 0xb16   : > { %v4982_v42 = vsub.f32 %v11272_v57, %v4888_v8 }
 0xb17   : > { %v5018_v33 = vmul.f32 1.442695, %v4984_v9 }
 0xb18   : > { %v5014_v4 = vmul.f32 1.442695, %v4982_v42 }
 0xb19   : > { %8364 = vpow2.f32 %v5018_v33  ;;  %v4897_v38 = vpop.xlane.xlu1 %4896 }
 0xb1a   : > { %8366 = vpow2.f32 %v5014_v4  ;;  %v4985_v8 = vsub.f32 %v11277_v63, %v4897_v38 }
 0xb1c   : > { %v5020_v11 = vmul.f32 1.442695, %v4985_v8 }
 0xb23   : > { %v11465_v58 = vpop.eup %8364 }
 0xb24   : > { %v5084_v20 = vsel %vm1354_vm1, %v11465_v58, 0.0  ;;  %v11469_v34 = vpop.eup %8366 }
 0xb25   : > { %v5078_v41 = vsel %vm1354_vm1, %v11469_v34, 0.0 }
 0xb29   : > { %5085 = vadd.xlane.f32.xlu0 %v5084_v20 }
 0xb2d   : > { %5079 = vadd.xlane.f32.xlu0 %v5078_v41 }
 0xb49   : > { %v4918_v31 = vpop.xlane.xlu0 %4917 }
 0xb4a   : > { %v4992_v9 = vsub.f32 %v11296_v47, %v4918_v31 }
 0xb4b   : > { %v4921_v57 = vpop.xlane.xlu1 %4920 }
 0xb4c   : > { %v5034_v33 = vmul.f32 1.442695, %v4992_v9  ;;  %v4993_v20 = vsub.f32 %v11304_v60, %v4921_v57 }
 0xb4d   : > { %v4912_v42 = vpop.xlane.xlu0 %4911 }
 0xb4e   : > { %8368 = vpow2.f32 %v5034_v33  ;;  %v4990_v4 = vsub.f32 %v11301_v22, %v4912_v42  ;;  %v5036_v5 = vmul.f32 1.442695, %v4993_v20 }
 0xb4f   : > { %v4915_v59 = vpop.xlane.xlu1 %4914 }
 0xb50   : > { %v5030_v43 = vmul.f32 1.442695, %v4990_v4  ;;  %v4991_v22 = vsub.f32 %v11311_v52, %v4915_v59 }
 0xb51   : > { %v4891_v39 = vpop.xlane.xlu0 %4890 }
 0xb52   : > { %8370 = vpow2.f32 %v5030_v43  ;;  %v4983_v47 = vsub.f32 %v11316_v53, %v4891_v39 }
 0xb53   : > { %v4909_v41 = vpop.xlane.xlu1 %4908  ;;  %8372 = vpow2.f32 %v5020_v11 }
 0xb54   : > { %8374 = vpow2.f32 %v5036_v5  ;;  %v5016_v8 = vmul.f32 1.442695, %v4983_v47  ;;  %v4989_v57 = vsub.f32 %v11323_v44, %v4909_v41 }
 0xb55   : > { %v4906_v31 = vpop.xlane.xlu0 %4905 }
 0xb56   : > { %v4988_v63 = vsub.f32 %v11328_v27, %v4906_v31  ;;  %v5032_v27 = vmul.f32 1.442695, %v4991_v22  ;;  %v5028_v20 = vmul.f32 1.442695, %v4989_v57 }
 0xb57   : > { %v4933_v38 = vpop.xlane.xlu1 %4932 }
 0xb58   : > { %v11479_v9 = vpop.eup %8368  ;;  %v5026_v33 = vmul.f32 1.442695, %v4988_v63 }
 0xb59   : > { %v4930_v60 = vpop.xlane.xlu0 %4929  ;;  %v5108_v43 = vsel %vm1354_vm1, %v11479_v9, 0.0 }
 0xb5a   : > { %8376 = vpow2.f32 %v5026_v33  ;;  %v4996_v11 = vsub.f32 %v11344_v19, %v4930_v60  ;;  %5109 = vadd.xlane.f32.xlu1 %v5108_v43  ;;  %v4997_v19 = vsub.f32 %v11335_v21, %v4933_v38 }
 0xb5b   : > { %v4903_v53 = vpop.xlane.xlu1 %4902  ;;  %8378 = vpow2.f32 %v5016_v8 }
 0xb5c   : > { %v11485_v39 = vpop.eup %8370  ;;  %v5042_v5 = vmul.f32 1.442695, %v4996_v11  ;;  %v4987_v47 = vsub.f32 %v11349_v61, %v4903_v53 }
 0xb5d   : > { %v4900_v42 = vpop.xlane.xlu0 %4899  ;;  %v5102_v59 = vsel %vm1354_vm1, %v11485_v39, 0.0  ;;  %v11490_v52 = vpop.eup %8372 }
 0xb5e   : > { %8380 = vpow2.f32 %v5042_v5  ;;  %v4986_v4 = vsub.f32 %v11354_v28, %v4900_v42  ;;  %5103 = vadd.xlane.f32.xlu1 %v5102_v59  ;;  %v5087_v41 = vsel %vm1354_vm1, %v11490_v52, 0.0  ;;  %v11497_v22 = vpop.eup %8374  ;;  %v5044_v28 = vmul.f32 1.442695, %v4997_v19 }
 0xb5f   : > { %8382 = vpow2.f32 %v5032_v27  ;;  %v4927_v63 = vpop.xlane.xlu1 %4926  ;;  %v5024_v38 = vmul.f32 1.442695, %v4987_v47  ;;  %v5111_v43 = vsel %vm1354_vm1, %v11497_v22, 0.0 }
 0xb60   : > { %v5022_v31 = vmul.f32 1.442695, %v4986_v4  ;;  %v4995_v33 = vsub.f32 %v11359_v26, %v4927_v63 }
 0xb61   : > { %v4924_v44 = vpop.xlane.xlu0 %4923 }
 0xb62   : > { %8384 = vpow2.f32 %v5022_v31  ;;  %v4994_v8 = vsub.f32 %v11364_v32, %v4924_v44  ;;  %5088 = vadd.xlane.f32.xlu1 %v5087_v41  ;;  %v5040_v26 = vmul.f32 1.442695, %v4995_v33 }
 0xb63   : > { %8386 = vpow2.f32 %v5028_v20  ;;  %v4945_v27 = vpop.xlane.xlu1 %4944 }
 0xb64   : > { %v11501_v21 = vpop.eup %8376  ;;  %v5038_v61 = vmul.f32 1.442695, %v4994_v8  ;;  %v5001_v31 = vsub.f32 %v11369_v13, %v4945_v27 }
 0xb65   : > { %v4942_v60 = vpop.xlane.xlu0 %4941  ;;  %v5096_v11 = vsel %vm1354_vm1, %v11501_v21, 0.0  ;;  %v11507_v53 = vpop.eup %8378 }
 0xb66   : > { %8388 = vpow2.f32 %v5038_v61  ;;  %v5000_v32 = vsub.f32 %v11374_v30, %v4942_v60  ;;  %5112 = vadd.xlane.f32.xlu1 %v5111_v43  ;;  %5097 = vadd.xlane.f32.xlu0 %v5096_v11  ;;  %v5081_v59 = vsel %vm1354_vm1, %v11507_v53, 0.0  ;;  %v5052_v13 = vmul.f32 1.442695, %v5001_v31 }
 0xb67   : > { %8390 = vpow2.f32 %v5044_v28 }
 0xb68   : > { %v11510_v57 = vpop.eup %8380  ;;  %8392 = vpow2.f32 %v5024_v38  ;;  %v5050_v5 = vmul.f32 1.442695, %v5000_v32 }
 0xb69   : > { %v4966_v42 = vpop.xlane.xlu0 %4965  ;;  %v5120_v4 = vsel %vm1354_vm1, %v11510_v57, 0.0  ;;  %v11516_v19 = vpop.eup %8382  ;;  %8394 = vpow2.f32 %v5040_v26 }
 0xb6a   : > { %v5008_v30 = vsub.f32 %v11383_v18, %v4966_v42  ;;  %5082 = vadd.xlane.f32.xlu1 %v5081_v59  ;;  %5121 = vadd.xlane.f32.xlu0 %v5120_v4  ;;  %8396 = vpow2.f32 %v5050_v5  ;;  %v5105_v41 = vsel %vm1354_vm1, %v11516_v19, 0.0 }
 0xb6b   : > { %v4969_v20 = vpop.xlane.xlu1 %4968 }
 0xb6c   : > { %v11519_v47 = vpop.eup %8384  ;;  %v5066_v63 = vmul.f32 1.442695, %v5008_v30  ;;  %v5009_v33 = vsub.f32 %v11389_v14, %v4969_v20 }
 0xb6d   : > { %v4936_v44 = vpop.xlane.xlu0 %4935  ;;  %v5090_v8 = vsel %vm1354_vm1, %v11519_v47, 0.0  ;;  %v11526_v28 = vpop.eup %8386 }
 0xb6e   : > { %v4998_v18 = vsub.f32 %v11386_v45, %v4936_v44  ;;  %5106 = vadd.xlane.f32.xlu1 %v5105_v41  ;;  %5091 = vadd.xlane.f32.xlu0 %v5090_v8  ;;  %8398 = vpow2.f32 %v5066_v63  ;;  %v5099_v26 = vsel %vm1354_vm1, %v11526_v28, 0.0  ;;  %v5068_v5 = vmul.f32 1.442695, %v5009_v33 }
 0xb6f   : > { %v4939_v38 = vpop.xlane.xlu1 %4938 }
 0xb70   : > { %v11530_v61 = vpop.eup %8388  ;;  %v5046_v60 = vmul.f32 1.442695, %v4998_v18  ;;  %v4999_v43 = vsub.f32 %v11394_v50, %v4939_v38 }
 0xb71   : > { %v11533_v11 = vpop.eup %8390  ;;  %v4960_v32 = vpop.xlane.xlu0 %4959  ;;  %v5114_v45 = vsel %vm1354_vm1, %v11530_v61, 0.0 }
 0xb72   : > { %v11539_v27 = vpop.eup %8392  ;;  %8400 = vpow2.f32 %v5046_v60  ;;  %v5006_v14 = vsub.f32 %v11399_v36, %v4960_v32  ;;  %5100 = vadd.xlane.f32.xlu1 %v5099_v26  ;;  %5115 = vadd.xlane.f32.xlu0 %v5114_v45  ;;  %v5048_v50 = vmul.f32 1.442695, %v4999_v43  ;;  %v5123_v63 = vsel %vm1354_vm1, %v11533_v11, 0.0 }
 0xb73   : > { %v4963_v42 = vpop.xlane.xlu1 %4962  ;;  %8402 = vpow2.f32 %v5052_v13  ;;  %v11543_v30 = vpop.eup %8394  ;;  %v5093_v31 = vsel %vm1354_vm1, %v11539_v27, 0.0 }
 0xb74   : > { %v5062_v59 = vmul.f32 1.442695, %v5006_v14  ;;  %v5007_v4 = vsub.f32 %v11404_v3, %v4963_v42  ;;  %v11549_v44 = vpop.eup %8396  ;;  %v5117_v38 = vsel %vm1354_vm1, %v11543_v30, 0.0 }
 0xb75   : > { %v4954_v20 = vpop.xlane.xlu0 %4953  ;;  %v5132_v13 = vsel %vm1354_vm1, %v11549_v44, 0.0 }
 0xb76   : > { %8404 = vpow2.f32 %v5062_v59  ;;  %v5004_v36 = vsub.f32 %v11409_v35, %v4954_v20  ;;  %5094 = vadd.xlane.f32.xlu1 %v5093_v31  ;;  %5124 = vadd.xlane.f32.xlu0 %v5123_v63  ;;  %v5064_v41 = vmul.f32 1.442695, %v5007_v4 }
 0xb77   : > { %8406 = vpow2.f32 %v5068_v5  ;;  %v4957_v8 = vpop.xlane.xlu1 %4956 }
 0xb78   : > { %8408 = vpow2.f32 %v5048_v50  ;;  %v5058_v3 = vmul.f32 1.442695, %v5004_v36  ;;  %v5005_v18 = vsub.f32 %v11414_v10, %v4957_v8  ;;  %v11557_v60 = vpop.eup %8398 }
 0xb79   : > { %v4978_v33 = vpop.xlane.xlu0 %4977  ;;  %8410 = vpow2.f32 %v5064_v41  ;;  %v5156_v5 = vsel %vm1354_vm1, %v11557_v60, 0.0 }
 0xb7a   : > { %v5012_v35 = vsub.f32 %v11419_v62, %v4978_v33  ;;  %5118 = vadd.xlane.f32.xlu1 %v5117_v38  ;;  %5133 = vadd.xlane.f32.xlu0 %v5132_v13  ;;  %v5060_v43 = vmul.f32 1.442695, %v5005_v18  ;;  %8412 = vpow2.f32 %v5058_v3 }
 0xb7b   : > { %v4981_v32 = vpop.xlane.xlu1 %4980 }
 0xb7c   : > { %v11560_v26 = vpop.eup %8400  ;;  %v5074_v10 = vmul.f32 1.442695, %v5012_v35  ;;  %v5013_v45 = vsub.f32 %v11424_v17, %v4981_v32  ;;  %8414 = vpow2.f32 %v5060_v43 }
 0xb7d   : > { %v4948_v14 = vpop.xlane.xlu0 %4947  ;;  %v5126_v42 = vsel %vm1354_vm1, %v11560_v26, 0.0  ;;  %v11567_v50 = vpop.eup %8402 }
 0xb7e   : > { %v5002_v62 = vsub.f32 %v11430_v12, %v4948_v14  ;;  %5157 = vadd.xlane.f32.xlu1 %v5156_v5  ;;  %5127 = vadd.xlane.f32.xlu0 %v5126_v42  ;;  %v5076_v59 = vmul.f32 1.442695, %v5013_v45  ;;  %8416 = vpow2.f32 %v5074_v10  ;;  %v5135_v41 = vsel %vm1354_vm1, %v11567_v50, 0.0 }
 0xb7f   : > { %v4951_v4 = vpop.xlane.xlu1 %4950 }
 0xb80   : > { %v11570_v20 = vpop.eup %8404  ;;  %v5054_v17 = vmul.f32 1.442695, %v5002_v62  ;;  %v5003_v31 = vsub.f32 %v11435_v29, %v4951_v4  ;;  %8418 = vpow2.f32 %v5076_v59 }
 0xb81   : > { %v11573_v63 = vpop.eup %8406  ;;  %v4972_v36 = vpop.xlane.xlu0 %4971  ;;  %v5150_v12 = vsel %vm1354_vm1, %v11570_v20, 0.0 }
 0xb82   : > { %v11579_v8 = vpop.eup %8408  ;;  %v5010_v3 = vsub.f32 %v11440_v55, %v4972_v36  ;;  %5136 = vadd.xlane.f32.xlu0 %v5135_v41  ;;  %5151 = vadd.xlane.f32.xlu1 %v5150_v12  ;;  %v5056_v18 = vmul.f32 1.442695, %v5003_v31  ;;  %8420 = vpow2.f32 %v5054_v17  ;;  %v5159_v43 = vsel %vm1354_vm1, %v11573_v63, 0.0 }
 0xb83   : > { %v4975_v33 = vpop.xlane.xlu1 %4974  ;;  %v11583_v13 = vpop.eup %8410  ;;  %v5129_v32 = vsel %vm1354_vm1, %v11579_v8, 0.0 }
 0xb84   : > { %v5070_v29 = vmul.f32 1.442695, %v5010_v3  ;;  %v5011_v38 = vsub.f32 %v11445_v25, %v4975_v33  ;;  %v11591_v55 = vpop.eup %8412  ;;  %8422 = vpow2.f32 %v5056_v18  ;;  %v5153_v45 = vsel %vm1354_vm1, %v11583_v13, 0.0 }
 0xb85   : > { %v11585_v35 = vpop.permute.xlu0 %5521  ;;  %v5144_v14 = vsel %vm1354_vm1, %v11591_v55, 0.0 }
 0xb86   : > { %5160 = vadd.xlane.f32.xlu0 %v5159_v43  ;;  %5130 = vadd.xlane.f32.xlu1 %v5129_v32  ;;  %8424 = vpow2.f32 %v5070_v29  ;;  %v5072_v10 = vmul.f32 1.442695, %v5011_v38  ;;  %v11594_v25 = vpop.eup %8414  ;;  %v12528_v29 = vld [vmem:[#allocation58_spill] sm:$0xff]  ;;  %v12529_v38 = vld [vmem:[#allocation24_spill] sm:$0xff] }
 0xb87   : > { %7694 = vmatprep.subr.bf16.mxu1 %v11585_v35  ;;  %v5147_v62 = vsel %vm1354_vm1, %v11594_v25, 0.0  ;;  %v12530_v43 = vld [vmem:[#allocation28_spill] sm:$0xff] }
 0xb88   : > { %v11600_v5 = vpop.eup %8416  ;;  %8426 = vpow2.f32 %v5072_v10  ;;  %v12531_v32 = vpack.c.bf16 %v12529_v38, %v12530_v43  ;;  %v12532_v10 = vpack.c.bf16 %v11186_v40, %v11180_v24  ;;  %v12541_v24 = vpack.c.bf16 %v11182_v49, %v11178_v37  ;;  %v12542_v40 = vld [vmem:[#allocation98_spill] sm:$0xff]  ;;  %v12545_v38 = vld [vmem:[#allocation67_spill] sm:$0xff]  ;;  %v12546_v43 = vld [vmem:[#allocation69_spill] sm:$0xff] }
 0xb89   : > { %v5168_v59 = vsel %vm1354_vm1, %v11600_v5, 0.0  ;;  %v12549_v37 = vpack.c.bf16 %v11218_v16, %v11214_v2  ;;  %v12550_v49 = vld [vmem:[#allocation33_spill] sm:$0xff]  ;;  %v12558_v2 = vld [vmem:[#allocation99_spill] sm:$0xff]  ;;  %v12559_v16 = vld [vmem:[#allocation94_spill] sm:$0xff] }
 0xb8a   : > { %5154 = vadd.xlane.f32.xlu0 %v5153_v45  ;;  %5145 = vadd.xlane.f32.xlu1 %v5144_v14  ;;  %v11602_v42 = vpop.eup %8418  ;;  %v12533_v45 = vld [vmem:[#allocation57_spill] sm:$0xff]  ;;  %v12534_v14 = vld [vmem:[#allocation23_spill] sm:$0xff] }
 0xb8b   : > { %v5171_v31 = vsel %vm1354_vm1, %v11602_v42, 0.0 }
 0xb8c   : > { %v11608_v4 = vpop.eup %8420 }
 0xb8d   : > { %v5138_v36 = vsel %vm1354_vm1, %v11608_v4, 0.0 }
 0xb8e   : > { %5148 = vadd.xlane.f32.xlu0 %v5147_v62  ;;  %5169 = vadd.xlane.f32.xlu1 %v5168_v59  ;;  %v11610_v17 = vpop.eup %8422  ;;  %v12535_v62 = vld [vmem:[#allocation95_spill] sm:$0xff] }
 0xb8f   : > { %v5141_v12 = vsel %vm1354_vm1, %v11610_v17, 0.0  ;;  %v12536_v59 = vpack.c.bf16 %v12534_v14, %v12535_v62  ;;  %v12554_v14 = vld [vmem:[#allocation15_spill] sm:$0xff] }
 0xb90   : > { %v11616_v41 = vpop.eup %8424 }
 0xb91   : > { %v5162_v3 = vsel %vm1354_vm1, %v11616_v41, 0.0 }
 0xb92   : > { %5172 = vadd.xlane.f32.xlu0 %v5171_v31  ;;  %5139 = vadd.xlane.f32.xlu1 %v5138_v36  ;;  %v11622_v18 = vpop.eup %8426  ;;  %v12537_v31 = vld [vmem:[#allocation36_spill] sm:$0xff] }
 0xb93   : > { %v5165_v33 = vsel %vm1354_vm1, %v11622_v18, 0.0  ;;  %v12538_v36 = vld [vmem:[#allocation32_spill] sm:$0xff] }
 0xb96   : > { %5142 = vadd.xlane.f32.xlu0 %v5141_v12  ;;  %5163 = vadd.xlane.f32.xlu1 %v5162_v3  ;;  %v12539_v12 = vpack.c.bf16 %v12537_v31, %v12538_v36  ;;  %v12540_v3 = vpack.c.bf16 %v11222_v56, %v11216_v46  ;;  %v12548_v46 = vpack.c.bf16 %v11198_v0, %v11192_v7  ;;  %v12551_v56 = vld [vmem:[#allocation60_spill] sm:$0xff]  ;;  %v12562_v36 = vld [vmem:[#allocation17_spill] sm:$0xff] }
 0xb97   : > { %v12556_v7 = vpack.c.bf16 %v11210_v6, %v11204_v54  ;;  %v12557_v0 = vpack.c.bf16 %v11194_v51, %v11190_v23  ;;  %v12561_v31 = vld [vmem:[#allocation68_spill] sm:$0xff]  ;;  %v12564_v54 = vpack.c.bf16 %v11206_v15, %v11202_v48  ;;  %v12565_v6 = vld [vmem:[#allocation97_spill] sm:$0xff]  ;;  %v11702_v51 = vpop.permute.xlu1 %5523 }
 0xb9a   : > { %5166 = vadd.xlane.f32.xlu0 %v5165_v33  ;;  %v12543_v33 = vld [vmem:[#allocation26_spill] sm:$0xff] }
 0xba7   : > { %5525 = vrot.lane.b32.xlu1 %v12528_v29, %s8693_s14  ;;  %v12544_v29 = vpack.c.bf16 %v12542_v40, %v12543_v33 }
 0xbab   : > { %5642 = vrot.lane.b32.xlu1 %v12531_v32, %s8693_s14  ;;  %v12547_v32 = vpack.c.bf16 %v12545_v38, %v12546_v43 }
 0xbaf   : > { %5690 = vrot.lane.b32.xlu1 %v12532_v10, %s8692_s26  ;;  %v12552_v10 = vpack.c.bf16 %v12550_v49, %v12551_v56 }
 0xbb0   : > { %5527 = vrot.lane.b32.xlu0 %v12533_v45, %s8693_s14  ;;  %v12553_v45 = vld [vmem:[#allocation48_spill] sm:$0xff] }
 0xbb1   : > { %v12555_v62 = vpack.c.bf16 %v12553_v45, %v12554_v14 }
 0xbb3   : > { %5646 = vrot.lane.b32.xlu1 %v12536_v59, %s8693_s14  ;;  %v12560_v59 = vpack.c.bf16 %v12558_v2, %v12559_v16 }
 0xbb4   : > { %5644 = vrot.lane.b32.xlu0 %v12539_v12, %s8693_s14  ;;  %v12563_v12 = vpack.c.bf16 %v12561_v31, %v12562_v36 }
 0xbb6   : > { %v5086_v40 = vpop.xlane.xlu0 %5085 }
 0xbb7   : > { %5694 = vrot.lane.b32.xlu1 %v12540_v3, %s8692_s26  ;;  %v12566_v3 = vld [vmem:[#allocation96_spill] sm:$0xff] }
 0xbb8   : > { %5692 = vrot.lane.b32.xlu0 %v12541_v24, %s8692_s26  ;;  %v12567_v23 = vpack.c.bf16 %v12565_v6, %v12566_v3 }
 0xbbb   : > { %5650 = vrot.lane.b32.xlu1 %v12544_v29, %s8693_s14  ;;  %v5080_v29 = vpop.xlane.xlu0 %5079 }
 0xbbc   : > { %5648 = vrot.lane.b32.xlu0 %v12547_v32, %s8693_s14 }
 0xbbf   : > { %5698 = vrot.lane.b32.xlu1 %v12548_v46, %s8692_s26 }
 0xbc0   : > { %5696 = vrot.lane.b32.xlu0 %v12549_v37, %s8692_s26 }
 0xbc3   : > { %5654 = vrot.lane.b32.xlu1 %v12552_v10, %s8693_s14 }
 0xbc4   : > { %5652 = vrot.lane.b32.xlu0 %v12555_v62, %s8693_s14 }
 0xbc7   : > { %5702 = vrot.lane.b32.xlu1 %v12556_v7, %s8692_s26 }
 0xbc8   : > { %5700 = vrot.lane.b32.xlu0 %v12557_v0, %s8692_s26 }
 0xbcb   : > { %5658 = vrot.lane.b32.xlu1 %v12560_v59, %s8693_s14 }
 0xbcc   : > { %5656 = vrot.lane.b32.xlu0 %v12563_v12, %s8693_s14 }
 0xbd0   : > { %5704 = vrot.lane.b32.xlu0 %v12564_v54, %s8692_s26 }
 0xbd4   : > { %5660 = vrot.lane.b32.xlu0 %v12567_v23, %s8693_s14 }
 0xbe7   : > { %v5110_v24 = vpop.xlane.xlu1 %5109 }
 0xbeb   : > { %v5104_v33 = vpop.xlane.xlu1 %5103 }
 0xbef   : > { %v5089_v38 = vpop.xlane.xlu1 %5088 }
 0xbf0   : > { %8428 = vrcp.f32 %v5089_v38 }
 0xbf1   : > { %8430 = vrcp.f32 %v5080_v29 }
 0xbf2   : > { %8432 = vrcp.f32 %v5086_v40 }
 0xbf3   : > { %v5113_v43 = vpop.xlane.xlu1 %5112  ;;  %v5098_v32 = vpop.xlane.xlu0 %5097 }
 0xbf7   : > { %v5083_v46 = vpop.xlane.xlu1 %5082  ;;  %v5122_v48 = vpop.xlane.xlu0 %5121 }
 0xbf8   : > { %8434 = vrcp.f32 %v5083_v46 }
 0xbf9   : > { %8436 = vrcp.f32 %v5113_v43 }
 0xbfa   : > { %8438 = vrcp.f32 %v5104_v33  ;;  %v8429_v49 = vpop.eup %8428 }
 0xbfb   : > { %8440 = vrcp.f32 %v5110_v24  ;;  %v5107_v15 = vpop.xlane.xlu1 %5106  ;;  %v5092_v37 = vpop.xlane.xlu0 %5091  ;;  %v5209_v7 = vmul.f32 %v8429_v49, %v11490_v52 }
 0xbfc   : > { %8442 = vrcp.f32 %v5107_v15  ;;  %v8431_v45 = vpop.eup %8430 }
 0xbfd   : > { %v8433_v14 = vpop.eup %8432  ;;  %v5206_v59 = vmul.f32 %v8431_v45, %v11469_v34 }
 0xbfe   : > { %v5208_v12 = vmul.f32 %v8433_v14, %v11465_v58 }
 0xbff   : > { %v5101_v56 = vpop.xlane.xlu1 %5100  ;;  %v5116_v10 = vpop.xlane.xlu0 %5115 }
 0xc00   : > { %8444 = vrcp.f32 %v5101_v56  ;;  %v5239_v23 = vpack.c.bf16 %v5209_v7, %v5208_v12 }
 0xc01   : > { %8446 = vrcp.f32 %v5092_v37 }
 0xc02   : > { %v8435_v62 = vpop.eup %8434  ;;  %8448 = vrcp.f32 %v5098_v32 }
 0xc03   : > { %v8437_v0 = vpop.eup %8436  ;;  %v5095_v2 = vpop.xlane.xlu1 %5094  ;;  %v5207_v31 = vmul.f32 %v8435_v62, %v11507_v53 }
 0xc04   : > { %v5125_v16 = vpop.xlane.xlu0 %5124  ;;  %v8439_v36 = vpop.eup %8438  ;;  %8450 = vrcp.f32 %v5095_v2  ;;  %v5217_v52 = vmul.f32 %v8437_v0, %v11497_v22  ;;  %v12568_v22 = vld [vmem:[#allocation29_spill] sm:$0xff] }
 0xc05   : > { %v8441_v54 = vpop.eup %8440  ;;  %8452 = vrcp.f32 %v5125_v16  ;;  %v5238_v6 = vpack.c.bf16 %v5207_v31, %v5206_v59  ;;  %v5214_v34 = vmul.f32 %v8439_v36, %v11485_v39 }
 0xc06   : > { %v8443_v3 = vpop.eup %8442  ;;  %8454 = vrcp.f32 %v5116_v10  ;;  %v5216_v58 = vmul.f32 %v8441_v54, %v11479_v9 }
 0xc07   : > { %8456 = vrcp.f32 %v5122_v48  ;;  %v5119_v24 = vpop.xlane.xlu1 %5118  ;;  %7654 = vmatprep.mubr.msk.bf16.mxu0 %vm1354_vm1, %v5238_v6  ;;  %v5215_v53 = vmul.f32 %v8443_v3, %v11516_v19  ;;  %v12569_v19 = vld [vmem:[#allocation16_spill] sm:$0xff] }
 0xc08   : > { %v5134_v40 = vpop.xlane.xlu0 %5133  ;;  %8458 = vrcp.f32 %v5119_v24  ;;  %7655 = vmatmul.mubr.msk.bf16.vlgmr.msra.gmra.mrb[148].mxu0 %vm1354_vm1, %v5239_v23  ;;  %v5243_v29 = vpack.c.bf16 %v5217_v52, %v5216_v58 }
 0xc09   : > { %7679 = vmatpush3.bf16.msra.mxu0 %v11172_v1  ;;  %v5242_v33 = vpack.c.bf16 %v5215_v53, %v5214_v34 }
 0xc0a   : > { %7680 = vmatprep.subr.bf16.mxu0 %v12568_v22  ;;  %v8445_v38 = vpop.eup %8444 }
 0xc0b   : > { %7670 = vmatprep.mubr.msk.bf16.mxu1 %vm1354_vm1, %v5242_v33  ;;  %v5158_v43 = vpop.xlane.xlu1 %5157  ;;  %v8447_v46 = vpop.eup %8446  ;;  %v5213_v1 = vmul.f32 %v8445_v38, %v11526_v28  ;;  %v12570_v28 = vld [vmem:[#allocation19_spill] sm:$0xff] }
 0xc0c   : > { %v5128_v32 = vpop.xlane.xlu0 %5127  ;;  %7671 = vmatmul.mubr.msk.bf16.vlgmr.msra.gmra.mrb[172].mxu1 %vm1354_vm1, %v5243_v29  ;;  %v8449_v39 = vpop.eup %8448  ;;  %v5210_v49 = vmul.f32 %v8447_v46, %v11519_v47 }
 0xc0d   : > { %7681 = vmatpush3.bf16.msra.mxu0 %v12568_v22  ;;  %7695 = vmatpush3.bf16.msra.mxu1 %v11585_v35  ;;  %v5212_v45 = vmul.f32 %v8449_v39, %v11501_v21 }
 0xc0e   : > { %v8451_v9 = vpop.eup %8450  ;;  %7682 = vmatprep.subr.bf16.mxu0 %v12569_v19  ;;  %7696 = vmatprep.subr.bf16.mxu1 %v11702_v51 }
 0xc0f   : > { %v8453_v48 = vpop.eup %8452  ;;  %v5152_v15 = vpop.xlane.xlu1 %5151  ;;  %v5211_v56 = vmul.f32 %v8451_v9, %v11539_v27  ;;  %v5241_v7 = vpack.c.bf16 %v5213_v1, %v5212_v45 }
 0xc10   : > { %v5137_v37 = vpop.xlane.xlu0 %5136  ;;  %v8455_v10 = vpop.eup %8454  ;;  %v5221_v0 = vmul.f32 %v8453_v48, %v11533_v11 }
 0xc11   : > { %v8457_v14 = vpop.eup %8456  ;;  %8460 = vrcp.f32 %v5137_v37  ;;  %7683 = vmatpush3.bf16.msra.mxu0 %v12569_v19  ;;  %7697 = vmatpush3.bf16.msra.mxu1 %v11702_v51  ;;  %v5240_v35 = vpack.c.bf16 %v5211_v56, %v5210_v49  ;;  %v5218_v21 = vmul.f32 %v8455_v10, %v11530_v61 }
 0xc12   : > { %v8459_v62 = vpop.eup %8458  ;;  %8462 = vrcp.f32 %v5128_v32  ;;  %7684 = vmatprep.subr.bf16.mxu0 %v12570_v28  ;;  %v5220_v51 = vmul.f32 %v8457_v14, %v11510_v57 }
 0xc13   : > { %8464 = vrcp.f32 %v5134_v40  ;;  %v5131_v47 = vpop.xlane.xlu1 %5130  ;;  %7658 = vmatprep.mubr.msk.bf16.mxu0 %vm1354_vm1, %v5240_v35  ;;  %v5219_v2 = vmul.f32 %v8459_v62, %v11543_v30 }
 0xc14   : > { %v5161_v27 = vpop.xlane.xlu0 %5160  ;;  %8466 = vrcp.f32 %v5131_v47  ;;  %7659 = vmatmul.mubr.msk.bf16.gmra.mrb[152].mxu0 %vm1354_vm1, %v5241_v7  ;;  %v5245_v59 = vpack.c.bf16 %v5221_v0, %v5220_v51  ;;  %v7973_v0 = vld [vmem:[#allocation8 + $0x8] sm:$0xff]   ;;  %v7978_v47 = vld [vmem:[#allocation8 + $0x30] sm:$0xff]  }
 0xc15   : > { %7685 = vmatpush3.bf16.msra.mxu0 %v12570_v28  ;;  %v5244_v16 = vpack.c.bf16 %v5219_v2, %v5218_v21  ;;  %8468 = vrcp.f32 %v5152_v15 }
 0xc17   : > { %v5146_v11 = vpop.xlane.xlu1 %5145  ;;  %7674 = vmatprep.mubr.msk.bf16.mxu1 %vm1354_vm1, %v5244_v16 }
 0xc18   : > { %v5155_v31 = vpop.xlane.xlu0 %5154  ;;  %7675 = vmatmul.mubr.msk.bf16.gmra.mrb[176].mxu1 %vm1354_vm1, %v5245_v59 }
 0xc19   : > { %8470 = vrcp.f32 %v5155_v31 }
 0xc1a   : > { %8472 = vrcp.f32 %v5161_v27  ;;  %v7979_v27 = vld [vmem:[#allocation8 + $0x38] sm:$0xff]  }
 0xc1b   : > { %v8461_v61 = vpop.eup %8460  ;;  %v5170_v36 = vpop.xlane.xlu1 %5169  ;;  %8474 = vrcp.f32 %v5158_v43 }
 0xc1c   : > { %v5149_v30 = vpop.xlane.xlu0 %5148  ;;  %v8463_v12 = vpop.eup %8462  ;;  %v5225_v57 = vmul.f32 %v8461_v61, %v11567_v50  ;;  %8476 = vrcp.f32 %v5146_v11 }
 0xc1d   : > { %v8465_v54 = vpop.eup %8464  ;;  %v5222_v52 = vmul.f32 %v8463_v12, %v11560_v26  ;;  %8478 = vrcp.f32 %v5149_v30 }
 0xc1e   : > { %v8467_v6 = vpop.eup %8466  ;;  %v5224_v40 = vmul.f32 %v8465_v54, %v11549_v44 }
 0xc1f   : > { %v5140_v3 = vpop.xlane.xlu1 %5139  ;;  %v5223_v24 = vmul.f32 %v8467_v6, %v11579_v8  ;;  %v8469_v34 = vpop.eup %8468 }
 0xc20   : > { %v5173_v23 = vpop.xlane.xlu0 %5172  ;;  %v5247_v58 = vpack.c.bf16 %v5225_v57, %v5224_v40  ;;  %8480 = vrcp.f32 %v5140_v3  ;;  %v5230_v26 = vmul.f32 %v8469_v34, %v11570_v20 }
 0xc21   : > { %v5246_v53 = vpack.c.bf16 %v5223_v24, %v5222_v52  ;;  %8482 = vrcp.f32 %v5173_v23 }
 0xc23   : > { %v8471_v33 = vpop.eup %8470  ;;  %v5164_v29 = vpop.xlane.xlu1 %5163  ;;  %7686 = vmatprep.mubr.msk.bf16.mxu0 %vm1354_vm1, %v5246_v53 }
 0xc24   : > { %v5143_v50 = vpop.xlane.xlu0 %5142  ;;  %7687 = vmatmul.mubr.msk.bf16.vlgmr.msra.gmra.mrb[156].mxu0 %vm1354_vm1, %v5247_v58  ;;  %v5231_v8 = vmul.f32 %v8471_v33, %v11583_v13  ;;  %v8473_v22 = vpop.eup %8472 }
 0xc25   : > { %8484 = vrcp.f32 %v5143_v50  ;;  %v8475_v32 = vpop.eup %8474  ;;  %v5233_v46 = vmul.f32 %v8473_v22, %v11573_v63  ;;  %v12571_v50 = vld [vmem:[#allocation25_spill] sm:$0xff]  ;;  %v12575_v22 = vld [vmem:[#allocation34_spill] sm:$0xff] }
 0xc26   : > { %8486 = vrcp.f32 %v5164_v29  ;;  %v5250_v44 = vpack.c.bf16 %v5231_v8, %v5230_v26  ;;  %v8477_v39 = vpop.eup %8476  ;;  %v5232_v13 = vmul.f32 %v8475_v32, %v11557_v60  ;;  %v12572_v26 = vld [vmem:[#allocation21_spill] sm:$0xff]  ;;  %v12578_v32 = vld [vmem:[#allocation20_spill] sm:$0xff] }
 0xc27   : > { %8488 = vrcp.f32 %v5170_v36  ;;  %v5526_v38 = vpop.permute.xlu1 %5525  ;;  %v8479_v20 = vpop.eup %8478  ;;  %v5228_v45 = vmul.f32 %v8477_v39, %v11591_v55  ;;  %v7972_v55 = vld [vmem:[#allocation8] sm:$0xff]   ;;  %v12573_v8 = vpack.c.bf16 %v12571_v50, %v12572_v26  ;;  %v12611_v50 = vld [vmem:[#allocation38_spill] sm:$0xff] }
 0xc28   : > { %v5167_v43 = vpop.xlane.xlu0 %5166  ;;  %7702 = vmatprep.mubr.msk.bf16.mxu1 %vm1354_vm1, %v5250_v44  ;;  %7698 = vmatprep.subr.bf16.mxu1 %v5526_v38  ;;  %v5251_v48 = vpack.c.bf16 %v5233_v46, %v5232_v13  ;;  %v5229_v37 = vmul.f32 %v8479_v20, %v11594_v25  ;;  %v12574_v44 = vld [vmem:[#allocation41_spill] sm:$0xff]  ;;  %v12581_v20 = vld [vmem:[#allocation54_spill] sm:$0xff] }
 0xc29   : > { %8490 = vrcp.f32 %v5167_v43  ;;  %7699 = vmatpush3.bf16.msra.mxu1 %v5526_v38  ;;  %7710 = vmatprep.subr.bf16.mxu0 %v7972_v55  ;;  %v12576_v38 = vpack.c.bf16 %v12574_v44, %v12575_v22  ;;  %v12577_v43 = vld [vmem:[#allocation101_spill] sm:$0xff] }
 0xc2a   : > { %v8481_v19 = vpop.eup %8480  ;;  %v5249_v62 = vpack.c.bf16 %v5229_v37, %v5228_v45  ;;  %7711 = vmatpush3.bf16.msra.mxu0 %v7972_v55  ;;  %v12579_v46 = vpack.c.bf16 %v12577_v43, %v12578_v32  ;;  %v12587_v45 = vld [vmem:[#allocation30_spill] sm:$0xff] }
 0xc2b   : > { %v8483_v1 = vpop.eup %8482  ;;  %v5226_v56 = vmul.f32 %v8481_v19, %v11608_v4  ;;  %7712 = vmatprep.subr.bf16.mxu0 %v7973_v0  ;;  %v5643_v44 = vpop.permute.xlu1 %5642 }
 0xc2c   : > { %v5528_v9 = vpop.permute.xlu0 %5527  ;;  %v5237_v35 = vmul.f32 %v8483_v1, %v11602_v42  ;;  %v7974_v42 = vld [vmem:[#allocation8 + $0x10] sm:$0xff]   ;;  %v12583_v1 = vld [vmem:[#allocation106_spill] sm:$0xff] }
 0xc2d   : > { %7700 = vmatprep.subr.bf16.mxu1 %v5528_v9 }
 0xc2e   : > { %7701 = vmatpush3.bf16.msra.mxu1 %v5528_v9  ;;  %7713 = vmatpush3.bf16.msra.mxu0 %v7973_v0  ;;  %v12580_v9 = vld [vmem:[#allocation100_spill] sm:$0xff] }
 0xc2f   : > { %v8485_v15 = vpop.eup %8484  ;;  %7714 = vmatprep.subr.bf16.mxu0 %v7974_v42  ;;  %v12582_v13 = vpack.c.bf16 %v12580_v9, %v12581_v20 }
 0xc30   : > { %v8487_v49 = vpop.eup %8486  ;;  %v5227_v63 = vmul.f32 %v8485_v15, %v11610_v17 }
 0xc31   : > { %7703 = vmatmul.mubr.msk.bf16.vlgmr.msra.gmra.mrb[180].mxu1 %vm1354_vm1, %v5251_v48  ;;  %v8489_v10 = vpop.eup %8488  ;;  %v5234_v28 = vmul.f32 %v8487_v49, %v11616_v41  ;;  %v7975_v41 = vld [vmem:[#allocation8 + $0x18] sm:$0xff]  }
 0xc32   : > { %v5248_v60 = vpack.c.bf16 %v5227_v63, %v5226_v56  ;;  %v5236_v25 = vmul.f32 %v8489_v10, %v11600_v5  ;;  %7715 = vmatpush3.bf16.msra.mxu0 %v7974_v42  ;;  %v7976_v5 = vld [vmem:[#allocation8 + $0x20] sm:$0xff]   ;;  %v12584_v48 = vld [vmem:[#allocation110_spill] sm:$0xff]  ;;  %v12586_v10 = vld [vmem:[#allocation53_spill] sm:$0xff] }
 0xc33   : > { %v8491_v14 = vpop.eup %8490  ;;  %7716 = vmatprep.subr.bf16.mxu0 %v7975_v41  ;;  %v12585_v15 = vpack.c.bf16 %v12583_v1, %v12584_v48 }
 0xc34   : > { %v5235_v7 = vmul.f32 %v8491_v14, %v11622_v18  ;;  %7690 = vmatprep.mubr.msk.bf16.mxu0 %vm1354_vm1, %v5248_v60  ;;  %v5253_v17 = vpack.c.bf16 %v5237_v35, %v5236_v25  ;;  %v7977_v18 = vld [vmem:[#allocation8 + $0x28] sm:$0xff]   ;;  %v12588_v14 = vpack.c.bf16 %v12586_v10, %v12587_v45  ;;  %v12589_v60 = vld [vmem:[#allocation50_spill] sm:$0xff]  ;;  %v12590_v35 = vld [vmem:[#allocation31_spill] sm:$0xff] }
 0xc35   : > { %7691 = vmatmul.mubr.msk.bf16.gmra.mrb[160].mxu0 %vm1354_vm1, %v5249_v62  ;;  %v12591_v62 = vpack.c.bf16 %v12589_v60, %v12590_v35  ;;  %v12614_v10 = vld [vmem:[#allocation22_spill] sm:$0xff] }
 0xc36   : > { %v5252_v4 = vpack.c.bf16 %v5235_v7, %v5234_v28  ;;  %7717 = vmatpush3.bf16.msra.mxu0 %v7975_v41  ;;  %v12592_v28 = vld [vmem:[#allocation47_spill] sm:$0xff]  ;;  %v12593_v7 = vld [vmem:[#allocation40_spill] sm:$0xff] }
 0xc37   : > { %7718 = vmatprep.subr.bf16.mxu0 %v7976_v5  ;;  %v12594_v25 = vpack.c.bf16 %v12592_v28, %v12593_v7  ;;  %v12617_v28 = vld [vmem:[#allocation61_spill] sm:$0xff] }
 0xc38   : > { %7706 = vmatprep.mubr.msk.bf16.mxu1 %vm1354_vm1, %v5252_v4 }
 0xc39   : > { %7707 = vmatmul.mubr.msk.bf16.gmra.mrb[184].mxu1 %vm1354_vm1, %v5253_v17 }
 0xc3a   : > { %7719 = vmatpush3.bf16.msra.mxu0 %v7976_v5 }
 0xc3b   : > { %7720 = vmatprep.subr.bf16.mxu0 %v7977_v18 }
 0xc3e   : > { %7721 = vmatpush3.bf16.msra.mxu0 %v7977_v18  ;;  %v12595_v18 = vld [vmem:[#allocation39_spill] sm:$0xff] }
 0xc3f   : > { %7722 = vmatprep.subr.bf16.mxu0 %v7978_v47 }
 0xc42   : > { %7723 = vmatpush3.bf16.msra.mxu0 %v7978_v47  ;;  %v12596_v47 = vld [vmem:[#allocation51_spill] sm:$0xff] }
 0xc43   : > { %7724 = vmatprep.subr.bf16.mxu0 %v7979_v27 }
 0xc46   : > { %7725 = vmatpush3.bf16.msra.mxu0 %v7979_v27  ;;  %v12597_v27 = vpack.c.bf16 %v12595_v18, %v12596_v47  ;;  %v12620_v18 = vld [vmem:[#allocation64_spill] sm:$0xff] }
 0xcdb   : > { %v7656_v21 = vpop.f32.mrb[148].mxu0 }
 0xcdc   : > { %v5312_v2 = vpop.f32.mrb[149].mxu0 }
 0xcdd   : > { %v7657_v51 = vpop.f32.mrb[150].mxu0 }
 0xcde   : > { %v5611_v16 = vpack.c.bf16 %v7657_v51, %v7656_v21  ;;  %v5315_v59 = vpop.f32.mrb[151].mxu0  ;;  %v12599_v51 = vld [vmem:[#allocation37_spill] sm:$0xff] }
 0xcdf   : > { %v5610_v11 = vpack.c.bf16 %v5315_v59, %v5312_v2  ;;  %v7672_v31 = vpop.f32.mrb[172].mxu1  ;;  %v12598_v2 = vld [vmem:[#allocation43_spill] sm:$0xff] }
 0xce0   : > { %v5401_v61 = vpop.f32.mrb[173].mxu1  ;;  %5740 = vrot.lane.b32.xlu0 %v5611_v16, %s8691_s24  ;;  %v12600_v16 = vpack.c.bf16 %v12598_v2, %v12599_v51  ;;  %v12622_v51 = vld [vmem:[#allocation65_spill] sm:$0xff] }
 0xce1   : > { %v7673_v36 = vpop.f32.mrb[174].mxu1  ;;  %5738 = vrot.lane.b32.xlu1 %v5610_v11, %s8691_s24 }
 0xce2   : > { %v5615_v30 = vpack.c.bf16 %v7673_v36, %v7672_v31  ;;  %v5404_v12 = vpop.f32.mrb[175].mxu1 }
 0xce3   : > { %v5614_v54 = vpack.c.bf16 %v5404_v12, %v5401_v61 }
 0xce4   : > { %5748 = vrot.lane.b32.xlu0 %v5615_v30, %s8691_s24 }
 0xce5   : > { %5746 = vrot.lane.b32.xlu1 %v5614_v54, %s8691_s24 }
 0xce7   : > { %v7660_v6 = vpop.f32.mrb[152].mxu0 }
 0xce8   : > { %v5328_v57 = vpop.f32.mrb[153].mxu0 }
 0xce9   : > { %v7661_v3 = vpop.f32.mrb[154].mxu0 }
 0xcea   : > { %v5613_v23 = vpack.c.bf16 %v7661_v3, %v7660_v6  ;;  %v5331_v52 = vpop.f32.mrb[155].mxu0  ;;  %v12601_v3 = vld [vmem:[#allocation104_spill] sm:$0xff] }
 0xceb   : > { %v5612_v24 = vpack.c.bf16 %v5331_v52, %v5328_v57  ;;  %v7676_v40 = vpop.f32.mrb[176].mxu1 }
 0xcec   : > { %5744 = vrot.lane.b32.xlu0 %v5613_v23, %s8691_s24  ;;  %v5417_v34 = vpop.f32.mrb[177].mxu1  ;;  %v12602_v23 = vld [vmem:[#allocation102_spill] sm:$0xff] }
 0xced   : > { %5742 = vrot.lane.b32.xlu1 %v5612_v24, %s8691_s24  ;;  %v7677_v53 = vpop.f32.mrb[178].mxu1  ;;  %v12603_v52 = vpack.c.bf16 %v12601_v3, %v12602_v23  ;;  %v12604_v24 = vld [vmem:[#allocation105_spill] sm:$0xff] }
 0xcee   : > { %v5617_v58 = vpack.c.bf16 %v7677_v53, %v7676_v40  ;;  %v5420_v33 = vpop.f32.mrb[179].mxu1  ;;  %v12605_v40 = vld [vmem:[#allocation103_spill] sm:$0xff]  ;;  %v12607_v53 = vld [vmem:[#allocation18_spill] sm:$0xff] }
 0xcef   : > { %v5616_v29 = vpack.c.bf16 %v5420_v33, %v5417_v34  ;;  %v12606_v34 = vpack.c.bf16 %v12604_v24, %v12605_v40 }
 0xcf0   : > { %5752 = vrot.lane.b32.xlu0 %v5617_v58, %s8691_s24  ;;  %v12608_v58 = vld [vmem:[#allocation112_spill] sm:$0xff] }
 0xcf1   : > { %5706 = vrot.lane.b32.xlu1 %v12573_v8, %s8692_s26  ;;  %v12609_v33 = vpack.c.bf16 %v12607_v53, %v12608_v58  ;;  %v5645_v8 = vpop.permute.xlu0 %5644  ;;  %v12629_v53 = vld [vmem:[#allocation70_spill] sm:$0xff] }
 0xcf4   : > { %5708 = vrot.lane.b32.xlu0 %v12576_v38, %s8692_s26  ;;  %v5691_v38 = vpop.permute.xlu1 %5690 }
 0xcf5   : > { %5662 = vrot.lane.b32.xlu1 %v12579_v46, %s8693_s14  ;;  %v5693_v22 = vpop.permute.xlu0 %5692 }
 0xcf7   : > { %v7688_v39 = vpop.f32.mrb[156].mxu0 }
 0xcf8   : > { %5664 = vrot.lane.b32.xlu0 %v12582_v13, %s8693_s14  ;;  %v5490_v19 = vpop.f32.mrb[157].mxu0  ;;  %v5647_v32 = vpop.permute.xlu1 %5646 }
 0xcf9   : > { %5710 = vrot.lane.b32.xlu1 %v12585_v15, %s8692_s26  ;;  %v7689_v37 = vpop.f32.mrb[158].mxu0  ;;  %v5649_v43 = vpop.permute.xlu0 %5648 }
 0xcfa   : > { %v5619_v49 = vpack.c.bf16 %v7689_v37, %v7688_v39  ;;  %v5493_v56 = vpop.f32.mrb[159].mxu0 }
 0xcfb   : > { %v5618_v63 = vpack.c.bf16 %v5493_v56, %v5490_v19 }
 0xcfc   : > { %5712 = vrot.lane.b32.xlu0 %v12588_v14, %s8692_s26  ;;  %v5695_v39 = vpop.permute.xlu1 %5694 }
 0xcfd   : > { %5750 = vrot.lane.b32.xlu1 %v5616_v29, %s8691_s24  ;;  %v12610_v29 = vld [vmem:[#allocation45_spill] sm:$0xff]  ;;  %v5697_v46 = vpop.permute.xlu0 %5696 }
 0xcfe   : > { %v12612_v26 = vpack.c.bf16 %v12610_v29, %v12611_v50 }
 0xd00   : > { %5668 = vrot.lane.b32.xlu0 %v12591_v62, %s8693_s14  ;;  %v5651_v20 = vpop.permute.xlu1 %5650  ;;  %v12616_v62 = vld [vmem:[#allocation59_spill] sm:$0xff] }
 0xd01   : > { %5666 = vrot.lane.b32.xlu1 %v12594_v25, %s8693_s14  ;;  %v5653_v9 = vpop.permute.xlu0 %5652  ;;  %v12618_v7 = vpack.c.bf16 %v12616_v62, %v12617_v28  ;;  %v12638_v62 = vld [vmem:[#allocation79_spill] sm:$0xff] }
 0xd03   : > { %v5775_v25 = vsel %vm997_vm0, %v12618_v7, %v5645_v8 }
 0xd04   : > { %v7704_v4 = vpop.f32.mrb[180].mxu1  ;;  %5756 = vrot.lane.b32.xlu0 %v5619_v49, %s8691_s24  ;;  %v5699_v19 = vpop.permute.xlu1 %5698 }
 0xd05   : > { %v5579_v17 = vpop.f32.mrb[181].mxu1  ;;  %5754 = vrot.lane.b32.xlu1 %v5618_v63, %s8691_s24  ;;  %v5701_v13 = vpop.permute.xlu0 %5700  ;;  %v12613_v63 = vld [vmem:[#allocation62_spill] sm:$0xff] }
 0xd06   : > { %v7705_v55 = vpop.f32.mrb[182].mxu1  ;;  %v12615_v45 = vpack.c.bf16 %v12613_v63, %v12614_v10 }
 0xd07   : > { %v5623_v0 = vpack.c.bf16 %v7705_v55, %v7704_v4  ;;  %v5582_v42 = vpop.f32.mrb[183].mxu1 }
 0xd08   : > { %v5622_v41 = vpack.c.bf16 %v5582_v42, %v5579_v17  ;;  %v7692_v5 = vpop.f32.mrb[160].mxu0  ;;  %5716 = vrot.lane.b32.xlu0 %v12597_v27, %s8692_s26  ;;  %v5655_v48 = vpop.permute.xlu1 %5654  ;;  %v5772_v14 = vsel %vm997_vm0, %v12615_v45, %v5643_v44  ;;  %v5821_v17 = vsel %vm1354_vm1, %v5775_v25, %v5693_v22  ;;  %v12631_v22 = vld [vmem:[#allocation77_spill] sm:$0xff]  ;;  %v12640_v25 = vld [vmem:[#allocation80_spill] sm:$0xff] }
 0xd09   : > { %v5506_v21 = vpop.f32.mrb[161].mxu0  ;;  %5714 = vrot.lane.b32.xlu1 %v12600_v16, %s8692_s26  ;;  %v5657_v1 = vpop.permute.xlu0 %5656  ;;  %v5819_v35 = vsel %vm1354_vm1, %v5772_v14, %v5691_v38  ;;  %v12623_v16 = vld [vmem:[#allocation63_spill] sm:$0xff] }
 0xd0a   : > { %v7693_v59 = vpop.f32.mrb[162].mxu0  ;;  %v12632_v38 = vld [vmem:[#allocation75_spill] sm:$0xff] }
 0xd0b   : > { %v5621_v11 = vpack.c.bf16 %v7693_v59, %v7692_v5  ;;  %v5509_v31 = vpop.f32.mrb[163].mxu0  ;;  %v12619_v5 = vld [vmem:[#allocation66_spill] sm:$0xff]  ;;  %v12624_v59 = vpack.c.bf16 %v12622_v51, %v12623_v16 }
 0xd0c   : > { %v7708_v61 = vpop.f32.mrb[184].mxu1  ;;  %v5620_v36 = vpack.c.bf16 %v5509_v31, %v5506_v21  ;;  %v5703_v37 = vpop.permute.xlu1 %5702  ;;  %v12621_v47 = vpack.c.bf16 %v12619_v5, %v12620_v18  ;;  %v12647_v51 = vld [vmem:[#allocation86_spill] sm:$0xff] }
 0xd0d   : > { %v5595_v30 = vpop.f32.mrb[185].mxu1  ;;  %5760 = vrot.lane.b32.xlu0 %v5621_v11, %s8691_s24  ;;  %v5705_v15 = vpop.permute.xlu0 %5704  ;;  %v5781_v11 = vsel %vm997_vm0, %v12624_v59, %v5649_v43  ;;  %v12633_v43 = vpack.c.bf16 %v12631_v22, %v12632_v38  ;;  %v12655_v22 = vld [vmem:[#allocation93_spill] sm:$0xff]  ;;  %v12656_v38 = vld [vmem:[#allocation91_spill] sm:$0xff] }
 0xd0e   : > { %v7709_v12 = vpop.f32.mrb[186].mxu1  ;;  %5758 = vrot.lane.b32.xlu1 %v5620_v36, %s8691_s24  ;;  %v5778_v27 = vsel %vm997_vm0, %v12621_v47, %v5647_v32  ;;  %v12626_v36 = vld [vmem:[#allocation71_spill] sm:$0xff] }
 0xd0f   : > { %v5625_v54 = vpack.c.bf16 %v7709_v12, %v7708_v61  ;;  %v5598_v6 = vpop.f32.mrb[187].mxu1  ;;  %v5823_v2 = vsel %vm1354_vm1, %v5778_v27, %v5695_v39  ;;  %v12625_v61 = vld [vmem:[#allocation73_spill] sm:$0xff]  ;;  %v5790_v32 = vsel %vm997_vm0, %v12633_v43, %v5655_v48  ;;  %v12644_v47 = vld [vmem:[#allocation87_spill] sm:$0xff]  ;;  %v12657_v43 = vpack.c.bf16 %v12655_v22, %v12656_v38 }
 0xd10   : > { %v5624_v57 = vpack.c.bf16 %v5598_v6, %v5595_v30  ;;  %v5659_v56 = vpop.permute.xlu1 %5658  ;;  %v12627_v30 = vpack.c.bf16 %v12625_v61, %v12626_v36  ;;  %v5831_v39 = vsel %vm1354_vm1, %v5790_v32, %v5703_v37  ;;  %v12637_v48 = vld [vmem:[#allocation81_spill] sm:$0xff] }
 0xd11   : > { %5764 = vrot.lane.b32.xlu0 %v5623_v0, %s8691_s24  ;;  %v5661_v49 = vpop.permute.xlu0 %5660  ;;  %v12639_v28 = vpack.c.bf16 %v12637_v48, %v12638_v62 }
 0xd12   : > { %5762 = vrot.lane.b32.xlu1 %v5622_v41, %s8691_s24  ;;  %v5784_v12 = vsel %vm997_vm0, %v12627_v30, %v5651_v20  ;;  %v12634_v20 = vld [vmem:[#allocation76_spill] sm:$0xff] }
 0xd13   : > { %v5796_v37 = vsel %vm997_vm0, %v12639_v28, %v5659_v56  ;;  %v12643_v56 = vld [vmem:[#allocation89_spill] sm:$0xff] }
 0xd14   : > { %v12645_v27 = vpack.c.bf16 %v12643_v56, %v12644_v47 }
 0xd15   : > { %5672 = vrot.lane.b32.xlu0 %v12603_v52, %s8693_s14 }
 0xd16   : > { %5670 = vrot.lane.b32.xlu1 %v12606_v34, %s8693_s14  ;;  %v12628_v34 = vld [vmem:[#allocation72_spill] sm:$0xff] }
 0xd17   : > { %v12630_v58 = vpack.c.bf16 %v12628_v34, %v12629_v53  ;;  %v12652_v34 = vld [vmem:[#allocation84_spill] sm:$0xff]  ;;  %v12653_v53 = vld [vmem:[#allocation82_spill] sm:$0xff] }
 0xd19   : > { %5720 = vrot.lane.b32.xlu0 %v12609_v33, %s8692_s26  ;;  %v5787_v33 = vsel %vm997_vm0, %v12630_v58, %v5653_v9  ;;  %v12654_v58 = vpack.c.bf16 %v12652_v34, %v12653_v53 }
 0xd1a   : > { %5718 = vrot.lane.b32.xlu1 %v12612_v26, %s8692_s26  ;;  %v5829_v50 = vsel %vm1354_vm1, %v5787_v33, %v5701_v13 }
 0xd1d   : > { %5768 = vrot.lane.b32.xlu0 %v5625_v54, %s8691_s24  ;;  %v5825_v54 = vsel %vm1354_vm1, %v5781_v11, %v5697_v46 }
 0xd1e   : > { %5766 = vrot.lane.b32.xlu1 %v5624_v57, %s8691_s24  ;;  %v5827_v57 = vsel %vm1354_vm1, %v5784_v12, %v5699_v19  ;;  %v12635_v19 = vld [vmem:[#allocation74_spill] sm:$0xff]  ;;  %v12649_v12 = vld [vmem:[#allocation85_spill] sm:$0xff] }
 0xd1f   : > { %v12636_v63 = vpack.c.bf16 %v12634_v20, %v12635_v19  ;;  %v12659_v20 = vld [vmem:[#allocation90_spill] sm:$0xff] }
 0xd21   : > { %v5793_v9 = vsel %vm997_vm0, %v12636_v63, %v5657_v1 }
 0xd22   : > { %v5833_v13 = vsel %vm1354_vm1, %v5793_v9, %v5705_v15 }
 0xd52   : > { %v5741_v60 = vpop.permute.xlu0 %5740 }
 0xd53   : > { %v5739_v4 = vpop.permute.xlu1 %5738  ;;  %v5855_v0 = vsel %vm5850_vm2, %v5821_v17, %v5741_v60 }
 0xd54   : > { %v5852_v55 = vsel %vm5850_vm2, %v5819_v35, %v5739_v4  ;;  %v12641_v4 = vld [vmem:[#allocation78_spill] sm:$0xff] }
 0xd55   : > { %7726 = vmatprep.mubr.bf16.mxu0 %v5852_v55  ;;  %v12642_v1 = vpack.c.bf16 %v12640_v25, %v12641_v4 }
 0xd56   : > { %7727 = vmatmul.mubr.bf16.vlgmr.msra.gmra.mrb[164].mxu0 %v5855_v0  ;;  %v5749_v42 = vpop.permute.xlu0 %5748 }
 0xd57   : > { %v5747_v41 = vpop.permute.xlu1 %5746  ;;  %v5867_v26 = vsel %vm5850_vm2, %v5829_v50, %v5749_v42  ;;  %v5799_v17 = vsel %vm997_vm0, %v12642_v1, %v5661_v49  ;;  %v12646_v49 = vld [vmem:[#allocation88_spill] sm:$0xff] }
 0xd58   : > { %v5864_v52 = vsel %vm5850_vm2, %v5827_v57, %v5747_v41  ;;  %v12648_v16 = vpack.c.bf16 %v12646_v49, %v12647_v51 }
 0xd5e   : > { %v5745_v21 = vpop.permute.xlu0 %5744 }
 0xd5f   : > { %v5743_v31 = vpop.permute.xlu1 %5742  ;;  %v5861_v3 = vsel %vm5850_vm2, %v5825_v54, %v5745_v21  ;;  %v12650_v54 = vld [vmem:[#allocation83_spill] sm:$0xff] }
 0xd60   : > { %v5858_v6 = vsel %vm5850_vm2, %v5823_v2, %v5743_v31 }
 0xd61   : > { %7730 = vmatprep.mubr.bf16.mxu0 %v5858_v6  ;;  %v12651_v6 = vpack.c.bf16 %v12649_v12, %v12650_v54 }
 0xd62   : > { %7731 = vmatmul.mubr.bf16.gmra.mrb[168].mxu0 %v5861_v3  ;;  %v5753_v23 = vpop.permute.xlu0 %5752 }
 0xd63   : > { %v5707_v24 = vpop.permute.xlu1 %5706  ;;  %7734 = vmatprep.mubr.bf16.mxu0 %v5864_v52  ;;  %v5873_v14 = vsel %vm5850_vm2, %v5833_v13, %v5753_v23 }
 0xd64   : > { %v5835_v15 = vsel %vm1354_vm1, %v5796_v37, %v5707_v24 }
 0xd66   : > { %v5709_v40 = vpop.permute.xlu0 %5708 }
 0xd67   : > { %v5663_v29 = vpop.permute.xlu1 %5662  ;;  %v5837_v0 = vsel %vm1354_vm1, %v5799_v17, %v5709_v40 }
 0xd68   : > { %v5802_v21 = vsel %vm997_vm0, %v12645_v27, %v5663_v29 }
 0xd6a   : > { %7735 = vmatmul.mubr.bf16.gmra.mrb[172].mxu0 %v5867_v26  ;;  %v5665_v8 = vpop.permute.xlu0 %5664 }
 0xd6b   : > { %v5711_v44 = vpop.permute.xlu1 %5710  ;;  %v5805_v59 = vsel %vm997_vm0, %v12648_v16, %v5665_v8 }
 0xd6c   : > { %v5839_v11 = vsel %vm1354_vm1, %v5802_v21, %v5711_v44 }
 0xd6e   : > { %v5713_v46 = vpop.permute.xlu0 %5712 }
 0xd6f   : > { %v5751_v10 = vpop.permute.xlu1 %5750  ;;  %v5841_v61 = vsel %vm1354_vm1, %v5805_v59, %v5713_v46 }
 0xd70   : > { %v5870_v45 = vsel %vm5850_vm2, %v5831_v39, %v5751_v10  ;;  %v12658_v39 = vld [vmem:[#allocation92_spill] sm:$0xff] }
 0xd71   : > { %7738 = vmatprep.mubr.bf16.mxu0 %v5870_v45  ;;  %v12660_v19 = vpack.c.bf16 %v12658_v39, %v12659_v20 }
 0xd72   : > { %7739 = vmatmul.mubr.bf16.gmra.mrb[176].mxu0 %v5873_v14  ;;  %v5669_v60 = vpop.permute.xlu0 %5668 }
 0xd73   : > { %v5667_v35 = vpop.permute.xlu1 %5666  ;;  %v5811_v33 = vsel %vm997_vm0, %v12654_v58, %v5669_v60 }
 0xd74   : > { %v5808_v57 = vsel %vm997_vm0, %v12651_v6, %v5667_v35  ;;  %v11933_v35 = vld [vmem:[%s12043_s4] ss:$0 sm:$0xff] }
 0xd76   : > { %v5757_v7 = vpop.permute.xlu0 %5756 }
 0xd77   : > { %v5755_v55 = vpop.permute.xlu1 %5754  ;;  %v5879_v41 = vsel %vm5850_vm2, %v5837_v0, %v5757_v7 }
 0xd78   : > { %v5876_v42 = vsel %vm5850_vm2, %v5835_v15, %v5755_v55 }
 0xd79   : > { %7742 = vmatprep.mubr.bf16.mxu0 %v5876_v42 }
 0xd7a   : > { %7743 = vmatmul.mubr.bf16.gmra.mrb[180].mxu0 %v5879_v41  ;;  %v5717_v5 = vpop.permute.xlu0 %5716 }
 0xd7b   : > { %v5715_v18 = vpop.permute.xlu1 %5714  ;;  %v5845_v50 = vsel %vm1354_vm1, %v5811_v33, %v5717_v5 }
 0xd7c   : > { %v5843_v23 = vsel %vm1354_vm1, %v5808_v57, %v5715_v18 }
 0xd7f   : > { %v5761_v2 = vpop.permute.xlu0 %5760 }
 0xd80   : > { %v5759_v31 = vpop.permute.xlu1 %5758  ;;  %v5885_v30 = vsel %vm5850_vm2, %v5841_v61, %v5761_v2 }
 0xd81   : > { %v5882_v36 = vsel %vm5850_vm2, %v5839_v11, %v5759_v31 }
 0xd82   : > { %7746 = vmatprep.mubr.bf16.mxu0 %v5882_v36 }
 0xd83   : > { %7747 = vmatmul.mubr.bf16.gmra.mrb[184].mxu0 %v5885_v30  ;;  %v5765_v3 = vpop.permute.xlu0 %5764 }
 0xd84   : > { %v5763_v52 = vpop.permute.xlu1 %5762  ;;  %v5891_v26 = vsel %vm5850_vm2, %v5845_v50, %v5765_v3 }
 0xd85   : > { %v5888_v24 = vsel %vm5850_vm2, %v5843_v23, %v5763_v52 }
 0xd86   : > { %7750 = vmatprep.mubr.bf16.mxu0 %v5888_v24 }
 0xd87   : > { %v5673_v40 = vpop.permute.xlu0 %5672 }
 0xd88   : > { %v5671_v29 = vpop.permute.xlu1 %5670  ;;  %v5817_v63 = vsel %vm997_vm0, %v12660_v19, %v5673_v40 }
 0xd89   : > { %v5814_v32 = vsel %vm997_vm0, %v12657_v43, %v5671_v29 }
 0xd8b   : > { %7751 = vmatmul.mubr.bf16.gmra.mrb[188].mxu0 %v5891_v26  ;;  %v5721_v8 = vpop.permute.xlu0 %5720 }
 0xd8c   : > { %v5719_v44 = vpop.permute.xlu1 %5718  ;;  %v5849_v13 = vsel %vm1354_vm1, %v5817_v63, %v5721_v8 }
 0xd8d   : > { %v5847_v9 = vsel %vm1354_vm1, %v5814_v32, %v5719_v44 }
 0xd8f   : > { %v5769_v46 = vpop.permute.xlu0 %5768 }
 0xd90   : > { %v5767_v10 = vpop.permute.xlu1 %5766  ;;  %v5897_v14 = vsel %vm5850_vm2, %v5849_v13, %v5769_v46 }
 0xd91   : > { %v5894_v45 = vsel %vm5850_vm2, %v5847_v9, %v5767_v10 }
 0xd92   : > { %7754 = vmatprep.mubr.bf16.mxu0 %v5894_v45 }
 0xd93   : > { %7755 = vmatmul.mubr.bf16.gmra.mrb[192].mxu0 %v5897_v14 }
 0xe29   : > { %v7728_v60 = vpop.f32.mrb[164].mxu0 }
 0xe2a   : > { %v6004_v48 = vpop.f32.mrb[165].mxu0  ;;  %v6013_v28 = vadd.f32 %v7728_v60, %v11933_v35 }
 0xe2b   : > { %v7729_v62 = vpop.f32.mrb[166].mxu0  ;;  %v6005_v25 = vadd.f32 %v11933_v35, %v6004_v48 }
 0xe2c   : > { %v6016_v37 = vadd.f32 %v7729_v62, %v11933_v35  ;;  %v6007_v7 = vpop.f32.mrb[167].mxu0 }
 0xe2d   : > { %v6008_v4 = vadd.f32 %v11933_v35, %v6007_v7 }
 0xe2e   : > { %v6747_v1 = vpack.c.bf16 %v6016_v37, %v6013_v28 }
 0xe2f   : > { %v6742_v17 = vpack.c.bf16 %v6008_v4, %v6005_v25 }
 0xe30   : > { %6831 = vst [vmem:[%s11941_s6 + $0x8] sm:$0xff] %v6747_v1  }
 0xe31   : > { %6743 = vst [vmem:[%s11941_s6] sm:$0xff] %v6742_v17  }
 0xe35   : > { %v7732_v15 = vpop.f32.mrb[168].mxu0 }
 0xe36   : > { %v6020_v55 = vpop.f32.mrb[169].mxu0  ;;  %v6029_v42 = vadd.f32 %v7732_v15, %v11933_v35 }
 0xe37   : > { %v7733_v0 = vpop.f32.mrb[170].mxu0  ;;  %v6021_v18 = vadd.f32 %v11933_v35, %v6020_v55 }
 0xe38   : > { %v6032_v41 = vadd.f32 %v7733_v0, %v11933_v35  ;;  %v6023_v5 = vpop.f32.mrb[171].mxu0 }
 0xe39   : > { %v6024_v56 = vadd.f32 %v11933_v35, %v6023_v5 }
 0xe3a   : > { %v6757_v47 = vpack.c.bf16 %v6032_v41, %v6029_v42 }
 0xe3b   : > { %v6752_v27 = vpack.c.bf16 %v6024_v56, %v6021_v18 }
 0xe3c   : > { %6833 = vst [vmem:[%s11941_s6 + $0x18] sm:$0xff] %v6757_v47  }
 0xe3d   : > { %6832 = vst [vmem:[%s11941_s6 + $0x10] sm:$0xff] %v6752_v27   ;;  %v7736_v21 = vpop.f32.mrb[172].mxu0 }
 0xe3e   : > { %v6036_v2 = vpop.f32.mrb[173].mxu0  ;;  %v6045_v51 = vadd.f32 %v7736_v21, %v11933_v35 }
 0xe3f   : > { %v7737_v49 = vpop.f32.mrb[174].mxu0  ;;  %v6037_v11 = vadd.f32 %v11933_v35, %v6036_v2 }
 0xe40   : > { %v6048_v16 = vadd.f32 %v7737_v49, %v11933_v35  ;;  %v6039_v59 = vpop.f32.mrb[175].mxu0 }
 0xe41   : > { %v6040_v31 = vadd.f32 %v11933_v35, %v6039_v59 }
 0xe42   : > { %v6767_v61 = vpack.c.bf16 %v6048_v16, %v6045_v51 }
 0xe43   : > { %v6762_v36 = vpack.c.bf16 %v6040_v31, %v6037_v11 }
 0xe44   : > { %6835 = vst [vmem:[%s11941_s6 + $0x28] sm:$0xff] %v6767_v61  }
 0xe45   : > { %6834 = vst [vmem:[%s11941_s6 + $0x20] sm:$0xff] %v6762_v36   ;;  %v7740_v30 = vpop.f32.mrb[176].mxu0 }
 0xe46   : > { %v6052_v12 = vpop.f32.mrb[177].mxu0  ;;  %v6061_v6 = vadd.f32 %v7740_v30, %v11933_v35 }
 0xe47   : > { %v7741_v54 = vpop.f32.mrb[178].mxu0  ;;  %v6053_v23 = vadd.f32 %v11933_v35, %v6052_v12 }
 0xe48   : > { %v6064_v57 = vadd.f32 %v7741_v54, %v11933_v35  ;;  %v6055_v3 = vpop.f32.mrb[179].mxu0 }
 0xe49   : > { %v6056_v52 = vadd.f32 %v11933_v35, %v6055_v3 }
 0xe4a   : > { %v6777_v24 = vpack.c.bf16 %v6064_v57, %v6061_v6 }
 0xe4b   : > { %v6772_v40 = vpack.c.bf16 %v6056_v52, %v6053_v23 }
 0xe4c   : > { %6837 = vst [vmem:[%s11941_s6 + $0x38] sm:$0xff] %v6777_v24  }
 0xe4d   : > { %6836 = vst [vmem:[%s11941_s6 + $0x30] sm:$0xff] %v6772_v40   ;;  %v7744_v34 = vpop.f32.mrb[180].mxu0 }
 0xe4e   : > { %v6068_v53 = vpop.f32.mrb[181].mxu0  ;;  %v6077_v33 = vadd.f32 %v7744_v34, %v11933_v35 }
 0xe4f   : > { %v7745_v58 = vpop.f32.mrb[182].mxu0  ;;  %v6069_v26 = vadd.f32 %v11933_v35, %v6068_v53 }
 0xe50   : > { %v6080_v29 = vadd.f32 %v7745_v58, %v11933_v35  ;;  %v6071_v50 = vpop.f32.mrb[183].mxu0 }
 0xe51   : > { %v6072_v8 = vadd.f32 %v11933_v35, %v6071_v50 }
 0xe52   : > { %v6787_v44 = vpack.c.bf16 %v6080_v29, %v6077_v33 }
 0xe53   : > { %v6782_v22 = vpack.c.bf16 %v6072_v8, %v6069_v26 }
 0xe54   : > { %6839 = vst [vmem:[%s11941_s6 + $0x48] sm:$0xff] %v6787_v44  }
 0xe55   : > { %6838 = vst [vmem:[%s11941_s6 + $0x40] sm:$0xff] %v6782_v22  }
 0xe56   : > { %v7748_v38 = vpop.f32.mrb[184].mxu0 }
 0xe57   : > { %v6084_v43 = vpop.f32.mrb[185].mxu0  ;;  %v6093_v46 = vadd.f32 %v7748_v38, %v11933_v35 }
 0xe58   : > { %v7749_v32 = vpop.f32.mrb[186].mxu0  ;;  %v6085_v19 = vadd.f32 %v11933_v35, %v6084_v43 }
 0xe59   : > { %v6096_v39 = vadd.f32 %v7749_v32, %v11933_v35  ;;  %v6087_v20 = vpop.f32.mrb[187].mxu0 }
 0xe5a   : > { %v6088_v63 = vadd.f32 %v11933_v35, %v6087_v20 }
 0xe5b   : > { %v6797_v9 = vpack.c.bf16 %v6096_v39, %v6093_v46 }
 0xe5c   : > { %v6792_v10 = vpack.c.bf16 %v6088_v63, %v6085_v19 }
 0xe5d   : > { %6841 = vst [vmem:[%s11941_s6 + $0x58] sm:$0xff] %v6797_v9  }
 0xe5e   : > { %6840 = vst [vmem:[%s11941_s6 + $0x50] sm:$0xff] %v6792_v10   ;;  %v7752_v13 = vpop.f32.mrb[188].mxu0 }
 0xe5f   : > { %v6100_v45 = vpop.f32.mrb[189].mxu0  ;;  %v6109_v60 = vadd.f32 %v7752_v13, %v11933_v35 }
 0xe60   : > { %v7753_v14 = vpop.f32.mrb[190].mxu0  ;;  %v6101_v28 = vadd.f32 %v11933_v35, %v6100_v45 }
 0xe61   : > { %v6112_v48 = vadd.f32 %v7753_v14, %v11933_v35  ;;  %v6103_v62 = vpop.f32.mrb[191].mxu0 }
 0xe62   : > { %v6104_v37 = vadd.f32 %v11933_v35, %v6103_v62 }
 0xe63   : > { %v6807_v7 = vpack.c.bf16 %v6112_v48, %v6109_v60 }
 0xe64   : > { %v6802_v25 = vpack.c.bf16 %v6104_v37, %v6101_v28 }
 0xe65   : > { %6843 = vst [vmem:[%s11941_s6 + $0x68] sm:$0xff] %v6807_v7  }
 0xe66   : > { %6842 = vst [vmem:[%s11941_s6 + $0x60] sm:$0xff] %v6802_v25   ;;  %v7756_v4 = vpop.f32.mrb[192].mxu0 }
 0xe67   : > { %v6116_v1 = vpop.f32.mrb[193].mxu0  ;;  %v6125_v15 = vadd.f32 %v7756_v4, %v11933_v35 }
 0xe68   : > { %v7757_v17 = vpop.f32.mrb[194].mxu0  ;;  %v6117_v42 = vadd.f32 %v11933_v35, %v6116_v1 }
 0xe69   : > { %v6128_v55 = vadd.f32 %v7757_v17, %v11933_v35  ;;  %v6119_v0 = vpop.f32.mrb[195].mxu0 }
 0xe6a   : > { %v6120_v41 = vadd.f32 %v11933_v35, %v6119_v0 }
 0xe6b   : > { %v6817_v5 = vpack.c.bf16 %v6128_v55, %v6125_v15 }
 0xe6c   : > { %v6812_v18 = vpack.c.bf16 %v6120_v41, %v6117_v42 }
 0xe6d   : > { %6845 = vst [vmem:[%s11941_s6 + $0x78] sm:$0xff] %v6817_v5  }
 0xe6e   : > { %6844 = vst [vmem:[%s11941_s6 + $0x70] sm:$0xff] %v6812_v18  }
 0xe6f   : > { %8619 = shalt.err (!%p8616_p12)
}
 0xe70   : > { %s8620_s24 = scalar_lea.hbm %s11990_s29, 2048  ;;  %s8624_s27 = scalar_lea.hbm %s12044_s5, 16384 }
 0xe71   : > { %p8621_p0 = scmp.ne.s32.totalorder %s11990_s29, %s8620_s24  ;;  %p8625_p11 = scmp.lt.u32.totalorder %s11990_s29, %s12044_s5 }
 0xe72   : > { %p8626_p1 = scmp.lt.u32.totalorder %s8624_s27, %s8620_s24  ;;  %p8628_p4 = scmp.lt.u32.totalorder %s8620_s24, %s11990_s29 }
 0xe73   : > { %p8622_p5 = pnand %p8621_p0, %p8866_p8 }
 0xe74   : > { %p8627_p2 = por %p8626_p1, %p8625_p11 }
 0xe75   : > { %p8623_p10 = pneg %p8622_p5 }
 0xe76   : > { %p8629_p6 = por %p8628_p4, %p8627_p2 }
 0xe78   : > { %p8630_p13 = pnand %p8629_p6, %p8623_p10 }
 0xe7a   : > { %8633 = shalt.err (!%p8630_p13)
}
 0xe7b   : > { %s8695_s8 = smov 4  }
 0xe7c   : > { %7852 = dma.vmem_to_hbm [thread:$0]  (%p8866_p8), %s11992_s13, 2048, %s11990_s29, %s6292_s22, %s8692_s26, %s8692_s26, %s8695_s8  }
 0xe7d PF: > { %p7879_p3 = scmp.ge.s32.totalorder %s8680_s21, 2  ;;  %s6321_s28 = sand.u32 1, %s8668_s18  }
 0xe7e   : > { %p12661_p7 = scmp.ne.s32.totalorder %s12256_s25, 0  ;;  %s6322_s9 = scalar_lea.sflag [#allocation4], %s6321_s28 }
 0xe80   : > { %p7869_p9 = pnand %p7879_p3, %p12661_p7 }
 0xe82   : > { %8663 = dma.done.wait (!%p7869_p9), %s6322_s9, 2048  }
 0xe83   : > { %8665 = vsyncadd (!%p7869_p9), %s6322_s9, 4294965248  ;;  %p20_p12 = scmp.ge.s32.totalorder %s8831_s30, 10   ;;  %s12662_s18 = smov %s8672_s19 }
 0xe84   : > { %s12663_s19 = smov %s8676_s20  ;;  %s12664_s20 = smov %s8862_s23 }
 0xe85   : > { %s12665_s21 = smov %s8831_s30  ;;  %22 = sbr.rel (!%p20_p12) target bundleno = 7 (0x7), region = 100 }
 0xe8c   :  { %6327 = vsyncpa [#allocation3], 1 }
 0xe8d   :  { %6329 = vsyncpa [#allocation3 + $0x1], 1 }
 0xe8e   :  { %6330 = vsyncpa [#allocation6], 1 }
 0xe8f   :  { %6331 = vsyncpa [#allocation9], 1 }
 0xe90   :  { %6332 = vsyncpa [#allocation4], 1 }
 0xe91   :  { %6334 = vsyncpa [#allocation4 + $0x1], 1 }

</bundles_post_ra>
